<compile_context>
chip_gen: v6e
topology: v6e:2x2x1
jax: 0.10.0
libtpu: 0.0.40
codegen_flags: <defaults>
</compile_context>

<pallas_src>
import functools
import numpy as np
import jax
import jax.numpy as jnp
from jax.experimental import pallas as pl
from jax.experimental.pallas import tpu as pltpu

LANE = 128
_PHASES = ((0, 0), (0, 1), (1, 0), (1, 1))   # output (row, col) parity, pr-major
_TAPS = ((0, 0), (0, 1), (1, 0), (1, 1))     # live-tap offsets (a, b)


def _round_up(x, m):
    return (x + m - 1) // m * m


def _choose_th(h, w, max_rows=512):
    """Largest divisor th of h with (th*w) % 8 == 0 and th*w <= max_rows."""
    best = None
    for th in range(1, h + 1):
        if h % th:
            continue
        if (th * w) % 8:
            continue
        if th * w <= max_rows:
            best = th
    if best is not None:
        return best
    for th in range(1, h + 1):
        if h % th == 0 and (th * w) % 8 == 0:
            return th
    return h


# ----------------------------------------------------------------------------
# Pass 1: in-VMEM tap gather + per-phase sub-pixel matmul + channel partial stats
# ----------------------------------------------------------------------------
def _deconv_stats_kernel(x_ref, w_ref, y_ref, psum_ref, psq_ref, acc_ref, *,
                         th, wi, cin, cp):
    # x_ref : (H+2, W+2, Cin)  zero-padded per-sample NHWC slab, bf16 (resident per n)
    # w_ref : (16, Cin, Cp)    per-(phase, tap) weight matrices, bf16 (resident)
    # y_ref : (4, th*W, Cp)    pre-BN activations for this tile, bf16
    # psum/psq_ref : (1, Cp)   per-(n, h-tile) channel partial sum / sum of squares
    # acc_ref : (th*W, Cp) f32 VMEM accumulator scratch
    hi = pl.program_id(1)
    h0 = hi * th
    tw = th * wi

    s_acc = jnp.zeros((1, cp), jnp.float32)
    q_acc = jnp.zeros((1, cp), jnp.float32)
    for p, (pr, pc) in enumerate(_PHASES):
        for t, (a, b) in enumerate(_TAPS):
            tap = x_ref[pl.ds(h0 + pr + a, th), pl.ds(pc + b, wi), :]   # (th, W, Cin)
            lhs = tap.reshape(tw, cin)
            part = jnp.dot(lhs, w_ref[4 * p + t],
                           preferred_element_type=jnp.float32)
            if t == 0:
                acc_ref[...] = part
            else:
                acc_ref[...] += part
        acc = acc_ref[...]
        y_ref[p] = acc.astype(y_ref.dtype)
        s_acc = s_acc + jnp.sum(acc, axis=0, keepdims=True)
        q_acc = q_acc + jnp.sum(acc * acc, axis=0, keepdims=True)
    psum_ref[...] = s_acc
    psq_ref[...] = q_acc


# ----------------------------------------------------------------------------
# Pass 2: y * scale + shift (folded BN), LeakyReLU(0.2)
# ----------------------------------------------------------------------------
def _bn_lrelu_kernel(y_ref, scale_ref, shift_ref, out_ref, *, slope):
    scale = scale_ref[0, :]
    shift = shift_ref[0, :]
    z = y_ref[...].astype(jnp.float32) * scale + shift
    out_ref[...] = jnp.where(z >= 0.0, z, slope * z).astype(out_ref.dtype)


# ----------------------------------------------------------------------------
# Wrapper
# ----------------------------------------------------------------------------
def simple_deconv_block(x, weight, bias, gamma, beta, *,
                        kernel_size=4, stride=2, padding=1,
                        eps=1e-5, negative_slope=0.2,
                        max_phase_tile_rows=512,
                        compute_dtype=jnp.bfloat16,
                        out_dtype=jnp.float32):
    """x: (N, Cin, H, W) NCHW.  weight: (Cin, Cout, K, K) (PyTorch ConvTranspose2d)."""
    assert kernel_size == 4 and stride == 2 and padding == 1, \
        "sub-pixel decomposition below assumes k=4, s=2, p=1"
    n, cin, h, w = x.shape
    cout = weight.shape[1]
    h_out, w_out = 2 * h, 2 * w

    cp = _round_up(cout, LANE)            # lane-dense output channels
    cin_p = max(8, _round_up(cin, 8))     # sublane-friendly reduction depth
    th = _choose_th(h, w, max_phase_tile_rows)
    assert h % th == 0 and (th * w) % 8 == 0, "need an h-tile with (th*W) % 8 == 0"
    n_htiles = h // th
    tw = th * w
    m = n * h * w
    hp, wp = h + 2, w + 2

    # --- x -> NHWC, 1px zero border, channel pad, bf16 (the only HBM copy of x) -------
    x_nhwc = jnp.transpose(x, (0, 2, 3, 1))
    x_pad = jnp.pad(x_nhwc, ((0, 0), (1, 1), (1, 1), (0, cin_p - cin)))
    x_pad = x_pad.astype(compute_dtype)                            # (N, H+2, W+2, Cin_p)

    # --- per-(phase, tap) weight matrices (structural zero taps never materialized) ---
    wrows = []
    for pr, pc in _PHASES:
        kh = (3, 1) if pr == 0 else (2, 0)
        kw = (3, 1) if pc == 0 else (2, 0)
        for a, b in _TAPS:
            wrows.append(weight[:, :, kh[a], kw[b]])               # (Cin, Cout)
    w_all = jnp.stack(wrows, axis=0)                               # (16, Cin, Cout)
    w_all = jnp.pad(w_all, ((0, 0), (0, cin_p - cin), (0, cp - cout)))
    w_all = w_all.astype(compute_dtype)                            # (16, Cin_p, Cp)

    # --- VMEM budget (double-buffered blocks), capped for v7x's 64 MiB/TC -------------
    cd = 2                                   # bf16 itemsize
    od = jnp.dtype(out_dtype).itemsize
    need1 = (2 * hp * wp * cin_p * cd        # x slab
             + 2 * 16 * cin_p * cp * cd      # weights
             + 2 * 4 * tw * cp * cd          # y out block
             + tw * cp * 4                   # f32 accumulator scratch
             + 4 * 2 * cp * 4)               # stats partials
    need2 = 2 * 4 * tw * cp * cd + 2 * 4 * tw * cp * od + 4 * cp * 4
    vmem_limit = int(min(48 * 1024 * 1024, max(2 * max(need1, need2), 16 * 1024 * 1024)))

    cost1 = pl.CostEstimate(
        flops=2 * 4 * m * 4 * cin_p * cp,
        transcendentals=0,
        bytes_accessed=(x_pad.size * cd + w_all.size * cd
                        + 4 * m * cp * cd + 2 * n * n_htiles * cp * 4))

    # --- pass 1: deconv (4 sub-pixel phases) + channel partial stats ------------------
    y_all, psum, psq = pl.pallas_call(
        functools.partial(_deconv_stats_kernel, th=th, wi=w, cin=cin_p, cp=cp),
        grid=(n, n_htiles),
        in_specs=[
            pl.BlockSpec((None, hp, wp, cin_p), lambda nn, hi: (nn, 0, 0, 0)),
            pl.BlockSpec((16, cin_p, cp), lambda nn, hi: (0, 0, 0)),
        ],
        out_specs=[
            pl.BlockSpec((4, tw, cp), lambda nn, hi: (0, nn * n_htiles + hi, 0)),
            pl.BlockSpec((None, 1, cp), lambda nn, hi: (nn * n_htiles + hi, 0, 0)),
            pl.BlockSpec((None, 1, cp), lambda nn, hi: (nn * n_htiles + hi, 0, 0)),
        ],
        out_shape=[
            jax.ShapeDtypeStruct((4, m, cp), compute_dtype),
            jax.ShapeDtypeStruct((n * n_htiles, 1, cp), jnp.float32),
            jax.ShapeDtypeStruct((n * n_htiles, 1, cp), jnp.float32),
        ],
        scratch_shapes=[pltpu.VMEM((tw, cp), jnp.float32)],
        compiler_params=pltpu.CompilerParams(
            dimension_semantics=("parallel", "parallel"),
            vmem_limit_bytes=vmem_limit),
        cost_estimate=cost1,
    )(x_pad, w_all)

    # --- fold BN into per-channel scale/shift (tiny, plain JAX) -----------------------
    count = float(4 * m)                              # N * H_out * W_out per channel
    ch_sum = jnp.sum(psum, axis=(0, 1))               # (Cp,)
    ch_sq = jnp.sum(psq, axis=(0, 1))
    mean = ch_sum / count
    # NOTE: E[y^2] - mean^2 in f32; clamp guards tiny negative values from cancellation.
    var = jnp.maximum(ch_sq / count - mean * mean, 0.0)   # biased var (training BN)
    inv = jax.lax.rsqrt(var + eps)
    gamma_p = jnp.pad(gamma.astype(jnp.float32), (0, cp - cout))
    beta_p = jnp.pad(beta.astype(jnp.float32), (0, cp - cout))
    scale = (gamma_p * inv).reshape(1, cp)
    shift = (beta_p - mean * gamma_p * inv).reshape(1, cp)
    _ = bias   # ConvTranspose bias is cancelled exactly by the BN mean subtraction.

    # --- pass 2: normalize + LeakyReLU -------------------------------------------------
    out_all = pl.pallas_call(
        functools.partial(_bn_lrelu_kernel, slope=negative_slope),
        grid=(n, n_htiles),
        in_specs=[
            pl.BlockSpec((4, tw, cp), lambda nn, hi: (0, nn * n_htiles + hi, 0)),
            pl.BlockSpec((1, cp), lambda nn, hi: (0, 0)),
            pl.BlockSpec((1, cp), lambda nn, hi: (0, 0)),
        ],
        out_specs=pl.BlockSpec((4, tw, cp), lambda nn, hi: (0, nn * n_htiles + hi, 0)),
        out_shape=jax.ShapeDtypeStruct((4, m, cp), out_dtype),
        compiler_params=pltpu.CompilerParams(
            dimension_semantics=("parallel", "parallel"),
            vmem_limit_bytes=vmem_limit),
    )(y_all, scale, shift)

    # --- interleave the 4 sub-pixel phases, back to NCHW -------------------------------
    out = out_all[:, :, :cout].reshape(2, 2, n, h, w, cout)
    out = out.transpose(2, 5, 3, 0, 4, 1).reshape(n, cout, h_out, w_out)
    return out


# ----------------------------------------------------------------------------
# Pure-numpy reference straight from the PyTorch ConvTranspose2d definition
# ----------------------------------------------------------------------------
def _reference(x, weight, bias, gamma, beta, kernel_size=4, stride=2, padding=1):
    x = np.asarray(x, np.float64)
    w = np.asarray(weight, np.float64)
    b = np.asarray(bias, np.float64)
    g = np.asarray(gamma, np.float64)
    be = np.asarray(beta, np.float64)
    n, cin, h, wdt = x.shape
    cout = w.shape[1]
    k = kernel_size
    h_out = (h - 1) * stride - 2 * padding + k
    w_out = (wdt - 1) * stride - 2 * padding + k
    y = np.zeros((n, cout, h_out, w_out), np.float64)
    for ih in range(h):
        for iw in range(wdt):
            for kh in range(k):
                for kw in range(k):
                    oh = ih * stride - padding + kh
                    ow = iw * stride - padding + kw
                    if 0 <= oh < h_out and 0 <= ow < w_out:
                        y[:, :, oh, ow] += x[:, :, ih, iw] @ w[:, :, kh, kw]
    y += b[None, :, None, None]
    mean = y.mean(axis=(0, 2, 3), keepdims=True)
    var = y.var(axis=(0, 2, 3), keepdims=True)   # biased, like PyTorch training BN
    z = (y - mean) / np.sqrt(var + 1e-5) * g[None, :, None, None] + be[None, :, None, None]
    return np.where(z >= 0, z, 0.2 * z)


if __name__ == "__main__":
    N, Cin, Cout, H, W = 2, 4, 8, 16, 16
    K, S, P = 4, 2, 1

    key = jax.random.PRNGKey(0)
    k1, k2, k3, k4, k5 = jax.random.split(key, 5)
    x = jax.random.normal(k1, (N, Cin, H, W), jnp.float32)
    weight = jax.random.normal(k2, (Cin, Cout, K, K), jnp.float32) * 0.1
    bias = jax.random.normal(k3, (Cout,), jnp.float32) * 0.1
    gamma = 1.0 + jax.random.normal(k4, (Cout,), jnp.float32) * 0.1
    beta = jax.random.normal(k5, (Cout,), jnp.float32) * 0.1

    out = simple_deconv_block(x, weight, bias, gamma, beta,
                              kernel_size=K, stride=S, padding=P)
    out = jax.block_until_ready(out)

    ref = _reference(np.asarray(x), np.asarray(weight), np.asarray(bias),
                     np.asarray(gamma), np.asarray(beta), K, S, P)
    assert out.shape == (N, Cout, 2 * H, 2 * W)
    # bf16 MXU operands + bf16 y intermediate -> slightly loose tolerance
    assert np.allclose(np.asarray(out), ref, atol=4e-2, rtol=4e-2)

    print("KERNEL_OK")
</pallas_src>

<mosaic_0001>
module attributes {stable_mosaic.version = 11 : i64} {
  func.func @_deconv_stats_kernel(%arg0: i32, %arg1: i32, %arg2: memref<1x18x18x8xbf16, #tpu.memory_space<vmem>>, %arg3: memref<16x8x128xbf16, #tpu.memory_space<vmem>>, %arg4: memref<4x256x128xbf16, #tpu.memory_space<vmem>>, %arg5: memref<1x1x128xf32, #tpu.memory_space<vmem>>, %arg6: memref<1x1x128xf32, #tpu.memory_space<vmem>>, %arg7: memref<256x128xf32, #tpu.memory_space<vmem>>) attributes {dimension_semantics = [#tpu.dimension_semantics<parallel>, #tpu.dimension_semantics<parallel>], iteration_bounds = array<i64: 2, 1>, scalar_prefetch = 0 : i64, scratch_operands = 1 : i64, tpu.core_type = #tpu.core_type<tc>, window_params = [{transform_indices = @transform_0, window_bounds = array<i64: 1, 18, 18, 8>}, {pipeline_mode = #tpu.pipeline_mode<synchronous>, transform_indices = @transform_1, window_bounds = array<i64: 16, 8, 128>}, {transform_indices = @transform_2, window_bounds = array<i64: 4, 256, 128>}, {transform_indices = @transform_3, window_bounds = array<i64: 1, 1, 128>}, {transform_indices = @transform_4, window_bounds = array<i64: 1, 1, 128>}]} {
    %c16_i32 = arith.constant 16 : i32
    %0 = arith.muli %arg1, %c16_i32 : i32
    %cst = arith.constant 0.000000e+00 : f32
    %1 = vector.broadcast %cst : f32 to vector<1x128xf32>
    %cst_0 = arith.constant 0.000000e+00 : f32
    %2 = vector.broadcast %cst_0 : f32 to vector<1x128xf32>
    %c0_i32 = arith.constant 0 : i32
    %3 = arith.addi %0, %c0_i32 : i32
    %c0_i32_1 = arith.constant 0 : i32
    %4 = arith.addi %3, %c0_i32_1 : i32
    %c0 = arith.constant 0 : index
    %5 = arith.index_cast %4 : i32 to index
    %c0_2 = arith.constant 0 : index
    %c0_3 = arith.constant 0 : index
    %6 = vector.load %arg2[%c0, %5, %c0_2, %c0_3] : memref<1x18x18x8xbf16, #tpu.memory_space<vmem>>, vector<1x16x16x8xbf16>
    %7 = vector.shape_cast %6 : vector<1x16x16x8xbf16> to vector<16x16x8xbf16>
    %8 = vector.shape_cast %7 : vector<16x16x8xbf16> to vector<256x8xbf16>
    %c0_4 = arith.constant 0 : index
    %c0_5 = arith.constant 0 : index
    %c0_6 = arith.constant 0 : index
    %9 = vector.load %arg3[%c0_4, %c0_5, %c0_6] : memref<16x8x128xbf16, #tpu.memory_space<vmem>>, vector<1x8x128xbf16>
    %10 = vector.shape_cast %9 : vector<1x8x128xbf16> to vector<8x128xbf16>
    %cst_7 = arith.constant dense<0.000000e+00> : vector<256x128xf32>
    %11 = tpu.matmul %8, %10, %cst_7 {dimension_numbers = #tpu.dot_dimension_numbers<[1], [0], [0], [1], [0, 0, 1, 1], [], []>} : vector<256x8xbf16>, vector<8x128xbf16>, vector<256x128xf32> -> vector<256x128xf32>
    %c0_8 = arith.constant 0 : index
    %c0_9 = arith.constant 0 : index
    %12 = vector.load %arg7[%c0_8, %c0_9] : memref<256x128xf32, #tpu.memory_space<vmem>>, vector<256x128xf32>
    tpu.vector_store %arg7[%c0_8, %c0_9], %11 {strides = array<i32>} : memref<256x128xf32, #tpu.memory_space<vmem>>, vector<256x128xf32>,
    %c0_i32_10 = arith.constant 0 : i32
    %13 = arith.addi %0, %c0_i32_10 : i32
    %c0_i32_11 = arith.constant 0 : i32
    %14 = arith.addi %13, %c0_i32_11 : i32
    %c0_12 = arith.constant 0 : index
    %15 = arith.index_cast %14 : i32 to index
    %c1 = arith.constant 1 : index
    %c0_13 = arith.constant 0 : index
    %16 = vector.load %arg2[%c0_12, %15, %c1, %c0_13] : memref<1x18x18x8xbf16, #tpu.memory_space<vmem>>, vector<1x16x16x8xbf16>
    %17 = vector.shape_cast %16 : vector<1x16x16x8xbf16> to vector<16x16x8xbf16>
    %18 = vector.shape_cast %17 : vector<16x16x8xbf16> to vector<256x8xbf16>
    %c1_14 = arith.constant 1 : index
    %c0_15 = arith.constant 0 : index
    %c0_16 = arith.constant 0 : index
    %19 = vector.load %arg3[%c1_14, %c0_15, %c0_16] : memref<16x8x128xbf16, #tpu.memory_space<vmem>>, vector<1x8x128xbf16>
    %20 = vector.shape_cast %19 : vector<1x8x128xbf16> to vector<8x128xbf16>
    %cst_17 = arith.constant dense<0.000000e+00> : vector<256x128xf32>
    %21 = tpu.matmul %18, %20, %cst_17 {dimension_numbers = #tpu.dot_dimension_numbers<[1], [0], [0], [1], [0, 0, 1, 1], [], []>} : vector<256x8xbf16>, vector<8x128xbf16>, vector<256x128xf32> -> vector<256x128xf32>
    %c0_18 = arith.constant 0 : index
    %c0_19 = arith.constant 0 : index
    %22 = vector.load %arg7[%c0_18, %c0_19] : memref<256x128xf32, #tpu.memory_space<vmem>>, vector<256x128xf32>
    %23 = arith.addf %22, %21 : vector<256x128xf32>
    %c0_20 = arith.constant 0 : index
    %c0_21 = arith.constant 0 : index
    %24 = vector.load %arg7[%c0_20, %c0_21] : memref<256x128xf32, #tpu.memory_space<vmem>>, vector<256x128xf32>
    tpu.vector_store %arg7[%c0_20, %c0_21], %23 {strides = array<i32>} : memref<256x128xf32, #tpu.memory_space<vmem>>, vector<256x128xf32>,
    %c0_i32_22 = arith.constant 0 : i32
    %25 = arith.addi %0, %c0_i32_22 : i32
    %c1_i32 = arith.constant 1 : i32
    %26 = arith.addi %25, %c1_i32 : i32
    %c0_23 = arith.constant 0 : index
    %27 = arith.index_cast %26 : i32 to index
    %c0_24 = arith.constant 0 : index
    %c0_25 = arith.constant 0 : index
    %28 = vector.load %arg2[%c0_23, %27, %c0_24, %c0_25] : memref<1x18x18x8xbf16, #tpu.memory_space<vmem>>, vector<1x16x16x8xbf16>
    %29 = vector.shape_cast %28 : vector<1x16x16x8xbf16> to vector<16x16x8xbf16>
    %30 = vector.shape_cast %29 : vector<16x16x8xbf16> to vector<256x8xbf16>
    %c2 = arith.constant 2 : index
    %c0_26 = arith.constant 0 : index
    %c0_27 = arith.constant 0 : index
    %31 = vector.load %arg3[%c2, %c0_26, %c0_27] : memref<16x8x128xbf16, #tpu.memory_space<vmem>>, vector<1x8x128xbf16>
    %32 = vector.shape_cast %31 : vector<1x8x128xbf16> to vector<8x128xbf16>
    %cst_28 = arith.constant dense<0.000000e+00> : vector<256x128xf32>
    %33 = tpu.matmul %30, %32, %cst_28 {dimension_numbers = #tpu.dot_dimension_numbers<[1], [0], [0], [1], [0, 0, 1, 1], [], []>} : vector<256x8xbf16>, vector<8x128xbf16>, vector<256x128xf32> -> vector<256x128xf32>
    %c0_29 = arith.constant 0 : index
    %c0_30 = arith.constant 0 : index
    %34 = vector.load %arg7[%c0_29, %c0_30] : memref<256x128xf32, #tpu.memory_space<vmem>>, vector<256x128xf32>
    %35 = arith.addf %34, %33 : vector<256x128xf32>
    %c0_31 = arith.constant 0 : index
    %c0_32 = arith.constant 0 : index
    %36 = vector.load %arg7[%c0_31, %c0_32] : memref<256x128xf32, #tpu.memory_space<vmem>>, vector<256x128xf32>
    tpu.vector_store %arg7[%c0_31, %c0_32], %35 {strides = array<i32>} : memref<256x128xf32, #tpu.memory_space<vmem>>, vector<256x128xf32>,
    %c0_i32_33 = arith.constant 0 : i32
    %37 = arith.addi %0, %c0_i32_33 : i32
    %c1_i32_34 = arith.constant 1 : i32
    %38 = arith.addi %37, %c1_i32_34 : i32
    %c0_35 = arith.constant 0 : index
    %39 = arith.index_cast %38 : i32 to index
    %c1_36 = arith.constant 1 : index
    %c0_37 = arith.constant 0 : index
    %40 = vector.load %arg2[%c0_35, %39, %c1_36, %c0_37] : memref<1x18x18x8xbf16, #tpu.memory_space<vmem>>, vector<1x16x16x8xbf16>
    %41 = vector.shape_cast %40 : vector<1x16x16x8xbf16> to vector<16x16x8xbf16>
    %42 = vector.shape_cast %41 : vector<16x16x8xbf16> to vector<256x8xbf16>
    %c3 = arith.constant 3 : index
    %c0_38 = arith.constant 0 : index
    %c0_39 = arith.constant 0 : index
    %43 = vector.load %arg3[%c3, %c0_38, %c0_39] : memref<16x8x128xbf16, #tpu.memory_space<vmem>>, vector<1x8x128xbf16>
    %44 = vector.shape_cast %43 : vector<1x8x128xbf16> to vector<8x128xbf16>
    %cst_40 = arith.constant dense<0.000000e+00> : vector<256x128xf32>
    %45 = tpu.matmul %42, %44, %cst_40 {dimension_numbers = #tpu.dot_dimension_numbers<[1], [0], [0], [1], [0, 0, 1, 1], [], []>} : vector<256x8xbf16>, vector<8x128xbf16>, vector<256x128xf32> -> vector<256x128xf32>
    %c0_41 = arith.constant 0 : index
    %c0_42 = arith.constant 0 : index
    %46 = vector.load %arg7[%c0_41, %c0_42] : memref<256x128xf32, #tpu.memory_space<vmem>>, vector<256x128xf32>
    %47 = arith.addf %46, %45 : vector<256x128xf32>
    %c0_43 = arith.constant 0 : index
    %c0_44 = arith.constant 0 : index
    %48 = vector.load %arg7[%c0_43, %c0_44] : memref<256x128xf32, #tpu.memory_space<vmem>>, vector<256x128xf32>
    tpu.vector_store %arg7[%c0_43, %c0_44], %47 {strides = array<i32>} : memref<256x128xf32, #tpu.memory_space<vmem>>, vector<256x128xf32>,
    %c0_45 = arith.constant 0 : index
    %c0_46 = arith.constant 0 : index
    %49 = vector.load %arg7[%c0_45, %c0_46] : memref<256x128xf32, #tpu.memory_space<vmem>>, vector<256x128xf32>
    %50 = arith.truncf %49 : vector<256x128xf32> to vector<256x128xbf16>
    %c0_47 = arith.constant 0 : index
    %c0_48 = arith.constant 0 : index
    %c0_49 = arith.constant 0 : index
    %51 = vector.load %arg4[%c0_47, %c0_48, %c0_49] : memref<4x256x128xbf16, #tpu.memory_space<vmem>>, vector<1x256x128xbf16>
    %52 = vector.shape_cast %51 : vector<1x256x128xbf16> to vector<256x128xbf16>
    %53 = vector.shape_cast %50 : vector<256x128xbf16> to vector<1x256x128xbf16>
    tpu.vector_store %arg4[%c0_47, %c0_48, %c0_49], %53 {strides = array<i32>} : memref<4x256x128xbf16, #tpu.memory_space<vmem>>, vector<1x256x128xbf16>,
    %cst_50 = arith.constant dense<0.000000e+00> : vector<128xf32>
    %54 = vector.multi_reduction <add>, %49, %cst_50 [0] : vector<256x128xf32> to vector<128xf32>
    %55 = vector.shape_cast %54 : vector<128xf32> to vector<1x128xf32>
    %56 = arith.addf %1, %55 : vector<1x128xf32>
    %57 = arith.mulf %49, %49 : vector<256x128xf32>
    %cst_51 = arith.constant dense<0.000000e+00> : vector<128xf32>
    %58 = vector.multi_reduction <add>, %57, %cst_51 [0] : vector<256x128xf32> to vector<128xf32>
    %59 = vector.shape_cast %58 : vector<128xf32> to vector<1x128xf32>
    %60 = arith.addf %2, %59 : vector<1x128xf32>
    %c0_i32_52 = arith.constant 0 : i32
    %61 = arith.addi %0, %c0_i32_52 : i32
    %c0_i32_53 = arith.constant 0 : i32
    %62 = arith.addi %61, %c0_i32_53 : i32
    %c0_54 = arith.constant 0 : index
    %63 = arith.index_cast %62 : i32 to index
    %c1_55 = arith.constant 1 : index
    %c0_56 = arith.constant 0 : index
    %64 = vector.load %arg2[%c0_54, %63, %c1_55, %c0_56] : memref<1x18x18x8xbf16, #tpu.memory_space<vmem>>, vector<1x16x16x8xbf16>
    %65 = vector.shape_cast %64 : vector<1x16x16x8xbf16> to vector<16x16x8xbf16>
    %66 = vector.shape_cast %65 : vector<16x16x8xbf16> to vector<256x8xbf16>
    %c4 = arith.constant 4 : index
    %c0_57 = arith.constant 0 : index
    %c0_58 = arith.constant 0 : index
    %67 = vector.load %arg3[%c4, %c0_57, %c0_58] : memref<16x8x128xbf16, #tpu.memory_space<vmem>>, vector<1x8x128xbf16>
    %68 = vector.shape_cast %67 : vector<1x8x128xbf16> to vector<8x128xbf16>
    %cst_59 = arith.constant dense<0.000000e+00> : vector<256x128xf32>
    %69 = tpu.matmul %66, %68, %cst_59 {dimension_numbers = #tpu.dot_dimension_numbers<[1], [0], [0], [1], [0, 0, 1, 1], [], []>} : vector<256x8xbf16>, vector<8x128xbf16>, vector<256x128xf32> -> vector<256x128xf32>
    %c0_60 = arith.constant 0 : index
    %c0_61 = arith.constant 0 : index
    %70 = vector.load %arg7[%c0_60, %c0_61] : memref<256x128xf32, #tpu.memory_space<vmem>>, vector<256x128xf32>
    tpu.vector_store %arg7[%c0_60, %c0_61], %69 {strides = array<i32>} : memref<256x128xf32, #tpu.memory_space<vmem>>, vector<256x128xf32>,
    %c0_i32_62 = arith.constant 0 : i32
    %71 = arith.addi %0, %c0_i32_62 : i32
    %c0_i32_63 = arith.constant 0 : i32
    %72 = arith.addi %71, %c0_i32_63 : i32
    %c0_64 = arith.constant 0 : index
    %73 = arith.index_cast %72 : i32 to index
    %c2_65 = arith.constant 2 : index
    %c0_66 = arith.constant 0 : index
    %74 = vector.load %arg2[%c0_64, %73, %c2_65, %c0_66] : memref<1x18x18x8xbf16, #tpu.memory_space<vmem>>, vector<1x16x16x8xbf16>
    %75 = vector.shape_cast %74 : vector<1x16x16x8xbf16> to vector<16x16x8xbf16>
    %76 = vector.shape_cast %75 : vector<16x16x8xbf16> to vector<256x8xbf16>
    %c5 = arith.constant 5 : index
    %c0_67 = arith.constant 0 : index
    %c0_68 = arith.constant 0 : index
    %77 = vector.load %arg3[%c5, %c0_67, %c0_68] : memref<16x8x128xbf16, #tpu.memory_space<vmem>>, vector<1x8x128xbf16>
    %78 = vector.shape_cast %77 : vector<1x8x128xbf16> to vector<8x128xbf16>
    %cst_69 = arith.constant dense<0.000000e+00> : vector<256x128xf32>
    %79 = tpu.matmul %76, %78, %cst_69 {dimension_numbers = #tpu.dot_dimension_numbers<[1], [0], [0], [1], [0, 0, 1, 1], [], []>} : vector<256x8xbf16>, vector<8x128xbf16>, vector<256x128xf32> -> vector<256x128xf32>
    %c0_70 = arith.constant 0 : index
    %c0_71 = arith.constant 0 : index
    %80 = vector.load %arg7[%c0_70, %c0_71] : memref<256x128xf32, #tpu.memory_space<vmem>>, vector<256x128xf32>
    %81 = arith.addf %80, %79 : vector<256x128xf32>
    %c0_72 = arith.constant 0 : index
    %c0_73 = arith.constant 0 : index
    %82 = vector.load %arg7[%c0_72, %c0_73] : memref<256x128xf32, #tpu.memory_space<vmem>>, vector<256x128xf32>
    tpu.vector_store %arg7[%c0_72, %c0_73], %81 {strides = array<i32>} : memref<256x128xf32, #tpu.memory_space<vmem>>, vector<256x128xf32>,
    %c0_i32_74 = arith.constant 0 : i32
    %83 = arith.addi %0, %c0_i32_74 : i32
    %c1_i32_75 = arith.constant 1 : i32
    %84 = arith.addi %83, %c1_i32_75 : i32
    %c0_76 = arith.constant 0 : index
    %85 = arith.index_cast %84 : i32 to index
    %c1_77 = arith.constant 1 : index
    %c0_78 = arith.constant 0 : index
    %86 = vector.load %arg2[%c0_76, %85, %c1_77, %c0_78] : memref<1x18x18x8xbf16, #tpu.memory_space<vmem>>, vector<1x16x16x8xbf16>
    %87 = vector.shape_cast %86 : vector<1x16x16x8xbf16> to vector<16x16x8xbf16>
    %88 = vector.shape_cast %87 : vector<16x16x8xbf16> to vector<256x8xbf16>
    %c6 = arith.constant 6 : index
    %c0_79 = arith.constant 0 : index
    %c0_80 = arith.constant 0 : index
    %89 = vector.load %arg3[%c6, %c0_79, %c0_80] : memref<16x8x128xbf16, #tpu.memory_space<vmem>>, vector<1x8x128xbf16>
    %90 = vector.shape_cast %89 : vector<1x8x128xbf16> to vector<8x128xbf16>
    %cst_81 = arith.constant dense<0.000000e+00> : vector<256x128xf32>
    %91 = tpu.matmul %88, %90, %cst_81 {dimension_numbers = #tpu.dot_dimension_numbers<[1], [0], [0], [1], [0, 0, 1, 1], [], []>} : vector<256x8xbf16>, vector<8x128xbf16>, vector<256x128xf32> -> vector<256x128xf32>
    %c0_82 = arith.constant 0 : index
    %c0_83 = arith.constant 0 : index
    %92 = vector.load %arg7[%c0_82, %c0_83] : memref<256x128xf32, #tpu.memory_space<vmem>>, vector<256x128xf32>
    %93 = arith.addf %92, %91 : vector<256x128xf32>
    %c0_84 = arith.constant 0 : index
    %c0_85 = arith.constant 0 : index
    %94 = vector.load %arg7[%c0_84, %c0_85] : memref<256x128xf32, #tpu.memory_space<vmem>>, vector<256x128xf32>
    tpu.vector_store %arg7[%c0_84, %c0_85], %93 {strides = array<i32>} : memref<256x128xf32, #tpu.memory_space<vmem>>, vector<256x128xf32>,
    %c0_i32_86 = arith.constant 0 : i32
    %95 = arith.addi %0, %c0_i32_86 : i32
    %c1_i32_87 = arith.constant 1 : i32
    %96 = arith.addi %95, %c1_i32_87 : i32
    %c0_88 = arith.constant 0 : index
    %97 = arith.index_cast %96 : i32 to index
    %c2_89 = arith.constant 2 : index
    %c0_90 = arith.constant 0 : index
    %98 = vector.load %arg2[%c0_88, %97, %c2_89, %c0_90] : memref<1x18x18x8xbf16, #tpu.memory_space<vmem>>, vector<1x16x16x8xbf16>
    %99 = vector.shape_cast %98 : vector<1x16x16x8xbf16> to vector<16x16x8xbf16>
    %100 = vector.shape_cast %99 : vector<16x16x8xbf16> to vector<256x8xbf16>
    %c7 = arith.constant 7 : index
    %c0_91 = arith.constant 0 : index
    %c0_92 = arith.constant 0 : index
    %101 = vector.load %arg3[%c7, %c0_91, %c0_92] : memref<16x8x128xbf16, #tpu.memory_space<vmem>>, vector<1x8x128xbf16>
    %102 = vector.shape_cast %101 : vector<1x8x128xbf16> to vector<8x128xbf16>
    %cst_93 = arith.constant dense<0.000000e+00> : vector<256x128xf32>
    %103 = tpu.matmul %100, %102, %cst_93 {dimension_numbers = #tpu.dot_dimension_numbers<[1], [0], [0], [1], [0, 0, 1, 1], [], []>} : vector<256x8xbf16>, vector<8x128xbf16>, vector<256x128xf32> -> vector<256x128xf32>
    %c0_94 = arith.constant 0 : index
    %c0_95 = arith.constant 0 : index
    %104 = vector.load %arg7[%c0_94, %c0_95] : memref<256x128xf32, #tpu.memory_space<vmem>>, vector<256x128xf32>
    %105 = arith.addf %104, %103 : vector<256x128xf32>
    %c0_96 = arith.constant 0 : index
    %c0_97 = arith.constant 0 : index
    %106 = vector.load %arg7[%c0_96, %c0_97] : memref<256x128xf32, #tpu.memory_space<vmem>>, vector<256x128xf32>
    tpu.vector_store %arg7[%c0_96, %c0_97], %105 {strides = array<i32>} : memref<256x128xf32, #tpu.memory_space<vmem>>, vector<256x128xf32>,
    %c0_98 = arith.constant 0 : index
    %c0_99 = arith.constant 0 : index
    %107 = vector.load %arg7[%c0_98, %c0_99] : memref<256x128xf32, #tpu.memory_space<vmem>>, vector<256x128xf32>
    %108 = arith.truncf %107 : vector<256x128xf32> to vector<256x128xbf16>
    %c1_100 = arith.constant 1 : index
    %c0_101 = arith.constant 0 : index
    %c0_102 = arith.constant 0 : index
    %109 = vector.load %arg4[%c1_100, %c0_101, %c0_102] : memref<4x256x128xbf16, #tpu.memory_space<vmem>>, vector<1x256x128xbf16>
    %110 = vector.shape_cast %109 : vector<1x256x128xbf16> to vector<256x128xbf16>
    %111 = vector.shape_cast %108 : vector<256x128xbf16> to vector<1x256x128xbf16>
    tpu.vector_store %arg4[%c1_100, %c0_101, %c0_102], %111 {strides = array<i32>} : memref<4x256x128xbf16, #tpu.memory_space<vmem>>, vector<1x256x128xbf16>,
    %cst_103 = arith.constant dense<0.000000e+00> : vector<128xf32>
    %112 = vector.multi_reduction <add>, %107, %cst_103 [0] : vector<256x128xf32> to vector<128xf32>
    %113 = vector.shape_cast %112 : vector<128xf32> to vector<1x128xf32>
    %114 = arith.addf %56, %113 : vector<1x128xf32>
    %115 = arith.mulf %107, %107 : vector<256x128xf32>
    %cst_104 = arith.constant dense<0.000000e+00> : vector<128xf32>
    %116 = vector.multi_reduction <add>, %115, %cst_104 [0] : vector<256x128xf32> to vector<128xf32>
    %117 = vector.shape_cast %116 : vector<128xf32> to vector<1x128xf32>
    %118 = arith.addf %60, %117 : vector<1x128xf32>
    %c1_i32_105 = arith.constant 1 : i32
    %119 = arith.addi %0, %c1_i32_105 : i32
    %c0_i32_106 = arith.constant 0 : i32
    %120 = arith.addi %119, %c0_i32_106 : i32
    %c0_107 = arith.constant 0 : index
    %121 = arith.index_cast %120 : i32 to index
    %c0_108 = arith.constant 0 : index
    %c0_109 = arith.constant 0 : index
    %122 = vector.load %arg2[%c0_107, %121, %c0_108, %c0_109] : memref<1x18x18x8xbf16, #tpu.memory_space<vmem>>, vector<1x16x16x8xbf16>
    %123 = vector.shape_cast %122 : vector<1x16x16x8xbf16> to vector<16x16x8xbf16>
    %124 = vector.shape_cast %123 : vector<16x16x8xbf16> to vector<256x8xbf16>
    %c8 = arith.constant 8 : index
    %c0_110 = arith.constant 0 : index
    %c0_111 = arith.constant 0 : index
    %125 = vector.load %arg3[%c8, %c0_110, %c0_111] : memref<16x8x128xbf16, #tpu.memory_space<vmem>>, vector<1x8x128xbf16>
    %126 = vector.shape_cast %125 : vector<1x8x128xbf16> to vector<8x128xbf16>
    %cst_112 = arith.constant dense<0.000000e+00> : vector<256x128xf32>
    %127 = tpu.matmul %124, %126, %cst_112 {dimension_numbers = #tpu.dot_dimension_numbers<[1], [0], [0], [1], [0, 0, 1, 1], [], []>} : vector<256x8xbf16>, vector<8x128xbf16>, vector<256x128xf32> -> vector<256x128xf32>
    %c0_113 = arith.constant 0 : index
    %c0_114 = arith.constant 0 : index
    %128 = vector.load %arg7[%c0_113, %c0_114] : memref<256x128xf32, #tpu.memory_space<vmem>>, vector<256x128xf32>
    tpu.vector_store %arg7[%c0_113, %c0_114], %127 {strides = array<i32>} : memref<256x128xf32, #tpu.memory_space<vmem>>, vector<256x128xf32>,
    %c1_i32_115 = arith.constant 1 : i32
    %129 = arith.addi %0, %c1_i32_115 : i32
    %c0_i32_116 = arith.constant 0 : i32
    %130 = arith.addi %129, %c0_i32_116 : i32
    %c0_117 = arith.constant 0 : index
    %131 = arith.index_cast %130 : i32 to index
    %c1_118 = arith.constant 1 : index
    %c0_119 = arith.constant 0 : index
    %132 = vector.load %arg2[%c0_117, %131, %c1_118, %c0_119] : memref<1x18x18x8xbf16, #tpu.memory_space<vmem>>, vector<1x16x16x8xbf16>
    %133 = vector.shape_cast %132 : vector<1x16x16x8xbf16> to vector<16x16x8xbf16>
    %134 = vector.shape_cast %133 : vector<16x16x8xbf16> to vector<256x8xbf16>
    %c9 = arith.constant 9 : index
    %c0_120 = arith.constant 0 : index
    %c0_121 = arith.constant 0 : index
    %135 = vector.load %arg3[%c9, %c0_120, %c0_121] : memref<16x8x128xbf16, #tpu.memory_space<vmem>>, vector<1x8x128xbf16>
    %136 = vector.shape_cast %135 : vector<1x8x128xbf16> to vector<8x128xbf16>
    %cst_122 = arith.constant dense<0.000000e+00> : vector<256x128xf32>
    %137 = tpu.matmul %134, %136, %cst_122 {dimension_numbers = #tpu.dot_dimension_numbers<[1], [0], [0], [1], [0, 0, 1, 1], [], []>} : vector<256x8xbf16>, vector<8x128xbf16>, vector<256x128xf32> -> vector<256x128xf32>
    %c0_123 = arith.constant 0 : index
    %c0_124 = arith.constant 0 : index
    %138 = vector.load %arg7[%c0_123, %c0_124] : memref<256x128xf32, #tpu.memory_space<vmem>>, vector<256x128xf32>
    %139 = arith.addf %138, %137 : vector<256x128xf32>
    %c0_125 = arith.constant 0 : index
    %c0_126 = arith.constant 0 : index
    %140 = vector.load %arg7[%c0_125, %c0_126] : memref<256x128xf32, #tpu.memory_space<vmem>>, vector<256x128xf32>
    tpu.vector_store %arg7[%c0_125, %c0_126], %139 {strides = array<i32>} : memref<256x128xf32, #tpu.memory_space<vmem>>, vector<256x128xf32>,
    %c1_i32_127 = arith.constant 1 : i32
    %141 = arith.addi %0, %c1_i32_127 : i32
    %c1_i32_128 = arith.constant 1 : i32
    %142 = arith.addi %141, %c1_i32_128 : i32
    %c0_129 = arith.constant 0 : index
    %143 = arith.index_cast %142 : i32 to index
    %c0_130 = arith.constant 0 : index
    %c0_131 = arith.constant 0 : index
    %144 = vector.load %arg2[%c0_129, %143, %c0_130, %c0_131] : memref<1x18x18x8xbf16, #tpu.memory_space<vmem>>, vector<1x16x16x8xbf16>
    %145 = vector.shape_cast %144 : vector<1x16x16x8xbf16> to vector<16x16x8xbf16>
    %146 = vector.shape_cast %145 : vector<16x16x8xbf16> to vector<256x8xbf16>
    %c10 = arith.constant 10 : index
    %c0_132 = arith.constant 0 : index
    %c0_133 = arith.constant 0 : index
    %147 = vector.load %arg3[%c10, %c0_132, %c0_133] : memref<16x8x128xbf16, #tpu.memory_space<vmem>>, vector<1x8x128xbf16>
    %148 = vector.shape_cast %147 : vector<1x8x128xbf16> to vector<8x128xbf16>
    %cst_134 = arith.constant dense<0.000000e+00> : vector<256x128xf32>
    %149 = tpu.matmul %146, %148, %cst_134 {dimension_numbers = #tpu.dot_dimension_numbers<[1], [0], [0], [1], [0, 0, 1, 1], [], []>} : vector<256x8xbf16>, vector<8x128xbf16>, vector<256x128xf32> -> vector<256x128xf32>
    %c0_135 = arith.constant 0 : index
    %c0_136 = arith.constant 0 : index
    %150 = vector.load %arg7[%c0_135, %c0_136] : memref<256x128xf32, #tpu.memory_space<vmem>>, vector<256x128xf32>
    %151 = arith.addf %150, %149 : vector<256x128xf32>
    %c0_137 = arith.constant 0 : index
    %c0_138 = arith.constant 0 : index
    %152 = vector.load %arg7[%c0_137, %c0_138] : memref<256x128xf32, #tpu.memory_space<vmem>>, vector<256x128xf32>
    tpu.vector_store %arg7[%c0_137, %c0_138], %151 {strides = array<i32>} : memref<256x128xf32, #tpu.memory_space<vmem>>, vector<256x128xf32>,
    %c1_i32_139 = arith.constant 1 : i32
    %153 = arith.addi %0, %c1_i32_139 : i32
    %c1_i32_140 = arith.constant 1 : i32
    %154 = arith.addi %153, %c1_i32_140 : i32
    %c0_141 = arith.constant 0 : index
    %155 = arith.index_cast %154 : i32 to index
    %c1_142 = arith.constant 1 : index
    %c0_143 = arith.constant 0 : index
    %156 = vector.load %arg2[%c0_141, %155, %c1_142, %c0_143] : memref<1x18x18x8xbf16, #tpu.memory_space<vmem>>, vector<1x16x16x8xbf16>
    %157 = vector.shape_cast %156 : vector<1x16x16x8xbf16> to vector<16x16x8xbf16>
    %158 = vector.shape_cast %157 : vector<16x16x8xbf16> to vector<256x8xbf16>
    %c11 = arith.constant 11 : index
    %c0_144 = arith.constant 0 : index
    %c0_145 = arith.constant 0 : index
    %159 = vector.load %arg3[%c11, %c0_144, %c0_145] : memref<16x8x128xbf16, #tpu.memory_space<vmem>>, vector<1x8x128xbf16>
    %160 = vector.shape_cast %159 : vector<1x8x128xbf16> to vector<8x128xbf16>
    %cst_146 = arith.constant dense<0.000000e+00> : vector<256x128xf32>
    %161 = tpu.matmul %158, %160, %cst_146 {dimension_numbers = #tpu.dot_dimension_numbers<[1], [0], [0], [1], [0, 0, 1, 1], [], []>} : vector<256x8xbf16>, vector<8x128xbf16>, vector<256x128xf32> -> vector<256x128xf32>
    %c0_147 = arith.constant 0 : index
    %c0_148 = arith.constant 0 : index
    %162 = vector.load %arg7[%c0_147, %c0_148] : memref<256x128xf32, #tpu.memory_space<vmem>>, vector<256x128xf32>
    %163 = arith.addf %162, %161 : vector<256x128xf32>
    %c0_149 = arith.constant 0 : index
    %c0_150 = arith.constant 0 : index
    %164 = vector.load %arg7[%c0_149, %c0_150] : memref<256x128xf32, #tpu.memory_space<vmem>>, vector<256x128xf32>
    tpu.vector_store %arg7[%c0_149, %c0_150], %163 {strides = array<i32>} : memref<256x128xf32, #tpu.memory_space<vmem>>, vector<256x128xf32>,
    %c0_151 = arith.constant 0 : index
    %c0_152 = arith.constant 0 : index
    %165 = vector.load %arg7[%c0_151, %c0_152] : memref<256x128xf32, #tpu.memory_space<vmem>>, vector<256x128xf32>
    %166 = arith.truncf %165 : vector<256x128xf32> to vector<256x128xbf16>
    %c2_153 = arith.constant 2 : index
    %c0_154 = arith.constant 0 : index
    %c0_155 = arith.constant 0 : index
    %167 = vector.load %arg4[%c2_153, %c0_154, %c0_155] : memref<4x256x128xbf16, #tpu.memory_space<vmem>>, vector<1x256x128xbf16>
    %168 = vector.shape_cast %167 : vector<1x256x128xbf16> to vector<256x128xbf16>
    %169 = vector.shape_cast %166 : vector<256x128xbf16> to vector<1x256x128xbf16>
    tpu.vector_store %arg4[%c2_153, %c0_154, %c0_155], %169 {strides = array<i32>} : memref<4x256x128xbf16, #tpu.memory_space<vmem>>, vector<1x256x128xbf16>,
    %cst_156 = arith.constant dense<0.000000e+00> : vector<128xf32>
    %170 = vector.multi_reduction <add>, %165, %cst_156 [0] : vector<256x128xf32> to vector<128xf32>
    %171 = vector.shape_cast %170 : vector<128xf32> to vector<1x128xf32>
    %172 = arith.addf %114, %171 : vector<1x128xf32>
    %173 = arith.mulf %165, %165 : vector<256x128xf32>
    %cst_157 = arith.constant dense<0.000000e+00> : vector<128xf32>
    %174 = vector.multi_reduction <add>, %173, %cst_157 [0] : vector<256x128xf32> to vector<128xf32>
    %175 = vector.shape_cast %174 : vector<128xf32> to vector<1x128xf32>
    %176 = arith.addf %118, %175 : vector<1x128xf32>
    %c1_i32_158 = arith.constant 1 : i32
    %177 = arith.addi %0, %c1_i32_158 : i32
    %c0_i32_159 = arith.constant 0 : i32
    %178 = arith.addi %177, %c0_i32_159 : i32
    %c0_160 = arith.constant 0 : index
    %179 = arith.index_cast %178 : i32 to index
    %c1_161 = arith.constant 1 : index
    %c0_162 = arith.constant 0 : index
    %180 = vector.load %arg2[%c0_160, %179, %c1_161, %c0_162] : memref<1x18x18x8xbf16, #tpu.memory_space<vmem>>, vector<1x16x16x8xbf16>
    %181 = vector.shape_cast %180 : vector<1x16x16x8xbf16> to vector<16x16x8xbf16>
    %182 = vector.shape_cast %181 : vector<16x16x8xbf16> to vector<256x8xbf16>
    %c12 = arith.constant 12 : index
    %c0_163 = arith.constant 0 : index
    %c0_164 = arith.constant 0 : index
    %183 = vector.load %arg3[%c12, %c0_163, %c0_164] : memref<16x8x128xbf16, #tpu.memory_space<vmem>>, vector<1x8x128xbf16>
    %184 = vector.shape_cast %183 : vector<1x8x128xbf16> to vector<8x128xbf16>
    %cst_165 = arith.constant dense<0.000000e+00> : vector<256x128xf32>
    %185 = tpu.matmul %182, %184, %cst_165 {dimension_numbers = #tpu.dot_dimension_numbers<[1], [0], [0], [1], [0, 0, 1, 1], [], []>} : vector<256x8xbf16>, vector<8x128xbf16>, vector<256x128xf32> -> vector<256x128xf32>
    %c0_166 = arith.constant 0 : index
    %c0_167 = arith.constant 0 : index
    %186 = vector.load %arg7[%c0_166, %c0_167] : memref<256x128xf32, #tpu.memory_space<vmem>>, vector<256x128xf32>
    tpu.vector_store %arg7[%c0_166, %c0_167], %185 {strides = array<i32>} : memref<256x128xf32, #tpu.memory_space<vmem>>, vector<256x128xf32>,
    %c1_i32_168 = arith.constant 1 : i32
    %187 = arith.addi %0, %c1_i32_168 : i32
    %c0_i32_169 = arith.constant 0 : i32
    %188 = arith.addi %187, %c0_i32_169 : i32
    %c0_170 = arith.constant 0 : index
    %189 = arith.index_cast %188 : i32 to index
    %c2_171 = arith.constant 2 : index
    %c0_172 = arith.constant 0 : index
    %190 = vector.load %arg2[%c0_170, %189, %c2_171, %c0_172] : memref<1x18x18x8xbf16, #tpu.memory_space<vmem>>, vector<1x16x16x8xbf16>
    %191 = vector.shape_cast %190 : vector<1x16x16x8xbf16> to vector<16x16x8xbf16>
    %192 = vector.shape_cast %191 : vector<16x16x8xbf16> to vector<256x8xbf16>
    %c13 = arith.constant 13 : index
    %c0_173 = arith.constant 0 : index
    %c0_174 = arith.constant 0 : index
    %193 = vector.load %arg3[%c13, %c0_173, %c0_174] : memref<16x8x128xbf16, #tpu.memory_space<vmem>>, vector<1x8x128xbf16>
    %194 = vector.shape_cast %193 : vector<1x8x128xbf16> to vector<8x128xbf16>
    %cst_175 = arith.constant dense<0.000000e+00> : vector<256x128xf32>
    %195 = tpu.matmul %192, %194, %cst_175 {dimension_numbers = #tpu.dot_dimension_numbers<[1], [0], [0], [1], [0, 0, 1, 1], [], []>} : vector<256x8xbf16>, vector<8x128xbf16>, vector<256x128xf32> -> vector<256x128xf32>
    %c0_176 = arith.constant 0 : index
    %c0_177 = arith.constant 0 : index
    %196 = vector.load %arg7[%c0_176, %c0_177] : memref<256x128xf32, #tpu.memory_space<vmem>>, vector<256x128xf32>
    %197 = arith.addf %196, %195 : vector<256x128xf32>
    %c0_178 = arith.constant 0 : index
    %c0_179 = arith.constant 0 : index
    %198 = vector.load %arg7[%c0_178, %c0_179] : memref<256x128xf32, #tpu.memory_space<vmem>>, vector<256x128xf32>
    tpu.vector_store %arg7[%c0_178, %c0_179], %197 {strides = array<i32>} : memref<256x128xf32, #tpu.memory_space<vmem>>, vector<256x128xf32>,
    %c1_i32_180 = arith.constant 1 : i32
    %199 = arith.addi %0, %c1_i32_180 : i32
    %c1_i32_181 = arith.constant 1 : i32
    %200 = arith.addi %199, %c1_i32_181 : i32
    %c0_182 = arith.constant 0 : index
    %201 = arith.index_cast %200 : i32 to index
    %c1_183 = arith.constant 1 : index
    %c0_184 = arith.constant 0 : index
    %202 = vector.load %arg2[%c0_182, %201, %c1_183, %c0_184] : memref<1x18x18x8xbf16, #tpu.memory_space<vmem>>, vector<1x16x16x8xbf16>
    %203 = vector.shape_cast %202 : vector<1x16x16x8xbf16> to vector<16x16x8xbf16>
    %204 = vector.shape_cast %203 : vector<16x16x8xbf16> to vector<256x8xbf16>
    %c14 = arith.constant 14 : index
    %c0_185 = arith.constant 0 : index
    %c0_186 = arith.constant 0 : index
    %205 = vector.load %arg3[%c14, %c0_185, %c0_186] : memref<16x8x128xbf16, #tpu.memory_space<vmem>>, vector<1x8x128xbf16>
    %206 = vector.shape_cast %205 : vector<1x8x128xbf16> to vector<8x128xbf16>
    %cst_187 = arith.constant dense<0.000000e+00> : vector<256x128xf32>
    %207 = tpu.matmul %204, %206, %cst_187 {dimension_numbers = #tpu.dot_dimension_numbers<[1], [0], [0], [1], [0, 0, 1, 1], [], []>} : vector<256x8xbf16>, vector<8x128xbf16>, vector<256x128xf32> -> vector<256x128xf32>
    %c0_188 = arith.constant 0 : index
    %c0_189 = arith.constant 0 : index
    %208 = vector.load %arg7[%c0_188, %c0_189] : memref<256x128xf32, #tpu.memory_space<vmem>>, vector<256x128xf32>
    %209 = arith.addf %208, %207 : vector<256x128xf32>
    %c0_190 = arith.constant 0 : index
    %c0_191 = arith.constant 0 : index
    %210 = vector.load %arg7[%c0_190, %c0_191] : memref<256x128xf32, #tpu.memory_space<vmem>>, vector<256x128xf32>
    tpu.vector_store %arg7[%c0_190, %c0_191], %209 {strides = array<i32>} : memref<256x128xf32, #tpu.memory_space<vmem>>, vector<256x128xf32>,
    %c1_i32_192 = arith.constant 1 : i32
    %211 = arith.addi %0, %c1_i32_192 : i32
    %c1_i32_193 = arith.constant 1 : i32
    %212 = arith.addi %211, %c1_i32_193 : i32
    %c0_194 = arith.constant 0 : index
    %213 = arith.index_cast %212 : i32 to index
    %c2_195 = arith.constant 2 : index
    %c0_196 = arith.constant 0 : index
    %214 = vector.load %arg2[%c0_194, %213, %c2_195, %c0_196] : memref<1x18x18x8xbf16, #tpu.memory_space<vmem>>, vector<1x16x16x8xbf16>
    %215 = vector.shape_cast %214 : vector<1x16x16x8xbf16> to vector<16x16x8xbf16>
    %216 = vector.shape_cast %215 : vector<16x16x8xbf16> to vector<256x8xbf16>
    %c15 = arith.constant 15 : index
    %c0_197 = arith.constant 0 : index
    %c0_198 = arith.constant 0 : index
    %217 = vector.load %arg3[%c15, %c0_197, %c0_198] : memref<16x8x128xbf16, #tpu.memory_space<vmem>>, vector<1x8x128xbf16>
    %218 = vector.shape_cast %217 : vector<1x8x128xbf16> to vector<8x128xbf16>
    %cst_199 = arith.constant dense<0.000000e+00> : vector<256x128xf32>
    %219 = tpu.matmul %216, %218, %cst_199 {dimension_numbers = #tpu.dot_dimension_numbers<[1], [0], [0], [1], [0, 0, 1, 1], [], []>} : vector<256x8xbf16>, vector<8x128xbf16>, vector<256x128xf32> -> vector<256x128xf32>
    %c0_200 = arith.constant 0 : index
    %c0_201 = arith.constant 0 : index
    %220 = vector.load %arg7[%c0_200, %c0_201] : memref<256x128xf32, #tpu.memory_space<vmem>>, vector<256x128xf32>
    %221 = arith.addf %220, %219 : vector<256x128xf32>
    %c0_202 = arith.constant 0 : index
    %c0_203 = arith.constant 0 : index
    %222 = vector.load %arg7[%c0_202, %c0_203] : memref<256x128xf32, #tpu.memory_space<vmem>>, vector<256x128xf32>
    tpu.vector_store %arg7[%c0_202, %c0_203], %221 {strides = array<i32>} : memref<256x128xf32, #tpu.memory_space<vmem>>, vector<256x128xf32>,
    %c0_204 = arith.constant 0 : index
    %c0_205 = arith.constant 0 : index
    %223 = vector.load %arg7[%c0_204, %c0_205] : memref<256x128xf32, #tpu.memory_space<vmem>>, vector<256x128xf32>
    %224 = arith.truncf %223 : vector<256x128xf32> to vector<256x128xbf16>
    %c3_206 = arith.constant 3 : index
    %c0_207 = arith.constant 0 : index
    %c0_208 = arith.constant 0 : index
    %225 = vector.load %arg4[%c3_206, %c0_207, %c0_208] : memref<4x256x128xbf16, #tpu.memory_space<vmem>>, vector<1x256x128xbf16>
    %226 = vector.shape_cast %225 : vector<1x256x128xbf16> to vector<256x128xbf16>
    %227 = vector.shape_cast %224 : vector<256x128xbf16> to vector<1x256x128xbf16>
    tpu.vector_store %arg4[%c3_206, %c0_207, %c0_208], %227 {strides = array<i32>} : memref<4x256x128xbf16, #tpu.memory_space<vmem>>, vector<1x256x128xbf16>,
    %cst_209 = arith.constant dense<0.000000e+00> : vector<128xf32>
    %228 = vector.multi_reduction <add>, %223, %cst_209 [0] : vector<256x128xf32> to vector<128xf32>
    %229 = vector.shape_cast %228 : vector<128xf32> to vector<1x128xf32>
    %230 = arith.addf %172, %229 : vector<1x128xf32>
    %231 = arith.mulf %223, %223 : vector<256x128xf32>
    %cst_210 = arith.constant dense<0.000000e+00> : vector<128xf32>
    %232 = vector.multi_reduction <add>, %231, %cst_210 [0] : vector<256x128xf32> to vector<128xf32>
    %233 = vector.shape_cast %232 : vector<128xf32> to vector<1x128xf32>
    %234 = arith.addf %176, %233 : vector<1x128xf32>
    %c0_211 = arith.constant 0 : index
    %c0_212 = arith.constant 0 : index
    %c0_213 = arith.constant 0 : index
    %235 = vector.load %arg5[%c0_211, %c0_212, %c0_213] : memref<1x1x128xf32, #tpu.memory_space<vmem>>, vector<1x1x128xf32>
    %236 = vector.shape_cast %235 : vector<1x1x128xf32> to vector<1x128xf32>
    %237 = vector.shape_cast %230 : vector<1x128xf32> to vector<1x1x128xf32>
    tpu.vector_store %arg5[%c0_211, %c0_212, %c0_213], %237 {strides = array<i32>} : memref<1x1x128xf32, #tpu.memory_space<vmem>>, vector<1x1x128xf32>,
    %c0_214 = arith.constant 0 : index
    %c0_215 = arith.constant 0 : index
    %c0_216 = arith.constant 0 : index
    %238 = vector.load %arg6[%c0_214, %c0_215, %c0_216] : memref<1x1x128xf32, #tpu.memory_space<vmem>>, vector<1x1x128xf32>
    %239 = vector.shape_cast %238 : vector<1x1x128xf32> to vector<1x128xf32>
    %240 = vector.shape_cast %234 : vector<1x128xf32> to vector<1x1x128xf32>
    tpu.vector_store %arg6[%c0_214, %c0_215, %c0_216], %240 {strides = array<i32>} : memref<1x1x128xf32, #tpu.memory_space<vmem>>, vector<1x1x128xf32>,
    return
  }
  func.func @transform_0(%arg0: i32, %arg1: i32) -> (i32, i32, i32, i32) {
    %c0_i32 = arith.constant 0 : i32
    %c0_i32_0 = arith.constant 0 : i32
    %c0_i32_1 = arith.constant 0 : i32
    %c0_i32_2 = arith.constant 0 : i32
    return %arg0, %c0_i32, %c0_i32_0, %c0_i32_1 : i32, i32, i32, i32
  }
  func.func @transform_1(%arg0: i32, %arg1: i32) -> (i32, i32, i32) {
    %c0_i32 = arith.constant 0 : i32
    %c0_i32_0 = arith.constant 0 : i32
    %c0_i32_1 = arith.constant 0 : i32
    %c0_i32_2 = arith.constant 0 : i32
    return %c0_i32, %c0_i32_0, %c0_i32_1 : i32, i32, i32
  }
  func.func @transform_2(%arg0: i32, %arg1: i32) -> (i32, i32, i32) {
    %c1_i32 = arith.constant 1 : i32
    %0 = arith.muli %arg0, %c1_i32 : i32
    %1 = arith.addi %0, %arg1 : i32
    %c0_i32 = arith.constant 0 : i32
    %c0_i32_0 = arith.constant 0 : i32
    %c0_i32_1 = arith.constant 0 : i32
    return %c0_i32, %1, %c0_i32_0 : i32, i32, i32
  }
  func.func @transform_3(%arg0: i32, %arg1: i32) -> (i32, i32, i32) {
    %c1_i32 = arith.constant 1 : i32
    %0 = arith.muli %arg0, %c1_i32 : i32
    %1 = arith.addi %0, %arg1 : i32
    %c0_i32 = arith.constant 0 : i32
    %c0_i32_0 = arith.constant 0 : i32
    %c0_i32_1 = arith.constant 0 : i32
    return %1, %c0_i32, %c0_i32_0 : i32, i32, i32
  }
  func.func @transform_4(%arg0: i32, %arg1: i32) -> (i32, i32, i32) {
    %c1_i32 = arith.constant 1 : i32
    %0 = arith.muli %arg0, %c1_i32 : i32
    %1 = arith.addi %0, %arg1 : i32
    %c0_i32 = arith.constant 0 : i32
    %c0_i32_0 = arith.constant 0 : i32
    %c0_i32_1 = arith.constant 0 : i32
    return %1, %c0_i32, %c0_i32_0 : i32, i32, i32
  }
}

</mosaic_0001>

<bundles_post_ra>
// kernel: tpu_custom_call.1
= control target key start
LH: loop header
LB: loop body
LE: loop exit
PB: predicated region body
PF: predicated region fallthrough
CT: control target
= control target key end

     0   :  { %10 = vsyncpa [#allocation4], 0  ;;  %s18835_s0 = inlined_call_operand.vmem [shape: bf16[2,18,18,8], index: 0, kind: input, shape index: {}]   ;;  %s18836_s1 = inlined_call_operand.vmem [shape: bf16[16,8,128], index: 1, kind: input, shape index: {}]   ;;  %s18837_s2 = inlined_call_operand.hbm [shape: bf16[4,512,128], index: 2, kind: output, shape index: {0}]   ;;  %s18838_s3 = inlined_call_operand.hbm [shape: f32[2,1,128], index: 3, kind: output, shape index: {1}]   ;;  %s18839_s4 = inlined_call_operand.hbm [shape: f32[2,1,128], index: 4, kind: output, shape index: {2}]  }
   0x1   :  { %12 = vsyncpa [#allocation4 + $0x1], 0 }
   0x2   :  { %13 = vsyncpa [#allocation6], 0 }
   0x3   :  { %15 = vsyncpa [#allocation6 + $0x1], 0  ;;  %s14676_s15 = smov 0   ;;  %s14678_s16 = smov 0  }
   0x4   :  { %s14680_s17 = smov 0   ;;  %s14682_s18 = smov 0  }
   0x5   :  { %s14684_s19 = smov 0   ;;  %s14686_s20 = smov 0  }
   0x6 LB: > { %s11685_s21 = sadd.s32 4294967295, %s14640_s20   ;;  %s18845_s22 = sadd.s32 4294967294, %s14640_s20   ;;  %s14640_s20 = sphi %s14686_s20, %s21_s20   ;;  %s14636_s19 = sphi %s14684_s19, %s19419_s19   ;;  %s14632_s18 = sphi %s14682_s18, %s19418_s18   ;;  %s14628_s17 = sphi %s14680_s17, %s19417_s17   ;;  %s14624_s16 = sphi %s14678_s16, %s19416_s16   ;;  %s14620_s15 = sphi %s14676_s15, %s19415_s15  }
   0x7   : > { %s33_s23 = sadd.s32 1, %s14636_s19  ;;  %s89_s24 = sadd.s32 1, %s14628_s17 }
   0x8   : > { %p35_p0 = scmp.ge.s32.totalorder %s33_s23, 2  ;;  %p99_p1 = scmp.ne.s32.totalorder %s14628_s17, %s14624_s16 }
   0x9   : > { %p100_p2 = scmp.eq.s32.totalorder %s11685_s21, 1  ;;  %p105_p3 = scmp.ne.s32.totalorder %s14624_s16, %s14620_s15 }
   0xa   : > { %s19421_s23 = smov (%p35_p0, %s33_s23), 0  ;;  %p106_p5 = scmp.eq.s32.totalorder %s18845_s22, 1 }
   0xb   : > { %p14718_p4 = por %p100_p2, %p99_p1  ;;  %s86_s26 = ssub.s32 %s14636_s19, %s19421_s23 }
   0xc   : > { %p11689_p6 = scmp.ge.s32.totalorder %s14640_s20, 1  ;;  %p87_p7 = scmp.eq.s32.totalorder %s86_s26, 0 }
   0xd   : > { %p14727_p8 = por %p106_p5, %p105_p3  ;;  %p191_p9 = scmp.lt.s32.totalorder %s14640_s20, 3 }
   0xe   : > { %s14733_s28 = scalar_select %p87_p7, %s14628_s17, %s89_s24  }
   0xf   : > { %p192_p10 = pnand %p11689_p6, %p191_p9 }
  0x11   : > { %195 = sbr.rel (%p192_p10) target bundleno = 1093 (0x445), region = 28 }
  0x16   : > { %v271_v0 = vld [vmem:[%s18836_s1] sm:$0xf]  ;;  %vm401_vm0 = vcmask 1043456   ;;  %p225_p11 = scmp.lt.s32.totalorder %s14632_s18, 1  ;;  %v11724_v2 = vld [vmem:[%s18836_s1 + $0x4] sm:$0xf] }
  0x17   : > { %14370 = vmatprep.subr.msk.bf16.mxu0 %vm401_vm0, %v271_v0  ;;  %v403_v1 = vsel %vm401_vm0, %v271_v0, 0  ;;  %v11789_v3 = vld [vmem:[%s18836_s1 + $0x8] sm:$0xf]  ;;  %14371 = vmatprep.subr.msk.bf16.mxu1 %vm401_vm0, %v11724_v2  ;;  %v1132_v4 = vsel %vm401_vm0, %v11724_v2, 0  ;;  %v11870_v5 = vld [vmem:[%s18836_s1 + $0xc] sm:$0xf] }
  0x18   : > { %13827 = vmatpush3.bf16.msra.mxu0 %v403_v1  ;;  %s226_s9 = scalar_select %p225_p11, %s14632_s18, 1  ;;  %13861 = vmatpush3.bf16.msra.mxu1 %v1132_v4  ;;  %vm352_vm1 = vcmask 64512   ;;  %vm646_vm2 = vsmask.f32 3328  ;;  %vm647_vm3 = vsmask.f32 7440 }
  0x19   : > { %14372 = vmatprep.subr.msk.bf16.mxu0 %vm401_vm0, %v11789_v3  ;;  %14373 = vmatprep.subr.msk.bf16.mxu1 %vm401_vm0, %v11870_v5  ;;  %v11935_v6 = vld [vmem:[%s18836_s1 + $0x10] sm:$0xf]  ;;  %v14766_v7 = vld [vmem:[%s18836_s1 + $0x14] sm:$0xf]  ;;  %v1558_v10 = vsel %vm401_vm0, %v11789_v3, 0  ;;  %v14774_v12 = vsel %vm401_vm0, %v11870_v5, 0  ;;  %vm14796_vm4 = vmor %vm646_vm2, %vm647_vm3 }
  0x1a   : > { %s14386_s12 = smul.u32 216, %s226_s9  ;;  %v14778_v13 = vsel %vm401_vm0, %v11935_v6, 0  ;;  %v14782_v14 = vsel %vm401_vm0, %v14766_v7, 0  ;;  %vm3729_vm5 = vcmask 1042432   ;;  %vm3730_vm6 = vcmask 1046532   ;;  %s16083_s9 = sand.u32 1, %s14624_s16  }
  0x1b   : > { %vm15159_vm7 = vmor %vm3729_vm5, %vm3730_vm6  ;;  %s11690_s10 = sshll.u32 %s16083_s9, 9  ;;  %s18846_s26 = scalar_lea.vmem [#allocation7], %s16083_s9 }
  0x1c   : > { %s14758_s24 = scalar_lea.vmem %s18835_s0, %s14386_s12  ;;  %s16154_s13 = scalar_lea.vmem [#allocation3], %s11690_s10 }
  0x1d   : > { %v14465_v8 = vld [vmem:[%s14758_s24] sm:$0xff]   ;;  %v14466_v9 = vld [vmem:[%s14758_s24 + $0xc] sm:$0xff]   ;;  %v14467_v11 = vld [vmem:[%s14758_s24 + $0x18] sm:$0xff]   ;;  %s11476_s29 = scalar_lea.sflag [#allocation4], %s16083_s9 }
  0x1e   : > { %13828 = vmatprep.mubr.msk.bf16.mxu0 %vm352_vm1, %v14465_v8  ;;  %v598_v15 = vld [vmem:[%s14758_s24] sm:$0xf]  ;;  %v599_v16 = vld [vmem:[%s14758_s24 + $0x4] sm:$0xf]  ;;  %v600_v17 = vld [vmem:[%s14758_s24 + $0x8] sm:$0x1] }
  0x1f   : > { %13829 = vmatmul.mubr.msk.bf16.vlgmr.msra.gmra.mxu0 %vm352_vm1, %v14466_v9  ;;  %v14468_v18 = vld [vmem:[%s14758_s24 + $0x24] sm:$0xff]   ;;  %v650_v19 = vshrl.u32 %v598_v15, 16  ;;  %v653_v20 = vshll.u32 %v598_v15, 16  ;;  %v659_v21 = vshll.u32 %v599_v16, 16  ;;  %v663_v22 = vshrl.u32 %v599_v16, 16  ;;  %v14469_v40 = vld [vmem:[%s14758_s24 + $0x30] sm:$0xff]  }
  0x20   : > { %13832 = vmatprep.mubr.msk.bf16.mxu0 %vm352_vm1, %v14467_v11  ;;  %13895 = vmatpush3.bf16.msra.mxu0 %v1558_v10  ;;  %v601_v23 = vld [vmem:[%s14758_s24 + $0xc] sm:$0xf]  ;;  %v669_v24 = vshll.u32 %v600_v17, 16  ;;  %v602_v25 = vld [vmem:[%s14758_s24 + $0x10] sm:$0xf]  ;;  %v14470_v58 = vld [vmem:[%s14758_s24 + $0x3c] sm:$0xff]  }
  0x21   : > { %14374 = vmatprep.subr.msk.bf16.mxu0 %vm401_vm0, %v11935_v6  ;;  %v603_v26 = vld [vmem:[%s14758_s24 + $0x14] sm:$0x1]  ;;  %v674_v27 = vshrl.u32 %v601_v23, 16  ;;  %v652_v28 = vrot.slane %v650_v19, 4  ;;  %v655_v29 = vrot.slane %v653_v20, 5  ;;  %v661_v30 = vrot.slane %v659_v21, 5 }
  0x22   : > { %v665_v31 = vrot.slane %v663_v22, 4  ;;  %v671_v32 = vrot.slane %v669_v24, 5  ;;  %v677_v34 = vshll.u32 %v601_v23, 16  ;;  %v683_v35 = vshll.u32 %v602_v25, 16  ;;  %v604_v44 = vld [vmem:[%s14758_s24 + $0x18] sm:$0xf] }
  0x23   : > { %v676_v33 = vrot.slane %v674_v27, 4  ;;  %v656_v36 = vor.u32 %v655_v29, %v652_v28  ;;  %v687_v38 = vshrl.u32 %v602_v25, 16  ;;  %v693_v39 = vshll.u32 %v603_v26, 16  ;;  %v605_v49 = vld [vmem:[%s14758_s24 + $0x1c] sm:$0xf]  ;;  %v14471_v3 = vld [vmem:[%s14758_s24 + $0x48] sm:$0xff]  }
  0x24   : > { %v666_v37 = vor.u32 %v665_v31, %v661_v30  ;;  %v679_v42 = vrot.slane %v677_v34, 5  ;;  %v685_v43 = vrot.slane %v683_v35, 5  ;;  %v606_v51 = vld [vmem:[%s14758_s24 + $0x20] sm:$0x1]  ;;  %v698_v52 = vshrl.u32 %v604_v44, 16 }
  0x25   : > { %v657_v45 = vrot.slane %v656_v36, 4  ;;  %v689_v47 = vrot.slane %v687_v38, 4  ;;  %v695_v48 = vrot.slane %v693_v39, 5  ;;  %v701_v53 = vshll.u32 %v604_v44, 16  ;;  %v607_v60 = vld [vmem:[%s14758_s24 + $0x24] sm:$0xf] }
  0x26   : > { %v667_v46 = vrot.slane %v666_v37, 4  ;;  %v680_v50 = vor.u32 %v679_v42, %v676_v33  ;;  %v707_v54 = vshll.u32 %v605_v49, 16  ;;  %v711_v59 = vshrl.u32 %v605_v49, 16  ;;  %v608_v61 = vld [vmem:[%s14758_s24 + $0x28] sm:$0xf]  ;;  %v14472_v44 = vld [vmem:[%s14758_s24 + $0x54] sm:$0xff]  }
  0x27   : > { %13833 = vmatmul.mubr.msk.bf16.gmra.mxu0 %vm352_vm1, %v14468_v18  ;;  %v662_v55 = vsel %vm14796_vm4, %v657_v45, %v661_v30  ;;  %v690_v57 = vor.u32 %v689_v47, %v685_v43  ;;  %v700_v0 = vrot.slane %v698_v52, 4  ;;  %v703_v1 = vrot.slane %v701_v53, 5  ;;  %v609_v2 = vld [vmem:[%s14758_s24 + $0x2c] sm:$0x1]  ;;  %v610_v20 = vld [vmem:[%s14758_s24 + $0x30] sm:$0xf] }
  0x28   : > { %13836 = vmatprep.mubr.msk.bf16.mxu0 %vm352_vm1, %v14469_v40  ;;  %v672_v56 = vsel %vm14796_vm4, %v667_v46, %v671_v32  ;;  %v681_v63 = vrot.slane %v680_v50, 4  ;;  %v709_v5 = vrot.slane %v707_v54, 5  ;;  %v713_v6 = vrot.slane %v711_v59, 4  ;;  %v611_v25 = vld [vmem:[%s14758_s24 + $0x34] sm:$0xf] }
  0x29   : > { %v11725_v62 = vcombine.low %v662_v55, %v672_v56  ;;  %v691_v4 = vrot.slane %v690_v57, 4  ;;  %v717_v8 = vshll.u32 %v606_v51, 16  ;;  %v704_v10 = vor.u32 %v703_v1, %v700_v0  ;;  %v612_v32 = vld [vmem:[%s14758_s24 + $0x38] sm:$0x1]  ;;  %v613_v35 = vld [vmem:[%s14758_s24 + $0x3c] sm:$0xf] }
  0x2a   : > { %v686_v9 = vsel %vm14796_vm4, %v681_v63, %v685_v43  ;;  %v722_v11 = vshrl.u32 %v607_v60, 16  ;;  %v725_v15 = vshll.u32 %v607_v60, 16  ;;  %v714_v17 = vor.u32 %v713_v6, %v709_v5  ;;  %v614_v40 = vld [vmem:[%s14758_s24 + $0x40] sm:$0xf]  ;;  %v615_v47 = vld [vmem:[%s14758_s24 + $0x44] sm:$0x1] }
  0x2b   : > { %13862 = vmatprep.mubr.msk.bf16.mxu1 %vm352_vm1, %v11725_v62  ;;  %v696_v16 = vsel %vm14796_vm4, %v691_v4, %v695_v48  ;;  %v719_v18 = vrot.slane %v717_v8, 5  ;;  %v731_v19 = vshll.u32 %v608_v61, 16  ;;  %v705_v22 = vrot.slane %v704_v10, 4  ;;  %v14473_v51 = vld [vmem:[%s14758_s24 + $0x60] sm:$0xff]   ;;  %v616_v63 = vld [vmem:[%s14758_s24 + $0x48] sm:$0xf] }
  0x2c   : > { %v11726_v21 = vcombine.low %v686_v9, %v696_v16  ;;  %v724_v23 = vrot.slane %v722_v11, 4  ;;  %v727_v24 = vrot.slane %v725_v15, 5  ;;  %v715_v26 = vrot.slane %v714_v17, 4  ;;  %v617_v4 = vld [vmem:[%s14758_s24 + $0x4c] sm:$0xf] }
  0x2d   : > { %v733_v27 = vrot.slane %v731_v19, 5  ;;  %v735_v28 = vshrl.u32 %v608_v61, 16  ;;  %v741_v29 = vshll.u32 %v609_v2, 16  ;;  %v710_v30 = vsel %vm14796_vm4, %v705_v22, %v709_v5  ;;  %v618_v10 = vld [vmem:[%s14758_s24 + $0x50] sm:$0x1] }
  0x2e   : > { %13863 = vmatmul.mubr.msk.bf16.vlgmr.msra.gmra.mxu1 %vm352_vm1, %v11726_v21  ;;  %v728_v31 = vor.u32 %v727_v24, %v724_v23  ;;  %v746_v33 = vshrl.u32 %v610_v20, 16  ;;  %v749_v34 = vshll.u32 %v610_v20, 16  ;;  %v720_v36 = vsel %vm14796_vm4, %v715_v26, %v719_v18  ;;  %v619_v11 = vld [vmem:[%s14758_s24 + $0x54] sm:$0xf]  ;;  %v620_v19 = vld [vmem:[%s14758_s24 + $0x58] sm:$0xf] }
  0x2f   : > { %13837 = vmatmul.mubr.msk.bf16.gmra.mxu0 %vm352_vm1, %v14470_v58  ;;  %13929 = vmatpush3.bf16.msra.mxu1 %v14774_v12  ;;  %v737_v37 = vrot.slane %v735_v28, 4  ;;  %v743_v38 = vrot.slane %v741_v29, 5  ;;  %v755_v39 = vshll.u32 %v611_v25, 16  ;;  %v11727_v42 = vcombine.low %v710_v30, %v720_v36 }
  0x30   : > { %13840 = vmatprep.mubr.msk.bf16.mxu0 %vm352_vm1, %v14471_v3  ;;  %v729_v43 = vrot.slane %v728_v31, 4  ;;  %v748_v45 = vrot.slane %v746_v33, 4  ;;  %v751_v46 = vrot.slane %v749_v34, 5  ;;  %14375 = vmatprep.subr.msk.bf16.mxu1 %vm401_vm0, %v14766_v7  ;;  %v759_v12 = vshrl.u32 %v611_v25, 16  ;;  %v14474_v25 = vld [vmem:[%s14758_s24 + $0x6c] sm:$0xff]   ;;  %v14475_v33 = vld [vmem:[%s14758_s24 + $0x78] sm:$0xff]  }
  0x31   : > { %v738_v48 = vor.u32 %v737_v37, %v733_v27  ;;  %v757_v49 = vrot.slane %v755_v39, 5  ;;  %v765_v50 = vshll.u32 %v612_v32, 16  ;;  %13866 = vmatprep.mubr.msk.bf16.mxu1 %vm352_vm1, %v11727_v42  ;;  %v770_v54 = vshrl.u32 %v613_v35, 16  ;;  %v621_v37 = vld [vmem:[%s14758_s24 + $0x5c] sm:$0x1] }
  0x32   : > { %v734_v52 = vsel %vm14796_vm4, %v729_v43, %v733_v27  ;;  %v752_v53 = vor.u32 %v751_v46, %v748_v45  ;;  %v773_v55 = vshll.u32 %v613_v35, 16  ;;  %v761_v57 = vrot.slane %v759_v12, 4 }
  0x33   : > { %v739_v56 = vrot.slane %v738_v48, 4  ;;  %v767_v58 = vrot.slane %v765_v50, 5  ;;  %v779_v59 = vshll.u32 %v614_v40, 16  ;;  %v772_v60 = vrot.slane %v770_v54, 4  ;;  %v625_v54 = vld [vmem:[%s14758_s24 + $0x6c] sm:$0xf] }
  0x34   : > { %v753_v7 = vrot.slane %v752_v53, 4  ;;  %v775_v61 = vrot.slane %v773_v55, 5  ;;  %v783_v62 = vshrl.u32 %v614_v40, 16  ;;  %v762_v1 = vor.u32 %v761_v57, %v757_v49  ;;  %v624_v53 = vld [vmem:[%s14758_s24 + $0x68] sm:$0x1] }
  0x35   : > { %v744_v0 = vsel %vm14796_vm4, %v739_v56, %v743_v38  ;;  %v781_v2 = vrot.slane %v779_v59, 5  ;;  %v789_v3 = vshll.u32 %v615_v47, 16  ;;  %v794_v17 = vshrl.u32 %v616_v63, 16  ;;  %v626_v59 = vld [vmem:[%s14758_s24 + $0x70] sm:$0xf] }
  0x36   : > { %v11728_v5 = vcombine.low %v734_v52, %v744_v0  ;;  %v758_v6 = vsel %vm14796_vm4, %v753_v7, %v757_v49  ;;  %v776_v8 = vor.u32 %v775_v61, %v772_v60  ;;  %v785_v9 = vrot.slane %v783_v62, 4  ;;  %v623_v49 = vld [vmem:[%s14758_s24 + $0x64] sm:$0xf] }
  0x37   : > { %13841 = vmatmul.mubr.msk.bf16.gmra.mxu0 %vm352_vm1, %v14472_v44  ;;  %v763_v15 = vrot.slane %v762_v1, 4  ;;  %v791_v16 = vrot.slane %v789_v3, 5  ;;  %v797_v18 = vshll.u32 %v616_v63, 16  ;;  %v803_v22 = vshll.u32 %v617_v4, 16  ;;  %v622_v44 = vld [vmem:[%s14758_s24 + $0x60] sm:$0xf] }
  0x38   : > { %13844 = vmatprep.mubr.msk.bf16.mxu0 %vm352_vm1, %v14473_v51  ;;  %13867 = vmatmul.mubr.msk.bf16.gmra.mxu1 %vm352_vm1, %v11728_v5  ;;  %v777_v20 = vrot.slane %v776_v8, 4  ;;  %v786_v21 = vor.u32 %v785_v9, %v781_v2  ;;  %v807_v23 = vshrl.u32 %v617_v4, 16  ;;  %v796_v26 = vrot.slane %v794_v17, 4  ;;  %v14476_v0 = vld [vmem:[%s14758_s24 + $0x84] sm:$0xff]   ;;  %v14477_v9 = vld [vmem:[%s14758_s24 + $0x90] sm:$0xff]  }
  0x39   : > { %v768_v24 = vsel %vm14796_vm4, %v763_v15, %v767_v58  ;;  %v799_v27 = vrot.slane %v797_v18, 5  ;;  %v813_v28 = vshll.u32 %v618_v10, 16  ;;  %v805_v32 = vrot.slane %v803_v22, 5  ;;  %v628_v22 = vld [vmem:[%s14758_s24 + $0x78] sm:$0xf] }
  0x3a   : > { %v11729_v29 = vcombine.low %v758_v6, %v768_v24  ;;  %v782_v30 = vsel %vm14796_vm4, %v777_v20, %v781_v2  ;;  %v787_v31 = vrot.slane %v786_v21, 4  ;;  %v809_v35 = vrot.slane %v807_v23, 4 }
  0x3b   : > { %v800_v34 = vor.u32 %v799_v27, %v796_v26  ;;  %v815_v36 = vrot.slane %v813_v28, 5  ;;  %v818_v38 = vshrl.u32 %v619_v11, 16  ;;  %v821_v40 = vshll.u32 %v619_v11, 16  ;;  %v629_v27 = vld [vmem:[%s14758_s24 + $0x7c] sm:$0xf] }
  0x3c   : > { %13870 = vmatprep.mubr.msk.bf16.mxu1 %vm352_vm1, %v11729_v29  ;;  %v792_v39 = vsel %vm14796_vm4, %v787_v31, %v791_v16  ;;  %v827_v42 = vshll.u32 %v620_v19, 16  ;;  %v831_v43 = vshrl.u32 %v620_v19, 16  ;;  %v810_v47 = vor.u32 %v809_v35, %v805_v32  ;;  %v627_v19 = vld [vmem:[%s14758_s24 + $0x74] sm:$0x1] }
  0x3d   : > { %v11730_v45 = vcombine.low %v782_v30, %v792_v39  ;;  %v801_v46 = vrot.slane %v800_v34, 4  ;;  %v820_v48 = vrot.slane %v818_v38, 4  ;;  %v823_v12 = vrot.slane %v821_v40, 5 }
  0x3e   : > { %v829_v50 = vrot.slane %v827_v42, 5  ;;  %v833_v51 = vrot.slane %v831_v43, 4  ;;  %v837_v52 = vshll.u32 %v621_v37, 16  ;;  %v811_v56 = vrot.slane %v810_v47, 4 }
  0x3f   : > { %13845 = vmatmul.mubr.msk.bf16.gmra.mxu0 %vm352_vm1, %v14474_v25  ;;  %v806_v55 = vsel %vm14796_vm4, %v801_v46, %v805_v32  ;;  %v842_v57 = vshrl.u32 %v622_v44, 16  ;;  %v845_v58 = vshll.u32 %v622_v44, 16  ;;  %v824_v7 = vor.u32 %v823_v12, %v820_v48  ;;  %v630_v32 = vld [vmem:[%s14758_s24 + $0x80] sm:$0x1] }
  0x40   : > { %13848 = vmatprep.mubr.msk.bf16.mxu0 %vm352_vm1, %v14475_v33  ;;  %13871 = vmatmul.mubr.msk.bf16.gmra.mxu1 %vm352_vm1, %v11730_v45  ;;  %v834_v60 = vor.u32 %v833_v51, %v829_v50  ;;  %v839_v61 = vrot.slane %v837_v52, 5  ;;  %v851_v62 = vshll.u32 %v623_v49, 16  ;;  %v816_v63 = vsel %vm14796_vm4, %v811_v56, %v815_v36  ;;  %v631_v33 = vld [vmem:[%s14758_s24 + $0x84] sm:$0xf]  ;;  %v14478_v45 = vld [vmem:[%s14758_s24 + $0x9c] sm:$0xff]   ;;  %v14479_v52 = vld [vmem:[%s14758_s24 + $0xa8] sm:$0xff]  }
  0x41   : > { %v844_v1 = vrot.slane %v842_v57, 4  ;;  %v847_v2 = vrot.slane %v845_v58, 5  ;;  %v855_v3 = vshrl.u32 %v623_v49, 16  ;;  %v11731_v4 = vcombine.low %v806_v55, %v816_v63  ;;  %v632_v51 = vld [vmem:[%s14758_s24 + $0x88] sm:$0xf] }
  0x42   : > { %v825_v5 = vrot.slane %v824_v7, 4  ;;  %v835_v6 = vrot.slane %v834_v60, 4  ;;  %v853_v8 = vrot.slane %v851_v62, 5  ;;  %v861_v15 = vshll.u32 %v624_v53, 16  ;;  %v633_v7 = vld [vmem:[%s14758_s24 + $0x8c] sm:$0x1] }
  0x43   : > { %v848_v10 = vor.u32 %v847_v2, %v844_v1  ;;  %v857_v11 = vrot.slane %v855_v3, 4  ;;  %v866_v16 = vshrl.u32 %v625_v54, 16  ;;  %13874 = vmatprep.mubr.msk.bf16.mxu1 %vm352_vm1, %v11731_v4  ;;  %v869_v20 = vshll.u32 %v625_v54, 16  ;;  %v635_v2 = vld [vmem:[%s14758_s24 + $0x94] sm:$0xf] }
  0x44   : > { %v830_v17 = vsel %vm14796_vm4, %v825_v5, %v829_v50  ;;  %v840_v18 = vsel %vm14796_vm4, %v835_v6, %v839_v61  ;;  %v875_v21 = vshll.u32 %v626_v59, 16  ;;  %v863_v26 = vrot.slane %v861_v15, 5  ;;  %v634_v61 = vld [vmem:[%s14758_s24 + $0x90] sm:$0xf]  ;;  %v14480_v15 = vld [vmem:[%s14758_s24 + $0xb4] sm:$0xff]  }
  0x45   : > { %v11732_v23 = vcombine.low %v830_v17, %v840_v18  ;;  %v849_v24 = vrot.slane %v848_v10, 4  ;;  %v858_v25 = vor.u32 %v857_v11, %v853_v8  ;;  %v868_v28 = vrot.slane %v866_v16, 4 }
  0x46   : > { %v871_v29 = vrot.slane %v869_v20, 5  ;;  %v877_v30 = vrot.slane %v875_v21, 5  ;;  %v879_v31 = vshrl.u32 %v626_v59, 16  ;;  %v885_v36 = vshll.u32 %v627_v19, 16  ;;  %v636_v19 = vld [vmem:[%s14758_s24 + $0x98] sm:$0x1] }
  0x47   : > { %13849 = vmatmul.mubr.msk.bf16.gmra.mxu0 %vm352_vm1, %v14476_v0  ;;  %v854_v34 = vsel %vm14796_vm4, %v849_v24, %v853_v8  ;;  %v859_v35 = vrot.slane %v858_v25, 4  ;;  %v890_v37 = vshrl.u32 %v628_v22, 16  ;;  %v893_v40 = vshll.u32 %v628_v22, 16  ;;  %v637_v21 = vld [vmem:[%s14758_s24 + $0x9c] sm:$0xf] }
  0x48   : > { %13852 = vmatprep.mubr.msk.bf16.mxu0 %vm352_vm1, %v14477_v9  ;;  %13875 = vmatmul.mubr.msk.bf16.gmra.mxu1 %vm352_vm1, %v11732_v23  ;;  %v872_v38 = vor.u32 %v871_v29, %v868_v28  ;;  %v881_v39 = vrot.slane %v879_v31, 4  ;;  %v899_v42 = vshll.u32 %v629_v27, 16  ;;  %v887_v44 = vrot.slane %v885_v36, 5  ;;  %v639_v36 = vld [vmem:[%s14758_s24 + $0xa4] sm:$0x1] }
  0x49   : > { %v864_v43 = vsel %vm14796_vm4, %v859_v35, %v863_v26  ;;  %v892_v46 = vrot.slane %v890_v37, 4  ;;  %v903_v47 = vshrl.u32 %v629_v27, 16  ;;  %v895_v50 = vrot.slane %v893_v40, 5  ;;  %v638_v26 = vld [vmem:[%s14758_s24 + $0xa0] sm:$0xf]  ;;  %v14481_v27 = vld [vmem:[%s14758_s24 + $0xc] sm:$0xff]  }
  0x4a   : > { %v11733_v48 = vcombine.low %v854_v34, %v864_v43  ;;  %v873_v49 = vrot.slane %v872_v38, 4  ;;  %v882_v12 = vor.u32 %v881_v39, %v877_v30  ;;  %v901_v53 = vrot.slane %v899_v42, 5  ;;  %v640_v42 = vld [vmem:[%s14758_s24 + $0xa8] sm:$0xf] }
  0x4b   : > { %v905_v54 = vrot.slane %v903_v47, 4  ;;  %v909_v55 = vshll.u32 %v630_v32, 16  ;;  %v914_v56 = vshrl.u32 %v631_v33, 16  ;;  %v896_v59 = vor.u32 %v895_v50, %v892_v46  ;;  %v641_v47 = vld [vmem:[%s14758_s24 + $0xac] sm:$0xf] }
  0x4c   : > { %13878 = vmatprep.mubr.msk.bf16.mxu1 %vm352_vm1, %v11733_v48  ;;  %v878_v57 = vsel %vm14796_vm4, %v873_v49, %v877_v30  ;;  %v883_v58 = vrot.slane %v882_v12, 4  ;;  %v917_v60 = vshll.u32 %v631_v33, 16  ;;  %v923_v1 = vshll.u32 %v632_v51, 16 }
  0x4d   : > { %v906_v62 = vor.u32 %v905_v54, %v901_v53  ;;  %v911_v63 = vrot.slane %v909_v55, 5  ;;  %v916_v0 = vrot.slane %v914_v56, 4  ;;  %v897_v4 = vrot.slane %v896_v59, 4 }
  0x4e   : > { %v888_v3 = vsel %vm14796_vm4, %v883_v58, %v887_v44  ;;  %v919_v5 = vrot.slane %v917_v60, 5  ;;  %v927_v6 = vshrl.u32 %v632_v51, 16  ;;  %v925_v10 = vrot.slane %v923_v1, 5  ;;  %v642_v60 = vld [vmem:[%s14758_s24 + $0xb0] sm:$0x1] }
  0x4f   : > { %13853 = vmatmul.mubr.msk.bf16.gmra.mxu0 %vm352_vm1, %v14478_v45  ;;  %v11734_v8 = vcombine.low %v878_v57, %v888_v3  ;;  %v907_v9 = vrot.slane %v906_v62, 4  ;;  %v933_v11 = vshll.u32 %v633_v7, 16  ;;  %v902_v16 = vsel %vm14796_vm4, %v897_v4, %v901_v53  ;;  %v643_v4 = vld [vmem:[%s14758_s24 + $0xb4] sm:$0xf] }
  0x50   : > { %13856 = vmatprep.mubr.msk.bf16.mxu0 %vm352_vm1, %v14479_v52  ;;  %v920_v17 = vor.u32 %v919_v5, %v916_v0  ;;  %v929_v18 = vrot.slane %v927_v6, 4  ;;  %v938_v20 = vshrl.u32 %v634_v61, 16  ;;  %v941_v24 = vshll.u32 %v634_v61, 16  ;;  %v14483_v5 = vld [vmem:[%s14758_s24 + $0x24] sm:$0xff]  }
  0x51   : > { %13879 = vmatmul.mubr.msk.bf16.gmra.mxu1 %vm352_vm1, %v11734_v8  ;;  %v912_v22 = vsel %vm14796_vm4, %v907_v9, %v911_v63  ;;  %v935_v23 = vrot.slane %v933_v11, 5  ;;  %v947_v25 = vshll.u32 %v635_v2, 16  ;;  %v951_v34 = vshrl.u32 %v635_v2, 16  ;;  %v14482_v63 = vld [vmem:[%s14758_s24 + $0x18] sm:$0xff]  }
  0x52   : > { %v11735_v28 = vcombine.low %v902_v16, %v912_v22  ;;  %v921_v29 = vrot.slane %v920_v17, 4  ;;  %v930_v30 = vor.u32 %v929_v18, %v925_v10  ;;  %v940_v31 = vrot.slane %v938_v20, 4  ;;  %v644_v11 = vld [vmem:[%s14758_s24 + $0xb8] sm:$0xf]  ;;  %v11822_v20 = vld [vmem:[%s14758_s24 + $0xc] sm:$0xf] }
  0x53   : > { %v943_v32 = vrot.slane %v941_v24, 5  ;;  %v949_v33 = vrot.slane %v947_v25, 5  ;;  %v957_v35 = vshll.u32 %v636_v19, 16  ;;  %v962_v39 = vshrl.u32 %v637_v21, 16  ;;  %v645_v19 = vld [vmem:[%s14758_s24 + $0xbc] sm:$0x1] }
  0x54   : > { %13882 = vmatprep.mubr.msk.bf16.mxu1 %vm352_vm1, %v11735_v28  ;;  %v926_v37 = vsel %vm14796_vm4, %v921_v29, %v925_v10  ;;  %v931_v38 = vrot.slane %v930_v30, 4  ;;  %v965_v40 = vshll.u32 %v637_v21, 16  ;;  %v953_v44 = vrot.slane %v951_v34, 4  ;;  %v11823_v25 = vld [vmem:[%s14758_s24 + $0x10] sm:$0xf] }
  0x55   : > { %v944_v43 = vor.u32 %v943_v32, %v940_v31  ;;  %v959_v45 = vrot.slane %v957_v35, 5  ;;  %v971_v46 = vshll.u32 %v638_v26, 16  ;;  %v964_v49 = vrot.slane %v962_v39, 4 }
  0x56   : > { %v936_v48 = vsel %vm14796_vm4, %v931_v38, %v935_v23  ;;  %v967_v12 = vrot.slane %v965_v40, 5  ;;  %v975_v50 = vshrl.u32 %v638_v26, 16  ;;  %v954_v53 = vor.u32 %v953_v44, %v949_v33  ;;  %v14484_v40 = vld [vmem:[%s14758_s24 + $0x30] sm:$0xff]   ;;  %v14485_v44 = vld [vmem:[%s14758_s24 + $0x3c] sm:$0xff]  }
  0x57   : > { %13857 = vmatmul.mubr.msk.bf16.gmra.mxu0 %vm352_vm1, %v14480_v15  ;;  %v11736_v51 = vcombine.low %v926_v37, %v936_v48  ;;  %v945_v52 = vrot.slane %v944_v43, 4  ;;  %v973_v54 = vrot.slane %v971_v46, 5  ;;  %v981_v57 = vshll.u32 %v639_v36, 16 }
  0x58   : > { %13896 = vmatprep.mubr.msk.bf16.mxu0 %vm352_vm1, %v14481_v27  ;;  %v968_v55 = vor.u32 %v967_v12, %v964_v49  ;;  %v977_v56 = vrot.slane %v975_v50, 4  ;;  %v986_v58 = vshrl.u32 %v640_v42, 16  ;;  %v955_v7 = vrot.slane %v954_v53, 4  ;;  %v11825_v49 = vld [vmem:[%s14758_s24 + $0x18] sm:$0xf] }
  0x59   : > { %13883 = vmatmul.mubr.msk.bf16.gmra.mxu1 %vm352_vm1, %v11736_v51  ;;  %v950_v59 = vsel %vm14796_vm4, %v945_v52, %v949_v33  ;;  %v989_v61 = vshll.u32 %v640_v42, 16  ;;  %v995_v62 = vshll.u32 %v641_v47, 16  ;;  %v983_v2 = vrot.slane %v981_v57, 5  ;;  %v11826_v53 = vld [vmem:[%s14758_s24 + $0x1c] sm:$0xf] }
  0x5a   : > { %v969_v0 = vrot.slane %v968_v55, 4  ;;  %v978_v1 = vor.u32 %v977_v56, %v973_v54  ;;  %v988_v3 = vrot.slane %v986_v58, 4  ;;  %v960_v6 = vsel %vm14796_vm4, %v955_v7, %v959_v45  ;;  %v11827_v58 = vld [vmem:[%s14758_s24 + $0x20] sm:$0x1] }
  0x5b   : > { %v991_v8 = vrot.slane %v989_v61, 5  ;;  %v997_v9 = vrot.slane %v995_v62, 5  ;;  %v999_v10 = vshrl.u32 %v641_v47, 16  ;;  %v11737_v15 = vcombine.low %v950_v59, %v960_v6  ;;  %v11824_v47 = vld [vmem:[%s14758_s24 + $0x14] sm:$0x1] }
  0x5c   : > { %v974_v16 = vsel %vm14796_vm4, %v969_v0, %v973_v54  ;;  %v979_v17 = vrot.slane %v978_v1, 4  ;;  %v1005_v18 = vshll.u32 %v642_v60, 16  ;;  %v1010_v23 = vshrl.u32 %v643_v4, 16  ;;  %v11828_v59 = vld [vmem:[%s14758_s24 + $0x24] sm:$0xf] }
  0x5d   : > { %v992_v21 = vor.u32 %v991_v8, %v988_v3  ;;  %v1001_v22 = vrot.slane %v999_v10, 4  ;;  %v1013_v24 = vshll.u32 %v643_v4, 16  ;;  %13886 = vmatprep.mubr.msk.bf16.mxu1 %vm352_vm1, %v11737_v15  ;;  %v1019_v28 = vshll.u32 %v644_v11, 16 }
  0x5e   : > { %v984_v26 = vsel %vm14796_vm4, %v979_v17, %v983_v2  ;;  %v1007_v27 = vrot.slane %v1005_v18, 5  ;;  %v1023_v29 = vshrl.u32 %v644_v11, 16  ;;  %v1012_v33 = vrot.slane %v1010_v23, 4 }
  0x5f   : > { %13897 = vmatmul.mubr.msk.bf16.vlgmr.msra.gmra.mxu0 %vm352_vm1, %v14482_v63  ;;  %v11738_v30 = vcombine.low %v974_v16, %v984_v26  ;;  %v993_v31 = vrot.slane %v992_v21, 4  ;;  %v1002_v32 = vor.u32 %v1001_v22, %v997_v9  ;;  %v1015_v34 = vrot.slane %v1013_v24, 5  ;;  %v11829_v63 = vld [vmem:[%s14758_s24 + $0x28] sm:$0xf]  ;;  %v11831_v26 = vld [vmem:[%s14758_s24 + $0x30] sm:$0xf] }
  0x60   : > { %13900 = vmatprep.mubr.msk.bf16.mxu0 %vm352_vm1, %v14483_v5  ;;  %13963 = vmatpush3.bf16.msra.mxu0 %v14778_v13  ;;  %v1021_v35 = vrot.slane %v1019_v28, 5  ;;  %v1025_v36 = vrot.slane %v1023_v29, 4  ;;  %v1029_v37 = vshll.u32 %v645_v19, 16  ;;  %v1866_v42 = vshrl.u32 %v11822_v20, 16  ;;  %v14486_v19 = vld [vmem:[%s14758_s24 + $0x48] sm:$0xff]  }
  0x61   : > { %13887 = vmatmul.mubr.msk.bf16.gmra.mxu1 %vm352_vm1, %v11738_v30  ;;  %v998_v38 = vsel %vm14796_vm4, %v993_v31, %v997_v9  ;;  %v1003_v39 = vrot.slane %v1002_v32, 4  ;;  %v1869_v43 = vshll.u32 %v11822_v20, 16  ;;  %v1016_v45 = vor.u32 %v1015_v34, %v1012_v33  ;;  %v11830_v20 = vld [vmem:[%s14758_s24 + $0x2c] sm:$0x1] }
  0x62   : > { %v1026_v13 = vor.u32 %v1025_v36, %v1021_v35  ;;  %v1031_v46 = vrot.slane %v1029_v37, 5  ;;  %v1875_v48 = vshll.u32 %v11823_v25, 16  ;;  %v1868_v50 = vrot.slane %v1866_v42, 4  ;;  %v11832_v36 = vld [vmem:[%s14758_s24 + $0x34] sm:$0xf] }
  0x63   : > { %v1008_v12 = vsel %vm14796_vm4, %v1003_v39, %v1007_v27  ;;  %v1871_v51 = vrot.slane %v1869_v43, 5  ;;  %v1879_v52 = vshrl.u32 %v11823_v25, 16  ;;  %v1017_v55 = vrot.slane %v1016_v45, 4  ;;  %v14487_v27 = vld [vmem:[%s14758_s24 + $0x54] sm:$0xff]   ;;  %v11834_v43 = vld [vmem:[%s14758_s24 + $0x3c] sm:$0xf] }
  0x64   : > { %v11739_v54 = vcombine.low %v998_v38, %v1008_v12  ;;  %v1027_v56 = vrot.slane %v1026_v13, 4  ;;  %v1877_v57 = vrot.slane %v1875_v48, 5  ;;  %v1885_v61 = vshll.u32 %v11824_v47, 16  ;;  %v11833_v37 = vld [vmem:[%s14758_s24 + $0x38] sm:$0x1] }
  0x65   : > { %v1872_v7 = vor.u32 %v1871_v51, %v1868_v50  ;;  %v1881_v60 = vrot.slane %v1879_v52, 4  ;;  %v1890_v62 = vshrl.u32 %v11825_v49, 16  ;;  %v1022_v0 = vsel %vm14796_vm4, %v1017_v55, %v1021_v35 }
  0x66   : > { %13890 = vmatprep.mubr.msk.bf16.mxu1 %vm352_vm1, %v11739_v54  ;;  %v1032_v1 = vsel %vm14796_vm4, %v1027_v56, %v1031_v46  ;;  %v1893_v2 = vshll.u32 %v11825_v49, 16  ;;  %v1899_v3 = vshll.u32 %v11826_v53, 16  ;;  %v1887_v8 = vrot.slane %v1885_v61, 5  ;;  %v11835_v54 = vld [vmem:[%s14758_s24 + $0x40] sm:$0xf] }
  0x67   : > { %13901 = vmatmul.mubr.msk.bf16.gmra.mxu0 %vm352_vm1, %v14484_v40  ;;  %v11740_v4 = vcombine.low %v1022_v0, %v1032_v1  ;;  %v1873_v5 = vrot.slane %v1872_v7, 4  ;;  %v1882_v6 = vor.u32 %v1881_v60, %v1877_v57  ;;  %v1892_v9 = vrot.slane %v1890_v62, 4  ;;  %v11836_v62 = vld [vmem:[%s14758_s24 + $0x44] sm:$0x1]  ;;  %v14489_v0 = vld [vmem:[%s14758_s24 + $0x6c] sm:$0xff]  }
  0x68   : > { %13904 = vmatprep.mubr.msk.bf16.mxu0 %vm352_vm1, %v14485_v44  ;;  %v1895_v10 = vrot.slane %v1893_v2, 5  ;;  %v1901_v11 = vrot.slane %v1899_v3, 5  ;;  %v1903_v15 = vshrl.u32 %v11826_v53, 16  ;;  %v1909_v18 = vshll.u32 %v11827_v58, 16 }
  0x69   : > { %13891 = vmatmul.mubr.msk.bf16.gmra.mxu1 %vm352_vm1, %v11740_v4  ;;  %v1878_v16 = vsel %vm14796_vm4, %v1873_v5, %v1877_v57  ;;  %v1883_v17 = vrot.slane %v1882_v6, 4  ;;  %v1914_v21 = vshrl.u32 %v11828_v59, 16  ;;  %v1917_v24 = vshll.u32 %v11828_v59, 16  ;;  %v14488_v59 = vld [vmem:[%s14758_s24 + $0x60] sm:$0xff]   ;;  %v11837_v5 = vld [vmem:[%s14758_s24 + $0x48] sm:$0xf] }
  0x6a   : > { %v1896_v22 = vor.u32 %v1895_v10, %v1892_v9  ;;  %v1905_v23 = vrot.slane %v1903_v15, 4  ;;  %v1923_v25 = vshll.u32 %v11829_v63, 16  ;;  %v1911_v29 = vrot.slane %v1909_v18, 5 }
  0x6b   : > { %v1888_v28 = vsel %vm14796_vm4, %v1883_v17, %v1887_v8  ;;  %v1916_v30 = vrot.slane %v1914_v21, 4  ;;  %v1927_v31 = vshrl.u32 %v11829_v63, 16  ;;  %v1919_v35 = vrot.slane %v1917_v24, 5 }
  0x6c   : > { %v11871_v32 = vcombine.low %v1878_v16, %v1888_v28  ;;  %v1897_v33 = vrot.slane %v1896_v22, 4  ;;  %v1906_v34 = vor.u32 %v1905_v23, %v1901_v11  ;;  %v1925_v38 = vrot.slane %v1923_v25, 5 }
  0x6d   : > { %v1929_v39 = vrot.slane %v1927_v31, 4  ;;  %v1933_v40 = vshll.u32 %v11830_v20, 16  ;;  %v1938_v42 = vshrl.u32 %v11831_v26, 16  ;;  %v1920_v13 = vor.u32 %v1919_v35, %v1916_v30  ;;  %v11840_v20 = vld [vmem:[%s14758_s24 + $0x54] sm:$0xf] }
  0x6e   : > { %13930 = vmatprep.mubr.msk.bf16.mxu1 %vm352_vm1, %v11871_v32  ;;  %v1902_v44 = vsel %vm14796_vm4, %v1897_v33, %v1901_v11  ;;  %v1907_v45 = vrot.slane %v1906_v34, 4  ;;  %v1941_v46 = vshll.u32 %v11831_v26, 16  ;;  %v1947_v12 = vshll.u32 %v11832_v36, 16  ;;  %v11838_v11 = vld [vmem:[%s14758_s24 + $0x4c] sm:$0xf] }
  0x6f   : > { %13905 = vmatmul.mubr.msk.bf16.gmra.mxu0 %vm352_vm1, %v14486_v19  ;;  %v1930_v47 = vor.u32 %v1929_v39, %v1925_v38  ;;  %v1935_v48 = vrot.slane %v1933_v40, 5  ;;  %v1940_v49 = vrot.slane %v1938_v42, 4  ;;  %v1921_v51 = vrot.slane %v1920_v13, 4  ;;  %v11839_v19 = vld [vmem:[%s14758_s24 + $0x50] sm:$0x1] }
  0x70   : > { %13908 = vmatprep.mubr.msk.bf16.mxu0 %vm352_vm1, %v14487_v27  ;;  %v1912_v50 = vsel %vm14796_vm4, %v1907_v45, %v1911_v29  ;;  %v1943_v52 = vrot.slane %v1941_v46, 5  ;;  %v1951_v53 = vshrl.u32 %v11832_v36, 16  ;;  %v1949_v57 = vrot.slane %v1947_v12, 5  ;;  %v11841_v32 = vld [vmem:[%s14758_s24 + $0x58] sm:$0xf] }
  0x71   : > { %v11872_v55 = vcombine.low %v1902_v44, %v1912_v50  ;;  %v1931_v56 = vrot.slane %v1930_v47, 4  ;;  %v1957_v58 = vshll.u32 %v11833_v37, 16  ;;  %v1926_v7 = vsel %vm14796_vm4, %v1921_v51, %v1925_v38  ;;  %v14490_v37 = vld [vmem:[%s14758_s24 + $0x78] sm:$0xff]   ;;  %v14491_v44 = vld [vmem:[%s14758_s24 + $0x84] sm:$0xff]  }
  0x72   : > { %v1944_v60 = vor.u32 %v1943_v52, %v1940_v49  ;;  %v1953_v61 = vrot.slane %v1951_v53, 4  ;;  %v1962_v63 = vshrl.u32 %v11834_v43, 16  ;;  %v1965_v3 = vshll.u32 %v11834_v43, 16  ;;  %v11842_v42 = vld [vmem:[%s14758_s24 + $0x5c] sm:$0x1] }
  0x73   : > { %13931 = vmatmul.mubr.msk.bf16.vlgmr.msra.gmra.mxu1 %vm352_vm1, %v11872_v55  ;;  %v1936_v1 = vsel %vm14796_vm4, %v1931_v56, %v1935_v48  ;;  %v1959_v2 = vrot.slane %v1957_v58, 5  ;;  %v1971_v4 = vshll.u32 %v11835_v54, 16  ;;  %v1975_v17 = vshrl.u32 %v11835_v54, 16  ;;  %v11843_v48 = vld [vmem:[%s14758_s24 + $0x60] sm:$0xf] }
  0x74   : > { %13997 = vmatpush3.bf16.msra.mxu1 %v14782_v14  ;;  %v11873_v6 = vcombine.low %v1926_v7, %v1936_v1  ;;  %v1945_v8 = vrot.slane %v1944_v60, 4  ;;  %v1954_v9 = vor.u32 %v1953_v61, %v1949_v57  ;;  %v1964_v10 = vrot.slane %v1962_v63, 4  ;;  %v11844_v52 = vld [vmem:[%s14758_s24 + $0x64] sm:$0xf] }
  0x75   : > { %v1967_v15 = vrot.slane %v1965_v3, 5  ;;  %v1973_v16 = vrot.slane %v1971_v4, 5  ;;  %v1981_v18 = vshll.u32 %v11836_v62, 16  ;;  %v1986_v22 = vshrl.u32 %v11837_v5, 16 }
  0x76   : > { %13934 = vmatprep.mubr.msk.bf16.mxu1 %vm352_vm1, %v11873_v6  ;;  %v1950_v21 = vsel %vm14796_vm4, %v1945_v8, %v1949_v57  ;;  %v1955_v14 = vrot.slane %v1954_v9, 4  ;;  %v1989_v23 = vshll.u32 %v11837_v5, 16  ;;  %v1977_v25 = vrot.slane %v1975_v17, 4  ;;  %v11845_v57 = vld [vmem:[%s14758_s24 + $0x68] sm:$0x1] }
  0x77   : > { %13909 = vmatmul.mubr.msk.bf16.gmra.mxu0 %vm352_vm1, %v14488_v59  ;;  %v1968_v24 = vor.u32 %v1967_v15, %v1964_v10  ;;  %v1983_v26 = vrot.slane %v1981_v18, 5  ;;  %v1995_v27 = vshll.u32 %v11838_v11, 16  ;;  %v1988_v29 = vrot.slane %v1986_v22, 4  ;;  %v11846_v5 = vld [vmem:[%s14758_s24 + $0x6c] sm:$0xf] }
  0x78   : > { %13912 = vmatprep.mubr.msk.bf16.mxu0 %vm352_vm1, %v14489_v0  ;;  %v1960_v28 = vsel %vm14796_vm4, %v1955_v14, %v1959_v2  ;;  %v1991_v30 = vrot.slane %v1989_v23, 5  ;;  %v1999_v31 = vshrl.u32 %v11838_v11, 16  ;;  %v1978_v35 = vor.u32 %v1977_v25, %v1973_v16  ;;  %v14492_v11 = vld [vmem:[%s14758_s24 + $0x90] sm:$0xff]   ;;  %v11849_v25 = vld [vmem:[%s14758_s24 + $0x78] sm:$0xf] }
  0x79   : > { %v11874_v33 = vcombine.low %v1950_v21, %v1960_v28  ;;  %v1969_v34 = vrot.slane %v1968_v24, 4  ;;  %v1997_v36 = vrot.slane %v1995_v27, 5  ;;  %v2005_v40 = vshll.u32 %v11839_v19, 16  ;;  %v11847_v15 = vld [vmem:[%s14758_s24 + $0x70] sm:$0xf] }
  0x7a   : > { %v1992_v38 = vor.u32 %v1991_v30, %v1988_v29  ;;  %v2001_v39 = vrot.slane %v1999_v31, 4  ;;  %v2010_v43 = vshrl.u32 %v11840_v20, 16  ;;  %v1979_v13 = vrot.slane %v1978_v35, 4  ;;  %v11848_v21 = vld [vmem:[%s14758_s24 + $0x74] sm:$0x1] }
  0x7b   : > { %13935 = vmatmul.mubr.msk.bf16.gmra.mxu1 %vm352_vm1, %v11874_v33  ;;  %v1974_v45 = vsel %vm14796_vm4, %v1969_v34, %v1973_v16  ;;  %v2013_v46 = vshll.u32 %v11840_v20, 16  ;;  %v2019_v47 = vshll.u32 %v11841_v32, 16  ;;  %v2007_v50 = vrot.slane %v2005_v40, 5  ;;  %v14493_v16 = vld [vmem:[%s14758_s24 + $0x9c] sm:$0xff]  }
  0x7c   : > { %v1993_v49 = vrot.slane %v1992_v38, 4  ;;  %v2002_v12 = vor.u32 %v2001_v39, %v1997_v36  ;;  %v2012_v51 = vrot.slane %v2010_v43, 4  ;;  %v1984_v53 = vsel %vm14796_vm4, %v1979_v13, %v1983_v26  ;;  %v11850_v30 = vld [vmem:[%s14758_s24 + $0x7c] sm:$0xf]  ;;  %v11851_v13 = vld [vmem:[%s14758_s24 + $0x80] sm:$0x1] }
  0x7d   : > { %v2015_v54 = vrot.slane %v2013_v46, 5  ;;  %v2021_v55 = vrot.slane %v2019_v47, 5  ;;  %v2023_v56 = vshrl.u32 %v11841_v32, 16  ;;  %v11875_v58 = vcombine.low %v1974_v45, %v1984_v53  ;;  %v11853_v53 = vld [vmem:[%s14758_s24 + $0x88] sm:$0xf] }
  0x7e   : > { %v1998_v59 = vsel %vm14796_vm4, %v1993_v49, %v1997_v36  ;;  %v2003_v7 = vrot.slane %v2002_v12, 4  ;;  %v2029_v60 = vshll.u32 %v11842_v42, 16  ;;  %v2034_v63 = vshrl.u32 %v11843_v48, 16 }
  0x7f   : > { %13913 = vmatmul.mubr.msk.bf16.gmra.mxu0 %vm352_vm1, %v14490_v37  ;;  %v2016_v61 = vor.u32 %v2015_v54, %v2012_v51  ;;  %v2025_v62 = vrot.slane %v2023_v56, 4  ;;  %v2037_v0 = vshll.u32 %v11843_v48, 16  ;;  %13938 = vmatprep.mubr.msk.bf16.mxu1 %vm352_vm1, %v11875_v58  ;;  %v2043_v3 = vshll.u32 %v11844_v52, 16  ;;  %v11852_v48 = vld [vmem:[%s14758_s24 + $0x84] sm:$0xf]  ;;  %v14495_v58 = vld [vmem:[%s14758_s24 + $0xb4] sm:$0xff]  }
  0x80   : > { %13916 = vmatprep.mubr.msk.bf16.mxu0 %vm352_vm1, %v14491_v44  ;;  %v2008_v1 = vsel %vm14796_vm4, %v2003_v7, %v2007_v50  ;;  %v2031_v2 = vrot.slane %v2029_v60, 5  ;;  %v2047_v4 = vshrl.u32 %v11844_v52, 16  ;;  %v2036_v10 = vrot.slane %v2034_v63, 4  ;;  %v14494_v52 = vld [vmem:[%s14758_s24 + $0xa8] sm:$0xff]  }
  0x81   : > { %v11876_v6 = vcombine.low %v1998_v59, %v2008_v1  ;;  %v2017_v8 = vrot.slane %v2016_v61, 4  ;;  %v2026_v9 = vor.u32 %v2025_v62, %v2021_v55  ;;  %v2039_v17 = vrot.slane %v2037_v0, 5  ;;  %v11854_v61 = vld [vmem:[%s14758_s24 + $0x8c] sm:$0x1] }
  0x82   : > { %v2045_v18 = vrot.slane %v2043_v3, 5  ;;  %v2049_v19 = vrot.slane %v2047_v4, 4  ;;  %v2053_v20 = vshll.u32 %v11845_v57, 16  ;;  %v2058_v23 = vshrl.u32 %v11846_v5, 16  ;;  %v11855_v3 = vld [vmem:[%s14758_s24 + $0x90] sm:$0xf] }
  0x83   : > { %13939 = vmatmul.mubr.msk.bf16.gmra.mxu1 %vm352_vm1, %v11876_v6  ;;  %v2022_v14 = vsel %vm14796_vm4, %v2017_v8, %v2021_v55  ;;  %v2027_v22 = vrot.slane %v2026_v9, 4  ;;  %v2061_v24 = vshll.u32 %v11846_v5, 16  ;;  %v2040_v26 = vor.u32 %v2039_v17, %v2036_v10 }
  0x84   : > { %v2050_v27 = vor.u32 %v2049_v19, %v2045_v18  ;;  %v2055_v28 = vrot.slane %v2053_v20, 5  ;;  %v2067_v29 = vshll.u32 %v11847_v15, 16  ;;  %v2060_v32 = vrot.slane %v2058_v23, 4  ;;  %v11857_v23 = vld [vmem:[%s14758_s24 + $0x98] sm:$0x1] }
  0x85   : > { %v2032_v31 = vsel %vm14796_vm4, %v2027_v22, %v2031_v2  ;;  %v2063_v33 = vrot.slane %v2061_v24, 5  ;;  %v2071_v34 = vshrl.u32 %v11847_v15, 16  ;;  %v2041_v36 = vrot.slane %v2040_v26, 4 }
  0x86   : > { %v11877_v35 = vcombine.low %v2022_v14, %v2032_v31  ;;  %v2051_v37 = vrot.slane %v2050_v27, 4  ;;  %v2069_v38 = vrot.slane %v2067_v29, 5  ;;  %v2077_v42 = vshll.u32 %v11848_v21, 16  ;;  %v14496_v29 = vld [vmem:[%s14758_s24 + $0xc0] sm:$0xff]  }
  0x87   : > { %13917 = vmatmul.mubr.msk.bf16.gmra.mxu0 %vm352_vm1, %v14492_v11  ;;  %v2064_v39 = vor.u32 %v2063_v33, %v2060_v32  ;;  %v2073_v40 = vrot.slane %v2071_v34, 4  ;;  %v2082_v43 = vshrl.u32 %v11849_v25, 16  ;;  %v2046_v44 = vsel %vm14796_vm4, %v2041_v36, %v2045_v18 }
  0x88   : > { %13920 = vmatprep.mubr.msk.bf16.mxu0 %vm352_vm1, %v14493_v16  ;;  %13942 = vmatprep.mubr.msk.bf16.mxu1 %vm352_vm1, %v11877_v35  ;;  %v2056_v45 = vsel %vm14796_vm4, %v2051_v37, %v2055_v28  ;;  %v2085_v46 = vshll.u32 %v11849_v25, 16  ;;  %v2091_v47 = vshll.u32 %v11850_v30, 16  ;;  %v2079_v51 = vrot.slane %v2077_v42, 5  ;;  %v11856_v16 = vld [vmem:[%s14758_s24 + $0x94] sm:$0xf] }
  0x89   : > { %v11878_v49 = vcombine.low %v2046_v44, %v2056_v45  ;;  %v2065_v12 = vrot.slane %v2064_v39, 4  ;;  %v2074_v50 = vor.u32 %v2073_v40, %v2069_v38  ;;  %v2084_v54 = vrot.slane %v2082_v43, 4  ;;  %v11859_v35 = vld [vmem:[%s14758_s24 + $0xa0] sm:$0xf]  ;;  %v11860_v44 = vld [vmem:[%s14758_s24 + $0xa4] sm:$0x1] }
  0x8a   : > { %v2087_v55 = vrot.slane %v2085_v46, 5  ;;  %v2093_v56 = vrot.slane %v2091_v47, 5  ;;  %v2095_v57 = vshrl.u32 %v11850_v30, 16  ;;  %v2101_v60 = vshll.u32 %v11851_v13, 16  ;;  %v11858_v30 = vld [vmem:[%s14758_s24 + $0x9c] sm:$0xf] }
  0x8b   : > { %13943 = vmatmul.mubr.msk.bf16.gmra.mxu1 %vm352_vm1, %v11878_v49  ;;  %v2070_v59 = vsel %vm14796_vm4, %v2065_v12, %v2069_v38  ;;  %v2075_v7 = vrot.slane %v2074_v50, 4  ;;  %v2106_v62 = vshrl.u32 %v11852_v48, 16  ;;  %v2109_v1 = vshll.u32 %v11852_v48, 16  ;;  %v11861_v13 = vld [vmem:[%s14758_s24 + $0xa8] sm:$0xf] }
  0x8c   : > { %v2088_v63 = vor.u32 %v2087_v55, %v2084_v54  ;;  %v2097_v0 = vrot.slane %v2095_v57, 4  ;;  %v2115_v2 = vshll.u32 %v11853_v53, 16  ;;  %v2103_v5 = vrot.slane %v2101_v60, 5  ;;  %v15080_v12 = vld [vmem:[%s18836_s1 + $0x18] sm:$0xf] }
  0x8d   : > { %v2080_v4 = vsel %vm14796_vm4, %v2075_v7, %v2079_v51  ;;  %v2108_v6 = vrot.slane %v2106_v62, 4  ;;  %v2119_v8 = vshrl.u32 %v11853_v53, 16  ;;  %v2111_v15 = vrot.slane %v2109_v1, 5  ;;  %v11862_v54 = vld [vmem:[%s14758_s24 + $0xac] sm:$0xf]  ;;  %14376 = vmatprep.subr.msk.bf16.mxu0 %vm401_vm0, %v15080_v12 }
  0x8e   : > { %v11879_v9 = vcombine.low %v2070_v59, %v2080_v4  ;;  %v2089_v10 = vrot.slane %v2088_v63, 4  ;;  %v2098_v11 = vor.u32 %v2097_v0, %v2093_v56  ;;  %v2117_v17 = vrot.slane %v2115_v2, 5  ;;  %v11863_v60 = vld [vmem:[%s14758_s24 + $0xb0] sm:$0x1] }
  0x8f   : > { %13921 = vmatmul.mubr.msk.bf16.gmra.mxu0 %vm352_vm1, %v14494_v52  ;;  %v2121_v18 = vrot.slane %v2119_v8, 4  ;;  %v2125_v19 = vshll.u32 %v11854_v61, 16  ;;  %v2130_v20 = vshrl.u32 %v11855_v3, 16  ;;  %v2112_v22 = vor.u32 %v2111_v15, %v2108_v6 }
  0x90   : > { %13924 = vmatprep.mubr.msk.bf16.mxu0 %vm352_vm1, %v14495_v58  ;;  %13946 = vmatprep.mubr.msk.bf16.mxu1 %vm352_vm1, %v11879_v9  ;;  %v2094_v21 = vsel %vm14796_vm4, %v2089_v10, %v2093_v56  ;;  %v2099_v14 = vrot.slane %v2098_v11, 4  ;;  %v2133_v24 = vshll.u32 %v11855_v3, 16  ;;  %v2139_v28 = vshll.u32 %v11856_v16, 16  ;;  %v2907_v3 = vld [vmem:[%s14758_s24] sm:$0xf] }
  0x91   : > { %v2122_v25 = vor.u32 %v2121_v18, %v2117_v17  ;;  %v2127_v26 = vrot.slane %v2125_v19, 5  ;;  %v2132_v27 = vrot.slane %v2130_v20, 4  ;;  %v2113_v32 = vrot.slane %v2112_v22, 4  ;;  %v2908_v9 = vld [vmem:[%s14758_s24 + $0x4] sm:$0xf] }
  0x92   : > { %v2104_v31 = vsel %vm14796_vm4, %v2099_v14, %v2103_v5  ;;  %v2135_v33 = vrot.slane %v2133_v24, 5  ;;  %v2143_v34 = vshrl.u32 %v11856_v16, 16  ;;  %v2141_v38 = vrot.slane %v2139_v28, 5  ;;  %v2909_v20 = vld [vmem:[%s14758_s24 + $0x8] sm:$0x1] }
  0x93   : > { %v11880_v36 = vcombine.low %v2094_v21, %v2104_v31  ;;  %v2123_v37 = vrot.slane %v2122_v25, 4  ;;  %v2149_v39 = vshll.u32 %v11857_v23, 16  ;;  %v2118_v40 = vsel %vm14796_vm4, %v2113_v32, %v2117_v17  ;;  %v15100_v25 = vld [vmem:[%s18836_s1 + $0x1c] sm:$0xf] }
  0x94   : > { %v2136_v42 = vor.u32 %v2135_v33, %v2132_v27  ;;  %v2145_v43 = vrot.slane %v2143_v34, 4  ;;  %v2154_v45 = vshrl.u32 %v11858_v30, 16  ;;  %v2157_v48 = vshll.u32 %v11858_v30, 16  ;;  %v11864_v30 = vld [vmem:[%s14758_s24 + $0xb4] sm:$0xf]  ;;  %14377 = vmatprep.subr.msk.bf16.mxu1 %vm401_vm0, %v15100_v25 }
  0x95   : > { %13947 = vmatmul.mubr.msk.bf16.gmra.mxu1 %vm352_vm1, %v11880_v36  ;;  %v2128_v46 = vsel %vm14796_vm4, %v2123_v37, %v2127_v26  ;;  %v2151_v47 = vrot.slane %v2149_v39, 5  ;;  %v2163_v49 = vshll.u32 %v11859_v35, 16  ;;  %v2167_v57 = vshrl.u32 %v11859_v35, 16  ;;  %v11865_v35 = vld [vmem:[%s14758_s24 + $0xb8] sm:$0xf] }
  0x96   : > { %v11881_v50 = vcombine.low %v2118_v40, %v2128_v46  ;;  %v2137_v51 = vrot.slane %v2136_v42, 4  ;;  %v2146_v52 = vor.u32 %v2145_v43, %v2141_v38  ;;  %v2156_v53 = vrot.slane %v2154_v45, 4  ;;  %v11866_v43 = vld [vmem:[%s14758_s24 + $0xbc] sm:$0x1] }
  0x97   : > { %13925 = vmatmul.mubr.msk.bf16.gmra.mxu0 %vm352_vm1, %v14496_v29  ;;  %v2159_v55 = vrot.slane %v2157_v48, 5  ;;  %v2165_v56 = vrot.slane %v2163_v49, 5  ;;  %v2173_v58 = vshll.u32 %v11860_v44, 16  ;;  %v2178_v61 = vshrl.u32 %v11861_v13, 16  ;;  %v2910_v49 = vld [vmem:[%s14758_s24 + $0xc] sm:$0xf] }
  0x98   : > { %13950 = vmatprep.mubr.msk.bf16.mxu1 %vm352_vm1, %v11881_v50  ;;  %v2142_v59 = vsel %vm14796_vm4, %v2137_v51, %v2141_v38  ;;  %v2147_v7 = vrot.slane %v2146_v52, 4  ;;  %v2181_v62 = vshll.u32 %v11861_v13, 16  ;;  %v2169_v0 = vrot.slane %v2167_v57, 4 }
  0x99   : > { %v2160_v63 = vor.u32 %v2159_v55, %v2156_v53  ;;  %v2175_v1 = vrot.slane %v2173_v58, 5  ;;  %v2187_v2 = vshll.u32 %v11862_v54, 16  ;;  %v2180_v5 = vrot.slane %v2178_v61, 4 }
  0x9a   : > { %v2152_v4 = vsel %vm14796_vm4, %v2147_v7, %v2151_v47  ;;  %v2183_v6 = vrot.slane %v2181_v62, 5  ;;  %v2191_v8 = vshrl.u32 %v11862_v54, 16  ;;  %v2170_v15 = vor.u32 %v2169_v0, %v2165_v56  ;;  %v2911_v54 = vld [vmem:[%s14758_s24 + $0x10] sm:$0xf] }
  0x9b   : > { %v11882_v10 = vcombine.low %v2142_v59, %v2152_v4  ;;  %v2161_v11 = vrot.slane %v2160_v63, 4  ;;  %v2189_v16 = vrot.slane %v2187_v2, 5  ;;  %v2197_v19 = vshll.u32 %v11863_v60, 16 }
  0x9c   : > { %v2184_v17 = vor.u32 %v2183_v6, %v2180_v5  ;;  %v2193_v18 = vrot.slane %v2191_v8, 4  ;;  %v2956_v21 = vshrl.u32 %v2907_v3, 16  ;;  %v2171_v22 = vrot.slane %v2170_v15, 4 }
  0x9d   : > { %13951 = vmatmul.mubr.msk.bf16.gmra.mxu1 %vm352_vm1, %v11882_v10  ;;  %v2166_v14 = vsel %vm14796_vm4, %v2161_v11, %v2165_v56  ;;  %v2959_v23 = vshll.u32 %v2907_v3, 16  ;;  %v2965_v24 = vshll.u32 %v2908_v9, 16  ;;  %v2199_v28 = vrot.slane %v2197_v19, 5  ;;  %v11867_v3 = vld [vmem:[%s14758_s24 + $0xc0] sm:$0xf] }
  0x9e   : > { %v2185_v26 = vrot.slane %v2184_v17, 4  ;;  %v2194_v27 = vor.u32 %v2193_v18, %v2189_v16  ;;  %v2958_v29 = vrot.slane %v2956_v21, 4  ;;  %v2176_v31 = vsel %vm14796_vm4, %v2171_v22, %v2175_v1  ;;  %v2912_v1 = vld [vmem:[%s14758_s24 + $0x14] sm:$0x1]  ;;  %v11869_v22 = vld [vmem:[%s14758_s24 + $0xc8] sm:$0x1] }
  0x9f   : > { %v2961_v32 = vrot.slane %v2959_v23, 5  ;;  %v2967_v33 = vrot.slane %v2965_v24, 5  ;;  %v2969_v34 = vshrl.u32 %v2908_v9, 16  ;;  %v11883_v36 = vcombine.low %v2166_v14, %v2176_v31  ;;  %v11868_v9 = vld [vmem:[%s14758_s24 + $0xc4] sm:$0xf] }
  0xa0   : > { %v2190_v37 = vsel %vm14796_vm4, %v2185_v26, %v2189_v16  ;;  %v2195_v38 = vrot.slane %v2194_v27, 4  ;;  %v2975_v39 = vshll.u32 %v2909_v20, 16  ;;  %v2202_v44 = vshrl.u32 %v11864_v30, 16  ;;  %v2913_v26 = vld [vmem:[%s14758_s24 + $0x18] sm:$0xf] }
  0xa1   : > { %v2962_v40 = vor.u32 %v2961_v32, %v2958_v29  ;;  %v2971_v42 = vrot.slane %v2969_v34, 4  ;;  %v2205_v45 = vshll.u32 %v11864_v30, 16  ;;  %13954 = vmatprep.mubr.msk.bf16.mxu1 %vm352_vm1, %v11883_v36  ;;  %v2211_v47 = vshll.u32 %v11865_v35, 16  ;;  %v2914_v31 = vld [vmem:[%s14758_s24 + $0x1c] sm:$0xf] }
  0xa2   : > { %v2200_v13 = vsel %vm14796_vm4, %v2195_v38, %v2199_v28  ;;  %v2977_v46 = vrot.slane %v2975_v39, 5  ;;  %v2215_v48 = vshrl.u32 %v11865_v35, 16  ;;  %v2204_v53 = vrot.slane %v2202_v44, 4 }
  0xa3   : > { %v11884_v50 = vcombine.low %v2190_v37, %v2200_v13  ;;  %v2963_v51 = vrot.slane %v2962_v40, 4  ;;  %v2972_v52 = vor.u32 %v2971_v42, %v2967_v33  ;;  %v2207_v55 = vrot.slane %v2205_v45, 5 }
  0xa4   : > { %v2213_v56 = vrot.slane %v2211_v47, 5  ;;  %v2217_v57 = vrot.slane %v2215_v48, 4  ;;  %v2221_v58 = vshll.u32 %v11866_v43, 16  ;;  %v2980_v60 = vshrl.u32 %v2910_v49, 16  ;;  %v2915_v43 = vld [vmem:[%s14758_s24 + $0x20] sm:$0x1] }
  0xa5   : > { %13955 = vmatmul.mubr.msk.bf16.gmra.mxu1 %vm352_vm1, %v11884_v50  ;;  %v2968_v59 = vsel %vm14796_vm4, %v2963_v51, %v2967_v33  ;;  %v2973_v7 = vrot.slane %v2972_v52, 4  ;;  %v2983_v61 = vshll.u32 %v2910_v49, 16  ;;  %v2208_v62 = vor.u32 %v2207_v55, %v2204_v53  ;;  %v2916_v49 = vld [vmem:[%s14758_s24 + $0x24] sm:$0xf] }
  0xa6   : > { %v2218_v63 = vor.u32 %v2217_v57, %v2213_v56  ;;  %v2223_v0 = vrot.slane %v2221_v58, 5  ;;  %v2989_v2 = vshll.u32 %v2911_v54, 16  ;;  %v2982_v5 = vrot.slane %v2980_v60, 4 }
  0xa7   : > { %v2978_v4 = vsel %vm14796_vm4, %v2973_v7, %v2977_v46  ;;  %v2985_v6 = vrot.slane %v2983_v61, 5  ;;  %v2993_v8 = vshrl.u32 %v2911_v54, 16  ;;  %v2209_v11 = vrot.slane %v2208_v62, 4  ;;  %v2917_v54 = vld [vmem:[%s14758_s24 + $0x28] sm:$0xf] }
  0xa8   : > { %v11936_v10 = vcombine.low %v2968_v59, %v2978_v4  ;;  %v2219_v15 = vrot.slane %v2218_v63, 4  ;;  %v2991_v16 = vrot.slane %v2989_v2, 5  ;;  %v2999_v19 = vshll.u32 %v2912_v1, 16  ;;  %v2918_v61 = vld [vmem:[%s14758_s24 + $0x2c] sm:$0x1] }
  0xa9   : > { %v2986_v17 = vor.u32 %v2985_v6, %v2982_v5  ;;  %v2995_v18 = vrot.slane %v2993_v8, 4  ;;  %v2226_v20 = vshrl.u32 %v11867_v3, 16  ;;  %v2214_v21 = vsel %vm14796_vm4, %v2209_v11, %v2213_v56  ;;  %v3633_v63 = vld [vmem:[%s14758_s24] sm:$0xe]  ;;  %v3634_v4 = vld [vmem:[%s14758_s24 + $0x4] sm:$0xf] }
  0xaa   : > { %13964 = vmatprep.mubr.msk.bf16.mxu0 %vm352_vm1, %v11936_v10  ;;  %v2224_v14 = vsel %vm14796_vm4, %v2219_v15, %v2223_v0  ;;  %v2229_v23 = vshll.u32 %v11867_v3, 16  ;;  %v2235_v24 = vshll.u32 %v11868_v9, 16  ;;  %v3001_v30 = vrot.slane %v2999_v19, 5 }
  0xab   : > { %v11885_v27 = vcombine.low %v2214_v21, %v2224_v14  ;;  %v2987_v28 = vrot.slane %v2986_v17, 4  ;;  %v2996_v29 = vor.u32 %v2995_v18, %v2991_v16  ;;  %v2228_v32 = vrot.slane %v2226_v20, 4  ;;  %v3636_v17 = vld [vmem:[%s14758_s24 + $0xc] sm:$0xe]  ;;  %v3637_v21 = vld [vmem:[%s14758_s24 + $0x10] sm:$0xf] }
  0xac   : > { %v2231_v33 = vrot.slane %v2229_v23, 5  ;;  %v2237_v34 = vrot.slane %v2235_v24, 5  ;;  %v2239_v35 = vshrl.u32 %v11868_v9, 16  ;;  %v2245_v38 = vshll.u32 %v11869_v22, 16  ;;  %v3635_v9 = vld [vmem:[%s14758_s24 + $0x8] sm:$0x1] }
  0xad   : > { %13958 = vmatprep.mubr.msk.bf16.mxu1 %vm352_vm1, %v11885_v27  ;;  %v2992_v36 = vsel %vm14796_vm4, %v2987_v28, %v2991_v16  ;;  %v2997_v37 = vrot.slane %v2996_v29, 4  ;;  %v3004_v39 = vshrl.u32 %v2913_v26, 16  ;;  %v3007_v44 = vshll.u32 %v2913_v26, 16  ;;  %v3638_v24 = vld [vmem:[%s14758_s24 + $0x14] sm:$0x1] }
  0xae   : > { %v2232_v40 = vor.u32 %v2231_v33, %v2228_v32  ;;  %v2241_v42 = vrot.slane %v2239_v35, 4  ;;  %v3013_v45 = vshll.u32 %v2914_v31, 16  ;;  %v2247_v46 = vrot.slane %v2245_v38, 5  ;;  %v2919_v35 = vld [vmem:[%s14758_s24 + $0x30] sm:$0xf] }
  0xaf   : > { %v3002_v13 = vsel %vm14796_vm4, %v2997_v37, %v3001_v30  ;;  %v3006_v47 = vrot.slane %v3004_v39, 4  ;;  %v3017_v48 = vshrl.u32 %v2914_v31, 16  ;;  %v3009_v53 = vrot.slane %v3007_v44, 5 }
  0xb0   : > { %v11937_v50 = vcombine.low %v2992_v36, %v3002_v13  ;;  %v2233_v51 = vrot.slane %v2232_v40, 4  ;;  %v2242_v52 = vor.u32 %v2241_v42, %v2237_v34  ;;  %v3015_v55 = vrot.slane %v3013_v45, 5  ;;  %v2920_v40 = vld [vmem:[%s14758_s24 + $0x34] sm:$0xf] }
  0xb1   : > { %v3019_v56 = vrot.slane %v3017_v48, 4  ;;  %v3023_v57 = vshll.u32 %v2915_v43, 16  ;;  %v4733_v58 = vsel %vm401_vm0, %v15080_v12, 0  ;;  %v3010_v60 = vor.u32 %v3009_v53, %v3006_v47  ;;  %v2921_v47 = vld [vmem:[%s14758_s24 + $0x38] sm:$0x1] }
  0xb2   : > { %13965 = vmatmul.mubr.msk.bf16.vlgmr.msra.gmra.mxu0 %vm352_vm1, %v11937_v50  ;;  %v2238_v59 = vsel %vm14796_vm4, %v2233_v51, %v2237_v34  ;;  %v2243_v7 = vrot.slane %v2242_v52, 4  ;;  %v3028_v62 = vshrl.u32 %v2916_v49, 16  ;;  %v3031_v2 = vshll.u32 %v2916_v49, 16  ;;  %v2922_v50 = vld [vmem:[%s14758_s24 + $0x3c] sm:$0xf] }
  0xb3   : > { %v3020_v0 = vor.u32 %v3019_v56, %v3015_v55  ;;  %v3025_v1 = vrot.slane %v3023_v57, 5  ;;  %14031 = vmatpush3.bf16.msra.mxu0 %v4733_v58  ;;  %v3037_v3 = vshll.u32 %v2917_v54, 16  ;;  %v3011_v5 = vrot.slane %v3010_v60, 4 }
  0xb4   : > { %v2248_v12 = vsel %vm14796_vm4, %v2243_v7, %v2247_v46  ;;  %v3030_v6 = vrot.slane %v3028_v62, 4  ;;  %v3041_v8 = vshrl.u32 %v2917_v54, 16  ;;  %v3033_v15 = vrot.slane %v3031_v2, 5  ;;  %v3639_v7 = vld [vmem:[%s14758_s24 + $0x18] sm:$0xe] }
  0xb5   : > { %v11886_v10 = vcombine.low %v2238_v59, %v2248_v12  ;;  %v3021_v11 = vrot.slane %v3020_v0, 4  ;;  %v3039_v16 = vrot.slane %v3037_v3, 5  ;;  %v3016_v18 = vsel %vm14796_vm4, %v3011_v5, %v3015_v55  ;;  %v2923_v55 = vld [vmem:[%s14758_s24 + $0x40] sm:$0xf]  ;;  %v3640_v0 = vld [vmem:[%s14758_s24 + $0x1c] sm:$0xf] }
  0xb6   : > { %v3043_v19 = vrot.slane %v3041_v8, 4  ;;  %v3047_v20 = vshll.u32 %v2918_v61, 16  ;;  %v3034_v22 = vor.u32 %v3033_v15, %v3030_v6  ;;  %v11968_v23 = vrot.slane %v3633_v63, 9  ;;  %v3641_v12 = vld [vmem:[%s14758_s24 + $0x20] sm:$0x1] }
  0xb7   : > { %13959 = vmatmul.mubr.msk.bf16.gmra.mxu1 %vm352_vm1, %v11886_v10  ;;  %v3026_v14 = vsel %vm14796_vm4, %v3021_v11, %v3025_v1  ;;  %v18851_v29 = vmov 0  ;;  %v3734_v30 = vrot.slane %v3634_v4, 5  ;;  %v3737_v32 = vrot.slane %v3635_v9, 5  ;;  %v3642_v10 = vld [vmem:[%s14758_s24 + $0x24] sm:$0xe] }
  0xb8   : > { %v11938_v26 = vcombine.low %v3016_v18, %v3026_v14  ;;  %v3044_v27 = vor.u32 %v3043_v19, %v3039_v16  ;;  %v3049_v28 = vrot.slane %v3047_v20, 5  ;;  %v18852_v29 = vsel %vm15159_vm7, 4294967295, %v18851_v29  ;;  %v3643_v18 = vld [vmem:[%s14758_s24 + $0x28] sm:$0xf] }
  0xb9   : > { %18853 = vst [vmem:[#allocation12_spill] sm:$0xff] %v18852_v29  ;;  %v3035_v31 = vrot.slane %v3034_v22, 4  ;;  %v11969_v33 = vrot.slane %v3636_v17, 9  ;;  %v3741_v34 = vrot.slane %v3637_v21, 5  ;;  %v3735_v37 = vsel %vm15159_vm7, %v11968_v23, %v3734_v30  ;;  %v3644_v22 = vld [vmem:[%s14758_s24 + $0x2c] sm:$0x1] }
  0xba   : > { %13968 = vmatprep.mubr.msk.bf16.mxu0 %vm352_vm1, %v11938_v26  ;;  %v3045_v36 = vrot.slane %v3044_v27, 4  ;;  %v3736_v38 = vrot.slane %v3734_v30, 4  ;;  %v3744_v39 = vrot.slane %v3638_v24, 5  ;;  %v5299_v45 = vsel %vm401_vm0, %v15100_v25, 0  ;;  %v2924_v25 = vld [vmem:[%s14758_s24 + $0x44] sm:$0x1] }
  0xbb   : > { %v3040_v42 = vsel %vm14796_vm4, %v3035_v31, %v3039_v16  ;;  %v3742_v43 = vsel %vm15159_vm7, %v11969_v33, %v3741_v34  ;;  %v3743_v44 = vrot.slane %v3741_v34, 4  ;;  %v3052_v48 = vshrl.u32 %v2919_v35, 16 }
  0xbc   : > { %v3050_v13 = vsel %vm14796_vm4, %v3045_v36, %v3049_v28  ;;  %v3738_v46 = vsel %vm15159_vm7, %v3736_v38, %v3737_v32  ;;  %v3055_v49 = vshll.u32 %v2919_v35, 16  ;;  %v3061_v54 = vshll.u32 %v2920_v40, 16  ;;  %v2925_v28 = vld [vmem:[%s14758_s24 + $0x48] sm:$0xf]  ;;  %v2926_v38 = vld [vmem:[%s14758_s24 + $0x4c] sm:$0xf] }
  0xbd   : > { %v11939_v51 = vcombine.low %v3040_v42, %v3050_v13  ;;  %v11985_v52 = vcombine.low %v3735_v37, %v3738_v46  ;;  %v3745_v53 = vsel %vm15159_vm7, %v3743_v44, %v3744_v39  ;;  %v3054_v57 = vrot.slane %v3052_v48, 4 }
  0xbe   : > { %v11986_v56 = vcombine.low %v3742_v43, %v3745_v53  ;;  %v3057_v58 = vrot.slane %v3055_v49, 5  ;;  %v3065_v59 = vshrl.u32 %v2920_v40, 16  ;;  %v3063_v60 = vrot.slane %v3061_v54, 5  ;;  %v2927_v43 = vld [vmem:[%s14758_s24 + $0x50] sm:$0x1] }
  0xbf   : > { %13969 = vmatmul.mubr.msk.bf16.gmra.mxu0 %vm352_vm1, %v11939_v51  ;;  %13998 = vmatprep.mubr.msk.bf16.mxu1 %vm352_vm1, %v11985_v52  ;;  %v3071_v61 = vshll.u32 %v2921_v47, 16  ;;  %v3076_v62 = vshrl.u32 %v2922_v50, 16  ;;  %v3079_v63 = vshll.u32 %v2922_v50, 16  ;;  %v3085_v3 = vshll.u32 %v2923_v55, 16  ;;  %v2929_v49 = vld [vmem:[%s14758_s24 + $0x58] sm:$0xf] }
  0xc0   : > { %13999 = vmatmul.mubr.msk.bf16.vlgmr.msra.gmra.mxu1 %vm352_vm1, %v11986_v56  ;;  %v3058_v1 = vor.u32 %v3057_v58, %v3054_v57  ;;  %v3067_v2 = vrot.slane %v3065_v59, 4  ;;  %v3089_v4 = vshrl.u32 %v2923_v55, 16  ;;  %v3095_v9 = vshll.u32 %v2924_v25, 16  ;;  %v2930_v54 = vld [vmem:[%s14758_s24 + $0x5c] sm:$0x1] }
  0xc1   : > { %14065 = vmatpush3.bf16.msra.mxu1 %v5299_v45  ;;  %v3073_v5 = vrot.slane %v3071_v61, 5  ;;  %v3078_v6 = vrot.slane %v3076_v62, 4  ;;  %v3081_v8 = vrot.slane %v3079_v63, 5  ;;  %v3087_v16 = vrot.slane %v3085_v3, 5  ;;  %v2928_v45 = vld [vmem:[%s14758_s24 + $0x54] sm:$0xf] }
  0xc2   : > { %v3059_v11 = vrot.slane %v3058_v1, 4  ;;  %v3068_v15 = vor.u32 %v3067_v2, %v3063_v60  ;;  %v3091_v17 = vrot.slane %v3089_v4, 4  ;;  %v3097_v20 = vrot.slane %v3095_v9, 5  ;;  %v3645_v58 = vld [vmem:[%s14758_s24 + $0x30] sm:$0xe] }
  0xc3   : > { %v3082_v19 = vor.u32 %v3081_v8, %v3078_v6  ;;  %v11970_v21 = vrot.slane %v3639_v7, 9  ;;  %v3748_v14 = vrot.slane %v3640_v0, 5  ;;  %v3751_v27 = vrot.slane %v3641_v12, 5  ;;  %v3646_v62 = vld [vmem:[%s14758_s24 + $0x34] sm:$0xf] }
  0xc4   : > { %v3064_v23 = vsel %vm14796_vm4, %v3059_v11, %v3063_v60  ;;  %v3069_v24 = vrot.slane %v3068_v15, 4  ;;  %v3092_v26 = vor.u32 %v3091_v17, %v3087_v16  ;;  %v11971_v33 = vrot.slane %v3642_v10, 9  ;;  %v3647_v3 = vld [vmem:[%s14758_s24 + $0x38] sm:$0x1]  ;;  %v3648_v8 = vld [vmem:[%s14758_s24 + $0x3c] sm:$0xe] }
  0xc5   : > { %v3083_v30 = vrot.slane %v3082_v19, 4  ;;  %v3749_v31 = vsel %vm15159_vm7, %v11970_v21, %v3748_v14  ;;  %v3750_v32 = vrot.slane %v3748_v14, 4  ;;  %v3755_v36 = vrot.slane %v3643_v18, 5  ;;  %v3650_v21 = vld [vmem:[%s14758_s24 + $0x44] sm:$0x1] }
  0xc6   : > { %v3074_v34 = vsel %vm14796_vm4, %v3069_v24, %v3073_v5  ;;  %v3093_v35 = vrot.slane %v3092_v26, 4  ;;  %v3758_v37 = vrot.slane %v3644_v22, 5  ;;  %v3100_v44 = vshrl.u32 %v2925_v28, 16 }
  0xc7   : > { %v11940_v39 = vcombine.low %v3064_v23, %v3074_v34  ;;  %v3088_v40 = vsel %vm14796_vm4, %v3083_v30, %v3087_v16  ;;  %v3752_v42 = vsel %vm15159_vm7, %v3750_v32, %v3751_v27  ;;  %v3756_v47 = vsel %vm15159_vm7, %v11971_v33, %v3755_v36  ;;  %v3649_v16 = vld [vmem:[%s14758_s24 + $0x40] sm:$0xf] }
  0xc8   : > { %v3098_v13 = vsel %vm14796_vm4, %v3093_v35, %v3097_v20  ;;  %v11987_v46 = vcombine.low %v3749_v31, %v3752_v42  ;;  %v3757_v48 = vrot.slane %v3755_v36, 4  ;;  %v3102_v51 = vrot.slane %v3100_v44, 4  ;;  %v2931_v31 = vld [vmem:[%s14758_s24 + $0x60] sm:$0xf]  ;;  %v2932_v36 = vld [vmem:[%s14758_s24 + $0x64] sm:$0xf] }
  0xc9   : > { %13972 = vmatprep.mubr.msk.bf16.mxu0 %vm352_vm1, %v11940_v39  ;;  %v11941_v50 = vcombine.low %v3088_v40, %v3098_v13  ;;  %v3103_v52 = vshll.u32 %v2925_v28, 16  ;;  %v3109_v53 = vshll.u32 %v2926_v38, 16  ;;  %v3113_v25 = vshrl.u32 %v2926_v38, 16 }
  0xca   : > { %14002 = vmatprep.mubr.msk.bf16.mxu1 %vm352_vm1, %v11987_v46  ;;  %v3759_v55 = vsel %vm15159_vm7, %v3757_v48, %v3758_v37  ;;  %v3119_v56 = vshll.u32 %v2927_v43, 16  ;;  %v3124_v57 = vshrl.u32 %v2928_v45, 16  ;;  %v3127_v61 = vshll.u32 %v2928_v45, 16  ;;  %v2933_v37 = vld [vmem:[%s14758_s24 + $0x68] sm:$0x1] }
  0xcb   : > { %13973 = vmatmul.mubr.msk.bf16.gmra.mxu0 %vm352_vm1, %v11941_v50  ;;  %v11988_v59 = vcombine.low %v3756_v47, %v3759_v55  ;;  %v3105_v7 = vrot.slane %v3103_v52, 5  ;;  %v3111_v60 = vrot.slane %v3109_v53, 5  ;;  %v3115_v63 = vrot.slane %v3113_v25, 4  ;;  %v2934_v46 = vld [vmem:[%s14758_s24 + $0x6c] sm:$0xf] }
  0xcc   : > { %v3121_v0 = vrot.slane %v3119_v56, 5  ;;  %v3126_v1 = vrot.slane %v3124_v57, 4  ;;  %v3133_v2 = vshll.u32 %v2929_v49, 16  ;;  %v3129_v12 = vrot.slane %v3127_v61, 5  ;;  %v2936_v25 = vld [vmem:[%s14758_s24 + $0x74] sm:$0x1] }
  0xcd   : > { %14003 = vmatmul.mubr.msk.bf16.gmra.mxu1 %vm352_vm1, %v11988_v59  ;;  %v3106_v4 = vor.u32 %v3105_v7, %v3102_v51  ;;  %v3137_v5 = vshrl.u32 %v2929_v49, 16  ;;  %v3143_v6 = vshll.u32 %v2930_v54, 16  ;;  %v3116_v9 = vor.u32 %v3115_v63, %v3111_v60  ;;  %v2935_v51 = vld [vmem:[%s14758_s24 + $0x70] sm:$0xf]  ;;  %v3651_v56 = vld [vmem:[%s14758_s24 + $0x48] sm:$0xe] }
  0xce   : > { %v3135_v10 = vrot.slane %v3133_v2, 5  ;;  %v11972_v11 = vrot.slane %v3645_v58, 9  ;;  %v3762_v15 = vrot.slane %v3646_v62, 5  ;;  %v3130_v18 = vor.u32 %v3129_v12, %v3126_v1  ;;  %v3653_v1 = vld [vmem:[%s14758_s24 + $0x50] sm:$0x1] }
  0xcf   : > { %v3107_v17 = vrot.slane %v3106_v4, 4  ;;  %v3139_v19 = vrot.slane %v3137_v5, 4  ;;  %v3145_v20 = vrot.slane %v3143_v6, 5  ;;  %v3117_v14 = vrot.slane %v3116_v9, 4  ;;  %v3654_v5 = vld [vmem:[%s14758_s24 + $0x54] sm:$0xe] }
  0xd0   : > { %v3763_v22 = vsel %vm15159_vm7, %v11972_v11, %v3762_v15  ;;  %v3764_v23 = vrot.slane %v3762_v15, 4  ;;  %v3765_v24 = vrot.slane %v3647_v3, 5  ;;  %v3131_v27 = vrot.slane %v3130_v18, 4  ;;  %v3655_v11 = vld [vmem:[%s14758_s24 + $0x58] sm:$0xf] }
  0xd1   : > { %v3112_v26 = vsel %vm14796_vm4, %v3107_v17, %v3111_v60  ;;  %v3140_v28 = vor.u32 %v3139_v19, %v3135_v10  ;;  %v11973_v30 = vrot.slane %v3648_v8, 9  ;;  %v3122_v32 = vsel %vm14796_vm4, %v3117_v14, %v3121_v0  ;;  %v3652_v60 = vld [vmem:[%s14758_s24 + $0x4c] sm:$0xf]  ;;  %v3656_v19 = vld [vmem:[%s14758_s24 + $0x5c] sm:$0x1] }
  0xd2   : > { %v3766_v33 = vsel %vm15159_vm7, %v3764_v23, %v3765_v24  ;;  %v3769_v34 = vrot.slane %v3649_v16, 5  ;;  %v3772_v35 = vrot.slane %v3650_v21, 5  ;;  %v11942_v38 = vcombine.low %v3112_v26, %v3122_v32  ;;  %v2937_v23 = vld [vmem:[%s14758_s24 + $0x78] sm:$0xf] }
  0xd3   : > { %v3136_v39 = vsel %vm14796_vm4, %v3131_v27, %v3135_v10  ;;  %v3141_v40 = vrot.slane %v3140_v28, 4  ;;  %v11989_v42 = vcombine.low %v3763_v22, %v3766_v33  ;;  %v3148_v45 = vshrl.u32 %v2931_v31, 16 }
  0xd4   : > { %v3770_v43 = vsel %vm15159_vm7, %v11973_v30, %v3769_v34  ;;  %v3771_v44 = vrot.slane %v3769_v34, 4  ;;  %v3151_v13 = vshll.u32 %v2931_v31, 16  ;;  %13976 = vmatprep.mubr.msk.bf16.mxu0 %vm352_vm1, %v11942_v38  ;;  %v3157_v48 = vshll.u32 %v2932_v36, 16  ;;  %v2938_v30 = vld [vmem:[%s14758_s24 + $0x7c] sm:$0xf] }
  0xd5   : > { %v3146_v47 = vsel %vm14796_vm4, %v3141_v40, %v3145_v20  ;;  %14006 = vmatprep.mubr.msk.bf16.mxu1 %vm352_vm1, %v11989_v42  ;;  %v3161_v49 = vshrl.u32 %v2932_v36, 16  ;;  %v3167_v50 = vshll.u32 %v2933_v37, 16  ;;  %v3150_v54 = vrot.slane %v3148_v45, 4  ;;  %v2939_v36 = vld [vmem:[%s14758_s24 + $0x80] sm:$0x1] }
  0xd6   : > { %v11943_v52 = vcombine.low %v3136_v39, %v3146_v47  ;;  %v3773_v53 = vsel %vm15159_vm7, %v3771_v44, %v3772_v35  ;;  %v3153_v55 = vrot.slane %v3151_v13, 5  ;;  %v3159_v58 = vrot.slane %v3157_v48, 5  ;;  %v2940_v42 = vld [vmem:[%s14758_s24 + $0x84] sm:$0xf]  ;;  %v2941_v47 = vld [vmem:[%s14758_s24 + $0x88] sm:$0xf] }
  0xd7   : > { %v11990_v57 = vcombine.low %v3770_v43, %v3773_v53  ;;  %v3163_v59 = vrot.slane %v3161_v49, 4  ;;  %v3169_v7 = vrot.slane %v3167_v50, 5  ;;  %v3172_v62 = vshrl.u32 %v2934_v46, 16  ;;  %v15282_v48 = vld [vmem:[%s18836_s1 + $0x20] sm:$0xf] }
  0xd8   : > { %13977 = vmatmul.mubr.msk.bf16.gmra.mxu0 %vm352_vm1, %v11943_v52  ;;  %v3154_v61 = vor.u32 %v3153_v55, %v3150_v54  ;;  %v3175_v63 = vshll.u32 %v2934_v46, 16  ;;  %v3181_v0 = vshll.u32 %v2935_v51, 16  ;;  %v3185_v3 = vshrl.u32 %v2935_v51, 16  ;;  %v2942_v53 = vld [vmem:[%s14758_s24 + $0x8c] sm:$0x1]  ;;  %14378 = vmatprep.subr.msk.bf16.mxu0 %vm401_vm0, %v15282_v48 }
  0xd9   : > { %14007 = vmatmul.mubr.msk.bf16.gmra.mxu1 %vm352_vm1, %v11990_v57  ;;  %v3164_v2 = vor.u32 %v3163_v59, %v3159_v58  ;;  %v3191_v4 = vshll.u32 %v2936_v25, 16  ;;  %v11974_v12 = vrot.slane %v3651_v56, 9  ;;  %v3174_v8 = vrot.slane %v3172_v62, 4  ;;  %v3658_v59 = vld [vmem:[%s14758_s24 + $0x64] sm:$0xf] }
  0xda   : > { %v3155_v6 = vrot.slane %v3154_v61, 4  ;;  %v3177_v9 = vrot.slane %v3175_v63, 5  ;;  %v3183_v10 = vrot.slane %v3181_v0, 5  ;;  %v3187_v16 = vrot.slane %v3185_v3, 4  ;;  %v3659_v63 = vld [vmem:[%s14758_s24 + $0x68] sm:$0x1] }
  0xdb   : > { %v3165_v15 = vrot.slane %v3164_v2, 4  ;;  %v3193_v17 = vrot.slane %v3191_v4, 5  ;;  %v3776_v18 = vrot.slane %v3652_v60, 5  ;;  %v3779_v14 = vrot.slane %v3653_v1, 5  ;;  %v3660_v0 = vld [vmem:[%s14758_s24 + $0x6c] sm:$0xe] }
  0xdc   : > { %v3160_v20 = vsel %vm14796_vm4, %v3155_v6, %v3159_v58  ;;  %v3178_v21 = vor.u32 %v3177_v9, %v3174_v8  ;;  %v11975_v22 = vrot.slane %v3654_v5, 9  ;;  %v3188_v26 = vor.u32 %v3187_v16, %v3183_v10  ;;  %v3657_v58 = vld [vmem:[%s14758_s24 + $0x60] sm:$0xe]  ;;  %v3661_v5 = vld [vmem:[%s14758_s24 + $0x70] sm:$0xf] }
  0xdd   : > { %v3170_v24 = vsel %vm14796_vm4, %v3165_v15, %v3169_v7  ;;  %v3777_v27 = vsel %vm15159_vm7, %v11974_v12, %v3776_v18  ;;  %v3778_v28 = vrot.slane %v3776_v18, 4  ;;  %v3783_v34 = vrot.slane %v3655_v11, 5  ;;  %v3662_v11 = vld [vmem:[%s14758_s24 + $0x74] sm:$0x1] }
  0xde   : > { %v11944_v32 = vcombine.low %v3160_v20, %v3170_v24  ;;  %v3179_v33 = vrot.slane %v3178_v21, 4  ;;  %v3786_v35 = vrot.slane %v3656_v19, 5  ;;  %v3189_v37 = vrot.slane %v3188_v26, 4  ;;  %v2943_v20 = vld [vmem:[%s14758_s24 + $0x90] sm:$0xf] }
  0xdf   : > { %v15265_v31 = vpop.f32.mrf.mxu0  ;;  %v3780_v38 = vsel %vm15159_vm7, %v3778_v28, %v3779_v14  ;;  %v3196_v39 = vshrl.u32 %v2937_v23, 16  ;;  %v3199_v40 = vshll.u32 %v2937_v23, 16  ;;  %v3784_v13 = vsel %vm15159_vm7, %v11975_v22, %v3783_v34  ;;  %v15312_v24 = vld [vmem:[%s18836_s1 + $0x24] sm:$0xf] }
  0xe0   : > { %13980 = vmatprep.mubr.msk.bf16.mxu0 %vm352_vm1, %v11944_v32  ;;  %v3184_v44 = vsel %vm14796_vm4, %v3179_v33, %v3183_v10  ;;  %v11991_v45 = vcombine.low %v3777_v27, %v3780_v38  ;;  %v3785_v46 = vrot.slane %v3783_v34, 4  ;;  %v3194_v49 = vsel %vm14796_vm4, %v3189_v37, %v3193_v17  ;;  %14379 = vmatprep.subr.msk.bf16.mxu1 %vm401_vm0, %v15312_v24 }
  0xe1   : > { %v15271_v43 = vpop.f32.mrf.mxu0  ;;  %v3198_v50 = vrot.slane %v3196_v39, 4  ;;  %v3201_v51 = vrot.slane %v3199_v40, 5  ;;  %v3205_v52 = vshll.u32 %v2938_v30, 16  ;;  %v11945_v55 = vcombine.low %v3184_v44, %v3194_v49  ;;  %v2945_v49 = vld [vmem:[%s14758_s24 + $0x98] sm:$0x1] }
  0xe2   : > { %14010 = vmatprep.mubr.msk.bf16.mxu1 %vm352_vm1, %v11991_v45  ;;  %v3787_v25 = vsel %vm15159_vm7, %v3785_v46, %v3786_v35  ;;  %v3209_v56 = vshrl.u32 %v2938_v30, 16  ;;  %v3215_v57 = vshll.u32 %v2939_v36, 16  ;;  %v3220_v62 = vshrl.u32 %v2940_v42, 16 }
  0xe3   : > { %v15287_v54 = vpop.f32.mrf.mxu0  ;;  %v11992_v7 = vcombine.low %v3784_v13, %v3787_v25  ;;  %v3202_v60 = vor.u32 %v3201_v51, %v3198_v50  ;;  %v3207_v61 = vrot.slane %v3205_v52, 5  ;;  %13981 = vmatmul.mubr.msk.bf16.gmra.mxu0 %vm352_vm1, %v11945_v55  ;;  %v3223_v4 = vshll.u32 %v2940_v42, 16  ;;  %v2944_v42 = vld [vmem:[%s14758_s24 + $0x94] sm:$0xf]  ;;  %v2946_v50 = vld [vmem:[%s14758_s24 + $0x9c] sm:$0xf] }
  0xe4   : > { %v3211_v2 = vrot.slane %v3209_v56, 4  ;;  %v3217_v3 = vrot.slane %v3215_v57, 5  ;;  %v3229_v12 = vshll.u32 %v2941_v47, 16  ;;  %v3222_v8 = vrot.slane %v3220_v62, 4 }
  0xe5   : > { %v15298_v1 = vpop.f32.mrf.mxu0  ;;  %14011 = vmatmul.mubr.msk.bf16.gmra.mxu1 %vm352_vm1, %v11992_v7  ;;  %v3203_v6 = vrot.slane %v3202_v60, 4  ;;  %v3233_v9 = vshrl.u32 %v2941_v47, 16  ;;  %v3239_v10 = vshll.u32 %v2942_v53, 16  ;;  %v3225_v17 = vrot.slane %v3223_v4, 5  ;;  %v2947_v7 = vld [vmem:[%s14758_s24 + $0xa0] sm:$0xf] }
  0xe6   : > { %v3212_v16 = vor.u32 %v3211_v2, %v3207_v61  ;;  %v3231_v18 = vrot.slane %v3229_v12, 5  ;;  %v11976_v19 = vrot.slane %v3657_v58, 9  ;;  %v3790_v23 = vrot.slane %v3658_v59, 5 }
  0xe7   : > { %v15304_v15 = vpop.f32.mrf.mxu0  ;;  %v3208_v21 = vsel %vm14796_vm4, %v3203_v6, %v3207_v61  ;;  %v3235_v14 = vrot.slane %v3233_v9, 4  ;;  %v3241_v22 = vrot.slane %v3239_v10, 5  ;;  %v3226_v28 = vor.u32 %v3225_v17, %v3222_v8  ;;  %v3664_v9 = vld [vmem:[%s14758_s24 + $0x7c] sm:$0xf] }
  0xe8   : > { %v3213_v27 = vrot.slane %v3212_v16, 4  ;;  %v3793_v30 = vrot.slane %v3659_v63, 5  ;;  %v11977_v32 = vrot.slane %v3660_v0, 9  ;;  %v3791_v34 = vsel %vm15159_vm7, %v11976_v19, %v3790_v23  ;;  %v2948_v0 = vld [vmem:[%s14758_s24 + $0xa4] sm:$0x1] }
  0xe9   : > { %v15314_v26 = vpop.f32.mrf.mxu0  ;;  %v3236_v33 = vor.u32 %v3235_v14, %v3231_v18  ;;  %v3792_v35 = vrot.slane %v3790_v23, 4  ;;  %v3797_v36 = vrot.slane %v3661_v5, 5  ;;  %v3227_v39 = vrot.slane %v3226_v28, 4  ;;  %v3665_v23 = vld [vmem:[%s14758_s24 + $0x80] sm:$0x1] }
  0xea   : > { %v3218_v38 = vsel %vm14796_vm4, %v3213_v27, %v3217_v3  ;;  %v3800_v40 = vrot.slane %v3662_v11, 5  ;;  %v3244_v44 = vshrl.u32 %v2943_v20, 16  ;;  %v3247_v57 = vshll.u32 %v2943_v20, 16  ;;  %v3663_v3 = vld [vmem:[%s14758_s24 + $0x78] sm:$0xe] }
  0xeb   : > { %v15320_v37 = vpop.f32.mrf.mxu0  ;;  %v11946_v45 = vcombine.low %v3208_v21, %v3218_v38  ;;  %v3237_v13 = vrot.slane %v3236_v33, 4  ;;  %v3794_v46 = vsel %vm15159_vm7, %v3792_v35, %v3793_v30  ;;  %v3798_v47 = vsel %vm15159_vm7, %v11977_v32, %v3797_v36 }
  0xec   : > { %v3232_v52 = vsel %vm14796_vm4, %v3227_v39, %v3231_v18  ;;  %v11993_v53 = vcombine.low %v3791_v34, %v3794_v46  ;;  %v3799_v55 = vrot.slane %v3797_v36, 4  ;;  %v3246_v25 = vrot.slane %v3244_v44, 4  ;;  %v3666_v34 = vld [vmem:[%s14758_s24 + $0x84] sm:$0xe] }
  0xed   : > { %v15331_v51 = vpop.f32.mrf.mxu0  ;;  %13984 = vmatprep.mubr.msk.bf16.mxu0 %vm352_vm1, %v11946_v45  ;;  %v3242_v56 = vsel %vm14796_vm4, %v3237_v13, %v3241_v22  ;;  %v3253_v58 = vshll.u32 %v2944_v42, 16  ;;  %v3257_v59 = vshrl.u32 %v2944_v42, 16  ;;  %v3263_v63 = vshll.u32 %v2945_v49, 16  ;;  %v3667_v42 = vld [vmem:[%s14758_s24 + $0x88] sm:$0xf] }
  0xee   : > { %v11947_v61 = vcombine.low %v3232_v52, %v3242_v56  ;;  %14014 = vmatprep.mubr.msk.bf16.mxu1 %vm352_vm1, %v11993_v53  ;;  %v3801_v62 = vsel %vm15159_vm7, %v3799_v55, %v3800_v40  ;;  %v3268_v2 = vshrl.u32 %v2946_v50, 16  ;;  %v15346_v4 = vpop.f32.mrf.mxu1  ;;  %v3249_v5 = vrot.slane %v3247_v57, 5  ;;  %v3668_v49 = vld [vmem:[%s14758_s24 + $0x8c] sm:$0x1] }
  0xef   : > { %v15339_v60 = vpop.f32.mrf.mxu0  ;;  %v11994_v12 = vcombine.low %v3798_v47, %v3801_v62  ;;  %v3255_v6 = vrot.slane %v3253_v58, 5  ;;  %v3259_v8 = vrot.slane %v3257_v59, 4  ;;  %v3265_v11 = vrot.slane %v3263_v63, 5  ;;  %v2950_v62 = vld [vmem:[%s14758_s24 + $0xac] sm:$0xf] }
  0xf0   : > { %13985 = vmatmul.mubr.msk.bf16.gmra.mxu0 %vm352_vm1, %v11947_v61  ;;  %v3270_v16 = vrot.slane %v3268_v2, 4  ;;  %v3271_v17 = vshll.u32 %v2946_v50, 16  ;;  %v3277_v18 = vshll.u32 %v2947_v7, 16  ;;  %v15352_v19 = vpop.f32.mrf.mxu1  ;;  %v3250_v20 = vor.u32 %v3249_v5, %v3246_v25  ;;  %v2949_v50 = vld [vmem:[%s14758_s24 + $0xa8] sm:$0xf] }
  0xf1   : > { %v15349_v10 = vpop.f32.mrf.mxu0  ;;  %14015 = vmatmul.mubr.msk.bf16.gmra.mxu1 %vm352_vm1, %v11994_v12  ;;  %v3260_v21 = vor.u32 %v3259_v8, %v3255_v6  ;;  %v3281_v14 = vshrl.u32 %v2947_v7, 16  ;;  %v3287_v22 = vshll.u32 %v2948_v0, 16  ;;  %v11978_v32 = vrot.slane %v3663_v3, 9  ;;  %v2951_v3 = vld [vmem:[%s14758_s24 + $0xb0] sm:$0x1] }
  0xf2   : > { %v3273_v28 = vrot.slane %v3271_v17, 5  ;;  %v3279_v30 = vrot.slane %v3277_v18, 5  ;;  %v3804_v33 = vrot.slane %v3664_v9, 5  ;;  %v15359_v35 = vpop.f32.mrf.mxu1  ;;  %v3251_v36 = vrot.slane %v3250_v20, 4 }
  0xf3   : > { %v15356_v27 = vpop.f32.mrf.mxu0  ;;  %v3261_v38 = vrot.slane %v3260_v21, 4  ;;  %v3283_v39 = vrot.slane %v3281_v14, 4  ;;  %v3289_v40 = vrot.slane %v3287_v22, 5  ;;  %v3807_v47 = vrot.slane %v3665_v23, 5  ;;  %v2953_v22 = vld [vmem:[%s14758_s24 + $0xb8] sm:$0xf] }
  0xf4   : > { %v3274_v45 = vor.u32 %v3273_v28, %v3270_v16  ;;  %v3805_v13 = vsel %vm15159_vm7, %v11978_v32, %v3804_v33  ;;  %v3806_v46 = vrot.slane %v3804_v33, 4  ;;  %v15368_v52 = vpop.f32.mrf.mxu1  ;;  %v3256_v53 = vsel %vm14796_vm4, %v3251_v36, %v3255_v6  ;;  %v2952_v16 = vld [vmem:[%s14758_s24 + $0xb4] sm:$0xf]  ;;  %v3669_v36 = vld [vmem:[%s14758_s24 + $0x90] sm:$0xe] }
  0xf5   : > { %v15362_v44 = vpop.f32.mrf.mxu0  ;;  %v3266_v55 = vsel %vm14796_vm4, %v3261_v38, %v3265_v11  ;;  %v3284_v25 = vor.u32 %v3283_v39, %v3279_v30  ;;  %v11979_v56 = vrot.slane %v3666_v34, 9  ;;  %v3811_v61 = vrot.slane %v3667_v42, 5  ;;  %v2954_v34 = vld [vmem:[%s14758_s24 + $0xbc] sm:$0x1] }
  0xf6   : > { %v11948_v58 = vcombine.low %v3256_v53, %v3266_v55  ;;  %v3275_v59 = vrot.slane %v3274_v45, 4  ;;  %v3808_v7 = vsel %vm15159_vm7, %v3806_v46, %v3807_v47  ;;  %v3814_v2 = vrot.slane %v3668_v49, 5  ;;  %v3671_v55 = vld [vmem:[%s14758_s24 + $0x98] sm:$0x1] }
  0xf7   : > { %v15374_v57 = vpop.f32.mrf.mxu0  ;;  %v3285_v63 = vrot.slane %v3284_v25, 4  ;;  %v11995_v0 = vcombine.low %v3805_v13, %v3808_v7  ;;  %v3292_v12 = vshrl.u32 %v2949_v50, 16  ;;  %v3812_v8 = vsel %vm15159_vm7, %v11979_v56, %v3811_v61  ;;  %v3670_v13 = vld [vmem:[%s14758_s24 + $0x94] sm:$0xf] }
  0xf8   : > { %13988 = vmatprep.mubr.msk.bf16.mxu0 %vm352_vm1, %v11948_v58  ;;  %v3280_v6 = vsel %vm14796_vm4, %v3275_v59, %v3279_v30  ;;  %v3813_v9 = vrot.slane %v3811_v61, 4  ;;  %v3295_v11 = vshll.u32 %v2949_v50, 16  ;;  %v15388_v17 = vpop.f32.mrf.mxu1  ;;  %v3301_v21 = vshll.u32 %v2950_v62, 16  ;;  %v3672_v61 = vld [vmem:[%s14758_s24 + $0x9c] sm:$0xe] }
  0xf9   : > { %v15380_v5 = vpop.f32.mrf.mxu0  ;;  %v3290_v18 = vsel %vm14796_vm4, %v3285_v63, %v3289_v40  ;;  %14018 = vmatprep.mubr.msk.bf16.mxu1 %vm352_vm1, %v11995_v0  ;;  %v3294_v20 = vrot.slane %v3292_v12, 4  ;;  %v3305_v14 = vshrl.u32 %v2950_v62, 16  ;;  %v3311_v33 = vshll.u32 %v2951_v3, 16  ;;  %v3673_v12 = vld [vmem:[%s14758_s24 + $0xa0] sm:$0xf] }
  0xfa   : > { %v11949_v28 = vcombine.low %v3280_v6, %v3290_v18  ;;  %v3815_v30 = vsel %vm15159_vm7, %v3813_v9, %v3814_v2  ;;  %v3297_v32 = vrot.slane %v3295_v11, 5  ;;  %v15400_v38 = vpop.f32.mrf.mxu1  ;;  %v3303_v40 = vrot.slane %v3301_v21, 5  ;;  %v3674_v18 = vld [vmem:[%s14758_s24 + $0xa4] sm:$0x1] }
  0xfb   : > { %v15394_v23 = vpop.f32.mrf.mxu0  ;;  %v11996_v39 = vcombine.low %v3812_v8, %v3815_v30  ;;  %v3307_v42 = vrot.slane %v3305_v14, 4  ;;  %v3316_v45 = vshrl.u32 %v2952_v16, 16  ;;  %v3313_v49 = vrot.slane %v3311_v33, 5  ;;  %v12017_v30 = vld [vmem:[%s14758_s24 + $0xc] sm:$0xf] }
  0xfc   : > { %13989 = vmatmul.mubr.msk.bf16.gmra.mxu0 %vm352_vm1, %v11949_v28  ;;  %v3298_v47 = vor.u32 %v3297_v32, %v3294_v20  ;;  %v3319_v50 = vshll.u32 %v2952_v16, 16  ;;  %v3325_v53 = vshll.u32 %v2953_v22, 16  ;;  %v15407_v25 = vpop.f32.mrf.mxu1  ;;  %v3329_v59 = vshrl.u32 %v2953_v22, 16 }
  0xfd   : > { %v15403_v46 = vpop.f32.mrf.mxu0  ;;  %14019 = vmatmul.mubr.msk.bf16.gmra.mxu1 %vm352_vm1, %v11996_v39  ;;  %v3308_v56 = vor.u32 %v3307_v42, %v3303_v40  ;;  %v3318_v58 = vrot.slane %v3316_v45, 4  ;;  %v3335_v7 = vshll.u32 %v2954_v34, 16  ;;  %v11980_v3 = vrot.slane %v3669_v36, 9 }
  0xfe   : > { %v3299_v63 = vrot.slane %v3298_v47, 4  ;;  %v3321_v0 = vrot.slane %v3319_v50, 5  ;;  %v3327_v2 = vrot.slane %v3325_v53, 5  ;;  %v15414_v6 = vpop.f32.mrf.mxu1  ;;  %v3331_v9 = vrot.slane %v3329_v59, 4  ;;  %v12018_v50 = vld [vmem:[%s14758_s24 + $0x10] sm:$0xf] }
  0xff   : > { %v15411_v62 = vpop.f32.mrf.mxu0  ;;  %v3309_v8 = vrot.slane %v3308_v56, 4  ;;  %v3337_v11 = vrot.slane %v3335_v7, 5  ;;  %v3818_v16 = vrot.slane %v3670_v13, 5  ;;  %v3821_v22 = vrot.slane %v3671_v55, 5  ;;  %v12019_v56 = vld [vmem:[%s14758_s24 + $0x14] sm:$0x1] }
 0x100   : > { %18854 = vst [vmem:[#allocation13_spill] sm:$0xff] %v15411_v62  ;;  %v3304_v21 = vsel %vm14796_vm4, %v3299_v63, %v3303_v40  ;;  %v3322_v14 = vor.u32 %v3321_v0, %v3318_v58  ;;  %v11981_v28 = vrot.slane %v3672_v61, 9  ;;  %v15422_v32 = vpop.f32.mrf.mxu1  ;;  %v3332_v34 = vor.u32 %v3331_v9, %v3327_v2  ;;  %v12025_v62 = vld [vmem:[%s14758_s24 + $0x2c] sm:$0x1] }
 0x101   : > { %v15417_v20 = vpop.f32.mrf.mxu0  ;;  %v3314_v33 = vsel %vm14796_vm4, %v3309_v8, %v3313_v49  ;;  %v3819_v36 = vsel %vm15159_vm7, %v11980_v3, %v3818_v16  ;;  %v3820_v39 = vrot.slane %v3818_v16, 4  ;;  %v3825_v40 = vrot.slane %v3673_v12, 5  ;;  %v3675_v12 = vld [vmem:[%s14758_s24 + $0xa8] sm:$0xe]  ;;  %v3676_v8 = vld [vmem:[%s14758_s24 + $0xac] sm:$0xf] }
 0x102   : > { %18855 = vst [vmem:[#allocation14_spill] sm:$0xff] %v15417_v20  ;;  %v11950_v45 = vcombine.low %v3304_v21, %v3314_v33  ;;  %v3323_v13 = vrot.slane %v3322_v14, 4  ;;  %v3828_v47 = vrot.slane %v3674_v18, 5  ;;  %v15431_v53 = vpop.f32.mrf.mxu1  ;;  %v3333_v55 = vrot.slane %v3332_v34, 4 }
 0x103   : > { %v15428_v42 = vpop.f32.mrf.mxu0  ;;  %v3822_v49 = vsel %vm15159_vm7, %v3820_v39, %v3821_v22  ;;  %v4251_v58 = vshrl.u32 %v12017_v30, 16  ;;  %v4254_v59 = vshll.u32 %v12017_v30, 16  ;;  %v3826_v0 = vsel %vm15159_vm7, %v11981_v28, %v3825_v40  ;;  %v3677_v22 = vld [vmem:[%s14758_s24 + $0xb0] sm:$0x1]  ;;  %v12021_v39 = vld [vmem:[%s14758_s24 + $0x1c] sm:$0xf] }
 0x104   : > { %18856 = vst [vmem:[#allocation15_spill] sm:$0xff] %v15428_v42  ;;  %13992 = vmatprep.mubr.msk.bf16.mxu0 %vm352_vm1, %v11950_v45  ;;  %v3328_v61 = vsel %vm14796_vm4, %v3323_v13, %v3327_v2  ;;  %v11997_v63 = vcombine.low %v3819_v36, %v3822_v49  ;;  %v3827_v3 = vrot.slane %v3825_v40, 4  ;;  %v15445_v9 = vpop.f32.mrf.mxu1  ;;  %v3338_v16 = vsel %vm14796_vm4, %v3333_v55, %v3337_v11  ;;  %v12020_v36 = vld [vmem:[%s14758_s24 + $0x18] sm:$0xf] }
 0x105   : > { %v15436_v7 = vpop.f32.mrf.mxu0  ;;  %v4253_v18 = vrot.slane %v4251_v58, 4  ;;  %v4256_v21 = vrot.slane %v4254_v59, 5  ;;  %v4260_v14 = vshll.u32 %v12018_v50, 16  ;;  %v11951_v2 = vcombine.low %v3328_v61, %v3338_v16 }
 0x106   : > { %18857 = vst [vmem:[#allocation16_spill] sm:$0xff] %v15436_v7  ;;  %14022 = vmatprep.mubr.msk.bf16.mxu1 %vm352_vm1, %v11997_v63  ;;  %v3829_v28 = vsel %vm15159_vm7, %v3827_v3, %v3828_v47  ;;  %v4264_v33 = vshrl.u32 %v12018_v50, 16  ;;  %v4270_v34 = vshll.u32 %v12019_v56, 16  ;;  %v15457_v45 = vpop.f32.mrf.mxu1  ;;  %v11982_v55 = vrot.slane %v3675_v12, 9  ;;  %v12022_v63 = vld [vmem:[%s14758_s24 + $0x20] sm:$0x1] }
 0x107   : > { %v15450_v30 = vpop.f32.mrf.mxu0  ;;  %v11998_v11 = vcombine.low %v3826_v0, %v3829_v28  ;;  %v4257_v13 = vor.u32 %v4256_v21, %v4253_v18  ;;  %v4262_v40 = vrot.slane %v4260_v14, 5  ;;  %13993 = vmatmul.mubr.msk.bf16.gmra.mxu0 %vm352_vm1, %v11951_v2  ;;  %v3832_v47 = vrot.slane %v3676_v8, 5  ;;  %v3678_v8 = vld [vmem:[%s14758_s24 + $0xb4] sm:$0xe] }
 0x108   : > { %18858 = vst [vmem:[#allocation17_spill] sm:$0xff] %v15450_v30  ;;  %v4266_v58 = vrot.slane %v4264_v33, 4  ;;  %v4272_v59 = vrot.slane %v4270_v34, 5  ;;  %v3835_v50 = vrot.slane %v3677_v22, 5  ;;  %v15462_v56 = vpop.f32.mrf.mxu1  ;;  %v4275_v0 = vshrl.u32 %v12020_v36, 16 }
 0x109   : > { %v15459_v49 = vpop.f32.mrf.mxu0  ;;  %14023 = vmatmul.mubr.msk.bf16.gmra.mxu1 %vm352_vm1, %v11998_v11  ;;  %v4258_v61 = vrot.slane %v4257_v13, 4  ;;  %v4278_v3 = vshll.u32 %v12020_v36, 16  ;;  %v4284_v12 = vshll.u32 %v12021_v39, 16  ;;  %v3833_v21 = vsel %vm15159_vm7, %v11982_v55, %v3832_v47  ;;  %v3679_v22 = vld [vmem:[%s14758_s24 + $0xb8] sm:$0xf] }
 0x10a   : > { %18859 = vst [vmem:[#allocation18_spill] sm:$0xff] %v15459_v49  ;;  %v4267_v18 = vor.u32 %v4266_v58, %v4262_v40  ;;  %v3834_v14 = vrot.slane %v3832_v47, 4  ;;  %v4288_v2 = vshrl.u32 %v12021_v39, 16  ;;  %v15472_v28 = vpop.f32.mrf.mxu1  ;;  %v4277_v34 = vrot.slane %v4275_v0, 4  ;;  %v3680_v13 = vld [vmem:[%s14758_s24 + $0xbc] sm:$0x1] }
 0x10b   : > { %v15466_v16 = vpop.f32.mrf.mxu0  ;;  %v4263_v33 = vsel %vm14796_vm4, %v4258_v61, %v4262_v40  ;;  %v4280_v36 = vrot.slane %v4278_v3, 5  ;;  %v4286_v11 = vrot.slane %v4284_v12, 5  ;;  %v4294_v47 = vshll.u32 %v12022_v63, 16  ;;  %v12023_v61 = vld [vmem:[%s14758_s24 + $0x24] sm:$0xf] }
 0x10c   : > { %18860 = vst [vmem:[#allocation19_spill] sm:$0xff] %v15466_v16  ;;  %v4268_v58 = vrot.slane %v4267_v18, 4  ;;  %v3836_v39 = vsel %vm15159_vm7, %v3834_v14, %v3835_v50  ;;  %v4290_v55 = vrot.slane %v4288_v2, 4  ;;  %v15481_v49 = vpop.f32.mrf.mxu1  ;;  %v11983_v42 = vrot.slane %v3678_v8, 9  ;;  %v12024_v0 = vld [vmem:[%s14758_s24 + $0x28] sm:$0xf] }
 0x10d   : > { %v15477_v16 = vpop.f32.mrf.mxu0  ;;  %v11999_v30 = vcombine.low %v3833_v21, %v3836_v39  ;;  %v4281_v7 = vor.u32 %v4280_v36, %v4277_v34  ;;  %v3839_v40 = vrot.slane %v3679_v22, 5  ;;  %v3842_v20 = vrot.slane %v3680_v13, 5  ;;  %v12026_v13 = vld [vmem:[%s14758_s24 + $0x30] sm:$0xf] }
 0x10e   : > { %18861 = vst [vmem:[#allocation20_spill] sm:$0xff] %v15477_v16  ;;  %v4273_v12 = vsel %vm14796_vm4, %v4268_v58, %v4272_v59  ;;  %v4291_v18 = vor.u32 %v4290_v55, %v4286_v11  ;;  %v4296_v16 = vrot.slane %v4294_v47, 5  ;;  %v15490_v50 = vpop.f32.mrf.mxu1  ;;  %v4299_v59 = vshrl.u32 %v12023_v61, 16 }
 0x10f   : > { %v15485_v3 = vpop.f32.mrf.mxu0  ;;  %v12066_v63 = vcombine.low %v4263_v33, %v4273_v12  ;;  %14026 = vmatprep.mubr.msk.bf16.mxu1 %vm352_vm1, %v11999_v30  ;;  %v4282_v21 = vrot.slane %v4281_v7, 4  ;;  %v3840_v14 = vsel %vm15159_vm7, %v11983_v42, %v3839_v40  ;;  %v3841_v2 = vrot.slane %v3839_v40, 4  ;;  %v12027_v12 = vld [vmem:[%s14758_s24 + $0x34] sm:$0xf] }
 0x110   : > { %18862 = vst [vmem:[#allocation21_spill] sm:$0xff] %v15485_v3  ;;  %v4292_v22 = vrot.slane %v4291_v18, 4  ;;  %v4302_v34 = vshll.u32 %v12023_v61, 16  ;;  %v4308_v36 = vshll.u32 %v12024_v0, 16  ;;  %v4312_v30 = vshrl.u32 %v12024_v0, 16 }
 0x111   : > { %v15495_v8 = vpop.f32.mrf.mxu0  ;;  %14032 = vmatprep.mubr.msk.bf16.mxu0 %vm352_vm1, %v12066_v63  ;;  %v4287_v33 = vsel %vm14796_vm4, %v4282_v21, %v4286_v11  ;;  %v3843_v7 = vsel %vm15159_vm7, %v3841_v2, %v3842_v20  ;;  %v4318_v42 = vshll.u32 %v12025_v62, 16  ;;  %v15503_v58 = vpop.f32.mrf.mxu1  ;;  %v4301_v40 = vrot.slane %v4299_v59, 4  ;;  %v12028_v11 = vld [vmem:[%s14758_s24 + $0x38] sm:$0x1]  ;;  %v12098_v62 = vld [vmem:[%s14758_s24 + $0xc] sm:$0xe] }
 0x112   : > { %18863 = vst [vmem:[#allocation22_spill] sm:$0xff] %v15495_v8  ;;  %v4297_v55 = vsel %vm14796_vm4, %v4292_v22, %v4296_v16  ;;  %v12000_v47 = vcombine.low %v3840_v14, %v3843_v7  ;;  %v4304_v61 = vrot.slane %v4302_v34, 5  ;;  %v4310_v63 = vrot.slane %v4308_v36, 5  ;;  %v12099_v59 = vld [vmem:[%s14758_s24 + $0x10] sm:$0xf] }
 0x113   : > { %v15505_v39 = vpop.f32.mrf.mxu0  ;;  %v12067_v18 = vcombine.low %v4287_v33, %v4297_v55  ;;  %v4314_v20 = vrot.slane %v4312_v30, 4  ;;  %v4320_v0 = vrot.slane %v4318_v42, 5  ;;  %v15512_v21 = vpop.f32.mrf.mxu1  ;;  %v6022_v16 = vsel %vm401_vm0, %v15282_v48, 0  ;;  %v12100_v30 = vld [vmem:[%s14758_s24 + $0x14] sm:$0x1] }
 0x114   : > { %18864 = vst [vmem:[#allocation23_spill] sm:$0xff] %v15505_v39  ;;  %14027 = vmatmul.mubr.msk.bf16.gmra.mxu1 %vm352_vm1, %v12000_v47  ;;  %v4305_v39 = vor.u32 %v4304_v61, %v4301_v40  ;;  %v4323_v14 = vshrl.u32 %v12026_v13, 16  ;;  %v4326_v22 = vshll.u32 %v12026_v13, 16  ;;  %v4332_v36 = vshll.u32 %v12027_v12, 16  ;;  %v12101_v13 = vld [vmem:[%s14758_s24 + $0x18] sm:$0xe] }
 0x115   : > { %v15514_v2 = vpop.f32.mrf.mxu0  ;;  %14033 = vmatmul.mubr.msk.bf16.vlgmr.msra.gmra.mxu0 %vm352_vm1, %v12067_v18  ;;  %v4315_v34 = vor.u32 %v4314_v20, %v4310_v63  ;;  %v4336_v33 = vshrl.u32 %v12027_v12, 16  ;;  %v4342_v7 = vshll.u32 %v12028_v11, 16  ;;  %v15522_v42 = vpop.f32.mrf.mxu1  ;;  %v12146_v61 = vrot.slane %v12098_v62, 9  ;;  %v12103_v62 = vld [vmem:[%s14758_s24 + $0x20] sm:$0x1] }
 0x116   : > { %18865 = vst [vmem:[#allocation24_spill] sm:$0xff] %v15514_v2  ;;  %v4306_v47 = vrot.slane %v4305_v39, 4  ;;  %14099 = vmatpush3.bf16.msra.mxu0 %v6022_v16  ;;  %v4325_v48 = vrot.slane %v4323_v14, 4  ;;  %v4328_v40 = vrot.slane %v4326_v22, 5  ;;  %v4334_v18 = vrot.slane %v4332_v36, 5 }
 0x117   : > { %v15524_v55 = vpop.f32.mrf.mxu0  ;;  %v4316_v2 = vrot.slane %v4315_v34, 4  ;;  %v4338_v20 = vrot.slane %v4336_v33, 4  ;;  %v4344_v8 = vrot.slane %v4342_v7, 5  ;;  %v15527_v12 = vpop.f32.mrf.mxu1  ;;  %v5090_v16 = vrot.slane %v12099_v59, 5  ;;  %v12102_v22 = vld [vmem:[%s14758_s24 + $0x1c] sm:$0xf] }
 0x118   : > { %18866 = vst [vmem:[#allocation25_spill] sm:$0xff] %v15524_v55  ;;  %v4311_v55 = vsel %vm14796_vm4, %v4306_v47, %v4310_v63  ;;  %v4329_v39 = vor.u32 %v4328_v40, %v4325_v48  ;;  %v5093_v14 = vrot.slane %v12100_v30, 5  ;;  %v15539_v33 = vadd.f32 %v15346_v4, %v15265_v31  ;;  %v12030_v40 = vld [vmem:[%s14758_s24 + $0x40] sm:$0xf] }
 0x119   : > { %v15529_v11 = vpop.f32.mrf.mxu0  ;;  %v4321_v34 = vsel %vm14796_vm4, %v4316_v2, %v4320_v0  ;;  %v4339_v36 = vor.u32 %v4338_v20, %v4334_v18  ;;  %v12147_v7 = vrot.slane %v12101_v13, 9  ;;  %v15542_v3 = vpop.f32.mrf.mxu1  ;;  %v5091_v30 = vsel %vm15159_vm7, %v12146_v61, %v5090_v16  ;;  %v12031_v0 = vld [vmem:[%s14758_s24 + $0x44] sm:$0x1] }
 0x11a   : > { %18867 = vst [vmem:[#allocation26_spill] sm:$0xff] %v15529_v11  ;;  %18868 = vst [vmem:[#allocation27_spill] sm:$0xff] %v15539_v33  ;;  %v12029_v11 = vld [vmem:[%s14758_s24 + $0x3c] sm:$0xf]  ;;  %v12068_v47 = vcombine.low %v4311_v55, %v4321_v34  ;;  %v4330_v59 = vrot.slane %v4329_v39, 4  ;;  %v5092_v48 = vrot.slane %v5090_v16, 4  ;;  %v15563_v16 = vadd.f32 %v15352_v19, %v15271_v43 }
 0x11b   : > { %v15544_v63 = vpop.f32.mrf.mxu0  ;;  %v4340_v2 = vrot.slane %v4339_v36, 4  ;;  %v5097_v20 = vrot.slane %v12102_v22, 5  ;;  %v5100_v31 = vrot.slane %v12103_v62, 5  ;;  %v15550_v4 = vpop.f32.mrf.mxu1  ;;  %v6748_v39 = vsel %vm401_vm0, %v15312_v24, 0  ;;  %v12032_v22 = vld [vmem:[%s14758_s24 + $0x48] sm:$0xf] }
 0x11c   : > { %18869 = vst [vmem:[#allocation28_spill] sm:$0xff] %v15544_v63  ;;  %14036 = vmatprep.mubr.msk.bf16.mxu0 %vm352_vm1, %v12068_v47  ;;  %v4335_v55 = vsel %vm14796_vm4, %v4330_v59, %v4334_v18  ;;  %v5094_v61 = vsel %vm15159_vm7, %v5092_v48, %v5093_v14  ;;  %18871 = vst [vmem:[#allocation30_spill] sm:$0xff] %v15563_v16  ;;  %v12033_v47 = vld [vmem:[%s14758_s24 + $0x4c] sm:$0xf]  ;;  %v15577_v43 = vadd.f32 %v15359_v35, %v15287_v54 }
 0x11d   : > { %v15552_v13 = vpop.f32.mrf.mxu0  ;;  %v4345_v62 = vsel %vm14796_vm4, %v4340_v2, %v4344_v8  ;;  %v12163_v34 = vcombine.low %v5091_v30, %v5094_v61  ;;  %v5098_v18 = vsel %vm15159_vm7, %v12147_v7, %v5097_v20  ;;  %v5099_v36 = vrot.slane %v5097_v20, 4  ;;  %v15571_v14 = vpop.f32.mrf.mxu1  ;;  %v12034_v8 = vld [vmem:[%s14758_s24 + $0x50] sm:$0x1]  ;;  %v12104_v30 = vld [vmem:[%s14758_s24 + $0x24] sm:$0xe] }
 0x11e   : > { %18870 = vst [vmem:[#allocation29_spill] sm:$0xff] %v15552_v13  ;;  %v12069_v24 = vcombine.low %v4335_v55, %v4345_v62  ;;  %18873 = vst [vmem:[#allocation32_spill] sm:$0xff] %v15577_v43  ;;  %v4347_v19 = vshrl.u32 %v12029_v11, 16  ;;  %v4350_v48 = vshll.u32 %v12029_v11, 16  ;;  %v4356_v2 = vshll.u32 %v12030_v40, 16 }
 0x11f   : > { %v15573_v59 = vpop.f32.mrf.mxu0  ;;  %14066 = vmatprep.mubr.msk.bf16.mxu1 %vm352_vm1, %v12163_v34  ;;  %v5101_v7 = vsel %vm15159_vm7, %v5099_v36, %v5100_v31  ;;  %v4360_v20 = vshrl.u32 %v12030_v40, 16  ;;  %v4366_v61 = vshll.u32 %v12031_v0, 16  ;;  %v12105_v13 = vld [vmem:[%s14758_s24 + $0x28] sm:$0xf]  ;;  %v15585_v63 = vpop.f32.mrf.mxu1  ;;  %v4371_v62 = vshrl.u32 %v12032_v22, 16 }
 0x120   : > { %18872 = vst [vmem:[#allocation31_spill] sm:$0xff] %v15573_v59  ;;  %18874 = vst [vmem:[#allocation33_spill] sm:$0xff] %v15585_v63  ;;  %14037 = vmatmul.mubr.msk.bf16.gmra.mxu0 %vm352_vm1, %v12069_v24  ;;  %v12164_v54 = vcombine.low %v5098_v18, %v5101_v7  ;;  %v4349_v35 = vrot.slane %v4347_v19, 4  ;;  %v4352_v11 = vrot.slane %v4350_v48, 5  ;;  %v12106_v43 = vld [vmem:[%s14758_s24 + $0x2c] sm:$0x1] }
 0x121   : > { %v15587_v55 = vpop.f32.mrf.mxu0  ;;  %v4358_v34 = vrot.slane %v4356_v2, 5  ;;  %v4362_v16 = vrot.slane %v4360_v20, 4  ;;  %v4368_v59 = vrot.slane %v4366_v61, 5  ;;  %v4374_v31 = vshll.u32 %v12032_v22, 16  ;;  %v15591_v40 = vpop.f32.mrf.mxu1  ;;  %v12437_v36 = vld [vmem:[%s18836_s1 + $0x28] sm:$0xf] }
 0x122   : > { %18875 = vst [vmem:[#allocation34_spill] sm:$0xff] %v15587_v55  ;;  %18876 = vst [vmem:[#allocation35_spill] sm:$0xff] %v15591_v40  ;;  %14067 = vmatmul.mubr.msk.bf16.vlgmr.msra.gmra.mxu1 %vm352_vm1, %v12164_v54  ;;  %v4353_v18 = vor.u32 %v4352_v11, %v4349_v35  ;;  %v4373_v24 = vrot.slane %v4371_v62, 4  ;;  %v4380_v19 = vshll.u32 %v12033_v47, 16  ;;  %v4384_v48 = vshrl.u32 %v12033_v47, 16  ;;  %14380 = vmatprep.subr.msk.bf16.mxu0 %vm401_vm0, %v12437_v36 }
 0x123   : > { %v15593_v0 = vpop.f32.mrf.mxu0  ;;  %v12107_v7 = vld [vmem:[%s14758_s24 + $0x30] sm:$0xe]  ;;  %14133 = vmatpush3.bf16.msra.mxu1 %v6748_v39  ;;  %v4363_v22 = vor.u32 %v4362_v16, %v4358_v34  ;;  %v4376_v2 = vrot.slane %v4374_v31, 5  ;;  %v4390_v20 = vshll.u32 %v12034_v8, 16  ;;  %v12148_v61 = vrot.slane %v12104_v30, 9 }
 0x124   : > { %18877 = vst [vmem:[#allocation36_spill] sm:$0xff] %v15593_v0  ;;  %v12108_v55 = vld [vmem:[%s14758_s24 + $0x34] sm:$0xf]  ;;  %v15602_v0 = vpop.f32.mrf.mxu1  ;;  %v4354_v40 = vrot.slane %v4353_v18, 4  ;;  %v4382_v54 = vrot.slane %v4380_v19, 5  ;;  %v4386_v35 = vrot.slane %v4384_v48, 4 }
 0x125   : > { %v15604_v33 = vpop.f32.mrf.mxu0  ;;  %v5104_v11 = vrot.slane %v12105_v13, 5  ;;  %v4364_v47 = vrot.slane %v4363_v22, 4  ;;  %v4377_v62 = vor.u32 %v4376_v2, %v4373_v24  ;;  %v4392_v63 = vrot.slane %v4390_v20, 5  ;;  %v12109_v13 = vld [vmem:[%s14758_s24 + $0x38] sm:$0x1] }
 0x126   : > { %18878 = vst [vmem:[#allocation37_spill] sm:$0xff] %v15604_v33  ;;  %v5107_v36 = vrot.slane %v12106_v43, 5  ;;  %v15606_v39 = vpop.f32.mrf.mxu1  ;;  %v4359_v8 = vsel %vm14796_vm4, %v4354_v40, %v4358_v34  ;;  %v4387_v30 = vor.u32 %v4386_v35, %v4382_v54  ;;  %v15619_v43 = vadd.f32 %v15388_v17, %v15304_v15  ;;  %v12035_v22 = vld [vmem:[%s14758_s24 + $0x54] sm:$0xf]  ;;  %v12518_v40 = vld [vmem:[%s18836_s1 + $0x2c] sm:$0xf] }
 0x127   : > { %v15608_v16 = vpop.f32.mrf.mxu0  ;;  %v5105_v31 = vsel %vm15159_vm7, %v12148_v61, %v5104_v11  ;;  %v5106_v18 = vrot.slane %v5104_v11, 4  ;;  %v4369_v24 = vsel %vm14796_vm4, %v4364_v47, %v4368_v59  ;;  %v4378_v19 = vrot.slane %v4377_v62, 4  ;;  %v12036_v15 = vld [vmem:[%s14758_s24 + $0x58] sm:$0xf]  ;;  %v12037_v17 = vld [vmem:[%s14758_s24 + $0x5c] sm:$0x1]  ;;  %14381 = vmatprep.subr.msk.bf16.mxu1 %vm401_vm0, %v12518_v40 }
 0x128   : > { %18879 = vst [vmem:[#allocation38_spill] sm:$0xff] %v15608_v16  ;;  %18880 = vst [vmem:[#allocation39_spill] sm:$0xff] %v15619_v43  ;;  %v12149_v48 = vrot.slane %v12107_v7, 9  ;;  %v15622_v34 = vpop.f32.mrf.mxu1  ;;  %v12070_v20 = vcombine.low %v4359_v8, %v4369_v24  ;;  %v4388_v61 = vrot.slane %v4387_v30, 4  ;;  %v5111_v35 = vrot.slane %v12108_v55, 5 }
 0x129   : > { %v15627_v2 = vpop.f32.mrf.mxu0  ;;  %v5108_v59 = vsel %vm15159_vm7, %v5106_v18, %v5107_v36  ;;  %v4383_v7 = vsel %vm14796_vm4, %v4378_v19, %v4382_v54  ;;  %v5114_v47 = vrot.slane %v12109_v13, 5  ;;  %v15638_v62 = vadd.f32 %v15400_v38, %v15314_v26  ;;  %v12038_v8 = vld [vmem:[%s14758_s24 + $0x60] sm:$0xf]  ;;  %v12039_v26 = vld [vmem:[%s14758_s24 + $0x64] sm:$0xf] }
 0x12a   : > { %18881 = vst [vmem:[#allocation40_spill] sm:$0xff] %v15627_v2  ;;  %v12165_v11 = vcombine.low %v5105_v31, %v5108_v59  ;;  %v15641_v30 = vpop.f32.mrf.mxu1  ;;  %14040 = vmatprep.mubr.msk.bf16.mxu0 %vm352_vm1, %v12070_v20  ;;  %v4393_v55 = vsel %vm14796_vm4, %v4388_v61, %v4392_v63  ;;  %v5112_v54 = vsel %vm15159_vm7, %v12149_v48, %v5111_v35  ;;  %v5113_v31 = vrot.slane %v5111_v35, 4  ;;  %v12040_v19 = vld [vmem:[%s14758_s24 + $0x68] sm:$0x1] }
 0x12b   : > { %18882 = vst [vmem:[#allocation41_spill] sm:$0xff] %v15638_v62  ;;  %v15643_v36 = vpop.f32.mrf.mxu0  ;;  %v15652_v18 = vadd.f32 %v15407_v25, %v15320_v37  ;;  %v15657_v38 = vadd.f32 %v15368_v52, %v15298_v1  ;;  %v12071_v13 = vcombine.low %v4383_v7, %v4393_v55  ;;  %v4395_v24 = vshrl.u32 %v12035_v22, 16  ;;  %v12110_v1 = vld [vmem:[%s14758_s24 + $0x3c] sm:$0xe]  ;;  %v12111_v7 = vld [vmem:[%s14758_s24 + $0x40] sm:$0xf] }
 0x12c   : > { %18883 = vst [vmem:[#allocation42_spill] sm:$0xff] %v15643_v36  ;;  %14070 = vmatprep.mubr.msk.bf16.mxu1 %vm352_vm1, %v12165_v11  ;;  %v4398_v63 = vshll.u32 %v12035_v22, 16  ;;  %v15661_v40 = vpop.f32.mrf.mxu1  ;;  %v5115_v37 = vsel %vm15159_vm7, %v5113_v31, %v5114_v47  ;;  %v4404_v25 = vshll.u32 %v12036_v15, 16  ;;  %v4408_v20 = vshrl.u32 %v12036_v15, 16  ;;  %v12112_v15 = vld [vmem:[%s14758_s24 + $0x44] sm:$0x1] }
 0x12d   : > { %18884 = vst [vmem:[#allocation43_spill] sm:$0xff] %v15652_v18  ;;  %v15663_v48 = vpop.f32.mrf.mxu0  ;;  %v4414_v61 = vshll.u32 %v12037_v17, 16  ;;  %14041 = vmatmul.mubr.msk.bf16.gmra.mxu0 %vm352_vm1, %v12071_v13  ;;  %v12166_v52 = vcombine.low %v5112_v54, %v5115_v37  ;;  %v4397_v59 = vrot.slane %v4395_v24, 4  ;;  %v4419_v22 = vshrl.u32 %v12038_v8, 16  ;;  %v12114_v62 = vld [vmem:[%s14758_s24 + $0x4c] sm:$0xf] }
 0x12e   : > { %18885 = vst [vmem:[#allocation44_spill] sm:$0xff] %v15663_v48  ;;  %v4400_v35 = vrot.slane %v4398_v63, 5  ;;  %v15670_v11 = vpop.f32.mrf.mxu1  ;;  %v4406_v48 = vrot.slane %v4404_v25, 5  ;;  %v4410_v36 = vrot.slane %v4408_v20, 4  ;;  %v4422_v31 = vshll.u32 %v12038_v8, 16 }
 0x12f   : > { %v15672_v55 = vpop.f32.mrf.mxu0  ;;  %v4416_v47 = vrot.slane %v4414_v61, 5  ;;  %14071 = vmatmul.mubr.msk.bf16.gmra.mxu1 %vm352_vm1, %v12166_v52  ;;  %v4421_v54 = vrot.slane %v4419_v22, 4  ;;  %v4428_v13 = vshll.u32 %v12039_v26, 16  ;;  %v4432_v24 = vshrl.u32 %v12039_v26, 16  ;;  %v12113_v63 = vld [vmem:[%s14758_s24 + $0x48] sm:$0xe] }
 0x130   : > { %18886 = vst [vmem:[#allocation45_spill] sm:$0xff] %v15672_v55  ;;  %v4401_v17 = vor.u32 %v4400_v35, %v4397_v59  ;;  %v15677_v37 = vpop.f32.mrf.mxu1  ;;  %v4411_v2 = vor.u32 %v4410_v36, %v4406_v48  ;;  %v4424_v55 = vrot.slane %v4422_v31, 5  ;;  %v4438_v25 = vshll.u32 %v12040_v19, 16  ;;  %v12115_v52 = vld [vmem:[%s14758_s24 + $0x50] sm:$0x1] }
 0x131   : > { %v15679_v18 = vpop.f32.mrf.mxu0  ;;  %v12150_v20 = vrot.slane %v12110_v1, 9  ;;  %v4430_v8 = vrot.slane %v4428_v13, 5  ;;  %v4434_v16 = vrot.slane %v4432_v24, 4  ;;  %v5118_v43 = vrot.slane %v12111_v7, 5  ;;  %v12041_v24 = vld [vmem:[%s14758_s24 + $0x6c] sm:$0xf] }
 0x132   : > { %18887 = vst [vmem:[#allocation46_spill] sm:$0xff] %v15679_v18  ;;  %v4402_v61 = vrot.slane %v4401_v17, 4  ;;  %v4412_v35 = vrot.slane %v4411_v2, 4  ;;  %v4425_v22 = vor.u32 %v4424_v55, %v4421_v54  ;;  %v4440_v26 = vrot.slane %v4438_v25, 5  ;;  %v12042_v25 = vld [vmem:[%s14758_s24 + $0x70] sm:$0xf] }
 0x133   : > { %v15683_v59 = vpop.f32.mrf.mxu0  ;;  %v5121_v33 = vrot.slane %v12112_v15, 5  ;;  %v4435_v31 = vor.u32 %v4434_v16, %v4430_v8  ;;  %v5119_v19 = vsel %vm15159_vm7, %v12150_v20, %v5118_v43  ;;  %v5120_v1 = vrot.slane %v5118_v43, 4  ;;  %v15689_v17 = vpop.f32.mrf.mxu1 }
 0x134   : > { %18888 = vst [vmem:[#allocation47_spill] sm:$0xff] %v15683_v59  ;;  %v4407_v36 = vsel %vm14796_vm4, %v4402_v61, %v4406_v48  ;;  %v15695_v2 = vadd.f32 %v15414_v6, %v15331_v51  ;;  %v4417_v55 = vsel %vm14796_vm4, %v4412_v35, %v4416_v47  ;;  %v4426_v15 = vrot.slane %v4425_v22, 4  ;;  %v12043_v35 = vld [vmem:[%s14758_s24 + $0x74] sm:$0x1] }
 0x135   : > { %v15691_v7 = vpop.f32.mrf.mxu0  ;;  %v12151_v48 = vrot.slane %v12113_v63, 9  ;;  %v12072_v16 = vcombine.low %v4407_v36, %v4417_v55  ;;  %v4436_v54 = vrot.slane %v4435_v31, 4  ;;  %v5122_v43 = vsel %vm15159_vm7, %v5120_v1, %v5121_v33  ;;  %v15703_v20 = vpop.f32.mrf.mxu1  ;;  %v12044_v33 = vld [vmem:[%s14758_s24 + $0x78] sm:$0xf]  ;;  %v12046_v55 = vld [vmem:[%s14758_s24 + $0x80] sm:$0x1] }
 0x136   : > { %18889 = vst [vmem:[#allocation48_spill] sm:$0xff] %v15691_v7  ;;  %v5125_v13 = vrot.slane %v12114_v62, 5  ;;  %v4431_v6 = vsel %vm14796_vm4, %v4426_v15, %v4430_v8  ;;  %v12167_v47 = vcombine.low %v5119_v19, %v5122_v43  ;;  %v15711_v63 = vadd.f32 %v15422_v32, %v15339_v60  ;;  %v12045_v60 = vld [vmem:[%s14758_s24 + $0x7c] sm:$0xf]  ;;  %v12120_v7 = vld [vmem:[%s14758_s24 + $0x64] sm:$0xf] }
 0x137   : > { %v15705_v51 = vpop.f32.mrf.mxu0  ;;  %v5128_v61 = vrot.slane %v12115_v52, 5  ;;  %14044 = vmatprep.mubr.msk.bf16.mxu0 %vm352_vm1, %v12072_v16  ;;  %v4441_v62 = vsel %vm14796_vm4, %v4436_v54, %v4440_v26  ;;  %v15722_v8 = vadd.f32 %v15431_v53, %v15349_v10  ;;  %v15725_v32 = vpop.f32.mrf.mxu1  ;;  %v15732_v26 = vadd.f32 %v15445_v9, %v15356_v27  ;;  %v12116_v16 = vld [vmem:[%s14758_s24 + $0x54] sm:$0xe] }
 0x138   : > { %18890 = vst [vmem:[#allocation49_spill] sm:$0xff] %v15705_v51  ;;  %v5126_v22 = vsel %vm15159_vm7, %v12151_v48, %v5125_v13  ;;  %v5127_v36 = vrot.slane %v5125_v13, 4  ;;  %v12073_v31 = vcombine.low %v4431_v6, %v4441_v62  ;;  %14074 = vmatprep.mubr.msk.bf16.mxu1 %vm352_vm1, %v12167_v47  ;;  %v4443_v19 = vshrl.u32 %v12041_v24, 16  ;;  %v12117_v6 = vld [vmem:[%s14758_s24 + $0x58] sm:$0xf] }
 0x139   : > { %18891 = vst [vmem:[#allocation50_spill] sm:$0xff] %v15722_v8  ;;  %v15727_v52 = vpop.f32.mrf.mxu0  ;;  %18893 = vst [vmem:[#allocation52_spill] sm:$0xff] %v15732_v26  ;;  %v4446_v1 = vshll.u32 %v12041_v24, 16  ;;  %v4452_v53 = vshll.u32 %v12042_v25, 16  ;;  %v4456_v15 = vshrl.u32 %v12042_v25, 16  ;;  %v4462_v48 = vshll.u32 %v12043_v35, 16  ;;  %v15738_v54 = vpop.f32.mrf.mxu1 }
 0x13a   : > { %18892 = vst [vmem:[#allocation51_spill] sm:$0xff] %v15727_v52  ;;  %v5129_v10 = vsel %vm15159_vm7, %v5127_v36, %v5128_v61  ;;  %14045 = vmatmul.mubr.msk.bf16.gmra.mxu0 %vm352_vm1, %v12073_v31  ;;  %v4445_v9 = vrot.slane %v4443_v19, 4  ;;  %v4467_v24 = vshrl.u32 %v12044_v33, 16  ;;  %v4470_v36 = vshll.u32 %v12044_v33, 16  ;;  %v12118_v25 = vld [vmem:[%s14758_s24 + $0x5c] sm:$0x1] }
 0x13b   : > { %v15740_v43 = vpop.f32.mrf.mxu0  ;;  %v12168_v27 = vcombine.low %v5126_v22, %v5129_v10  ;;  %v4448_v13 = vrot.slane %v4446_v1, 5  ;;  %v4454_v47 = vrot.slane %v4452_v53, 5  ;;  %v4458_v62 = vrot.slane %v4456_v15, 4  ;;  %v15745_v35 = vpop.f32.mrf.mxu1  ;;  %v12119_v1 = vld [vmem:[%s14758_s24 + $0x60] sm:$0xe] }
 0x13c   : > { %18894 = vst [vmem:[#allocation53_spill] sm:$0xff] %v15740_v43  ;;  %v4464_v61 = vrot.slane %v4462_v48, 5  ;;  %v4469_v22 = vrot.slane %v4467_v24, 4  ;;  %v4476_v31 = vshll.u32 %v12045_v60, 16  ;;  %v4480_v19 = vshrl.u32 %v12045_v60, 16 }
 0x13d   : > { %v15747_v52 = vpop.f32.mrf.mxu0  ;;  %14075 = vmatmul.mubr.msk.bf16.gmra.mxu1 %vm352_vm1, %v12168_v27  ;;  %v4449_v43 = vor.u32 %v4448_v13, %v4445_v9  ;;  %v4459_v10 = vor.u32 %v4458_v62, %v4454_v47  ;;  %v4472_v51 = vrot.slane %v4470_v36, 5  ;;  %v4486_v53 = vshll.u32 %v12046_v55, 16  ;;  %v15752_v48 = vpop.f32.mrf.mxu1  ;;  %v12121_v27 = vld [vmem:[%s14758_s24 + $0x68] sm:$0x1] }
 0x13e   : > { %18895 = vst [vmem:[#allocation54_spill] sm:$0xff] %v15747_v52  ;;  %v12152_v15 = vrot.slane %v12116_v16, 9  ;;  %v4478_v26 = vrot.slane %v4476_v31, 5  ;;  %v4482_v52 = vrot.slane %v4480_v19, 4  ;;  %v5132_v18 = vrot.slane %v12117_v6, 5 }
 0x13f   : > { %v15754_v33 = vpop.f32.mrf.mxu0  ;;  %v4450_v59 = vrot.slane %v4449_v43, 4  ;;  %v4460_v9 = vrot.slane %v4459_v10, 4  ;;  %v4473_v13 = vor.u32 %v4472_v51, %v4469_v22  ;;  %v4488_v24 = vrot.slane %v4486_v53, 5  ;;  %v15757_v60 = vpop.f32.mrf.mxu1 }
 0x140   : > { %18896 = vst [vmem:[#allocation55_spill] sm:$0xff] %v15754_v33  ;;  %v5135_v8 = vrot.slane %v12118_v25, 5  ;;  %v4483_v16 = vor.u32 %v4482_v52, %v4478_v26  ;;  %v5133_v43 = vsel %vm15159_vm7, %v12152_v15, %v5132_v18  ;;  %v5134_v36 = vrot.slane %v5132_v18, 4  ;;  %v12049_v15 = vld [vmem:[%s14758_s24 + $0x8c] sm:$0x1] }
 0x141   : > { %v15759_v62 = vpop.f32.mrf.mxu0  ;;  %v4455_v55 = vsel %vm14796_vm4, %v4450_v59, %v4454_v47  ;;  %v15767_v6 = vadd.f32 %v15457_v45, %v15362_v44  ;;  %v4465_v51 = vsel %vm14796_vm4, %v4460_v9, %v4464_v61  ;;  %v4474_v25 = vrot.slane %v4473_v13, 4  ;;  %v15771_v31 = vpop.f32.mrf.mxu1  ;;  %v12047_v44 = vld [vmem:[%s14758_s24 + $0x84] sm:$0xf]  ;;  %v12048_v45 = vld [vmem:[%s14758_s24 + $0x88] sm:$0xf] }
 0x142   : > { %18897 = vst [vmem:[#allocation56_spill] sm:$0xff] %v15759_v62  ;;  %v12153_v22 = vrot.slane %v12119_v1, 9  ;;  %v12074_v59 = vcombine.low %v4455_v55, %v4465_v51  ;;  %v4484_v52 = vrot.slane %v4483_v16, 4  ;;  %v5136_v18 = vsel %vm15159_vm7, %v5134_v36, %v5135_v8  ;;  %v12050_v9 = vld [vmem:[%s14758_s24 + $0x90] sm:$0xf] }
 0x143   : > { %v15773_v19 = vpop.f32.mrf.mxu0  ;;  %v5139_v47 = vrot.slane %v12120_v7, 5  ;;  %v4479_v10 = vsel %vm14796_vm4, %v4474_v25, %v4478_v26  ;;  %v12169_v61 = vcombine.low %v5133_v43, %v5136_v18  ;;  %v15783_v1 = vadd.f32 %v15462_v56, %v15374_v57  ;;  %v15787_v13 = vpop.f32.mrf.mxu1  ;;  %v12051_v56 = vld [vmem:[%s14758_s24 + $0x94] sm:$0xf] }
 0x144   : > { %18898 = vst [vmem:[#allocation57_spill] sm:$0xff] %v15773_v19  ;;  %v5142_v53 = vrot.slane %v12121_v27, 5  ;;  %14048 = vmatprep.mubr.msk.bf16.mxu0 %vm352_vm1, %v12074_v59  ;;  %v4489_v7 = vsel %vm14796_vm4, %v4484_v52, %v4488_v24  ;;  %v15798_v57 = vadd.f32 %v15472_v28, %v15380_v5  ;;  %v15804_v16 = vadd.f32 %v15481_v49, %v15394_v23  ;;  %v12052_v24 = vld [vmem:[%s14758_s24 + $0x98] sm:$0x1]  ;;  %v12125_v19 = vld [vmem:[%s14758_s24 + $0x78] sm:$0xe] }
 0x145   : > { %v15789_v55 = vpop.f32.mrf.mxu0  ;;  %v5140_v8 = vsel %vm15159_vm7, %v12153_v22, %v5139_v47  ;;  %v5141_v26 = vrot.slane %v5139_v47, 4  ;;  %v12075_v27 = vcombine.low %v4479_v10, %v4489_v7  ;;  %14078 = vmatprep.mubr.msk.bf16.mxu1 %vm352_vm1, %v12169_v61  ;;  %v4491_v43 = vshrl.u32 %v12047_v44, 16  ;;  %v15807_v51 = vpop.f32.mrf.mxu1  ;;  %v12122_v47 = vld [vmem:[%s14758_s24 + $0x6c] sm:$0xe] }
 0x146   : > { %18899 = vst [vmem:[#allocation58_spill] sm:$0xff] %v15789_v55  ;;  %18900 = vst [vmem:[#allocation59_spill] sm:$0xff] %v15804_v16  ;;  %v4494_v36 = vshll.u32 %v12047_v44, 16  ;;  %v4500_v28 = vshll.u32 %v12048_v45, 16  ;;  %v4504_v22 = vshrl.u32 %v12048_v45, 16  ;;  %v4510_v59 = vshll.u32 %v12049_v15, 16 }
 0x147   : > { %v15809_v25 = vpop.f32.mrf.mxu0  ;;  %v5143_v5 = vsel %vm15159_vm7, %v5141_v26, %v5142_v53  ;;  %14049 = vmatmul.mubr.msk.bf16.gmra.mxu0 %vm352_vm1, %v12075_v27  ;;  %v4493_v18 = vrot.slane %v4491_v43, 4  ;;  %v4515_v49 = vshrl.u32 %v12050_v9, 16  ;;  %v15815_v44 = vpop.f32.mrf.mxu1  ;;  %v4518_v26 = vshll.u32 %v12050_v9, 16  ;;  %v12124_v43 = vld [vmem:[%s14758_s24 + $0x74] sm:$0x1] }
 0x148   : > { %18901 = vst [vmem:[#allocation60_spill] sm:$0xff] %v15809_v25  ;;  %v12170_v52 = vcombine.low %v5140_v8, %v5143_v5  ;;  %v4496_v23 = vrot.slane %v4494_v36, 5  ;;  %v4502_v61 = vrot.slane %v4500_v28, 5  ;;  %v4506_v7 = vrot.slane %v4504_v22, 4  ;;  %v12123_v25 = vld [vmem:[%s14758_s24 + $0x70] sm:$0xf] }
 0x149   : > { %v15817_v10 = vpop.f32.mrf.mxu0  ;;  %v4512_v53 = vrot.slane %v4510_v59, 5  ;;  %v4517_v15 = vrot.slane %v4515_v49, 4  ;;  %v4524_v8 = vshll.u32 %v12051_v56, 16  ;;  %v4528_v27 = vshrl.u32 %v12051_v56, 16  ;;  %v15822_v36 = vpop.f32.mrf.mxu1 }
 0x14a   : > { %18902 = vst [vmem:[#allocation61_spill] sm:$0xff] %v15817_v10  ;;  %14079 = vmatmul.mubr.msk.bf16.gmra.mxu1 %vm352_vm1, %v12170_v52  ;;  %v4497_v45 = vor.u32 %v4496_v23, %v4493_v18  ;;  %v4507_v5 = vor.u32 %v4506_v7, %v4502_v61  ;;  %v4520_v55 = vrot.slane %v4518_v26, 5  ;;  %v4534_v10 = vshll.u32 %v12052_v24, 16  ;;  %v12126_v18 = vld [vmem:[%s14758_s24 + $0x7c] sm:$0xf] }
 0x14b   : > { %v12154_v28 = vrot.slane %v12122_v47, 9  ;;  %v15825_v22 = vpop.f32.mrf.mxu0  ;;  %v4526_v59 = vrot.slane %v4524_v8, 5  ;;  %v4530_v62 = vrot.slane %v4528_v27, 4  ;;  %v5146_v52 = vrot.slane %v12123_v25, 5  ;;  %v15828_v23 = vpop.f32.mrf.mxu1  ;;  %v12127_v7 = vld [vmem:[%s14758_s24 + $0x80] sm:$0x1] }
 0x14c   : > { %18903 = vst [vmem:[#allocation62_spill] sm:$0xff] %v15825_v22  ;;  %v4498_v9 = vrot.slane %v4497_v45, 4  ;;  %v4508_v49 = vrot.slane %v4507_v5, 4  ;;  %v4521_v56 = vor.u32 %v4520_v55, %v4517_v15  ;;  %v4536_v33 = vrot.slane %v4534_v10, 5 }
 0x14d   : > { %v5149_v16 = vrot.slane %v12124_v43, 5  ;;  %v4531_v47 = vor.u32 %v4530_v62, %v4526_v59  ;;  %v5147_v26 = vsel %vm15159_vm7, %v12154_v28, %v5146_v52  ;;  %v5148_v45 = vrot.slane %v5146_v52, 4  ;;  %v15835_v8 = vpop.f32.mrf.mxu1  ;;  %v15843_v27 = vpop.f32.mrf.mxu0  ;;  %v12053_v28 = vld [vmem:[%s14758_s24 + $0x9c] sm:$0xf] }
 0x14e   : > { %v4503_v24 = vsel %vm14796_vm4, %v4498_v9, %v4502_v61  ;;  %v15839_v25 = vadd.f32 %v15490_v50, %v15403_v46  ;;  %v4513_v55 = vsel %vm14796_vm4, %v4508_v49, %v4512_v53  ;;  %v4522_v10 = vrot.slane %v4521_v56, 4  ;;  %18904 = vst [vmem:[#allocation63_spill] sm:$0xff] %v15843_v27  ;;  %v18906_v53 = vld [vmem:[#allocation13_spill] sm:$0xff]  ;;  %v12054_v49 = vld [vmem:[%s14758_s24 + $0xa0] sm:$0xf] }
 0x14f   : > { %v12155_v15 = vrot.slane %v12125_v19, 9  ;;  %v12076_v62 = vcombine.low %v4503_v24, %v4513_v55  ;;  %v4532_v61 = vrot.slane %v4531_v47, 4  ;;  %v5150_v43 = vsel %vm15159_vm7, %v5148_v45, %v5149_v16  ;;  %v15848_v9 = vpop.f32.mrf.mxu1  ;;  %v12055_v56 = vld [vmem:[%s14758_s24 + $0xa4] sm:$0x1]  ;;  %v18907_v47 = vld [vmem:[#allocation14_spill] sm:$0xff]  ;;  %v18910_v55 = vld [vmem:[#allocation15_spill] sm:$0xff] }
 0x150   : > { %v5153_v5 = vrot.slane %v12126_v18, 5  ;;  %18905 = vst [vmem:[#allocation64_spill] sm:$0xff] %v15848_v9  ;;  %v4527_v46 = vsel %vm14796_vm4, %v4522_v10, %v4526_v59  ;;  %v12171_v50 = vcombine.low %v5147_v26, %v5150_v43  ;;  %v15854_v19 = vadd.f32 %v15503_v58, %v18906_v53  ;;  %v12056_v58 = vld [vmem:[%s14758_s24 + $0xa8] sm:$0xf]  ;;  %v12057_v26 = vld [vmem:[%s14758_s24 + $0xac] sm:$0xf] }
 0x151   : > { %v5156_v52 = vrot.slane %v12127_v7, 5  ;;  %14052 = vmatprep.mubr.msk.bf16.mxu0 %vm352_vm1, %v12076_v62  ;;  %v4537_v16 = vsel %vm14796_vm4, %v4532_v61, %v4536_v33  ;;  %v15865_v59 = vadd.f32 %v15512_v21, %v18907_v47  ;;  %v15869_v7 = vpop.f32.mrf.mxu1  ;;  %v15874_v33 = vadd.f32 %v15522_v42, %v18910_v55  ;;  %v12058_v62 = vld [vmem:[%s14758_s24 + $0xb0] sm:$0x1]  ;;  %v15877_v61 = vpop.f32.mrf.mxu0  ;;  %v12129_v55 = vld [vmem:[%s14758_s24 + $0x88] sm:$0xf] }
 0x152   : > { %v5154_v18 = vsel %vm15159_vm7, %v12155_v15, %v5153_v5  ;;  %v5155_v24 = vrot.slane %v5153_v5, 4  ;;  %18909 = vst [vmem:[#allocation14_spill] sm:$0xff] %v15869_v7  ;;  %v12077_v45 = vcombine.low %v4527_v46, %v4537_v16  ;;  %14082 = vmatprep.mubr.msk.bf16.mxu1 %vm352_vm1, %v12171_v50  ;;  %v4539_v10 = vshrl.u32 %v12053_v28, 16  ;;  %18912 = vst [vmem:[#allocation65_spill] sm:$0xff] %v15877_v61  ;;  %v12128_v46 = vld [vmem:[%s14758_s24 + $0x84] sm:$0xe] }
 0x153   : > { %18908 = vst [vmem:[#allocation13_spill] sm:$0xff] %v15865_v59  ;;  %18911 = vst [vmem:[#allocation15_spill] sm:$0xff] %v15874_v33  ;;  %v4542_v15 = vshll.u32 %v12053_v28, 16  ;;  %v4548_v43 = vshll.u32 %v12054_v49, 16  ;;  %v4552_v5 = vshrl.u32 %v12054_v49, 16  ;;  %v4558_v53 = vshll.u32 %v12055_v56, 16 }
 0x154   : > { %v5157_v21 = vsel %vm15159_vm7, %v5155_v24, %v5156_v52  ;;  %14053 = vmatmul.mubr.msk.bf16.gmra.mxu0 %vm352_vm1, %v12077_v45  ;;  %v4541_v16 = vrot.slane %v4539_v10, 4  ;;  %v4563_v47 = vshrl.u32 %v12056_v58, 16  ;;  %v4566_v61 = vshll.u32 %v12056_v58, 16  ;;  %v12130_v7 = vld [vmem:[%s14758_s24 + $0x8c] sm:$0x1]  ;;  %v15889_v45 = vpop.f32.mrf.mxu0 }
 0x155   : > { %v12172_v50 = vcombine.low %v5154_v18, %v5157_v21  ;;  %v4544_v42 = vrot.slane %v4542_v15, 5  ;;  %v4550_v28 = vrot.slane %v4548_v43, 5  ;;  %v4554_v27 = vrot.slane %v4552_v5, 4  ;;  %v15885_v33 = vpop.f32.mrf.mxu1  ;;  %v12131_v18 = vld [vmem:[%s14758_s24 + $0x90] sm:$0xe]  ;;  %18914 = vst [vmem:[#allocation67_spill] sm:$0xff] %v15889_v45 }
 0x156   : > { %v4560_v22 = vrot.slane %v4558_v53, 5  ;;  %18913 = vst [vmem:[#allocation66_spill] sm:$0xff] %v15885_v33  ;;  %v4565_v49 = vrot.slane %v4563_v47, 4  ;;  %v4572_v56 = vshll.u32 %v12057_v26, 16  ;;  %v4576_v24 = vshrl.u32 %v12057_v26, 16 }
 0x157   : > { %14083 = vmatmul.mubr.msk.bf16.gmra.mxu1 %vm352_vm1, %v12172_v50  ;;  %v4545_v52 = vor.u32 %v4544_v42, %v4541_v16  ;;  %v4555_v10 = vor.u32 %v4554_v27, %v4550_v28  ;;  %v4568_v15 = vrot.slane %v4566_v61, 5  ;;  %v4582_v21 = vshll.u32 %v12058_v62, 16  ;;  %v15891_v5 = vpop.f32.mrf.mxu1  ;;  %v12132_v9 = vld [vmem:[%s14758_s24 + $0x94] sm:$0xf]  ;;  %v12133_v59 = vld [vmem:[%s14758_s24 + $0x98] sm:$0x1] }
 0x158   : > { %v12156_v43 = vrot.slane %v12128_v46, 9  ;;  %v4574_v53 = vrot.slane %v4572_v56, 5  ;;  %v4578_v33 = vrot.slane %v4576_v24, 4  ;;  %v5160_v50 = vrot.slane %v12129_v55, 5  ;;  %v12059_v55 = vld [vmem:[%s14758_s24 + $0xb4] sm:$0xf] }
 0x159   : > { %v4546_v58 = vrot.slane %v4545_v52, 4  ;;  %v4556_v16 = vrot.slane %v4555_v10, 4  ;;  %v4569_v42 = vor.u32 %v4568_v15, %v4565_v49  ;;  %v4584_v26 = vrot.slane %v4582_v21, 5  ;;  %v15895_v45 = vpop.f32.mrf.mxu1  ;;  %v15902_v52 = vpop.f32.mrf.mxu0  ;;  %v18917_v56 = vld [vmem:[#allocation16_spill] sm:$0xff]  ;;  %v12060_v15 = vld [vmem:[%s14758_s24 + $0xb8] sm:$0xf] }
 0x15a   : > { %v5163_v47 = vrot.slane %v12130_v7, 5  ;;  %18915 = vst [vmem:[#allocation68_spill] sm:$0xff] %v15895_v45  ;;  %v4579_v62 = vor.u32 %v4578_v33, %v4574_v53  ;;  %v5161_v61 = vsel %vm15159_vm7, %v12156_v43, %v5160_v50  ;;  %v5162_v46 = vrot.slane %v5160_v50, 4  ;;  %18916 = vst [vmem:[#allocation69_spill] sm:$0xff] %v15902_v52  ;;  %v12062_v52 = vld [vmem:[%s14758_s24 + $0xc0] sm:$0xf] }
 0x15b   : > { %v4551_v27 = vsel %vm14796_vm4, %v4546_v58, %v4550_v28  ;;  %v15906_v49 = vadd.f32 %v15527_v12, %v18917_v56  ;;  %v4561_v7 = vsel %vm14796_vm4, %v4556_v16, %v4560_v22  ;;  %v4570_v24 = vrot.slane %v4569_v42, 4  ;;  %v12061_v28 = vld [vmem:[%s14758_s24 + $0xbc] sm:$0x1]  ;;  %v15912_v33 = vpop.f32.mrf.mxu1  ;;  %v18919_v45 = vld [vmem:[#allocation17_spill] sm:$0xff] }
 0x15c   : > { %v12157_v10 = vrot.slane %v12131_v18, 9  ;;  %18918 = vst [vmem:[#allocation16_spill] sm:$0xff] %v15912_v33  ;;  %v12078_v21 = vcombine.low %v4551_v27, %v4561_v7  ;;  %v4580_v43 = vrot.slane %v4579_v62, 4  ;;  %v5164_v58 = vsel %vm15159_vm7, %v5162_v46, %v5163_v47  ;;  %v12063_v62 = vld [vmem:[%s14758_s24 + $0xc4] sm:$0xf] }
 0x15d   : > { %v5167_v50 = vrot.slane %v12132_v9, 5  ;;  %v4575_v12 = vsel %vm14796_vm4, %v4570_v24, %v4574_v53  ;;  %v12173_v56 = vcombine.low %v5161_v61, %v5164_v58  ;;  %v15921_v22 = vadd.f32 %v15542_v3, %v18919_v45  ;;  %v15923_v16 = vpop.f32.mrf.mxu1  ;;  %v18921_v53 = vld [vmem:[#allocation18_spill] sm:$0xff]  ;;  %v15935_v3 = vpop.f32.mrf.mxu0  ;;  %v12064_v7 = vld [vmem:[%s14758_s24 + $0xc8] sm:$0x1]  ;;  %v12134_v24 = vld [vmem:[%s14758_s24 + $0x9c] sm:$0xe] }
 0x15e   : > { %v5170_v18 = vrot.slane %v12133_v59, 5  ;;  %18920 = vst [vmem:[#allocation17_spill] sm:$0xff] %v15923_v16  ;;  %14056 = vmatprep.mubr.msk.bf16.mxu0 %vm352_vm1, %v12078_v21  ;;  %v4585_v42 = vsel %vm14796_vm4, %v4580_v43, %v4584_v26  ;;  %v15932_v27 = vadd.f32 %v15550_v4, %v18921_v53  ;;  %18922 = vst [vmem:[#allocation18_spill] sm:$0xff] %v15935_v3  ;;  %v18923_v59 = vld [vmem:[#allocation19_spill] sm:$0xff]  ;;  %v4587_v26 = vshrl.u32 %v12059_v55, 16 }
 0x15f   : > { %v5168_v9 = vsel %vm15159_vm7, %v12157_v10, %v5167_v50  ;;  %v5169_v47 = vrot.slane %v5167_v50, 4  ;;  %v12079_v45 = vcombine.low %v4575_v12, %v4585_v42  ;;  %14086 = vmatprep.mubr.msk.bf16.mxu1 %vm352_vm1, %v12173_v56  ;;  %v15940_v61 = vadd.f32 %v15571_v14, %v18923_v59  ;;  %v15944_v10 = vpop.f32.mrf.mxu1  ;;  %v12135_v42 = vld [vmem:[%s14758_s24 + $0xa0] sm:$0xf]  ;;  %v12136_v16 = vld [vmem:[%s14758_s24 + $0xa4] sm:$0x1] }
 0x160   : > { %v4590_v46 = vshll.u32 %v12059_v55, 16  ;;  %18925 = vst [vmem:[#allocation70_spill] sm:$0xff] %v15944_v10  ;;  %v4596_v21 = vshll.u32 %v12060_v15, 16  ;;  %v4600_v43 = vshrl.u32 %v12060_v15, 16  ;;  %v4606_v58 = vshll.u32 %v12061_v28, 16 }
 0x161   : > { %18924 = vst [vmem:[#allocation19_spill] sm:$0xff] %v15940_v61  ;;  %v5171_v4 = vsel %vm15159_vm7, %v5169_v47, %v5170_v18  ;;  %14057 = vmatmul.mubr.msk.bf16.gmra.mxu0 %vm352_vm1, %v12079_v45  ;;  %v4589_v12 = vrot.slane %v4587_v26, 4  ;;  %v4611_v56 = vshrl.u32 %v12062_v52, 16  ;;  %v15950_v55 = vpop.f32.mrf.mxu1  ;;  %v4614_v10 = vshll.u32 %v12062_v52, 16  ;;  %v15953_v18 = vpop.f32.mrf.mxu0  ;;  %v12137_v45 = vld [vmem:[%s14758_s24 + $0xa8] sm:$0xe] }
 0x162   : > { %v12174_v50 = vcombine.low %v5168_v9, %v5171_v4  ;;  %v4592_v14 = vrot.slane %v4590_v46, 5  ;;  %18926 = vst [vmem:[#allocation71_spill] sm:$0xff] %v15950_v55  ;;  %v4598_v53 = vrot.slane %v4596_v21, 5  ;;  %v4602_v59 = vrot.slane %v4600_v43, 4  ;;  %18927 = vst [vmem:[#allocation72_spill] sm:$0xff] %v15953_v18 }
 0x163   : > { %v4608_v3 = vrot.slane %v4606_v58, 5  ;;  %v4613_v28 = vrot.slane %v4611_v56, 4  ;;  %v4620_v9 = vshll.u32 %v12063_v62, 16  ;;  %v4624_v47 = vshrl.u32 %v12063_v62, 16  ;;  %v15957_v26 = vpop.f32.mrf.mxu1  ;;  %v12138_v58 = vld [vmem:[%s14758_s24 + $0xac] sm:$0xf]  ;;  %v15961_v56 = vpop.f32.mrf.mxu0 }
 0x164   : > { %14087 = vmatmul.mubr.msk.bf16.gmra.mxu1 %vm352_vm1, %v12174_v50  ;;  %v4593_v15 = vor.u32 %v4592_v14, %v4589_v12  ;;  %v4603_v46 = vor.u32 %v4602_v59, %v4598_v53  ;;  %v4616_v4 = vrot.slane %v4614_v10, 5  ;;  %v4630_v21 = vshll.u32 %v12064_v7, 16  ;;  %v12139_v61 = vld [vmem:[%s14758_s24 + $0xb0] sm:$0x1]  ;;  %18928 = vst [vmem:[#allocation73_spill] sm:$0xff] %v15961_v56 }
 0x165   : > { %v12158_v43 = vrot.slane %v12134_v24, 9  ;;  %v4622_v55 = vrot.slane %v4620_v9, 5  ;;  %v4626_v33 = vrot.slane %v4624_v47, 4  ;;  %v5174_v18 = vrot.slane %v12135_v42, 5  ;;  %v15968_v42 = vpop.f32.mrf.mxu1  ;;  %v18930_v9 = vld [vmem:[#allocation20_spill] sm:$0xff]  ;;  %v18931_v47 = vld [vmem:[#allocation33_spill] sm:$0xff] }
 0x166   : > { %v4594_v52 = vrot.slane %v4593_v15, 4  ;;  %v4604_v50 = vrot.slane %v4603_v46, 4  ;;  %v4617_v12 = vor.u32 %v4616_v4, %v4613_v28  ;;  %v4632_v14 = vrot.slane %v4630_v21, 5  ;;  %v12140_v15 = vld [vmem:[%s14758_s24 + $0xb4] sm:$0xe]  ;;  %18929 = vst [vmem:[#allocation74_spill] sm:$0xff] %v15968_v42 }
 0x167   : > { %v5177_v62 = vrot.slane %v12136_v16, 5  ;;  %v4627_v7 = vor.u32 %v4626_v33, %v4622_v55  ;;  %v5175_v24 = vsel %vm15159_vm7, %v12158_v43, %v5174_v18  ;;  %v5176_v59 = vrot.slane %v5174_v18, 4  ;;  %v12141_v21 = vld [vmem:[%s14758_s24 + $0xb8] sm:$0xf]  ;;  %v12143_v56 = vld [vmem:[%s14758_s24 + $0xc0] sm:$0xe] }
 0x168   : > { %v4599_v10 = vsel %vm14796_vm4, %v4594_v52, %v4598_v53  ;;  %v15972_v46 = vadd.f32 %v18931_v47, %v18930_v9  ;;  %v4609_v16 = vsel %vm14796_vm4, %v4604_v50, %v4608_v3  ;;  %v4618_v28 = vrot.slane %v4617_v12, 4  ;;  %v12142_v53 = vld [vmem:[%s14758_s24 + $0xbc] sm:$0x1]  ;;  %v18932_v42 = vld [vmem:[#allocation21_spill] sm:$0xff]  ;;  %v15987_v12 = vpop.f32.mrf.mxu0 }
 0x169   : > { %v12159_v4 = vrot.slane %v12137_v45, 9  ;;  %v12080_v33 = vcombine.low %v4599_v10, %v4609_v16  ;;  %v4628_v52 = vrot.slane %v4627_v7, 4  ;;  %v5178_v18 = vsel %vm15159_vm7, %v5176_v59, %v5177_v62  ;;  %v18933_v3 = vld [vmem:[#allocation35_spill] sm:$0xff]  ;;  %18934 = vst [vmem:[#allocation20_spill] sm:$0xff] %v15987_v12  ;;  %v18935_v7 = vld [vmem:[#allocation22_spill] sm:$0xff] }
 0x16a   : > { %v5181_v43 = vrot.slane %v12138_v58, 5  ;;  %v4623_v9 = vsel %vm14796_vm4, %v4618_v28, %v4622_v55  ;;  %v12175_v47 = vcombine.low %v5175_v24, %v5178_v18  ;;  %v15985_v50 = vadd.f32 %v18933_v3, %v18932_v42  ;;  %v14497_v24 = vld [vmem:[%s14758_s24 + $0xc] sm:$0xff]   ;;  %v12144_v59 = vld [vmem:[%s14758_s24 + $0xc4] sm:$0xf]  ;;  %v12145_v42 = vld [vmem:[%s14758_s24 + $0xc8] sm:$0x1] }
 0x16b   : > { %v5184_v45 = vrot.slane %v12139_v61, 5  ;;  %14060 = vmatprep.mubr.msk.bf16.mxu0 %vm352_vm1, %v12080_v33  ;;  %v4633_v10 = vsel %vm14796_vm4, %v4628_v52, %v4632_v14  ;;  %v15996_v55 = vadd.f32 %v15602_v0, %v18935_v7  ;;  %v16001_v61 = vpop.f32.mrf.mxu1  ;;  %v18937_v28 = vld [vmem:[#allocation23_spill] sm:$0xff]  ;;  %v18938_v33 = vld [vmem:[#allocation24_spill] sm:$0xff]  ;;  %v12160_v52 = vrot.slane %v12140_v15, 9 }
 0x16c   : > { %v5182_v58 = vsel %vm15159_vm7, %v12159_v4, %v5181_v43  ;;  %v5183_v62 = vrot.slane %v5181_v43, 4  ;;  %18936 = vst [vmem:[#allocation33_spill] sm:$0xff] %v16001_v61  ;;  %v12081_v16 = vcombine.low %v4623_v9, %v4633_v10  ;;  %14090 = vmatprep.mubr.msk.bf16.mxu1 %vm352_vm1, %v12175_v47  ;;  %v16006_v14 = vadd.f32 %v15606_v39, %v18937_v28  ;;  %v18939_v18 = vld [vmem:[#allocation27_spill] sm:$0xff]  ;;  %v12324_v10 = vld [vmem:[%s14758_s24 + $0xc] sm:$0xf]  ;;  %v16018_v61 = vpop.f32.mrf.mxu0 }
 0x16d   : > { %v16010_v4 = vadd.f32 %v15622_v34, %v18938_v33  ;;  %v18940_v43 = vld [vmem:[#allocation31_spill] sm:$0xff]  ;;  %v5188_v7 = vrot.slane %v12141_v21, 5  ;;  %v5191_v9 = vrot.slane %v12142_v53, 5  ;;  %v12161_v39 = vrot.slane %v12143_v56, 9  ;;  %18941 = vst [vmem:[#allocation21_spill] sm:$0xff] %v16018_v61  ;;  %v18943_v53 = vld [vmem:[#allocation30_spill] sm:$0xff] }
 0x16e   : > { %v5185_v0 = vsel %vm15159_vm7, %v5183_v62, %v5184_v45  ;;  %v1755_v3 = vadd.f32 %v18940_v43, %v18939_v18  ;;  %14061 = vmatmul.mubr.msk.bf16.gmra.mxu0 %vm352_vm1, %v12081_v16  ;;  %v5195_v28 = vrot.slane %v12144_v59, 5  ;;  %v5198_v12 = vrot.slane %v12145_v42, 5  ;;  %v18942_v45 = vld [vmem:[#allocation25_spill] sm:$0xff]  ;;  %v18944_v62 = vld [vmem:[#allocation34_spill] sm:$0xff]  ;;  %v16032_v59 = vpop.f32.mrf.mxu1  ;;  %v18950_v43 = vld [vmem:[#allocation28_spill] sm:$0xff] }
 0x16f   : > { %v12176_v47 = vcombine.low %v5182_v58, %v5185_v0  ;;  %14100 = vmatprep.mubr.msk.bf16.mxu0 %vm352_vm1, %v14497_v24  ;;  %v5189_v34 = vsel %vm15159_vm7, %v12160_v52, %v5188_v7  ;;  %v5190_v15 = vrot.slane %v5188_v7, 4  ;;  %v16025_v21 = vadd.f32 %v15641_v30, %v18942_v45  ;;  %v12325_v58 = vld [vmem:[%s14758_s24 + $0x10] sm:$0xf]  ;;  %18945 = vst [vmem:[#allocation35_spill] sm:$0xff] %v16032_v59  ;;  %v18946_v16 = vld [vmem:[#allocation26_spill] sm:$0xff]  ;;  %v18948_v30 = vld [vmem:[#allocation32_spill] sm:$0xff] }
 0x170   : > { %v16029_v56 = vadd.f32 %v18944_v62, %v18943_v53  ;;  %v5196_v24 = vsel %vm15159_vm7, %v12161_v39, %v5195_v28  ;;  %v5197_v42 = vrot.slane %v5195_v28, 4  ;;  %v16039_v33 = vadd.f32 %v15661_v40, %v18946_v16  ;;  %v18949_v52 = vld [vmem:[#allocation36_spill] sm:$0xff]  ;;  %v18953_v28 = vld [vmem:[#allocation29_spill] sm:$0xff]  ;;  %v12326_v45 = vld [vmem:[%s14758_s24 + $0x14] sm:$0x1]  ;;  %v16073_v61 = vpop.f32.mrf.mxu1 }
 0x171   : > { %14091 = vmatmul.mubr.msk.bf16.gmra.mxu1 %vm352_vm1, %v12176_v47  ;;  %v16043_v0 = vadd.f32 %v18949_v52, %v18948_v30  ;;  %v5192_v18 = vsel %vm15159_vm7, %v5190_v15, %v5191_v9  ;;  %v16049_v7 = vadd.f32 %v15670_v11, %v18950_v43  ;;  %v18952_v47 = vld [vmem:[#allocation37_spill] sm:$0xff]  ;;  %v16057_v40 = vadd.f32 %v15677_v37, %v18953_v28  ;;  %v12327_v53 = vld [vmem:[%s14758_s24 + $0x18] sm:$0xf]  ;;  %v14529_v11 = vld [vmem:[%s18836_s1 + $0x28] sm:$0xf] }
 0x172   : > { %18947 = vst [vmem:[#allocation22_spill] sm:$0xff] %v16039_v33  ;;  %v16053_v39 = vadd.f32 %v18952_v47, %v15657_v38  ;;  %v12177_v62 = vcombine.low %v5189_v34, %v5192_v18  ;;  %v14498_v16 = vld [vmem:[%s14758_s24 + $0x18] sm:$0xff]   ;;  %v5199_v9 = vsel %vm15159_vm7, %v5197_v42, %v5198_v12  ;;  %v7174_v15 = vsel %vm401_vm0, %v14529_v11, 0  ;;  %v16069_v52 = vpop.f32.mrf.mxu0  ;;  %v14499_v43 = vld [vmem:[%s14758_s24 + $0x24] sm:$0xff]   ;;  %v12329_v18 = vld [vmem:[%s14758_s24 + $0x20] sm:$0x1] }
 0x173   : > { %18951 = vst [vmem:[#allocation23_spill] sm:$0xff] %v16049_v7  ;;  %18954 = vst [vmem:[#allocation24_spill] sm:$0xff] %v16057_v40  ;;  %v6266_v38 = vshrl.u32 %v12324_v10, 16  ;;  %v12328_v30 = vld [vmem:[%s14758_s24 + $0x1c] sm:$0xf]  ;;  %v12178_v37 = vcombine.low %v5196_v24, %v5199_v9  ;;  %v6269_v47 = vshll.u32 %v12324_v10, 16  ;;  %v16080_v29 = vadd.f32 %v15689_v17, %v1755_v3 }
 0x174   : > { %18955 = vst [vmem:[#allocation27_spill] sm:$0xff] %v16069_v52  ;;  %v6275_v28 = vshll.u32 %v12325_v58, 16  ;;  %v6279_v34 = vshrl.u32 %v12325_v58, 16  ;;  %18956 = vst [vmem:[#allocation31_spill] sm:$0xff] %v16073_v61  ;;  %v12663_v12 = vld [vmem:[%s18836_s1 + $0x30] sm:$0xf]  ;;  %14094 = vmatprep.mubr.msk.bf16.mxu1 %vm352_vm1, %v12177_v62  ;;  %v16085_v10 = vpop.f32.mrf.mxu0 }
 0x175   : > { %v6268_v42 = vrot.slane %v6266_v38, 4  ;;  %v6285_v11 = vshll.u32 %v12326_v45, 16  ;;  %v6290_v52 = vshrl.u32 %v12327_v53, 16  ;;  %18957 = vst [vmem:[#allocation25_spill] sm:$0xff] %v16085_v10  ;;  %v6271_v58 = vrot.slane %v6269_v47, 5  ;;  %v18958_v40 = vld [vmem:[#allocation39_spill] sm:$0xff] }
 0x176   : > { %v6277_v24 = vrot.slane %v6275_v28, 5  ;;  %v6281_v9 = vrot.slane %v6279_v34, 4  ;;  %v6293_v61 = vshll.u32 %v12327_v53, 16  ;;  %14101 = vmatmul.mubr.msk.bf16.vlgmr.msra.gmra.mxu0 %vm352_vm1, %v14498_v16  ;;  %v18959_v7 = vld [vmem:[#allocation38_spill] sm:$0xff]  ;;  %v6299_v17 = vshll.u32 %v12328_v30, 16  ;;  %v16096_v53 = vpop.f32.mrf.mxu0 }
 0x177   : > { %v16090_v62 = vadd.f32 %v18959_v7, %v18958_v40  ;;  %v6287_v45 = vrot.slane %v6285_v11, 5  ;;  %v6292_v38 = vrot.slane %v6290_v52, 4  ;;  %14104 = vmatprep.mubr.msk.bf16.mxu0 %vm352_vm1, %v14499_v43  ;;  %14167 = vmatpush3.bf16.msra.mxu0 %v7174_v15  ;;  %v6272_v3 = vor.u32 %v6271_v58, %v6268_v42  ;;  %v16094_v47 = vpop.f32.mrf.mxu1  ;;  %18960 = vst [vmem:[#allocation30_spill] sm:$0xff] %v16096_v53  ;;  %v14530_v15 = vld [vmem:[%s18836_s1 + $0x2c] sm:$0xf]  ;;  %v14500_v34 = vld [vmem:[%s14758_s24 + $0x30] sm:$0xff]  }
 0x178   : > { %v6282_v59 = vor.u32 %v6281_v9, %v6277_v24  ;;  %v6295_v10 = vrot.slane %v6293_v61, 5  ;;  %v6303_v33 = vshrl.u32 %v12328_v30, 16  ;;  %v16101_v7 = vmul.f32 %v16080_v29, %v16080_v29  ;;  %14382 = vmatprep.subr.msk.bf16.mxu0 %vm401_vm0, %v12663_v12  ;;  %v18961_v42 = vld [vmem:[#allocation41_spill] sm:$0xff]  ;;  %v18962_v11 = vld [vmem:[#allocation40_spill] sm:$0xff] }
 0x179   : > { %14095 = vmatmul.mubr.msk.bf16.gmra.mxu1 %vm352_vm1, %v12178_v37  ;;  %v6301_v40 = vrot.slane %v6299_v17, 5  ;;  %v6309_v16 = vshll.u32 %v12329_v18, 16  ;;  %v16107_v61 = vsel %vm401_vm0, %v14530_v15, 0  ;;  %v6273_v30 = vrot.slane %v6272_v3, 4  ;;  %v16110_v28 = vpop.f32.mrf.mxu1  ;;  %v14501_v17 = vld [vmem:[%s14758_s24 + $0x3c] sm:$0xff]  }
 0x17a   : > { %v6283_v52 = vrot.slane %v6282_v59, 4  ;;  %v6296_v37 = vor.u32 %v6295_v10, %v6292_v38  ;;  %v6305_v43 = vrot.slane %v6303_v33, 4  ;;  %v16115_v58 = vadd.f32 %v18962_v11, %v18961_v42  ;;  %v12330_v3 = vld [vmem:[%s14758_s24 + $0x24] sm:$0xf]  ;;  %v18965_v42 = vld [vmem:[#allocation42_spill] sm:$0xff] }
 0x17b   : > { %v6311_v18 = vrot.slane %v6309_v16, 5  ;;  %v2543_v9 = vadd.f32 %v15703_v20, %v16029_v56  ;;  %v16121_v12 = vadd.f32 %v15725_v32, %v16043_v0  ;;  %v6278_v59 = vsel %vm14796_vm4, %v6273_v30, %v6277_v24  ;;  %v12331_v16 = vld [vmem:[%s14758_s24 + $0x28] sm:$0xf]  ;;  %v16130_v15 = vpop.f32.mrf.mxu1  ;;  %v16132_v20 = vpop.f32.mrf.mxu0  ;;  %v18964_v0 = vld [vmem:[#allocation43_spill] sm:$0xff] }
 0x17c   : > { %v6288_v33 = vsel %vm14796_vm4, %v6283_v52, %v6287_v45  ;;  %v6297_v10 = vrot.slane %v6296_v37, 4  ;;  %v6306_v38 = vor.u32 %v6305_v43, %v6301_v40  ;;  %18963 = vst [vmem:[#allocation34_spill] sm:$0xff] %v16132_v20  ;;  %v16136_v11 = vadd.f32 %v18965_v42, %v18964_v0  ;;  %v12333_v42 = vld [vmem:[%s14758_s24 + $0x30] sm:$0xf] }
 0x17d   : > { %v12373_v56 = vcombine.low %v6278_v59, %v6288_v33  ;;  %v2837_v32 = vmul.f32 %v2543_v9, %v2543_v9  ;;  %v13179_v24 = vpack.c.bf16 %v16121_v12, %v16080_v29  ;;  %v16144_v52 = vmul.f32 %v16121_v12, %v16121_v12  ;;  %v16148_v43 = vpop.f32.mrf.mxu1  ;;  %v12332_v33 = vld [vmem:[%s14758_s24 + $0x2c] sm:$0x1] }
 0x17e   : > { %v6302_v45 = vsel %vm14796_vm4, %v6297_v10, %v6301_v40  ;;  %v6307_v30 = vrot.slane %v6306_v38, 4  ;;  %v2544_v37 = vadd.f32 %v15738_v54, %v16053_v39  ;;  %18966 = vst [vmem:[#allocation26_spill] sm:$0xff] %v16148_v43  ;;  %14105 = vmatmul.mubr.msk.bf16.gmra.mxu0 %vm352_vm1, %v14500_v34  ;;  %v18967_v40 = vld [vmem:[#allocation44_spill] sm:$0xff]  ;;  %v6314_v10 = vshrl.u32 %v12330_v3, 16  ;;  %v12334_v43 = vld [vmem:[%s14758_s24 + $0x34] sm:$0xf] }
 0x17f   : > { %14134 = vmatprep.mubr.msk.bf16.mxu1 %vm352_vm1, %v12373_v56  ;;  %13491 = vst [vmem:[%s16154_s13 + $0x8] sm:$0xff] %v13179_v24   ;;  %v16159_v59 = vadd.f32 %v18967_v40, %v15695_v2  ;;  %v6317_v54 = vshll.u32 %v12330_v3, 16  ;;  %v6323_v39 = vshll.u32 %v12331_v16, 16  ;;  %14108 = vmatprep.mubr.msk.bf16.mxu0 %vm352_vm1, %v14501_v17  ;;  %v16166_v24 = vpop.f32.mrf.mxu0  ;;  %v12760_v17 = vld [vmem:[%s18836_s1 + $0x34] sm:$0xf] }
 0x180   : > { %v6312_v34 = vsel %vm14796_vm4, %v6307_v30, %v6311_v18  ;;  %v13174_v38 = vpack.c.bf16 %v2544_v37, %v2543_v9  ;;  %v2799_v56 = vadd.f32 %v2544_v37, %v2543_v9  ;;  %v2838_v0 = vmul.f32 %v2544_v37, %v2544_v37  ;;  %18968 = vst [vmem:[#allocation32_spill] sm:$0xff] %v16166_v24  ;;  %v16169_v3 = vpop.f32.mrf.mxu1 }
 0x181   : > { %v12374_v2 = vcombine.low %v6302_v45, %v6312_v34  ;;  %v6316_v40 = vrot.slane %v6314_v10, 4  ;;  %v6319_v20 = vrot.slane %v6317_v54, 5  ;;  %v6325_v53 = vrot.slane %v6323_v39, 5  ;;  %18969 = vst [vmem:[#allocation36_spill] sm:$0xff] %v16169_v3  ;;  %v16176_v24 = vpop.f32.mrf.mxu0  ;;  %v14502_v45 = vld [vmem:[%s14758_s24 + $0x48] sm:$0xff]  }
 0x182   : > { %13175 = vst [vmem:[%s16154_s13] sm:$0xff] %v13174_v38   ;;  %v2800_v18 = vadd.f32 %v2799_v56, %v16080_v29  ;;  %v2869_v30 = vadd.f32 %v2838_v0, %v2837_v32  ;;  %v6327_v9 = vshrl.u32 %v12331_v16, 16  ;;  %v6333_v37 = vshll.u32 %v12332_v33, 16  ;;  %18970 = vst [vmem:[#allocation28_spill] sm:$0xff] %v16176_v24  ;;  %v12335_v39 = vld [vmem:[%s14758_s24 + $0x38] sm:$0x1]  ;;  %v16185_v16 = vpop.f32.mrf.mxu1  ;;  %v18972_v34 = vld [vmem:[#allocation45_spill] sm:$0xff] }
 0x183   : > { %14135 = vmatmul.mubr.msk.bf16.vlgmr.msra.gmra.mxu1 %vm352_vm1, %v12374_v2  ;;  %v6320_v10 = vor.u32 %v6319_v20, %v6316_v40  ;;  %v16182_v54 = vadd.f32 %v15745_v35, %v16090_v62  ;;  %v6338_v29 = vshrl.u32 %v12333_v42, 16  ;;  %v6341_v32 = vshll.u32 %v12333_v42, 16  ;;  %18971 = vst [vmem:[#allocation37_spill] sm:$0xff] %v16185_v16  ;;  %v14503_v20 = vld [vmem:[%s14758_s24 + $0x54] sm:$0xff]   ;;  %v16194_v2 = vpop.f32.mrf.mxu0 }
 0x184   : > { %14201 = vmatpush3.bf16.msra.mxu1 %v16107_v61  ;;  %v2870_v33 = vadd.f32 %v2869_v30, %v16101_v7  ;;  %v16191_v38 = vadd.f32 %v18972_v34, %v15711_v63  ;;  %v6329_v56 = vrot.slane %v6327_v9, 4  ;;  %v6347_v0 = vshll.u32 %v12334_v43, 16  ;;  %v16197_v7 = vpop.f32.mrf.mxu1 }
 0x185   : > { %v6321_v35 = vrot.slane %v6320_v10, 4  ;;  %v6335_v62 = vrot.slane %v6333_v37, 5  ;;  %v6340_v40 = vrot.slane %v6338_v29, 4  ;;  %v6343_v24 = vrot.slane %v6341_v32, 5  ;;  %14383 = vmatprep.subr.msk.bf16.mxu1 %vm401_vm0, %v12760_v17  ;;  %v18973_v10 = vld [vmem:[#allocation50_spill] sm:$0xff] }
 0x186   : > { %v6330_v42 = vor.u32 %v6329_v56, %v6325_v53  ;;  %v6349_v16 = vrot.slane %v6347_v0, 5  ;;  %v6351_v61 = vshrl.u32 %v12334_v43, 16  ;;  %v6357_v3 = vshll.u32 %v12335_v39, 16  ;;  %14109 = vmatmul.mubr.msk.bf16.gmra.mxu0 %vm352_vm1, %v14502_v45  ;;  %v18974_v39 = vld [vmem:[#allocation46_spill] sm:$0xff] }
 0x187   : > { %v6326_v63 = vsel %vm14796_vm4, %v6321_v35, %v6325_v53  ;;  %v16204_v30 = vmul.f32 %v16182_v54, %v16182_v54  ;;  %v6344_v9 = vor.u32 %v6343_v24, %v6340_v40  ;;  %v2547_v37 = vadd.f32 %v15752_v48, %v16115_v58  ;;  %14112 = vmatprep.mubr.msk.bf16.mxu0 %vm352_vm1, %v14503_v20  ;;  %v16214_v53 = vpop.f32.mrf.mxu0  ;;  %v16225_v20 = vpop.f32.mrf.mxu1 }
 0x188   : > { %v6331_v17 = vrot.slane %v6330_v42, 4  ;;  %v6353_v43 = vrot.slane %v6351_v61, 4  ;;  %v16210_v29 = vadd.f32 %v18974_v39, %v18973_v10  ;;  %v2801_v45 = vadd.f32 %v2800_v18, %v16121_v12  ;;  %v12336_v12 = vld [vmem:[%s14758_s24 + $0x3c] sm:$0xf]  ;;  %v12337_v18 = vld [vmem:[%s14758_s24 + $0x40] sm:$0xf] }
 0x189   : > { %v6345_v32 = vrot.slane %v6344_v9, 4  ;;  %v6359_v24 = vrot.slane %v6357_v3, 5  ;;  %v2841_v34 = vmul.f32 %v2547_v37, %v2547_v37  ;;  %v2871_v56 = vadd.f32 %v2870_v33, %v16144_v52  ;;  %v18975_v33 = vld [vmem:[#allocation52_spill] sm:$0xff]  ;;  %v18976_v42 = vld [vmem:[#allocation47_spill] sm:$0xff] }
 0x18a   : > { %v6336_v48 = vsel %vm14796_vm4, %v6331_v17, %v6335_v62  ;;  %v6354_v58 = vor.u32 %v6353_v43, %v6349_v16  ;;  %v2802_v0 = vadd.f32 %v2801_v45, %v2547_v37  ;;  %v16221_v35 = vadd.f32 %v15757_v60, %v16136_v11  ;;  %v14504_v61 = vld [vmem:[%s14758_s24 + $0x60] sm:$0xff]  }
 0x18b   : > { %v12375_v40 = vcombine.low %v6326_v63, %v6336_v48  ;;  %v6350_v3 = vsel %vm14796_vm4, %v6345_v32, %v6349_v16  ;;  %v2872_v52 = vadd.f32 %v2871_v56, %v2841_v34  ;;  %v16231_v62 = vadd.f32 %v18976_v42, %v18975_v33  ;;  %v18977_v11 = vld [vmem:[#allocation48_spill] sm:$0xff]  ;;  %v14505_v16 = vld [vmem:[%s14758_s24 + $0x6c] sm:$0xff]   ;;  %v16243_v43 = vpop.f32.mrf.mxu0 }
 0x18c   : > { %v6355_v9 = vrot.slane %v6354_v58, 4  ;;  %v13189_v60 = vpack.c.bf16 %v16221_v35, %v16182_v54  ;;  %v16238_v17 = vadd.f32 %v18977_v11, %v15767_v6  ;;  %v2548_v63 = vadd.f32 %v15771_v31, %v16159_v59  ;;  %18978 = vst [vmem:[#allocation29_spill] sm:$0xff] %v16243_v43  ;;  %v12338_v39 = vld [vmem:[%s14758_s24 + $0x44] sm:$0x1]  ;;  %v12339_v48 = vld [vmem:[%s14758_s24 + $0x48] sm:$0xf] }
 0x18d   : > { %14138 = vmatprep.mubr.msk.bf16.mxu1 %vm352_vm1, %v12375_v40  ;;  %v2844_v10 = vmul.f32 %v16221_v35, %v16221_v35  ;;  %v6362_v45 = vshrl.u32 %v12336_v12, 16  ;;  %v6365_v32 = vshll.u32 %v12336_v12, 16  ;;  %v6371_v34 = vshll.u32 %v12337_v18, 16  ;;  %v16253_v58 = vpop.f32.mrf.mxu1  ;;  %v16255_v40 = vpop.f32.mrf.mxu0  ;;  %v12340_v43 = vld [vmem:[%s14758_s24 + $0x4c] sm:$0xf] }
 0x18e   : > { %v6360_v6 = vsel %vm14796_vm4, %v6355_v9, %v6359_v24  ;;  %13493 = vst [vmem:[%s16154_s13 + $0x18] sm:$0xff] %v13189_v60   ;;  %v13184_v56 = vpack.c.bf16 %v2548_v63, %v2547_v37  ;;  %v2803_v31 = vadd.f32 %v2802_v0, %v2548_v63  ;;  %v2842_v59 = vmul.f32 %v2548_v63, %v2548_v63  ;;  %v12341_v63 = vld [vmem:[%s14758_s24 + $0x50] sm:$0x1] }
 0x18f   : > { %v12376_v33 = vcombine.low %v6350_v3, %v6360_v6  ;;  %14113 = vmatmul.mubr.msk.bf16.gmra.mxu0 %vm352_vm1, %v14504_v61  ;;  %v6364_v42 = vrot.slane %v6362_v45, 4  ;;  %v6367_v12 = vrot.slane %v6365_v32, 5  ;;  %v6373_v11 = vrot.slane %v6371_v34, 5  ;;  %v16262_v60 = vpop.f32.mrf.mxu1 }
 0x190   : > { %13492 = vst [vmem:[%s16154_s13 + $0x10] sm:$0xff] %v13184_v56   ;;  %v2804_v24 = vadd.f32 %v2803_v31, %v16182_v54  ;;  %v2873_v9 = vadd.f32 %v2872_v52, %v2842_v59  ;;  %v6375_v37 = vshrl.u32 %v12337_v18, 16  ;;  %v6381_v0 = vshll.u32 %v12338_v39, 16  ;;  %14116 = vmatprep.mubr.msk.bf16.mxu0 %vm352_vm1, %v14505_v16  ;;  %v16270_v54 = vpop.f32.mrf.mxu0  ;;  %v18980_v52 = vld [vmem:[#allocation49_spill] sm:$0xff]  ;;  %v14506_v59 = vld [vmem:[%s14758_s24 + $0x78] sm:$0xff]  }
 0x191   : > { %14139 = vmatmul.mubr.msk.bf16.gmra.mxu1 %vm352_vm1, %v12376_v33  ;;  %v6368_v3 = vor.u32 %v6367_v12, %v6364_v42  ;;  %v16267_v61 = vadd.f32 %v15787_v13, %v16191_v38  ;;  %v6386_v45 = vshrl.u32 %v12339_v48, 16  ;;  %v6389_v32 = vshll.u32 %v12339_v48, 16  ;;  %18979 = vst [vmem:[#allocation39_spill] sm:$0xff] %v16270_v54  ;;  %v16277_v6 = vpop.f32.mrf.mxu1  ;;  %v14507_v54 = vld [vmem:[%s14758_s24 + $0x84] sm:$0xff]  }
 0x192   : > { %v2874_v18 = vadd.f32 %v2873_v9, %v16204_v30  ;;  %v16275_v16 = vadd.f32 %v18980_v52, %v15783_v1  ;;  %v6377_v39 = vrot.slane %v6375_v37, 4  ;;  %v6395_v34 = vshll.u32 %v12340_v43, 16 }
 0x193   : > { %v6369_v56 = vrot.slane %v6368_v3, 4  ;;  %v6383_v31 = vrot.slane %v6381_v0, 5  ;;  %v6388_v13 = vrot.slane %v6386_v45, 4  ;;  %v6391_v38 = vrot.slane %v6389_v32, 5  ;;  %v16289_v0 = vpop.f32.mrf.mxu0  ;;  %v16296_v32 = vpop.f32.mrf.mxu1 }
 0x194   : > { %v6378_v33 = vor.u32 %v6377_v39, %v6373_v11  ;;  %v6397_v48 = vrot.slane %v6395_v34, 5  ;;  %v6399_v42 = vshrl.u32 %v12340_v43, 16  ;;  %v6405_v12 = vshll.u32 %v12341_v63, 16  ;;  %18981 = vst [vmem:[#allocation38_spill] sm:$0xff] %v16289_v0  ;;  %v18982_v43 = vld [vmem:[#allocation51_spill] sm:$0xff] }
 0x195   : > { %v6374_v30 = vsel %vm14796_vm4, %v6369_v56, %v6373_v11  ;;  %v16285_v1 = vmul.f32 %v16267_v61, %v16267_v61  ;;  %v6392_v9 = vor.u32 %v6391_v38, %v6388_v13  ;;  %v2551_v37 = vadd.f32 %v15807_v51, %v16210_v29 }
 0x196   : > { %v6379_v3 = vrot.slane %v6378_v33, 4  ;;  %v6401_v45 = vrot.slane %v6399_v42, 4  ;;  %v16293_v63 = vadd.f32 %v18982_v43, %v15798_v57  ;;  %v2805_v11 = vadd.f32 %v2804_v24, %v16221_v35  ;;  %v12342_v57 = vld [vmem:[%s14758_s24 + $0x54] sm:$0xf]  ;;  %v12343_v35 = vld [vmem:[%s14758_s24 + $0x58] sm:$0xf] }
 0x197   : > { %v6393_v52 = vrot.slane %v6392_v9, 4  ;;  %v6407_v39 = vrot.slane %v6405_v12, 5  ;;  %v2845_v34 = vmul.f32 %v2551_v37, %v2551_v37  ;;  %v2875_v56 = vadd.f32 %v2874_v18, %v2844_v10  ;;  %14117 = vmatmul.mubr.msk.bf16.gmra.mxu0 %vm352_vm1, %v14506_v59  ;;  %v18983_v59 = vld [vmem:[#allocation59_spill] sm:$0xff]  ;;  %v18984_v33 = vld [vmem:[#allocation53_spill] sm:$0xff]  ;;  %v18986_v12 = vld [vmem:[#allocation54_spill] sm:$0xff] }
 0x198   : > { %v6384_v51 = vsel %vm14796_vm4, %v6379_v3, %v6383_v31  ;;  %v6402_v29 = vor.u32 %v6401_v45, %v6397_v48  ;;  %v2806_v13 = vadd.f32 %v2805_v11, %v2551_v37  ;;  %v16303_v38 = vadd.f32 %v15815_v44, %v16231_v62  ;;  %14120 = vmatprep.mubr.msk.bf16.mxu0 %vm352_vm1, %v14507_v54  ;;  %v16314_v42 = vpop.f32.mrf.mxu0  ;;  %v12344_v3 = vld [vmem:[%s14758_s24 + $0x5c] sm:$0x1] }
 0x199   : > { %v12377_v24 = vcombine.low %v6374_v30, %v6384_v51  ;;  %v6398_v10 = vsel %vm14796_vm4, %v6393_v52, %v6397_v48  ;;  %v2876_v18 = vadd.f32 %v2875_v56, %v2845_v34  ;;  %v16312_v31 = vadd.f32 %v18984_v33, %v18983_v59  ;;  %18985 = vst [vmem:[#allocation41_spill] sm:$0xff] %v16314_v42  ;;  %v16324_v30 = vpop.f32.mrf.mxu1  ;;  %v14508_v52 = vld [vmem:[%s14758_s24 + $0x90] sm:$0xff]   ;;  %v12345_v51 = vld [vmem:[%s14758_s24 + $0x60] sm:$0xf]  ;;  %v12346_v42 = vld [vmem:[%s14758_s24 + $0x64] sm:$0xf] }
 0x19a   : > { %v6403_v44 = vrot.slane %v6402_v29, 4  ;;  %v13199_v62 = vpack.c.bf16 %v16303_v38, %v16267_v61  ;;  %v16320_v54 = vadd.f32 %v18986_v12, %v15839_v25  ;;  %v2552_v48 = vadd.f32 %v15822_v36, %v16238_v17  ;;  %v16331_v25 = vpop.f32.mrf.mxu0  ;;  %v14509_v29 = vld [vmem:[%s14758_s24 + $0x9c] sm:$0xff]  }
 0x19b   : > { %14142 = vmatprep.mubr.msk.bf16.mxu1 %vm352_vm1, %v12377_v24  ;;  %v2848_v9 = vmul.f32 %v16303_v38, %v16303_v38  ;;  %v6410_v45 = vshrl.u32 %v12342_v57, 16  ;;  %v6413_v43 = vshll.u32 %v12342_v57, 16  ;;  %v6419_v11 = vshll.u32 %v12343_v35, 16  ;;  %18987 = vst [vmem:[#allocation40_spill] sm:$0xff] %v16331_v25  ;;  %v16338_v24 = vpop.f32.mrf.mxu1 }
 0x19c   : > { %v6408_v36 = vsel %vm14796_vm4, %v6403_v44, %v6407_v39  ;;  %13495 = vst [vmem:[%s16154_s13 + $0x28] sm:$0xff] %v13199_v62   ;;  %v13194_v17 = vpack.c.bf16 %v2552_v48, %v2551_v37  ;;  %v2807_v34 = vadd.f32 %v2806_v13, %v2552_v48  ;;  %v2846_v56 = vmul.f32 %v2552_v48, %v2552_v48  ;;  %v16341_v0 = vpop.f32.mrf.mxu0  ;;  %v12347_v48 = vld [vmem:[%s14758_s24 + $0x68] sm:$0x1] }
 0x19d   : > { %v12378_v59 = vcombine.low %v6398_v10, %v6408_v36  ;;  %v6412_v57 = vrot.slane %v6410_v45, 4  ;;  %v6415_v33 = vrot.slane %v6413_v43, 5  ;;  %v6421_v12 = vrot.slane %v6419_v11, 5  ;;  %18988 = vst [vmem:[#allocation43_spill] sm:$0xff] %v16341_v0  ;;  %v16345_v13 = vpop.f32.mrf.mxu1 }
 0x19e   : > { %13494 = vst [vmem:[%s16154_s13 + $0x20] sm:$0xff] %v13194_v17   ;;  %v2808_v25 = vadd.f32 %v2807_v34, %v16267_v61  ;;  %v2877_v39 = vadd.f32 %v2876_v18, %v2846_v56  ;;  %v6423_v44 = vshrl.u32 %v12343_v35, 16  ;;  %v6429_v37 = vshll.u32 %v12344_v3, 16  ;;  %v18989_v61 = vld [vmem:[#allocation55_spill] sm:$0xff]  ;;  %v16360_v34 = vpop.f32.mrf.mxu0 }
 0x19f   : > { %14143 = vmatmul.mubr.msk.bf16.gmra.mxu1 %vm352_vm1, %v12378_v59  ;;  %v6416_v62 = vor.u32 %v6415_v33, %v6412_v57  ;;  %v16350_v10 = vadd.f32 %v15828_v23, %v16275_v16  ;;  %v6434_v45 = vshrl.u32 %v12345_v51, 16  ;;  %v6437_v43 = vshll.u32 %v12345_v51, 16  ;;  %14121 = vmatmul.mubr.msk.bf16.gmra.mxu0 %vm352_vm1, %v14508_v52  ;;  %18990 = vst [vmem:[#allocation42_spill] sm:$0xff] %v16360_v34  ;;  %v16362_v59 = vpop.f32.mrf.mxu1  ;;  %v14512_v34 = vld [vmem:[%s14758_s24 + $0xc0] sm:$0xff]  }
 0x1a0   : > { %v2878_v11 = vadd.f32 %v2877_v39, %v16285_v1  ;;  %v16357_v35 = vadd.f32 %v18989_v61, %v15854_v19  ;;  %v6425_v18 = vrot.slane %v6423_v44, 4  ;;  %v6443_v3 = vshll.u32 %v12346_v42, 16  ;;  %14124 = vmatprep.mubr.msk.bf16.mxu0 %vm352_vm1, %v14509_v29  ;;  %v14510_v39 = vld [vmem:[%s14758_s24 + $0xa8] sm:$0xff]  }
 0x1a1   : > { %v6417_v36 = vrot.slane %v6416_v62, 4  ;;  %v6431_v17 = vrot.slane %v6429_v37, 5  ;;  %v6436_v23 = vrot.slane %v6434_v45, 4  ;;  %v6439_v16 = vrot.slane %v6437_v43, 5  ;;  %v18992_v62 = vld [vmem:[#allocation56_spill] sm:$0xff] }
 0x1a2   : > { %v6426_v56 = vor.u32 %v6425_v18, %v6421_v12  ;;  %v6445_v52 = vrot.slane %v6443_v3, 5  ;;  %v6447_v51 = vshrl.u32 %v12346_v42, 16  ;;  %v6453_v1 = vshll.u32 %v12347_v48, 16  ;;  %v18991_v42 = vld [vmem:[#allocation13_spill] sm:$0xff] }
 0x1a3   : > { %v6422_v19 = vsel %vm14796_vm4, %v6417_v36, %v6421_v12  ;;  %v16368_v57 = vmul.f32 %v16350_v10, %v16350_v10  ;;  %v6440_v29 = vor.u32 %v6439_v16, %v6436_v23  ;;  %v2555_v33 = vadd.f32 %v15835_v8, %v16293_v63  ;;  %v14511_v12 = vld [vmem:[%s14758_s24 + $0xb4] sm:$0xff]   ;;  %v16379_v36 = vpop.f32.mrf.mxu0  ;;  %v18994_v16 = vld [vmem:[#allocation64_spill] sm:$0xff] }
 0x1a4   : > { %v6427_v44 = vrot.slane %v6426_v56, 4  ;;  %v6449_v37 = vrot.slane %v6447_v51, 4  ;;  %v16375_v48 = vadd.f32 %v18992_v62, %v18991_v42  ;;  %v2809_v45 = vadd.f32 %v2808_v25, %v16303_v38  ;;  %18993 = vst [vmem:[#allocation44_spill] sm:$0xff] %v16379_v36  ;;  %v12348_v51 = vld [vmem:[%s14758_s24 + $0x6c] sm:$0xf] }
 0x1a5   : > { %v6441_v43 = vrot.slane %v6440_v29, 4  ;;  %v6455_v61 = vrot.slane %v6453_v1, 5  ;;  %v2849_v18 = vmul.f32 %v2555_v33, %v2555_v33  ;;  %v2879_v3 = vadd.f32 %v2878_v11, %v2848_v9  ;;  %v12349_v42 = vld [vmem:[%s14758_s24 + $0x70] sm:$0xf]  ;;  %v16389_v38 = vpop.f32.mrf.mxu1  ;;  %v18995_v1 = vld [vmem:[#allocation15_spill] sm:$0xff] }
 0x1a6   : > { %v6432_v8 = vsel %vm14796_vm4, %v6427_v44, %v6431_v17  ;;  %v6450_v63 = vor.u32 %v6449_v37, %v6445_v52  ;;  %v2810_v23 = vadd.f32 %v2809_v45, %v2555_v33  ;;  %v16385_v56 = vadd.f32 %v18994_v16, %v16312_v31  ;;  %v18996_v29 = vld [vmem:[#allocation57_spill] sm:$0xff]  ;;  %v16398_v17 = vpop.f32.mrf.mxu0  ;;  %v18998_v37 = vld [vmem:[#allocation58_spill] sm:$0xff]  ;;  %v12352_v36 = vld [vmem:[%s14758_s24 + $0x7c] sm:$0xf] }
 0x1a7   : > { %v12379_v25 = vcombine.low %v6422_v19, %v6432_v8  ;;  %v6446_v9 = vsel %vm14796_vm4, %v6441_v43, %v6445_v52  ;;  %v2880_v11 = vadd.f32 %v2879_v3, %v2849_v18  ;;  %v16395_v62 = vadd.f32 %v18996_v29, %v18995_v1  ;;  %14125 = vmatmul.mubr.msk.bf16.gmra.mxu0 %vm352_vm1, %v14510_v39  ;;  %v18999_v52 = vld [vmem:[#allocation14_spill] sm:$0xff]  ;;  %v16409_v43 = vpop.f32.mrf.mxu1 }
 0x1a8   : > { %18997 = vst [vmem:[#allocation45_spill] sm:$0xff] %v16398_v17  ;;  %v6451_v31 = vrot.slane %v6450_v63, 4  ;;  %v13209_v44 = vpack.c.bf16 %v16385_v56, %v16350_v10  ;;  %v16404_v19 = vadd.f32 %v18998_v37, %v15906_v49  ;;  %v2556_v45 = vadd.f32 %v18999_v52, %v16320_v54  ;;  %14128 = vmatprep.mubr.msk.bf16.mxu0 %vm352_vm1, %v14511_v12  ;;  %v12350_v18 = vld [vmem:[%s14758_s24 + $0x74] sm:$0x1]  ;;  %v16415_v63 = vpop.f32.mrf.mxu0  ;;  %v12351_v1 = vld [vmem:[%s14758_s24 + $0x78] sm:$0xf] }
 0x1a9   : > { %14146 = vmatprep.mubr.msk.bf16.mxu1 %vm352_vm1, %v12379_v25  ;;  %v2852_v39 = vmul.f32 %v16385_v56, %v16385_v56  ;;  %v6458_v3 = vshrl.u32 %v12348_v51, 16  ;;  %v6461_v8 = vshll.u32 %v12348_v51, 16  ;;  %v6467_v49 = vshll.u32 %v12349_v42, 16  ;;  %19000 = vst [vmem:[#allocation50_spill] sm:$0xff] %v16415_v63  ;;  %v16421_v29 = vpop.f32.mrf.mxu1 }
 0x1aa   : > { %v6456_v54 = vsel %vm14796_vm4, %v6451_v31, %v6455_v61  ;;  %13497 = vst [vmem:[%s16154_s13 + $0x38] sm:$0xff] %v13209_v44   ;;  %v13204_v12 = vpack.c.bf16 %v2556_v45, %v2555_v33  ;;  %v2811_v16 = vadd.f32 %v2810_v23, %v2556_v45  ;;  %v2850_v25 = vmul.f32 %v2556_v45, %v2556_v45  ;;  %v14513_v33 = vld [vmem:[%s14758_s24 + $0x18] sm:$0xff]  }
 0x1ab   : > { %v12380_v37 = vcombine.low %v6446_v9, %v6456_v54  ;;  %v6460_v52 = vrot.slane %v6458_v3, 4  ;;  %v6463_v17 = vrot.slane %v6461_v8, 5  ;;  %v6469_v51 = vrot.slane %v6467_v49, 5  ;;  %v19001_v44 = vld [vmem:[#allocation66_spill] sm:$0xff]  ;;  %v12353_v9 = vld [vmem:[%s14758_s24 + $0x80] sm:$0x1]  ;;  %v16434_v49 = vpop.f32.mrf.mxu0 }
 0x1ac   : > { %13496 = vst [vmem:[%s16154_s13 + $0x30] sm:$0xff] %v13204_v12   ;;  %v2812_v63 = vadd.f32 %v2811_v16, %v16350_v10  ;;  %v2881_v0 = vadd.f32 %v2880_v11, %v2850_v25  ;;  %v6471_v61 = vshrl.u32 %v12349_v42, 16  ;;  %v6477_v31 = vshll.u32 %v12350_v18, 16  ;;  %19002 = vst [vmem:[#allocation46_spill] sm:$0xff] %v16434_v49  ;;  %v19003_v10 = vld [vmem:[#allocation60_spill] sm:$0xff]  ;;  %v16441_v12 = vpop.f32.mrf.mxu1 }
 0x1ad   : > { %14147 = vmatmul.mubr.msk.bf16.gmra.mxu1 %vm352_vm1, %v12380_v37  ;;  %v6464_v23 = vor.u32 %v6463_v17, %v6460_v52  ;;  %v16431_v45 = vadd.f32 %v19001_v44, %v16357_v35  ;;  %v6482_v3 = vshrl.u32 %v12351_v1, 16  ;;  %v6485_v8 = vshll.u32 %v12351_v1, 16 }
 0x1ae   : > { %v2882_v54 = vadd.f32 %v2881_v0, %v16368_v57  ;;  %v16439_v11 = vadd.f32 %v19003_v10, %v15921_v22  ;;  %v6473_v42 = vrot.slane %v6471_v61, 4  ;;  %v6491_v18 = vshll.u32 %v12352_v36, 16 }
 0x1af   : > { %v6465_v17 = vrot.slane %v6464_v23, 4  ;;  %v6479_v16 = vrot.slane %v6477_v31, 5  ;;  %v6484_v25 = vrot.slane %v6482_v3, 4  ;;  %v6487_v35 = vrot.slane %v6485_v8, 5  ;;  %14129 = vmatmul.mubr.msk.bf16.gmra.mxu0 %vm352_vm1, %v14512_v34  ;;  %v19005_v23 = vld [vmem:[#allocation61_spill] sm:$0xff] }
 0x1b0   : > { %v6474_v37 = vor.u32 %v6473_v42, %v6469_v51  ;;  %v6493_v1 = vrot.slane %v6491_v18, 5  ;;  %v6495_v52 = vshrl.u32 %v12352_v36, 16  ;;  %v6501_v44 = vshll.u32 %v12353_v9, 16  ;;  %14168 = vmatprep.mubr.msk.bf16.mxu0 %vm352_vm1, %v14513_v33  ;;  %v16453_v31 = vpop.f32.mrf.mxu0 }
 0x1b1   : > { %v6470_v22 = vsel %vm14796_vm4, %v6465_v17, %v6469_v51  ;;  %v16449_v0 = vmul.f32 %v16431_v45, %v16431_v45  ;;  %v6488_v57 = vor.u32 %v6487_v35, %v6484_v25  ;;  %v2559_v61 = vadd.f32 %v15891_v5, %v16375_v48  ;;  %19004 = vst [vmem:[#allocation52_spill] sm:$0xff] %v16453_v31  ;;  %v16460_v9 = vpop.f32.mrf.mxu1  ;;  %v14514_v5 = vld [vmem:[%s14758_s24 + $0x24] sm:$0xff]   ;;  %v12358_v31 = vld [vmem:[%s14758_s24 + $0x94] sm:$0xf] }
 0x1b2   : > { %v6475_v34 = vrot.slane %v6474_v37, 4  ;;  %v6497_v36 = vrot.slane %v6495_v52, 4  ;;  %v16457_v33 = vadd.f32 %v19005_v23, %v15932_v27  ;;  %v2813_v51 = vadd.f32 %v2812_v63, %v16385_v56  ;;  %v16463_v48 = vpop.f32.mrf.mxu0  ;;  %v19007_v35 = vld [vmem:[#allocation68_spill] sm:$0xff]  ;;  %v14515_v63 = vld [vmem:[%s14758_s24 + $0x30] sm:$0xff]  }
 0x1b3   : > { %v6489_v3 = vrot.slane %v6488_v57, 4  ;;  %v6503_v8 = vrot.slane %v6501_v44, 5  ;;  %v2853_v10 = vmul.f32 %v2559_v61, %v2559_v61  ;;  %v2883_v42 = vadd.f32 %v2882_v54, %v2852_v39  ;;  %19006 = vst [vmem:[#allocation47_spill] sm:$0xff] %v16463_v48  ;;  %v12354_v37 = vld [vmem:[%s14758_s24 + $0x84] sm:$0xf]  ;;  %v16474_v52 = vpop.f32.mrf.mxu1  ;;  %v19008_v57 = vld [vmem:[#allocation19_spill] sm:$0xff] }
 0x1b4   : > { %v6480_v18 = vsel %vm14796_vm4, %v6475_v34, %v6479_v16  ;;  %v6498_v17 = vor.u32 %v6497_v36, %v6493_v1  ;;  %v2814_v25 = vadd.f32 %v2813_v51, %v2559_v61  ;;  %v16469_v27 = vadd.f32 %v19007_v35, %v16395_v62  ;;  %v12355_v56 = vld [vmem:[%s14758_s24 + $0x88] sm:$0xf]  ;;  %v19009_v23 = vld [vmem:[#allocation62_spill] sm:$0xff]  ;;  %v16482_v34 = vpop.f32.mrf.mxu0  ;;  %v19011_v51 = vld [vmem:[#allocation63_spill] sm:$0xff] }
 0x1b5   : > { %v12381_v44 = vcombine.low %v6470_v22, %v6480_v18  ;;  %v6494_v39 = vsel %vm14796_vm4, %v6489_v3, %v6493_v1  ;;  %v2884_v54 = vadd.f32 %v2883_v42, %v2853_v10  ;;  %v16480_v16 = vadd.f32 %v19009_v23, %v19008_v57  ;;  %19010 = vst [vmem:[#allocation48_spill] sm:$0xff] %v16482_v34  ;;  %v19012_v22 = vld [vmem:[#allocation16_spill] sm:$0xff]  ;;  %v16492_v3 = vpop.f32.mrf.mxu1  ;;  %v12356_v42 = vld [vmem:[%s14758_s24 + $0x8c] sm:$0x1] }
 0x1b6   : > { %v6499_v62 = vrot.slane %v6498_v17, 4  ;;  %v13219_v36 = vpack.c.bf16 %v16469_v27, %v16431_v45  ;;  %v16488_v35 = vadd.f32 %v19011_v51, %v15972_v46  ;;  %v2560_v1 = vadd.f32 %v19012_v22, %v16404_v19  ;;  %v12357_v22 = vld [vmem:[%s14758_s24 + $0x90] sm:$0xf]  ;;  %v16505_v49 = vpop.f32.mrf.mxu0 }
 0x1b7   : > { %14150 = vmatprep.mubr.msk.bf16.mxu1 %vm352_vm1, %v12381_v44  ;;  %v2856_v10 = vmul.f32 %v16469_v27, %v16469_v27  ;;  %v6506_v18 = vshrl.u32 %v12354_v37, 16  ;;  %v6509_v17 = vshll.u32 %v12354_v37, 16  ;;  %v6515_v57 = vshll.u32 %v12355_v56, 16  ;;  %14169 = vmatmul.mubr.msk.bf16.vlgmr.msra.gmra.mxu0 %vm352_vm1, %v14514_v5  ;;  %19013 = vst [vmem:[#allocation49_spill] sm:$0xff] %v16505_v49 }
 0x1b8   : > { %v6504_v46 = vsel %vm14796_vm4, %v6499_v62, %v6503_v8  ;;  %13499 = vst [vmem:[%s16154_s13 + $0x48] sm:$0xff] %v13219_v36   ;;  %v13214_v19 = vpack.c.bf16 %v2560_v1, %v2559_v61  ;;  %v2815_v23 = vadd.f32 %v2814_v25, %v2560_v1  ;;  %v2854_v51 = vmul.f32 %v2560_v1, %v2560_v1  ;;  %v16509_v62 = vpop.f32.mrf.mxu1  ;;  %v12359_v1 = vld [vmem:[%s14758_s24 + $0x98] sm:$0x1] }
 0x1b9   : > { %14172 = vmatprep.mubr.msk.bf16.mxu0 %vm352_vm1, %v14515_v63  ;;  %v12382_v44 = vcombine.low %v6494_v39, %v6504_v46  ;;  %v6508_v34 = vrot.slane %v6506_v18, 4  ;;  %v6511_v48 = vrot.slane %v6509_v17, 5  ;;  %v6517_v37 = vrot.slane %v6515_v57, 5  ;;  %19014 = vst [vmem:[#allocation51_spill] sm:$0xff] %v16509_v62  ;;  %v19015_v39 = vld [vmem:[#allocation17_spill] sm:$0xff]  ;;  %v14516_v57 = vld [vmem:[%s14758_s24 + $0x3c] sm:$0xff]  }
 0x1ba   : > { %13498 = vst [vmem:[%s16154_s13 + $0x40] sm:$0xff] %v13214_v19   ;;  %v2816_v5 = vadd.f32 %v2815_v23, %v16431_v45  ;;  %v2885_v8 = vadd.f32 %v2884_v54, %v2854_v51  ;;  %v6519_v61 = vshrl.u32 %v12355_v56, 16  ;;  %v6525_v25 = vshll.u32 %v12356_v42, 16  ;;  %v19016_v45 = vld [vmem:[#allocation65_spill] sm:$0xff] }
 0x1bb   : > { %14151 = vmatmul.mubr.msk.bf16.gmra.mxu1 %vm352_vm1, %v12382_v44  ;;  %v6512_v63 = vor.u32 %v6511_v48, %v6508_v34  ;;  %v16514_v36 = vadd.f32 %v19015_v39, %v16439_v11  ;;  %v6530_v18 = vshrl.u32 %v12357_v22, 16  ;;  %v6533_v17 = vshll.u32 %v12357_v22, 16  ;;  %v14517_v19 = vld [vmem:[%s14758_s24 + $0x48] sm:$0xff]  }
 0x1bc   : > { %v2886_v46 = vadd.f32 %v2885_v8, %v16449_v0  ;;  %v16521_v54 = vadd.f32 %v19016_v45, %v15985_v50  ;;  %v6521_v56 = vrot.slane %v6519_v61, 4  ;;  %v6539_v42 = vshll.u32 %v12358_v31, 16  ;;  %v16524_v44 = vpop.f32.mrf.mxu0  ;;  %v19018_v61 = vld [vmem:[#allocation70_spill] sm:$0xff] }
 0x1bd   : > { %v6513_v23 = vrot.slane %v6512_v63, 4  ;;  %v6527_v51 = vrot.slane %v6525_v25, 5  ;;  %v6532_v48 = vrot.slane %v6530_v18, 4  ;;  %v6535_v34 = vrot.slane %v6533_v17, 5  ;;  %19017 = vst [vmem:[#allocation59_spill] sm:$0xff] %v16524_v44  ;;  %v16526_v62 = vpop.f32.mrf.mxu1  ;;  %v19020_v18 = vld [vmem:[#allocation67_spill] sm:$0xff] }
 0x1be   : > { %v6522_v11 = vor.u32 %v6521_v56, %v6517_v37  ;;  %v6541_v39 = vrot.slane %v6539_v42, 5  ;;  %v6543_v49 = vshrl.u32 %v12358_v31, 16  ;;  %v6549_v22 = vshll.u32 %v12359_v1, 16  ;;  %v16537_v63 = vpop.f32.mrf.mxu0 }
 0x1bf   : > { %v6518_v0 = vsel %vm14796_vm4, %v6513_v23, %v6517_v37  ;;  %v16532_v50 = vmul.f32 %v16514_v36, %v16514_v36  ;;  %v6536_v8 = vor.u32 %v6535_v34, %v6532_v48  ;;  %v2563_v25 = vadd.f32 %v19018_v61, %v16457_v33  ;;  %14173 = vmatmul.mubr.msk.bf16.gmra.mxu0 %vm352_vm1, %v14516_v57  ;;  %v16545_v45 = vpop.f32.mrf.mxu1  ;;  %v19022_v34 = vld [vmem:[#allocation71_spill] sm:$0xff]  ;;  %v14518_v61 = vld [vmem:[%s14758_s24 + $0x54] sm:$0xff]  }
 0x1c0   : > { %19019 = vst [vmem:[#allocation53_spill] sm:$0xff] %v16537_v63  ;;  %v6523_v31 = vrot.slane %v6522_v11, 4  ;;  %v6545_v1 = vrot.slane %v6543_v49, 4  ;;  %v16541_v17 = vadd.f32 %v19020_v18, %v15996_v55  ;;  %v2817_v37 = vadd.f32 %v2816_v5, %v16469_v27  ;;  %14176 = vmatprep.mubr.msk.bf16.mxu0 %vm352_vm1, %v14517_v19  ;;  %v16547_v23 = vpop.f32.mrf.mxu0  ;;  %v12360_v5 = vld [vmem:[%s14758_s24 + $0x9c] sm:$0xf] }
 0x1c1   : > { %v6537_v56 = vrot.slane %v6536_v8, 4  ;;  %v6551_v33 = vrot.slane %v6549_v22, 5  ;;  %v2857_v57 = vmul.f32 %v2563_v25, %v2563_v25  ;;  %v2887_v42 = vadd.f32 %v2886_v46, %v2856_v10  ;;  %19021 = vst [vmem:[#allocation54_spill] sm:$0xff] %v16547_v23  ;;  %v12361_v19 = vld [vmem:[%s14758_s24 + $0xa0] sm:$0xf]  ;;  %v16557_v11 = vpop.f32.mrf.mxu1  ;;  %v19023_v8 = vld [vmem:[#allocation69_spill] sm:$0xff] }
 0x1c2   : > { %v6528_v49 = vsel %vm14796_vm4, %v6523_v31, %v6527_v51  ;;  %v6546_v48 = vor.u32 %v6545_v1, %v6541_v39  ;;  %v2818_v55 = vadd.f32 %v2817_v37, %v2563_v25  ;;  %v16553_v27 = vadd.f32 %v19022_v34, %v16480_v16  ;;  %v19024_v1 = vld [vmem:[#allocation18_spill] sm:$0xff]  ;;  %v12362_v37 = vld [vmem:[%s14758_s24 + $0xa4] sm:$0x1]  ;;  %v12363_v34 = vld [vmem:[%s14758_s24 + $0xa8] sm:$0xf] }
 0x1c3   : > { %v12383_v22 = vcombine.low %v6518_v0, %v6528_v49  ;;  %v6542_v10 = vsel %vm14796_vm4, %v6537_v56, %v6541_v39  ;;  %v2888_v46 = vadd.f32 %v2887_v42, %v2857_v57  ;;  %v16563_v51 = vadd.f32 %v19023_v8, %v16006_v14  ;;  %v14519_v39 = vld [vmem:[%s14758_s24 + $0x60] sm:$0xff]   ;;  %v16579_v49 = vpop.f32.mrf.mxu0 }
 0x1c4   : > { %v6547_v31 = vrot.slane %v6546_v48, 4  ;;  %v13229_v16 = vpack.c.bf16 %v16553_v27, %v16514_v36  ;;  %v16570_v18 = vadd.f32 %v19024_v1, %v16010_v4  ;;  %v2564_v0 = vadd.f32 %v15957_v26, %v16488_v35  ;;  %19025 = vst [vmem:[#allocation55_spill] sm:$0xff] %v16579_v49 }
 0x1c5   : > { %14154 = vmatprep.mubr.msk.bf16.mxu1 %vm352_vm1, %v12383_v22  ;;  %v2860_v14 = vmul.f32 %v16553_v27, %v16553_v27  ;;  %v6554_v56 = vshrl.u32 %v12360_v5, 16  ;;  %v6557_v57 = vshll.u32 %v12360_v5, 16  ;;  %v6563_v42 = vshll.u32 %v12361_v19, 16  ;;  %v16585_v22 = vpop.f32.mrf.mxu1  ;;  %v12364_v5 = vld [vmem:[%s14758_s24 + $0xac] sm:$0xf] }
 0x1c6   : > { %v6552_v4 = vsel %vm14796_vm4, %v6547_v31, %v6551_v33  ;;  %13501 = vst [vmem:[%s16154_s13 + $0x58] sm:$0xff] %v13229_v16   ;;  %v13224_v48 = vpack.c.bf16 %v2564_v0, %v2563_v25  ;;  %v2819_v26 = vadd.f32 %v2818_v55, %v2564_v0  ;;  %v2858_v35 = vmul.f32 %v2564_v0, %v2564_v0  ;;  %v19026_v55 = vld [vmem:[#allocation74_spill] sm:$0xff]  ;;  %v12365_v16 = vld [vmem:[%s14758_s24 + $0xb0] sm:$0x1] }
 0x1c7   : > { %v12384_v8 = vcombine.low %v6542_v10, %v6552_v4  ;;  %v6556_v1 = vrot.slane %v6554_v56, 4  ;;  %v6559_v23 = vrot.slane %v6557_v57, 5  ;;  %v6565_v63 = vrot.slane %v6563_v42, 5  ;;  %14177 = vmatmul.mubr.msk.bf16.gmra.mxu0 %vm352_vm1, %v14518_v61  ;;  %v16598_v61 = vpop.f32.mrf.mxu0 }
 0x1c8   : > { %13500 = vst [vmem:[%s16154_s13 + $0x50] sm:$0xff] %v13224_v48   ;;  %v2820_v49 = vadd.f32 %v2819_v26, %v16514_v36  ;;  %v2889_v44 = vadd.f32 %v2888_v46, %v2858_v35  ;;  %v6567_v33 = vshrl.u32 %v12361_v19, 16  ;;  %v6573_v31 = vshll.u32 %v12362_v37, 16  ;;  %14180 = vmatprep.mubr.msk.bf16.mxu0 %vm352_vm1, %v14519_v39  ;;  %19027 = vst [vmem:[#allocation13_spill] sm:$0xff] %v16598_v61  ;;  %v19028_v19 = vld [vmem:[#allocation72_spill] sm:$0xff]  ;;  %v14520_v48 = vld [vmem:[%s14758_s24 + $0x6c] sm:$0xff]  }
 0x1c9   : > { %14155 = vmatmul.mubr.msk.bf16.gmra.mxu1 %vm352_vm1, %v12384_v8  ;;  %v6560_v25 = vor.u32 %v6559_v23, %v6556_v1  ;;  %v16595_v10 = vadd.f32 %v19026_v55, %v16521_v54  ;;  %v6578_v0 = vshrl.u32 %v12363_v34, 16  ;;  %v6581_v56 = vshll.u32 %v12363_v34, 16  ;;  %v16605_v57 = vpop.f32.mrf.mxu1  ;;  %v16608_v26 = vpop.f32.mrf.mxu0 }
 0x1ca   : > { %v2890_v36 = vadd.f32 %v2889_v44, %v16532_v50  ;;  %v16603_v46 = vadd.f32 %v19028_v19, %v16025_v21  ;;  %v6569_v39 = vrot.slane %v6567_v33, 4  ;;  %v6587_v37 = vshll.u32 %v12364_v5, 16  ;;  %19029 = vst [vmem:[#allocation56_spill] sm:$0xff] %v16605_v57  ;;  %19030 = vst [vmem:[#allocation64_spill] sm:$0xff] %v16608_v26  ;;  %v14521_v44 = vld [vmem:[%s14758_s24 + $0x78] sm:$0xff]  }
 0x1cb   : > { %v6561_v23 = vrot.slane %v6560_v25, 4  ;;  %v6575_v42 = vrot.slane %v6573_v31, 5  ;;  %v6580_v54 = vrot.slane %v6578_v0, 4  ;;  %v6583_v4 = vrot.slane %v6581_v56, 5  ;;  %v16611_v50 = vpop.f32.mrf.mxu1  ;;  %v19032_v25 = vld [vmem:[#allocation33_spill] sm:$0xff] }
 0x1cc   : > { %v6570_v35 = vor.u32 %v6569_v39, %v6565_v63  ;;  %v6589_v34 = vrot.slane %v6587_v37, 5  ;;  %v6591_v8 = vshrl.u32 %v12364_v5, 16  ;;  %v6597_v1 = vshll.u32 %v12365_v16, 16  ;;  %19031 = vst [vmem:[#allocation15_spill] sm:$0xff] %v16611_v50  ;;  %v19033_v5 = vld [vmem:[#allocation22_spill] sm:$0xff]  ;;  %v19034_v16 = vld [vmem:[#allocation73_spill] sm:$0xff]  ;;  %v16626_v37 = vpop.f32.mrf.mxu0 }
 0x1cd   : > { %v6566_v21 = vsel %vm14796_vm4, %v6561_v23, %v6565_v63  ;;  %v16617_v33 = vmul.f32 %v16595_v10, %v16595_v10  ;;  %v6584_v31 = vor.u32 %v6583_v4, %v6580_v54  ;;  %v2567_v55 = vadd.f32 %v19032_v25, %v16541_v17  ;;  %19035 = vst [vmem:[#allocation57_spill] sm:$0xff] %v16626_v37  ;;  %v16628_v63 = vpop.f32.mrf.mxu1  ;;  %v19037_v25 = vld [vmem:[#allocation35_spill] sm:$0xff] }
 0x1ce   : > { %v6571_v0 = vrot.slane %v6570_v35, 4  ;;  %v6593_v56 = vrot.slane %v6591_v8, 4  ;;  %v16623_v19 = vadd.f32 %v19034_v16, %v19033_v5  ;;  %v2821_v39 = vadd.f32 %v2820_v49, %v16553_v27  ;;  %19036 = vst [vmem:[#allocation58_spill] sm:$0xff] %v16628_v63  ;;  %v12366_v27 = vld [vmem:[%s14758_s24 + $0xb4] sm:$0xf]  ;;  %v19041_v16 = vld [vmem:[#allocation24_spill] sm:$0xff] }
 0x1cf   : > { %v6585_v23 = vrot.slane %v6584_v31, 4  ;;  %v6599_v26 = vrot.slane %v6597_v1, 5  ;;  %v2861_v54 = vmul.f32 %v2567_v55, %v2567_v55  ;;  %v2891_v4 = vadd.f32 %v2890_v36, %v2860_v14  ;;  %14181 = vmatmul.mubr.msk.bf16.gmra.mxu0 %vm352_vm1, %v14520_v48  ;;  %v12367_v49 = vld [vmem:[%s14758_s24 + $0xb8] sm:$0xf]  ;;  %v19038_v48 = vld [vmem:[#allocation23_spill] sm:$0xff]  ;;  %v19039_v1 = vld [vmem:[#allocation20_spill] sm:$0xff] }
 0x1d0   : > { %v6576_v17 = vsel %vm14796_vm4, %v6571_v0, %v6575_v42  ;;  %v6594_v35 = vor.u32 %v6593_v56, %v6589_v34  ;;  %v2822_v8 = vadd.f32 %v2821_v39, %v2567_v55  ;;  %v16635_v5 = vadd.f32 %v19037_v25, %v16563_v51  ;;  %14184 = vmatprep.mubr.msk.bf16.mxu0 %vm352_vm1, %v14521_v44  ;;  %v16646_v0 = vpop.f32.mrf.mxu1  ;;  %v19042_v39 = vld [vmem:[#allocation21_spill] sm:$0xff]  ;;  %v12370_v63 = vld [vmem:[%s14758_s24 + $0xc4] sm:$0xf] }
 0x1d1   : > { %v12385_v31 = vcombine.low %v6566_v21, %v6576_v17  ;;  %v6590_v14 = vsel %vm14796_vm4, %v6585_v23, %v6589_v34  ;;  %v2892_v36 = vadd.f32 %v2891_v4, %v2861_v54  ;;  %v16644_v42 = vadd.f32 %v19039_v1, %v19038_v48  ;;  %19040 = vst [vmem:[#allocation14_spill] sm:$0xff] %v16646_v0  ;;  %v19043_v21 = vld [vmem:[#allocation31_spill] sm:$0xff]  ;;  %v16657_v54 = vpop.f32.mrf.mxu0  ;;  %v14522_v48 = vld [vmem:[%s14758_s24 + $0x84] sm:$0xff]  }
 0x1d2   : > { %v6595_v56 = vrot.slane %v6594_v35, 4  ;;  %v13239_v51 = vpack.c.bf16 %v16635_v5, %v16595_v10  ;;  %v16652_v44 = vadd.f32 %v19042_v39, %v19041_v16  ;;  %v2568_v34 = vadd.f32 %v19043_v21, %v16570_v18  ;;  %v12368_v23 = vld [vmem:[%s14758_s24 + $0xbc] sm:$0x1]  ;;  %19044 = vst [vmem:[#allocation66_spill] sm:$0xff] %v16657_v54  ;;  %v12369_v18 = vld [vmem:[%s14758_s24 + $0xc0] sm:$0xf] }
 0x1d3   : > { %14158 = vmatprep.mubr.msk.bf16.mxu1 %vm352_vm1, %v12385_v31  ;;  %v6602_v4 = vshrl.u32 %v12366_v27, 16  ;;  %v6605_v17 = vshll.u32 %v12366_v27, 16  ;;  %v6611_v35 = vshll.u32 %v12367_v49, 16  ;;  %v6615_v25 = vshrl.u32 %v12367_v49, 16  ;;  %v14523_v21 = vld [vmem:[%s14758_s24 + $0x90] sm:$0xff]  }
 0x1d4   : > { %v6600_v1 = vsel %vm14796_vm4, %v6595_v56, %v6599_v26  ;;  %13503 = vst [vmem:[%s16154_s13 + $0x68] sm:$0xff] %v13239_v51   ;;  %v13234_v16 = vpack.c.bf16 %v2568_v34, %v2567_v55  ;;  %v2823_v39 = vadd.f32 %v2822_v8, %v2568_v34  ;;  %v2862_v37 = vmul.f32 %v2568_v34, %v2568_v34  ;;  %v16667_v27 = vpop.f32.mrf.mxu1 }
 0x1d5   : > { %v12386_v54 = vcombine.low %v6590_v14, %v6600_v1  ;;  %v6604_v61 = vrot.slane %v6602_v4, 4  ;;  %v6607_v31 = vrot.slane %v6605_v17, 5  ;;  %v6613_v0 = vrot.slane %v6611_v35, 5  ;;  %v16671_v56 = vpop.f32.mrf.mxu0  ;;  %v12371_v14 = vld [vmem:[%s14758_s24 + $0xc8] sm:$0x1] }
 0x1d6   : > { %13502 = vst [vmem:[%s16154_s13 + $0x60] sm:$0xff] %v13234_v16   ;;  %v2824_v49 = vadd.f32 %v2823_v39, %v16595_v10  ;;  %v2893_v50 = vadd.f32 %v2892_v36, %v2862_v37  ;;  %v6617_v57 = vrot.slane %v6615_v25, 4  ;;  %v6621_v26 = vshll.u32 %v12368_v23, 16  ;;  %v16678_v4 = vpop.f32.mrf.mxu1 }
 0x1d7   : > { %14159 = vmatmul.mubr.msk.bf16.gmra.mxu1 %vm352_vm1, %v12386_v54  ;;  %v2864_v55 = vmul.f32 %v16635_v5, %v16635_v5  ;;  %v6608_v8 = vor.u32 %v6607_v31, %v6604_v61  ;;  %v6626_v51 = vshrl.u32 %v12369_v18, 16  ;;  %v6629_v34 = vshll.u32 %v12369_v18, 16  ;;  %14185 = vmatmul.mubr.msk.bf16.gmra.mxu0 %vm352_vm1, %v14522_v48  ;;  %v16682_v17 = vpop.f32.mrf.mxu0 }
 0x1d8   : > { %v2894_v10 = vadd.f32 %v2893_v50, %v16617_v33  ;;  %v6618_v37 = vor.u32 %v6617_v57, %v6613_v0  ;;  %v6623_v36 = vrot.slane %v6621_v26, 5  ;;  %v6635_v23 = vshll.u32 %v12370_v63, 16  ;;  %14188 = vmatprep.mubr.msk.bf16.mxu0 %vm352_vm1, %v14523_v21 }
 0x1d9   : > { %v6609_v54 = vrot.slane %v6608_v8, 4  ;;  %v2573_v61 = vadd.f32 %v16094_v47, %v16603_v46  ;;  %v6628_v35 = vrot.slane %v6626_v51, 4  ;;  %v6631_v25 = vrot.slane %v6629_v34, 5  ;;  %v16686_v50 = vpop.f32.mrf.mxu0  ;;  %v16693_v46 = vpop.f32.mrf.mxu1  ;;  %v12470_v8 = vld [vmem:[%s14758_s24 + $0x18] sm:$0xf] }
 0x1da   : > { %v6619_v48 = vrot.slane %v6618_v37, 4  ;;  %v6637_v1 = vrot.slane %v6635_v23, 5  ;;  %v6639_v16 = vshrl.u32 %v12370_v63, 16  ;;  %v6645_v39 = vshll.u32 %v12371_v14, 16  ;;  %v14524_v14 = vld [vmem:[%s14758_s24 + $0x9c] sm:$0xff]   ;;  %v14525_v23 = vld [vmem:[%s14758_s24 + $0xa8] sm:$0xff]  }
 0x1db   : > { %v6614_v57 = vsel %vm14796_vm4, %v6609_v54, %v6613_v0  ;;  %v6632_v33 = vor.u32 %v6631_v25, %v6628_v35  ;;  %v2571_v18 = vadd.f32 %v16110_v28, %v16623_v19  ;;  %v2825_v47 = vadd.f32 %v2824_v49, %v16635_v5  ;;  %v16700_v28 = vpop.f32.mrf.mxu0  ;;  %v12841_v19 = vld [vmem:[%s18836_s1 + $0x38] sm:$0xf] }
 0x1dc   : > { %v6624_v21 = vsel %vm14796_vm4, %v6619_v48, %v6623_v36  ;;  %v6641_v31 = vrot.slane %v6639_v16, 4  ;;  %v6647_v63 = vrot.slane %v6645_v39, 5  ;;  %v2895_v26 = vadd.f32 %v2894_v10, %v2864_v55  ;;  %v19045_v55 = vld [vmem:[#allocation26_spill] sm:$0xff]  ;;  %v14531_v36 = vld [vmem:[%s18836_s1 + $0x30] sm:$0xf] }
 0x1dd   : > { %v12387_v51 = vcombine.low %v6614_v57, %v6624_v21  ;;  %v6633_v34 = vrot.slane %v6632_v33, 4  ;;  %v2826_v0 = vadd.f32 %v2825_v47, %v2571_v18  ;;  %v2865_v37 = vmul.f32 %v2571_v18, %v2571_v18  ;;  %v12471_v48 = vld [vmem:[%s14758_s24 + $0x1c] sm:$0xf]  ;;  %v12472_v16 = vld [vmem:[%s14758_s24 + $0x20] sm:$0x1] }
 0x1de   : > { %v6642_v5 = vor.u32 %v6641_v31, %v6637_v1  ;;  %v2574_v49 = vadd.f32 %v16130_v15, %v16644_v42  ;;  %v2572_v10 = vadd.f32 %v19045_v55, %v16652_v44  ;;  %v9055_v54 = vsel %vm401_vm0, %v14531_v36, 0  ;;  %v16716_v15 = vpop.f32.mrf.mxu1 }
 0x1df   : > { %14162 = vmatprep.mubr.msk.bf16.mxu1 %vm352_vm1, %v12387_v51  ;;  %v2867_v35 = vmul.f32 %v2573_v61, %v2573_v61  ;;  %v2896_v25 = vadd.f32 %v2895_v26, %v2865_v37  ;;  %14235 = vmatpush3.bf16.msra.mxu0 %v9055_v54  ;;  %v7482_v39 = vshrl.u32 %v12470_v8, 16  ;;  %v7485_v57 = vshll.u32 %v12470_v8, 16  ;;  %v12473_v37 = vld [vmem:[%s14758_s24 + $0x24] sm:$0xf] }
 0x1e0   : > { %v6638_v42 = vsel %vm14796_vm4, %v6633_v34, %v6637_v1  ;;  %v6643_v44 = vrot.slane %v6642_v5, 4  ;;  %v13249_v33 = vpack.c.bf16 %v2574_v49, %v2573_v61  ;;  %v13244_v47 = vpack.c.bf16 %v2572_v10, %v2571_v18  ;;  %14189 = vmatmul.mubr.msk.bf16.gmra.mxu0 %vm352_vm1, %v14524_v14  ;;  %14384 = vmatprep.subr.msk.bf16.mxu0 %vm401_vm0, %v12841_v19  ;;  %v16723_v8 = vpop.f32.mrf.mxu0 }
 0x1e1   : > { %v2827_v21 = vadd.f32 %v2826_v0, %v2572_v10  ;;  %v2866_v31 = vmul.f32 %v2572_v10, %v2572_v10  ;;  %v7484_v26 = vrot.slane %v7482_v39, 4  ;;  %v7487_v51 = vrot.slane %v7485_v57, 5  ;;  %14192 = vmatprep.mubr.msk.bf16.mxu0 %vm352_vm1, %v14525_v23  ;;  %v12474_v10 = vld [vmem:[%s14758_s24 + $0x28] sm:$0xf] }
 0x1e2   : > { %v6648_v1 = vsel %vm14796_vm4, %v6643_v44, %v6647_v63  ;;  %13505 = vst [vmem:[%s16154_s13 + $0x78] sm:$0xff] %v13249_v33   ;;  %13504 = vst [vmem:[%s16154_s13 + $0x70] sm:$0xff] %v13244_v47   ;;  %v7491_v18 = vshll.u32 %v12471_v48, 16  ;;  %v7495_v34 = vshrl.u32 %v12471_v48, 16  ;;  %v7501_v14 = vshll.u32 %v12472_v16, 16  ;;  %v16731_v23 = vpop.f32.mrf.mxu1  ;;  %v16733_v36 = vpop.f32.mrf.mxu0  ;;  %v14526_v44 = vld [vmem:[%s14758_s24 + $0xb4] sm:$0xff]  }
 0x1e3   : > { %v12388_v19 = vcombine.low %v6638_v42, %v6648_v1  ;;  %v2828_v0 = vadd.f32 %v2827_v21, %v2573_v61  ;;  %v2897_v5 = vadd.f32 %v2896_v25, %v2866_v31  ;;  %v7488_v55 = vor.u32 %v7487_v51, %v7484_v26  ;;  %v14527_v33 = vld [vmem:[%s14758_s24 + $0xc0] sm:$0xff]   ;;  %v12475_v21 = vld [vmem:[%s14758_s24 + $0x2c] sm:$0x1] }
 0x1e4   : > { %v2868_v54 = vmul.f32 %v2574_v49, %v2574_v49  ;;  %v7493_v63 = vrot.slane %v7491_v18, 5  ;;  %v7497_v39 = vrot.slane %v7495_v34, 4  ;;  %v7503_v57 = vrot.slane %v7501_v14, 5  ;;  %v16738_v25 = vpop.f32.mrf.mxu1  ;;  %v16741_v1 = vpop.f32.mrf.mxu0 }
 0x1e5   : > { %14163 = vmatmul.mubr.msk.bf16.gmra.mxu1 %vm352_vm1, %v12388_v19  ;;  %v2829_v48 = vadd.f32 %v2828_v0, %v2574_v49  ;;  %v2898_v16 = vadd.f32 %v2897_v5, %v2867_v35  ;;  %v7489_v42 = vrot.slane %v7488_v55, 4  ;;  %v7506_v61 = vshrl.u32 %v12473_v37, 16  ;;  %19046 = vst [vmem:[#allocation60_spill] sm:$0xff] %v16738_v25  ;;  %19047 = vst [vmem:[#allocation61_spill] sm:$0xff] %v16741_v1 }
 0x1e6   : > { %v7498_v47 = vor.u32 %v7497_v39, %v7493_v63  ;;  %v7509_v31 = vshll.u32 %v12473_v37, 16  ;;  %v7515_v26 = vshll.u32 %v12474_v10, 16  ;;  %v7519_v51 = vshrl.u32 %v12474_v10, 16  ;;  %v16746_v55 = vpop.f32.mrf.mxu1 }
 0x1e7   : > { %v2830_v18 = vrot.slane %v2829_v48, 4  ;;  %v2899_v34 = vadd.f32 %v2898_v16, %v2868_v54  ;;  %v7494_v14 = vsel %vm14796_vm4, %v7489_v42, %v7493_v63  ;;  %v7508_v49 = vrot.slane %v7506_v61, 4  ;;  %19048 = vst [vmem:[#allocation68_spill] sm:$0xff] %v16746_v55  ;;  %v12476_v42 = vld [vmem:[%s14758_s24 + $0x30] sm:$0xf]  ;;  %v16752_v61 = vpop.f32.mrf.mxu0 }
 0x1e8   : > { %v7499_v35 = vrot.slane %v7498_v47, 4  ;;  %v7511_v19 = vrot.slane %v7509_v31, 5  ;;  %v7517_v0 = vrot.slane %v7515_v26, 5  ;;  %v7521_v5 = vrot.slane %v7519_v51, 4  ;;  %14193 = vmatmul.mubr.msk.bf16.gmra.mxu0 %vm352_vm1, %v14526_v44  ;;  %19049 = vst [vmem:[#allocation19_spill] sm:$0xff] %v16752_v61 }
 0x1e9   : > { %v2831_v37 = vadd.f32 %v2830_v18, %v2829_v48  ;;  %v2900_v10 = vrot.slane %v2899_v34, 4  ;;  %v7525_v39 = vshll.u32 %v12475_v21, 16  ;;  %14196 = vmatprep.mubr.msk.bf16.mxu0 %vm352_vm1, %v14527_v33  ;;  %v12477_v51 = vld [vmem:[%s14758_s24 + $0x34] sm:$0xf]  ;;  %v19050_v48 = vld [vmem:[#allocation27_spill] sm:$0xff]  ;;  %v19051_v18 = vld [vmem:[#allocation36_spill] sm:$0xff] }
 0x1ea   : > { %v7504_v54 = vsel %vm14796_vm4, %v7499_v35, %v7503_v57  ;;  %v7512_v63 = vor.u32 %v7511_v19, %v7508_v49  ;;  %v7522_v16 = vor.u32 %v7521_v5, %v7517_v0  ;;  %v16757_v21 = vadd.f32 %v19051_v18, %v19050_v48  ;;  %v14532_v57 = vld [vmem:[%s18836_s1 + $0x34] sm:$0xf]  ;;  %v14528_v35 = vld [vmem:[%s14758_s24 + $0xcc] sm:$0xff]   ;;  %v16764_v19 = vpop.f32.mrf.mxu1  ;;  %v12478_v5 = vld [vmem:[%s14758_s24 + $0x38] sm:$0x1] }
 0x1eb   : > { %v2832_v47 = vrot.slane %v2831_v37, 2  ;;  %v2901_v31 = vadd.f32 %v2900_v10, %v2899_v34  ;;  %v12519_v44 = vcombine.low %v7494_v14, %v7504_v54  ;;  %v7527_v26 = vrot.slane %v7525_v39, 5  ;;  %19052 = vst [vmem:[#allocation62_spill] sm:$0xff] %v16764_v19  ;;  %v12479_v18 = vld [vmem:[%s14758_s24 + $0x3c] sm:$0xf]  ;;  %v19056_v19 = vld [vmem:[#allocation37_spill] sm:$0xff] }
 0x1ec   : > { %v7513_v33 = vrot.slane %v7512_v63, 4  ;;  %v7523_v55 = vrot.slane %v7522_v16, 4  ;;  %v9557_v49 = vsel %vm401_vm0, %v14532_v57, 0  ;;  %v7530_v10 = vshrl.u32 %v12476_v42, 16 }
 0x1ed   : > { %v16766_v34 = vadd.f32 %v2832_v47, %v2831_v37  ;;  %v2902_v14 = vrot.slane %v2901_v31, 2  ;;  %14202 = vmatprep.mubr.msk.bf16.mxu1 %vm352_vm1, %v12519_v44  ;;  %v7533_v39 = vshll.u32 %v12476_v42, 16  ;;  %v7539_v16 = vshll.u32 %v12477_v51, 16  ;;  %v16775_v57 = vpop.f32.mrf.mxu0  ;;  %v19055_v47 = vld [vmem:[#allocation25_spill] sm:$0xff]  ;;  %v19057_v44 = vld [vmem:[#allocation30_spill] sm:$0xff] }
 0x1ee   : > { %v7518_v54 = vsel %vm14796_vm4, %v7513_v33, %v7517_v0  ;;  %v7528_v63 = vsel %vm14796_vm4, %v7523_v55, %v7527_v26  ;;  %v7543_v48 = vshrl.u32 %v12477_v51, 16  ;;  %19054 = vst [vmem:[#allocation16_spill] sm:$0xff] %v16775_v57  ;;  %v16779_v61 = vadd.f32 %v19056_v19, %v19055_v47  ;;  %v12480_v0 = vld [vmem:[%s14758_s24 + $0x40] sm:$0xf]  ;;  %v16790_v51 = vld [vmem:[%s18836_s1 + $0x3c] sm:$0xf] }
 0x1ef   : > { %19053 = vst [vmem:[#allocation63_spill] sm:$0xff] %v16766_v34  ;;  %v12520_v37 = vcombine.low %v7518_v54, %v7528_v63  ;;  %v16783_v42 = vadd.f32 %v16197_v7, %v19057_v44  ;;  %v7532_v1 = vrot.slane %v7530_v10, 4  ;;  %v7535_v33 = vrot.slane %v7533_v39, 5  ;;  %v16792_v19 = vpop.f32.mrf.mxu1  ;;  %v16794_v54 = vpop.f32.mrf.mxu0  ;;  %v19061_v10 = vld [vmem:[#allocation34_spill] sm:$0xff]  ;;  %v19065_v34 = vld [vmem:[#allocation28_spill] sm:$0xff] }
 0x1f0   : > { %v7541_v25 = vrot.slane %v7539_v16, 5  ;;  %v7545_v55 = vrot.slane %v7543_v48, 4  ;;  %v7549_v26 = vshll.u32 %v12478_v5, 16  ;;  %14197 = vmatmul.mubr.msk.bf16.gmra.mxu0 %vm352_vm1, %v14528_v35  ;;  %19058 = vst [vmem:[#allocation17_spill] sm:$0xff] %v16792_v19  ;;  %19059 = vst [vmem:[#allocation65_spill] sm:$0xff] %v16794_v54  ;;  %v16797_v63 = vadd.f32 %v2902_v14, %v2901_v31  ;;  %v19063_v54 = vld [vmem:[#allocation32_spill] sm:$0xff] }
 0x1f1   : > { %14203 = vmatmul.mubr.msk.bf16.vlgmr.msra.gmra.mxu1 %vm352_vm1, %v12520_v37  ;;  %v16802_v5 = vadd.f32 %v16225_v20, %v19061_v10  ;;  %v12481_v35 = vld [vmem:[%s14758_s24 + $0x44] sm:$0x1]  ;;  %v7554_v39 = vshrl.u32 %v12479_v18, 16  ;;  %v7536_v16 = vor.u32 %v7535_v33, %v7532_v1  ;;  %v7557_v44 = vshll.u32 %v12479_v18, 16  ;;  %v16805_v19 = vpop.f32.mrf.mxu1  ;;  %v16813_v20 = vpop.f32.mrf.mxu0 }
 0x1f2   : > { %19060 = vst [vmem:[#allocation70_spill] sm:$0xff] %v16797_v63  ;;  %14269 = vmatpush3.bf16.msra.mxu1 %v9557_v49  ;;  %v7546_v48 = vor.u32 %v7545_v55, %v7541_v25  ;;  %v7551_v47 = vrot.slane %v7549_v26, 5  ;;  %19062 = vst [vmem:[#allocation67_spill] sm:$0xff] %v16805_v19  ;;  %v16809_v31 = vadd.f32 %v16253_v58, %v19063_v54  ;;  %v7563_v37 = vshll.u32 %v12480_v0, 16  ;;  %v12482_v55 = vld [vmem:[%s14758_s24 + $0x48] sm:$0xf] }
 0x1f3   : > { %v7556_v14 = vrot.slane %v7554_v39, 4  ;;  %v7567_v7 = vshrl.u32 %v12480_v0, 16  ;;  %14385 = vmatprep.subr.msk.bf16.mxu1 %vm401_vm0, %v16790_v51  ;;  %19064 = vst [vmem:[#allocation71_spill] sm:$0xff] %v16813_v20  ;;  %v7537_v1 = vrot.slane %v7536_v16, 4  ;;  %v7559_v33 = vrot.slane %v7557_v44, 5  ;;  %v16825_v39 = vpop.f32.mrf.mxu1 }
 0x1f4   : > { %v7547_v49 = vrot.slane %v7546_v48, 4  ;;  %v7573_v18 = vshll.u32 %v12481_v35, 16  ;;  %v7565_v26 = vrot.slane %v7563_v37, 5  ;;  %v16818_v58 = vadd.f32 %v16262_v60, %v19065_v34  ;;  %v12483_v54 = vld [vmem:[%s14758_s24 + $0x4c] sm:$0xf]  ;;  %19066 = vst [vmem:[#allocation69_spill] sm:$0xff] %v16825_v39  ;;  %v16836_v37 = vpop.f32.mrf.mxu0 }
 0x1f5   : > { %v7569_v10 = vrot.slane %v7567_v7, 4  ;;  %v16822_v0 = vadd.f32 %v16277_v6, %v16194_v2  ;;  %v7542_v16 = vsel %vm14796_vm4, %v7537_v1, %v7541_v25  ;;  %v7560_v48 = vor.u32 %v7559_v33, %v7556_v14  ;;  %v12484_v44 = vld [vmem:[%s14758_s24 + $0x50] sm:$0x1]  ;;  %19067 = vst [vmem:[#allocation18_spill] sm:$0xff] %v16836_v37  ;;  %v12485_v20 = vld [vmem:[%s14758_s24 + $0x54] sm:$0xf] }
 0x1f6   : > { %v7552_v35 = vsel %vm14796_vm4, %v7547_v49, %v7551_v47  ;;  %v7575_v7 = vrot.slane %v7573_v18, 5  ;;  %v16834_v2 = vadd.f32 %v16296_v32, %v16214_v53  ;;  %v7578_v6 = vshrl.u32 %v12482_v55, 16  ;;  %v19068_v33 = vld [vmem:[#allocation29_spill] sm:$0xff]  ;;  %v12486_v53 = vld [vmem:[%s14758_s24 + $0x58] sm:$0xf]  ;;  %v16845_v32 = vpop.f32.mrf.mxu1 }
 0x1f7   : > { %v12521_v60 = vcombine.low %v7542_v16, %v7552_v35  ;;  %v7570_v34 = vor.u32 %v7569_v10, %v7565_v26  ;;  %v7561_v63 = vrot.slane %v7560_v48, 4  ;;  %v7581_v39 = vshll.u32 %v12482_v55, 16  ;;  %19069 = vst [vmem:[#allocation74_spill] sm:$0xff] %v16845_v32  ;;  %v12487_v35 = vld [vmem:[%s14758_s24 + $0x5c] sm:$0x1] }
 0x1f8   : > { %v7587_v25 = vshll.u32 %v12483_v54, 16  ;;  %v7591_v1 = vshrl.u32 %v12483_v54, 16  ;;  %v7580_v14 = vrot.slane %v7578_v6, 4  ;;  %v7597_v49 = vshll.u32 %v12484_v44, 16 }
 0x1f9   : > { %14206 = vmatprep.mubr.msk.bf16.mxu1 %vm352_vm1, %v12521_v60  ;;  %v7571_v47 = vrot.slane %v7570_v34, 4  ;;  %v16842_v18 = vadd.f32 %v16324_v30, %v19068_v33  ;;  %v7566_v10 = vsel %vm14796_vm4, %v7561_v63, %v7565_v26  ;;  %v7583_v16 = vrot.slane %v7581_v39, 5 }
 0x1fa   : > { %v7589_v55 = vrot.slane %v7587_v25, 5  ;;  %v7593_v54 = vrot.slane %v7591_v1, 4  ;;  %v7599_v60 = vrot.slane %v7597_v49, 5  ;;  %v7602_v44 = vshrl.u32 %v12485_v20, 16  ;;  %v16852_v6 = vpop.f32.mrf.mxu0  ;;  %v12488_v25 = vld [vmem:[%s14758_s24 + $0x60] sm:$0xf] }
 0x1fb   : > { %v7576_v48 = vsel %vm14796_vm4, %v7571_v47, %v7575_v7  ;;  %v7605_v34 = vshll.u32 %v12485_v20, 16  ;;  %v7584_v33 = vor.u32 %v7583_v16, %v7580_v14  ;;  %v7611_v32 = vshll.u32 %v12486_v53, 16 }
 0x1fc   : > { %v12522_v30 = vcombine.low %v7566_v10, %v7576_v48  ;;  %v7594_v37 = vor.u32 %v7593_v54, %v7589_v55  ;;  %v7604_v19 = vrot.slane %v7602_v44, 4  ;;  %v7615_v26 = vshrl.u32 %v12486_v53, 16  ;;  %v16857_v57 = vpop.f32.mrf.mxu0  ;;  %v19072_v53 = vld [vmem:[#allocation39_spill] sm:$0xff]  ;;  %v12490_v48 = vld [vmem:[%s14758_s24 + $0x68] sm:$0x1] }
 0x1fd   : > { %v7607_v63 = vrot.slane %v7605_v34, 5  ;;  %v7621_v39 = vshll.u32 %v12487_v35, 16  ;;  %v16855_v1 = vpop.f32.mrf.mxu1  ;;  %19071 = vst [vmem:[#allocation33_spill] sm:$0xff] %v16857_v57  ;;  %v7585_v20 = vrot.slane %v7584_v33, 4  ;;  %v7613_v47 = vrot.slane %v7611_v32, 5 }
 0x1fe   : > { %19070 = vst [vmem:[#allocation72_spill] sm:$0xff] %v16855_v1  ;;  %14207 = vmatmul.mubr.msk.bf16.gmra.mxu1 %vm352_vm1, %v12522_v30  ;;  %v7595_v7 = vrot.slane %v7594_v37, 4  ;;  %v16862_v14 = vadd.f32 %v16338_v24, %v16255_v40  ;;  %v7617_v10 = vrot.slane %v7615_v26, 4  ;;  %v16866_v54 = vadd.f32 %v16345_v13, %v19072_v53  ;;  %v12489_v35 = vld [vmem:[%s14758_s24 + $0x64] sm:$0xf]  ;;  %v19074_v24 = vld [vmem:[#allocation38_spill] sm:$0xff]  ;;  %v16880_v34 = vpop.f32.mrf.mxu0 }
 0x1ff   : > { %v7608_v49 = vor.u32 %v7607_v63, %v7604_v19  ;;  %v7623_v16 = vrot.slane %v7621_v39, 5  ;;  %v16870_v44 = vpop.f32.mrf.mxu1  ;;  %v7590_v37 = vsel %vm14796_vm4, %v7585_v20, %v7589_v55  ;;  %v16878_v19 = vadd.f32 %v16362_v59, %v19074_v24  ;;  %19075 = vst [vmem:[#allocation73_spill] sm:$0xff] %v16880_v34  ;;  %v12491_v26 = vld [vmem:[%s14758_s24 + $0x6c] sm:$0xf]  ;;  %v12492_v20 = vld [vmem:[%s14758_s24 + $0x70] sm:$0xf] }
 0x200   : > { %19073 = vst [vmem:[#allocation22_spill] sm:$0xff] %v16870_v44  ;;  %v7600_v40 = vsel %vm14796_vm4, %v7595_v7, %v7599_v60  ;;  %v7626_v32 = vshrl.u32 %v12488_v25, 16  ;;  %v7618_v33 = vor.u32 %v7617_v10, %v7613_v47  ;;  %v7629_v63 = vshll.u32 %v12488_v25, 16  ;;  %v12493_v24 = vld [vmem:[%s14758_s24 + $0x74] sm:$0x1] }
 0x201   : > { %v12523_v13 = vcombine.low %v7590_v37, %v7600_v40  ;;  %v7609_v30 = vrot.slane %v7608_v49, 4  ;;  %v7635_v53 = vshll.u32 %v12489_v35, 16  ;;  %v7639_v44 = vshrl.u32 %v12489_v35, 16  ;;  %v16884_v57 = vpop.f32.mrf.mxu1  ;;  %v19077_v37 = vld [vmem:[#allocation41_spill] sm:$0xff]  ;;  %v12494_v1 = vld [vmem:[%s14758_s24 + $0x78] sm:$0xf] }
 0x202   : > { %v7628_v39 = vrot.slane %v7626_v32, 4  ;;  %v7645_v55 = vshll.u32 %v12490_v48, 16  ;;  %19076 = vst [vmem:[#allocation35_spill] sm:$0xff] %v16884_v57  ;;  %v7619_v60 = vrot.slane %v7618_v33, 4  ;;  %v7631_v7 = vrot.slane %v7629_v63, 5  ;;  %v16894_v48 = vpop.f32.mrf.mxu0 }
 0x203   : > { %14210 = vmatprep.mubr.msk.bf16.mxu1 %vm352_vm1, %v12523_v13  ;;  %v7614_v59 = vsel %vm14796_vm4, %v7609_v30, %v7613_v47  ;;  %v16891_v49 = vadd.f32 %v16389_v38, %v19077_v37  ;;  %v7637_v25 = vrot.slane %v7635_v53, 5  ;;  %v7641_v10 = vrot.slane %v7639_v44, 4  ;;  %19078 = vst [vmem:[#allocation23_spill] sm:$0xff] %v16894_v48  ;;  %v16898_v37 = vpop.f32.mrf.mxu1 }
 0x204   : > { %v7647_v40 = vrot.slane %v7645_v55, 5  ;;  %v7650_v35 = vshrl.u32 %v12491_v26, 16  ;;  %v7624_v32 = vsel %vm14796_vm4, %v7619_v60, %v7623_v16  ;;  %v7632_v13 = vor.u32 %v7631_v7, %v7628_v39  ;;  %19079 = vst [vmem:[#allocation20_spill] sm:$0xff] %v16898_v37  ;;  %v19080_v39 = vld [vmem:[#allocation40_spill] sm:$0xff] }
 0x205   : > { %v7653_v57 = vshll.u32 %v12491_v26, 16  ;;  %v7659_v47 = vshll.u32 %v12492_v20, 16  ;;  %v12524_v30 = vcombine.low %v7614_v59, %v7624_v32  ;;  %v7642_v33 = vor.u32 %v7641_v10, %v7637_v25  ;;  %v19081_v59 = vld [vmem:[#allocation43_spill] sm:$0xff] }
 0x206   : > { %v7652_v63 = vrot.slane %v7650_v35, 4  ;;  %v7663_v38 = vshrl.u32 %v12492_v20, 16  ;;  %v7633_v44 = vrot.slane %v7632_v13, 4  ;;  %v7669_v34 = vshll.u32 %v12493_v24, 16  ;;  %v12495_v20 = vld [vmem:[%s14758_s24 + $0x7c] sm:$0xf] }
 0x207   : > { %v7655_v53 = vrot.slane %v7653_v57, 5  ;;  %v7661_v55 = vrot.slane %v7659_v47, 5  ;;  %14211 = vmatmul.mubr.msk.bf16.gmra.mxu1 %vm352_vm1, %v12524_v30  ;;  %v7643_v48 = vrot.slane %v7642_v33, 4  ;;  %v16904_v26 = vadd.f32 %v16409_v43, %v19080_v39  ;;  %v16911_v7 = vpop.f32.mrf.mxu0  ;;  %v19083_v35 = vld [vmem:[#allocation42_spill] sm:$0xff]  ;;  %v12496_v13 = vld [vmem:[%s14758_s24 + $0x80] sm:$0x1] }
 0x208   : > { %v7665_v16 = vrot.slane %v7663_v38, 4  ;;  %v16908_v60 = vadd.f32 %v16421_v29, %v19081_v59  ;;  %19082 = vst [vmem:[#allocation24_spill] sm:$0xff] %v16911_v7  ;;  %v7638_v57 = vsel %vm14796_vm4, %v7633_v44, %v7637_v25  ;;  %v7671_v24 = vrot.slane %v7669_v34, 5  ;;  %v12497_v44 = vld [vmem:[%s14758_s24 + $0x84] sm:$0xf] }
 0x209   : > { %v7656_v10 = vor.u32 %v7655_v53, %v7652_v63  ;;  %v16917_v32 = vadd.f32 %v16441_v12, %v19083_v35  ;;  %v7648_v43 = vsel %vm14796_vm4, %v7643_v48, %v7647_v40  ;;  %v7674_v47 = vshrl.u32 %v12494_v1, 16  ;;  %v16924_v38 = vpop.f32.mrf.mxu0  ;;  %v12498_v7 = vld [vmem:[%s14758_s24 + $0x88] sm:$0xf] }
 0x20a   : > { %v7666_v29 = vor.u32 %v7665_v16, %v7661_v55  ;;  %v7677_v30 = vshll.u32 %v12494_v1, 16  ;;  %v16922_v33 = vpop.f32.mrf.mxu1  ;;  %19084 = vst [vmem:[#allocation21_spill] sm:$0xff] %v16924_v38  ;;  %v12525_v39 = vcombine.low %v7638_v57, %v7648_v43  ;;  %v7683_v34 = vshll.u32 %v12495_v20, 16  ;;  %v19086_v16 = vld [vmem:[#allocation44_spill] sm:$0xff]  ;;  %v12500_v38 = vld [vmem:[%s14758_s24 + $0x90] sm:$0xf] }
 0x20b   : > { %v7657_v25 = vrot.slane %v7656_v10, 4  ;;  %v7687_v63 = vshrl.u32 %v12495_v20, 16  ;;  %v7676_v53 = vrot.slane %v7674_v47, 4  ;;  %v7693_v35 = vshll.u32 %v12496_v13, 16  ;;  %v12499_v20 = vld [vmem:[%s14758_s24 + $0x8c] sm:$0x1]  ;;  %v16938_v10 = vpop.f32.mrf.mxu0 }
 0x20c   : > { %v7667_v12 = vrot.slane %v7666_v29, 4  ;;  %v7679_v59 = vrot.slane %v7677_v30, 5  ;;  %v16928_v37 = vpop.f32.mrf.mxu1  ;;  %14214 = vmatprep.mubr.msk.bf16.mxu1 %vm352_vm1, %v12525_v39  ;;  %v7685_v40 = vrot.slane %v7683_v34, 5  ;;  %v16935_v57 = vadd.f32 %v16460_v9, %v19086_v16  ;;  %19087 = vst [vmem:[#allocation26_spill] sm:$0xff] %v16938_v10 }
 0x20d   : > { %19085 = vst [vmem:[#allocation31_spill] sm:$0xff] %v16928_v37  ;;  %v7662_v1 = vsel %vm14796_vm4, %v7657_v25, %v7661_v55  ;;  %v7689_v48 = vrot.slane %v7687_v63, 4  ;;  %v7695_v29 = vrot.slane %v7693_v35, 5  ;;  %v7698_v47 = vshrl.u32 %v12497_v44, 16  ;;  %v12501_v35 = vld [vmem:[%s14758_s24 + $0x94] sm:$0xf] }
 0x20e   : > { %v7672_v13 = vsel %vm14796_vm4, %v7667_v12, %v7671_v24  ;;  %v7680_v43 = vor.u32 %v7679_v59, %v7676_v53  ;;  %v7701_v55 = vshll.u32 %v12497_v44, 16  ;;  %v7707_v25 = vshll.u32 %v12498_v7, 16  ;;  %v16942_v34 = vpop.f32.mrf.mxu1  ;;  %v19089_v53 = vld [vmem:[#allocation45_spill] sm:$0xff]  ;;  %v16951_v44 = vpop.f32.mrf.mxu0 }
 0x20f   : > { %v12526_v30 = vcombine.low %v7662_v1, %v7672_v13  ;;  %v7690_v39 = vor.u32 %v7689_v48, %v7685_v40  ;;  %19088 = vst [vmem:[#allocation27_spill] sm:$0xff] %v16942_v34  ;;  %v7700_v9 = vrot.slane %v7698_v47, 4  ;;  %v7711_v16 = vshrl.u32 %v12498_v7, 16  ;;  %19091 = vst [vmem:[#allocation25_spill] sm:$0xff] %v16951_v44 }
 0x210   : > { %v7681_v63 = vrot.slane %v7680_v43, 4  ;;  %v7717_v37 = vshll.u32 %v12499_v20, 16  ;;  %v7703_v24 = vrot.slane %v7701_v55, 5  ;;  %v7709_v12 = vrot.slane %v7707_v25, 5  ;;  %v19092_v20 = vld [vmem:[#allocation50_spill] sm:$0xff] }
 0x211   : > { %14215 = vmatmul.mubr.msk.bf16.gmra.mxu1 %vm352_vm1, %v12526_v30  ;;  %v7691_v10 = vrot.slane %v7690_v39, 4  ;;  %v16948_v59 = vadd.f32 %v16474_v52, %v19089_v53  ;;  %v7713_v48 = vrot.slane %v7711_v16, 4  ;;  %v16957_v13 = vadd.f32 %v16492_v3, %v19092_v20  ;;  %v12502_v43 = vld [vmem:[%s14758_s24 + $0x98] sm:$0x1]  ;;  %v19095_v39 = vld [vmem:[#allocation51_spill] sm:$0xff]  ;;  %v16966_v53 = vpop.f32.mrf.mxu1 }
 0x212   : > { %v7686_v1 = vsel %vm14796_vm4, %v7681_v63, %v7685_v40  ;;  %v7719_v7 = vrot.slane %v7717_v37, 5  ;;  %v7704_v52 = vor.u32 %v7703_v24, %v7700_v9  ;;  %v19094_v30 = vld [vmem:[#allocation46_spill] sm:$0xff]  ;;  %v7722_v25 = vshrl.u32 %v12500_v38, 16  ;;  %v12503_v3 = vld [vmem:[%s14758_s24 + $0x9c] sm:$0xf] }
 0x213   : > { %19090 = vst [vmem:[#allocation36_spill] sm:$0xff] %v16948_v59  ;;  %19093 = vst [vmem:[#allocation37_spill] sm:$0xff] %v16957_v13  ;;  %v7696_v47 = vsel %vm14796_vm4, %v7691_v10, %v7695_v29  ;;  %v16964_v55 = vadd.f32 %v19095_v39, %v19094_v30  ;;  %v7714_v63 = vor.u32 %v7713_v48, %v7709_v12  ;;  %v7725_v37 = vshll.u32 %v12500_v38, 16  ;;  %v12504_v59 = vld [vmem:[%s14758_s24 + $0xa0] sm:$0xf]  ;;  %v19097_v30 = vld [vmem:[#allocation52_spill] sm:$0xff] }
 0x214   : > { %v12527_v40 = vcombine.low %v7686_v1, %v7696_v47  ;;  %v7731_v16 = vshll.u32 %v12501_v35, 16  ;;  %v7705_v20 = vrot.slane %v7704_v52, 4  ;;  %v7724_v44 = vrot.slane %v7722_v25, 4  ;;  %v16970_v10 = vpop.f32.mrf.mxu0  ;;  %v12505_v52 = vld [vmem:[%s14758_s24 + $0xa4] sm:$0x1] }
 0x215   : > { %v7735_v34 = vshrl.u32 %v12501_v35, 16  ;;  %v7741_v13 = vshll.u32 %v12502_v43, 16  ;;  %19096 = vst [vmem:[#allocation30_spill] sm:$0xff] %v16970_v10  ;;  %v7715_v29 = vrot.slane %v7714_v63, 4  ;;  %v7727_v9 = vrot.slane %v7725_v37, 5 }
 0x216   : > { %14218 = vmatprep.mubr.msk.bf16.mxu1 %vm352_vm1, %v12527_v40  ;;  %v7733_v24 = vrot.slane %v7731_v16, 5  ;;  %v16975_v1 = vadd.f32 %v16526_v62, %v19097_v30  ;;  %v7710_v38 = vsel %vm14796_vm4, %v7705_v20, %v7709_v12  ;;  %v7746_v35 = vshrl.u32 %v12503_v3, 16  ;;  %v16984_v10 = vpop.f32.mrf.mxu0 }
 0x217   : > { %v7737_v48 = vrot.slane %v7735_v34, 4  ;;  %v7743_v47 = vrot.slane %v7741_v13, 5  ;;  %v16980_v43 = vpop.f32.mrf.mxu1  ;;  %v7720_v39 = vsel %vm14796_vm4, %v7715_v29, %v7719_v7  ;;  %v7728_v25 = vor.u32 %v7727_v9, %v7724_v44  ;;  %v19100_v44 = vld [vmem:[#allocation47_spill] sm:$0xff]  ;;  %v19101_v29 = vld [vmem:[#allocation48_spill] sm:$0xff] }
 0x218   : > { %19098 = vst [vmem:[#allocation34_spill] sm:$0xff] %v16975_v1  ;;  %19099 = vst [vmem:[#allocation32_spill] sm:$0xff] %v16980_v43  ;;  %v7749_v40 = vshll.u32 %v12503_v3, 16  ;;  %v7755_v63 = vshll.u32 %v12504_v59, 16  ;;  %v12528_v37 = vcombine.low %v7710_v38, %v7720_v39  ;;  %v7748_v16 = vrot.slane %v7746_v35, 4  ;;  %v19104_v39 = vld [vmem:[#allocation49_spill] sm:$0xff] }
 0x219   : > { %v7738_v62 = vor.u32 %v7737_v48, %v7733_v24  ;;  %v7759_v30 = vshrl.u32 %v12504_v59, 16  ;;  %v7729_v34 = vrot.slane %v7728_v25, 4  ;;  %v7765_v20 = vshll.u32 %v12505_v52, 16  ;;  %v12506_v1 = vld [vmem:[%s14758_s24 + $0xa8] sm:$0xf]  ;;  %v16997_v38 = vpop.f32.mrf.mxu1 }
 0x21a   : > { %v7751_v12 = vrot.slane %v7749_v40, 5  ;;  %v7757_v13 = vrot.slane %v7755_v63, 5  ;;  %14219 = vmatmul.mubr.msk.bf16.gmra.mxu1 %vm352_vm1, %v12528_v37  ;;  %v16990_v3 = vadd.f32 %v16545_v45, %v19100_v44  ;;  %v16994_v9 = vadd.f32 %v16557_v11, %v19101_v29  ;;  %v12507_v59 = vld [vmem:[%s14758_s24 + $0xac] sm:$0xf]  ;;  %19103 = vst [vmem:[#allocation29_spill] sm:$0xff] %v16997_v38 }
 0x21b   : > { %v7739_v43 = vrot.slane %v7738_v62, 4  ;;  %v7761_v7 = vrot.slane %v7759_v30, 4  ;;  %v7734_v48 = vsel %vm14796_vm4, %v7729_v34, %v7733_v24  ;;  %v7767_v35 = vrot.slane %v7765_v20, 5  ;;  %v12508_v45 = vld [vmem:[%s14758_s24 + $0xb0] sm:$0x1]  ;;  %v17008_v62 = vpop.f32.mrf.mxu0 }
 0x21c   : > { %19102 = vst [vmem:[#allocation28_spill] sm:$0xff] %v16994_v9  ;;  %v7752_v52 = vor.u32 %v7751_v12, %v7748_v16  ;;  %v17003_v25 = vadd.f32 %v16585_v22, %v19104_v39  ;;  %v7770_v63 = vshrl.u32 %v12506_v1, 16  ;;  %v7773_v37 = vshll.u32 %v12506_v1, 16  ;;  %19106 = vst [vmem:[#allocation38_spill] sm:$0xff] %v17008_v62  ;;  %v12509_v34 = vld [vmem:[%s14758_s24 + $0xb4] sm:$0xf] }
 0x21d   : > { %v7744_v40 = vsel %vm14796_vm4, %v7739_v43, %v7743_v47  ;;  %v7762_v11 = vor.u32 %v7761_v7, %v7757_v13  ;;  %v7779_v24 = vshll.u32 %v12507_v59, 16  ;;  %v7783_v16 = vshrl.u32 %v12507_v59, 16  ;;  %v12510_v39 = vld [vmem:[%s14758_s24 + $0xb8] sm:$0xf]  ;;  %v19108_v7 = vld [vmem:[#allocation59_spill] sm:$0xff] }
 0x21e   : > { %19105 = vst [vmem:[#allocation39_spill] sm:$0xff] %v17003_v25  ;;  %v12529_v30 = vcombine.low %v7734_v48, %v7744_v40  ;;  %v7753_v44 = vrot.slane %v7752_v52, 4  ;;  %v7772_v20 = vrot.slane %v7770_v63, 4  ;;  %v7775_v22 = vrot.slane %v7773_v37, 5  ;;  %v17012_v25 = vpop.f32.mrf.mxu1  ;;  %v19109_v48 = vld [vmem:[#allocation56_spill] sm:$0xff]  ;;  %v17024_v37 = vpop.f32.mrf.mxu0 }
 0x21f   : > { %v7763_v12 = vrot.slane %v7762_v11, 4  ;;  %v7789_v29 = vshll.u32 %v12508_v45, 16  ;;  %19107 = vst [vmem:[#allocation41_spill] sm:$0xff] %v17012_v25  ;;  %v7781_v47 = vrot.slane %v7779_v24, 5  ;;  %v7785_v43 = vrot.slane %v7783_v16, 4  ;;  %19111 = vst [vmem:[#allocation43_spill] sm:$0xff] %v17024_v37 }
 0x220   : > { %14222 = vmatprep.mubr.msk.bf16.mxu1 %vm352_vm1, %v12529_v30  ;;  %v7758_v1 = vsel %vm14796_vm4, %v7753_v44, %v7757_v13  ;;  %v17019_v52 = vadd.f32 %v19109_v48, %v19108_v7  ;;  %v12511_v59 = vld [vmem:[%s14758_s24 + $0xbc] sm:$0x1]  ;;  %v7776_v45 = vor.u32 %v7775_v22, %v7772_v20  ;;  %v7794_v63 = vshrl.u32 %v12509_v34, 16  ;;  %v12615_v48 = vld [vmem:[%s14758_s24 + $0xc] sm:$0xf] }
 0x221   : > { %v7768_v40 = vsel %vm14796_vm4, %v7763_v12, %v7767_v35  ;;  %v7791_v11 = vrot.slane %v7789_v29, 5  ;;  %v7786_v25 = vor.u32 %v7785_v43, %v7781_v47  ;;  %v7797_v13 = vshll.u32 %v12509_v34, 16  ;;  %v19113_v22 = vld [vmem:[#allocation53_spill] sm:$0xff]  ;;  %v19114_v29 = vld [vmem:[#allocation15_spill] sm:$0xff]  ;;  %v12513_v38 = vld [vmem:[%s14758_s24 + $0xc4] sm:$0xf] }
 0x222   : > { %19110 = vst [vmem:[#allocation40_spill] sm:$0xff] %v17019_v52  ;;  %v12530_v30 = vcombine.low %v7758_v1, %v7768_v40  ;;  %v7803_v44 = vshll.u32 %v12510_v39, 16  ;;  %v7777_v24 = vrot.slane %v7776_v45, 4  ;;  %v7796_v16 = vrot.slane %v7794_v63, 4  ;;  %v17027_v52 = vpop.f32.mrf.mxu1  ;;  %v12616_v34 = vld [vmem:[%s14758_s24 + $0x10] sm:$0xf] }
 0x223   : > { %v7807_v62 = vshrl.u32 %v12510_v39, 16  ;;  %v7813_v7 = vshll.u32 %v12511_v59, 16  ;;  %19112 = vst [vmem:[#allocation42_spill] sm:$0xff] %v17027_v52  ;;  %v7787_v35 = vrot.slane %v7786_v25, 4  ;;  %v7799_v12 = vrot.slane %v7797_v13, 5  ;;  %v19116_v59 = vld [vmem:[#allocation54_spill] sm:$0xff]  ;;  %v17042_v25 = vpop.f32.mrf.mxu0 }
 0x224   : > { %14223 = vmatmul.mubr.msk.bf16.gmra.mxu1 %vm352_vm1, %v12530_v30  ;;  %v7805_v20 = vrot.slane %v7803_v44, 5  ;;  %v17032_v37 = vadd.f32 %v19114_v29, %v19113_v22  ;;  %v7782_v1 = vsel %vm14796_vm4, %v7777_v24, %v7781_v47  ;;  %v19117_v40 = vld [vmem:[#allocation58_spill] sm:$0xff]  ;;  %19119 = vst [vmem:[#allocation50_spill] sm:$0xff] %v17042_v25  ;;  %v19120_v44 = vld [vmem:[#allocation55_spill] sm:$0xff]  ;;  %v8576_v24 = vshll.u32 %v12615_v48, 16 }
 0x225   : > { %v7809_v43 = vrot.slane %v7807_v62, 4  ;;  %v7815_v39 = vrot.slane %v7813_v7, 5  ;;  %v17039_v45 = vadd.f32 %v19117_v40, %v19116_v59  ;;  %v12617_v63 = vld [vmem:[%s14758_s24 + $0x14] sm:$0x1]  ;;  %v7792_v30 = vsel %vm14796_vm4, %v7787_v35, %v7791_v11  ;;  %v12512_v52 = vld [vmem:[%s14758_s24 + $0xc0] sm:$0xf]  ;;  %v17051_v59 = vpop.f32.mrf.mxu1 }
 0x226   : > { %19115 = vst [vmem:[#allocation44_spill] sm:$0xff] %v17032_v37  ;;  %v7800_v13 = vor.u32 %v7799_v12, %v7796_v16  ;;  %v19121_v22 = vld [vmem:[#allocation14_spill] sm:$0xff]  ;;  %v8573_v37 = vshrl.u32 %v12615_v48, 16  ;;  %v12531_v47 = vcombine.low %v7782_v1, %v7792_v30  ;;  %v8582_v7 = vshll.u32 %v12616_v34, 16  ;;  %v17059_v48 = vpop.f32.mrf.mxu0 }
 0x227   : > { %19118 = vst [vmem:[#allocation45_spill] sm:$0xff] %v17039_v45  ;;  %v17048_v29 = vadd.f32 %v19121_v22, %v19120_v44  ;;  %v7810_v62 = vor.u32 %v7809_v43, %v7805_v20  ;;  %v8586_v25 = vshrl.u32 %v12616_v34, 16  ;;  %v8592_v9 = vshll.u32 %v12617_v63, 16  ;;  %19123 = vst [vmem:[#allocation51_spill] sm:$0xff] %v17059_v48  ;;  %v12514_v43 = vld [vmem:[%s14758_s24 + $0xc8] sm:$0x1] }
 0x228   : > { %v7801_v40 = vrot.slane %v7800_v13, 4  ;;  %v8575_v45 = vrot.slane %v8573_v37, 4  ;;  %14226 = vmatprep.mubr.msk.bf16.mxu1 %vm352_vm1, %v12531_v47  ;;  %v8578_v16 = vrot.slane %v8576_v24, 5  ;;  %v8584_v35 = vrot.slane %v8582_v7, 5  ;;  %v12618_v47 = vld [vmem:[%s14758_s24 + $0x18] sm:$0xf]  ;;  %v17070_v48 = vpop.f32.mrf.mxu0 }
 0x229   : > { %19122 = vst [vmem:[#allocation46_spill] sm:$0xff] %v17048_v29  ;;  %v7811_v11 = vrot.slane %v7810_v62, 4  ;;  %v17057_v12 = vadd.f32 %v16671_v56, %v16757_v21  ;;  %v8588_v37 = vrot.slane %v8586_v25, 4  ;;  %v8594_v34 = vrot.slane %v8592_v9, 5  ;;  %v17067_v62 = vpop.f32.mrf.mxu1  ;;  %v12619_v29 = vld [vmem:[%s14758_s24 + $0x1c] sm:$0xf] }
 0x22a   : > { %v7806_v1 = vsel %vm14796_vm4, %v7801_v40, %v7805_v20  ;;  %v7818_v63 = vshrl.u32 %v12512_v52, 16  ;;  %v8579_v13 = vor.u32 %v8578_v16, %v8575_v45  ;;  %v7821_v44 = vshll.u32 %v12512_v52, 16  ;;  %19124 = vst [vmem:[#allocation52_spill] sm:$0xff] %v17067_v62  ;;  %19125 = vst [vmem:[#allocation47_spill] sm:$0xff] %v17070_v48  ;;  %v12516_v62 = vld [vmem:[%s14758_s24 + $0xd0] sm:$0xf] }
 0x22b   : > { %v7816_v30 = vsel %vm14796_vm4, %v7811_v11, %v7815_v39  ;;  %v7827_v22 = vshll.u32 %v12513_v38, 16  ;;  %v8589_v21 = vor.u32 %v8588_v37, %v8584_v35  ;;  %v7831_v7 = vshrl.u32 %v12513_v38, 16  ;;  %v12620_v37 = vld [vmem:[%s14758_s24 + $0x20] sm:$0x1] }
 0x22c   : > { %v12532_v56 = vcombine.low %v7806_v1, %v7816_v30  ;;  %v7820_v24 = vrot.slane %v7818_v63, 4  ;;  %v8580_v20 = vrot.slane %v8579_v13, 4  ;;  %v7823_v25 = vrot.slane %v7821_v44, 5  ;;  %v17076_v30 = vpop.f32.mrf.mxu1 }
 0x22d   : > { %v7829_v9 = vrot.slane %v7827_v22, 5  ;;  %v7837_v40 = vshll.u32 %v12514_v43, 16  ;;  %v8590_v52 = vrot.slane %v8589_v21, 4  ;;  %v7833_v39 = vrot.slane %v7831_v7, 4  ;;  %19126 = vst [vmem:[#allocation48_spill] sm:$0xff] %v17076_v30 }
 0x22e   : > { %14227 = vmatmul.mubr.msk.bf16.gmra.mxu1 %vm352_vm1, %v12532_v56  ;;  %v8597_v45 = vshrl.u32 %v12618_v47, 16  ;;  %v8600_v11 = vshll.u32 %v12618_v47, 16  ;;  %v8585_v16 = vsel %vm14796_vm4, %v8580_v20, %v8584_v35  ;;  %v7824_v1 = vor.u32 %v7823_v25, %v7820_v24  ;;  %v12515_v56 = vld [vmem:[%s14758_s24 + $0xcc] sm:$0xf]  ;;  %v17082_v35 = vpop.f32.mrf.mxu0 }
 0x22f   : > { %v7839_v38 = vrot.slane %v7837_v40, 5  ;;  %v8606_v63 = vshll.u32 %v12619_v29, 16  ;;  %v8595_v43 = vsel %vm14796_vm4, %v8590_v52, %v8594_v34  ;;  %v7834_v13 = vor.u32 %v7833_v39, %v7829_v9  ;;  %v19127_v40 = vld [vmem:[#allocation13_spill] sm:$0xff]  ;;  %v12517_v39 = vld [vmem:[%s14758_s24 + $0xd4] sm:$0x1] }
 0x230   : > { %v8599_v44 = vrot.slane %v8597_v45, 4  ;;  %v8602_v22 = vrot.slane %v8600_v11, 5  ;;  %v12664_v21 = vcombine.low %v8585_v16, %v8595_v43  ;;  %v7825_v47 = vrot.slane %v7824_v1, 4 }
 0x231   : > { %v8608_v7 = vrot.slane %v8606_v63, 5  ;;  %v8610_v48 = vshrl.u32 %v12619_v29, 16  ;;  %v7835_v24 = vrot.slane %v7834_v13, 4  ;;  %v8616_v25 = vshll.u32 %v12620_v37, 16  ;;  %v17092_v29 = vpop.f32.mrf.mxu1 }
 0x232   : > { %v8603_v20 = vor.u32 %v8602_v22, %v8599_v44  ;;  %v17086_v30 = vadd.f32 %v16667_v27, %v19127_v40  ;;  %14236 = vmatprep.mubr.msk.bf16.mxu0 %vm352_vm1, %v12664_v21  ;;  %v7830_v34 = vsel %vm14796_vm4, %v7825_v47, %v7829_v9  ;;  %v7842_v45 = vshrl.u32 %v12515_v56, 16  ;;  %v17096_v22 = vpop.f32.mrf.mxu0  ;;  %v12621_v40 = vld [vmem:[%s14758_s24 + $0x24] sm:$0xf] }
 0x233   : > { %v8612_v52 = vrot.slane %v8610_v48, 4  ;;  %v7845_v11 = vshll.u32 %v12515_v56, 16  ;;  %v7840_v16 = vsel %vm14796_vm4, %v7835_v24, %v7839_v38  ;;  %v8618_v37 = vrot.slane %v8616_v25, 5 }
 0x234   : > { %v8604_v1 = vrot.slane %v8603_v20, 4  ;;  %v7851_v63 = vshll.u32 %v12516_v62, 16  ;;  %v12533_v27 = vcombine.low %v7830_v34, %v7840_v16  ;;  %v7844_v13 = vrot.slane %v7842_v45, 4  ;;  %v19128_v20 = vld [vmem:[#allocation64_spill] sm:$0xff]  ;;  %v17110_v34 = vpop.f32.mrf.mxu1 }
 0x235   : > { %v8613_v43 = vor.u32 %v8612_v52, %v8608_v7  ;;  %v7847_v44 = vrot.slane %v7845_v11, 5  ;;  %v7855_v56 = vshrl.u32 %v12516_v62, 16  ;;  %v7861_v21 = vshll.u32 %v12517_v39, 16  ;;  %v19129_v39 = vld [vmem:[#allocation57_spill] sm:$0xff] }
 0x236   : > { %v8609_v48 = vsel %vm14796_vm4, %v8604_v1, %v8608_v7  ;;  %v7853_v9 = vrot.slane %v7851_v63, 5  ;;  %14230 = vmatprep.mubr.msk.bf16.mxu1 %vm352_vm1, %v12533_v27  ;;  %v17103_v24 = vadd.f32 %v16682_v17, %v16779_v61  ;;  %v17107_v25 = vadd.f32 %v16678_v4, %v19128_v20  ;;  %v12622_v17 = vld [vmem:[%s14758_s24 + $0x28] sm:$0xf]  ;;  %v12623_v61 = vld [vmem:[%s14758_s24 + $0x2c] sm:$0x1]  ;;  %v19130_v1 = vld [vmem:[#allocation66_spill] sm:$0xff] }
 0x237   : > { %v8614_v38 = vrot.slane %v8613_v43, 4  ;;  %v7848_v47 = vor.u32 %v7847_v44, %v7844_v13  ;;  %v7857_v7 = vrot.slane %v7855_v56, 4  ;;  %v7863_v52 = vrot.slane %v7861_v21, 5 }
 0x238   : > { %v17114_v62 = vadd.f32 %v16686_v50, %v16783_v42  ;;  %v17118_v45 = vadd.f32 %v16693_v46, %v19129_v39  ;;  %v17126_v16 = vadd.f32 %v16700_v28, %v16802_v5  ;;  %v17130_v63 = vadd.f32 %v16716_v15, %v19130_v1  ;;  %v17132_v50 = vpop.f32.mrf.mxu0  ;;  %v12624_v28 = vld [vmem:[%s14758_s24 + $0x30] sm:$0xf]  ;;  %v17137_v5 = vpop.f32.mrf.mxu1 }
 0x239   : > { %v8619_v4 = vsel %vm14796_vm4, %v8614_v38, %v8618_v37  ;;  %v7849_v11 = vrot.slane %v7848_v47, 4  ;;  %v7858_v46 = vor.u32 %v7857_v7, %v7853_v9  ;;  %v8621_v27 = vshrl.u32 %v12621_v40, 16  ;;  %v14533_v38 = vld [vmem:[%s18836_s1 + $0x38] sm:$0xf] }
 0x23a   : > { %19131 = vst [vmem:[#allocation49_spill] sm:$0xff] %v17130_v63  ;;  %v12665_v42 = vcombine.low %v8609_v48, %v8619_v4  ;;  %v8624_v43 = vshll.u32 %v12621_v40, 16  ;;  %v8630_v37 = vshll.u32 %v12622_v17, 16  ;;  %v8634_v44 = vshrl.u32 %v12622_v17, 16  ;;  %v12626_v17 = vld [vmem:[%s14758_s24 + $0x38] sm:$0x1] }
 0x23b   : > { %v7854_v13 = vsel %vm14796_vm4, %v7849_v11, %v7853_v9  ;;  %v8640_v56 = vshll.u32 %v12623_v61, 16  ;;  %v7859_v15 = vrot.slane %v7858_v46, 4  ;;  %v8623_v21 = vrot.slane %v8621_v27, 4  ;;  %v12625_v9 = vld [vmem:[%s14758_s24 + $0x34] sm:$0xf]  ;;  %v17150_v61 = vpop.f32.mrf.mxu0 }
 0x23c   : > { %14237 = vmatmul.mubr.msk.bf16.vlgmr.msra.gmra.mxu0 %vm352_vm1, %v12665_v42  ;;  %v8626_v48 = vrot.slane %v8624_v43, 5  ;;  %v10347_v47 = vsel %vm401_vm0, %v14533_v38, 0  ;;  %v8632_v20 = vrot.slane %v8630_v37, 5  ;;  %v8636_v40 = vrot.slane %v8634_v44, 4  ;;  %19132 = vst [vmem:[#allocation59_spill] sm:$0xff] %v17150_v61  ;;  %v17156_v38 = vpop.f32.mrf.mxu1 }
 0x23d   : > { %v8642_v7 = vrot.slane %v8640_v56, 5  ;;  %14303 = vmatpush3.bf16.msra.mxu0 %v10347_v47  ;;  %v17147_v39 = vadd.f32 %v16723_v8, %v16809_v31  ;;  %v7864_v4 = vsel %vm14796_vm4, %v7859_v15, %v7863_v52  ;;  %v8645_v1 = vshrl.u32 %v12624_v28, 16  ;;  %v12696_v46 = vld [vmem:[%s14758_s24 + $0xc] sm:$0xe]  ;;  %v12697_v56 = vld [vmem:[%s14758_s24 + $0x10] sm:$0xf] }
 0x23e   : > { %v8627_v11 = vor.u32 %v8626_v48, %v8623_v21  ;;  %v8648_v42 = vshll.u32 %v12624_v28, 16  ;;  %v12534_v27 = vcombine.low %v7854_v13, %v7864_v4  ;;  %v8637_v43 = vor.u32 %v8636_v40, %v8632_v20  ;;  %19133 = vst [vmem:[#allocation56_spill] sm:$0xff] %v17156_v38  ;;  %v12698_v61 = vld [vmem:[%s14758_s24 + $0x14] sm:$0x1]  ;;  %v17160_v21 = vpop.f32.mrf.mxu0 }
 0x23f   : > { %v8654_v37 = vshll.u32 %v12625_v9, 16  ;;  %v8658_v44 = vshrl.u32 %v12625_v9, 16  ;;  %v8647_v31 = vrot.slane %v8645_v1, 4  ;;  %v8664_v63 = vshll.u32 %v12626_v17, 16  ;;  %19134 = vst [vmem:[#allocation53_spill] sm:$0xff] %v17160_v21 }
 0x240   : > { %v8628_v8 = vrot.slane %v8627_v11, 4  ;;  %v8650_v47 = vrot.slane %v8648_v42, 5  ;;  %14231 = vmatmul.mubr.msk.bf16.gmra.mxu1 %vm352_vm1, %v12534_v27  ;;  %v8638_v52 = vrot.slane %v8637_v43, 4  ;;  %v12744_v13 = vrot.slane %v12696_v46, 9  ;;  %v12699_v11 = vld [vmem:[%s14758_s24 + $0x18] sm:$0xe]  ;;  %v17171_v46 = vpop.f32.mrf.mxu1 }
 0x241   : > { %v8656_v28 = vrot.slane %v8654_v37, 5  ;;  %v8660_v15 = vrot.slane %v8658_v44, 4  ;;  %v8666_v40 = vrot.slane %v8664_v63, 5  ;;  %v9348_v4 = vrot.slane %v12697_v56, 5  ;;  %v12700_v1 = vld [vmem:[%s14758_s24 + $0x1c] sm:$0xf] }
 0x242   : > { %v8633_v48 = vsel %vm14796_vm4, %v8628_v8, %v8632_v20  ;;  %v8651_v9 = vor.u32 %v8650_v47, %v8647_v31  ;;  %v8643_v17 = vsel %vm14796_vm4, %v8638_v52, %v8642_v7  ;;  %v9351_v27 = vrot.slane %v12698_v61, 5  ;;  %v12701_v37 = vld [vmem:[%s14758_s24 + $0x20] sm:$0x1]  ;;  %v17177_v47 = vpop.f32.mrf.mxu0 }
 0x243   : > { %v8661_v42 = vor.u32 %v8660_v15, %v8656_v28  ;;  %v5496_v43 = vadd.f32 %v16731_v23, %v17057_v12  ;;  %v12666_v44 = vcombine.low %v8633_v48, %v8643_v17  ;;  %v9349_v20 = vsel %vm15159_vm7, %v12744_v13, %v9348_v4  ;;  %19136 = vst [vmem:[#allocation15_spill] sm:$0xff] %v17177_v47  ;;  %v19139_v17 = vld [vmem:[#allocation61_spill] sm:$0xff]  ;;  %v12706_v47 = vld [vmem:[%s14758_s24 + $0x34] sm:$0xf] }
 0x244   : > { %v8652_v21 = vrot.slane %v8651_v9, 4  ;;  %v9350_v63 = vrot.slane %v9348_v4, 4  ;;  %v12745_v31 = vrot.slane %v12699_v11, 9  ;;  %v9355_v7 = vrot.slane %v12700_v1, 5  ;;  %v12627_v4 = vld [vmem:[%s14758_s24 + $0x3c] sm:$0xf]  ;;  %v17191_v11 = vpop.f32.mrf.mxu1 }
 0x245   : > { %v8662_v56 = vrot.slane %v8661_v42, 4  ;;  %v17175_v8 = vmul.f32 %v5496_v43, %v5496_v43  ;;  %14240 = vmatprep.mubr.msk.bf16.mxu0 %vm352_vm1, %v12666_v44  ;;  %v9358_v61 = vrot.slane %v12701_v37, 5  ;;  %v10913_v52 = vsel %vm401_vm0, %v16790_v51, 0  ;;  %19137 = vst [vmem:[#allocation54_spill] sm:$0xff] %v17191_v11  ;;  %v19138_v51 = vld [vmem:[#allocation60_spill] sm:$0xff] }
 0x246   : > { %v8657_v23 = vsel %vm14796_vm4, %v8652_v21, %v8656_v28  ;;  %v9352_v12 = vsel %vm15159_vm7, %v9350_v63, %v9351_v27  ;;  %v9356_v48 = vsel %vm15159_vm7, %v12745_v31, %v9355_v7  ;;  %v9357_v9 = vrot.slane %v9355_v7, 4  ;;  %v19140_v27 = vld [vmem:[#allocation68_spill] sm:$0xff]  ;;  %v12705_v11 = vld [vmem:[%s14758_s24 + $0x30] sm:$0xe] }
 0x247   : > { %v8667_v15 = vsel %vm14796_vm4, %v8662_v56, %v8666_v40  ;;  %v12761_v13 = vcombine.low %v9349_v20, %v9352_v12  ;;  %v17195_v21 = vadd.f32 %v16733_v36, %v16818_v58  ;;  %v5494_v1 = vadd.f32 %v19138_v51, %v17103_v24  ;;  %v19141_v36 = vld [vmem:[#allocation19_spill] sm:$0xff]  ;;  %v19142_v24 = vld [vmem:[#allocation62_spill] sm:$0xff]  ;;  %v12629_v31 = vld [vmem:[%s14758_s24 + $0x44] sm:$0x1] }
 0x248   : > { %v12667_v28 = vcombine.low %v8657_v23, %v8667_v15  ;;  %v17201_v40 = vadd.f32 %v19139_v17, %v16822_v0  ;;  %v9359_v42 = vsel %vm15159_vm7, %v9357_v9, %v9358_v61  ;;  %v17208_v37 = vadd.f32 %v19140_v27, %v17114_v62  ;;  %v12628_v20 = vld [vmem:[%s14758_s24 + $0x40] sm:$0xf]  ;;  %v17217_v0 = vpop.f32.mrf.mxu0  ;;  %v12630_v61 = vld [vmem:[%s14758_s24 + $0x48] sm:$0xf]  ;;  %v17227_v15 = vpop.f32.mrf.mxu1 }
 0x249   : > { %14270 = vmatprep.mubr.msk.bf16.mxu1 %vm352_vm1, %v12761_v13  ;;  %v17212_v58 = vadd.f32 %v19141_v36, %v16834_v2  ;;  %v5495_v44 = vadd.f32 %v19142_v24, %v17126_v16  ;;  %19143 = vst [vmem:[#allocation58_spill] sm:$0xff] %v17217_v0  ;;  %v12762_v63 = vcombine.low %v9356_v48, %v9359_v42  ;;  %v8669_v7 = vshrl.u32 %v12627_v4, 16  ;;  %v19145_v42 = vld [vmem:[#allocation16_spill] sm:$0xff] }
 0x24a   : > { %14241 = vmatmul.mubr.msk.bf16.gmra.mxu0 %vm352_vm1, %v12667_v28  ;;  %v5789_v56 = vmul.f32 %v5494_v1, %v5494_v1  ;;  %v8672_v62 = vshll.u32 %v12627_v4, 16  ;;  %v13259_v23 = vpack.c.bf16 %v17208_v37, %v5496_v43  ;;  %v17224_v2 = vmul.f32 %v17208_v37, %v17208_v37  ;;  %19144 = vst [vmem:[#allocation55_spill] sm:$0xff] %v17227_v15  ;;  %v12631_v4 = vld [vmem:[%s14758_s24 + $0x4c] sm:$0xf]  ;;  %v17239_v36 = vpop.f32.mrf.mxu0 }
 0x24b   : > { %v13254_v16 = vpack.c.bf16 %v5495_v44, %v5494_v1  ;;  %v5751_v12 = vadd.f32 %v5495_v44, %v5494_v1  ;;  %14271 = vmatmul.mubr.msk.bf16.vlgmr.msra.gmra.mxu1 %vm352_vm1, %v12762_v63  ;;  %v5790_v13 = vmul.f32 %v5495_v44, %v5495_v44  ;;  %v8671_v48 = vrot.slane %v8669_v7, 4  ;;  %19146 = vst [vmem:[#allocation14_spill] sm:$0xff] %v17239_v36  ;;  %v12632_v7 = vld [vmem:[%s14758_s24 + $0x50] sm:$0x1] }
 0x24c   : > { %v8674_v9 = vrot.slane %v8672_v62, 5  ;;  %v8678_v28 = vshll.u32 %v12628_v20, 16  ;;  %14337 = vmatpush3.bf16.msra.mxu1 %v10913_v52  ;;  %13507 = vst [vmem:[%s16154_s13 + $0x88] sm:$0xff] %v13259_v23   ;;  %v8682_v17 = vshrl.u32 %v12628_v20, 16  ;;  %v8688_v1 = vshll.u32 %v12629_v31, 16  ;;  %v17244_v31 = vpop.f32.mrf.mxu1  ;;  %v17249_v15 = vpop.f32.mrf.mxu0 }
 0x24d   : > { %13506 = vst [vmem:[%s16154_s13 + $0x80] sm:$0xff] %v13254_v16   ;;  %v17233_v51 = vadd.f32 %v5751_v12, %v5496_v43  ;;  %v17237_v27 = vadd.f32 %v19145_v42, %v16842_v18  ;;  %v5821_v24 = vadd.f32 %v5790_v13, %v5789_v56  ;;  %v8693_v62 = vshrl.u32 %v12630_v61, 16  ;;  %v12703_v52 = vld [vmem:[%s14758_s24 + $0x28] sm:$0xf]  ;;  %v12702_v20 = vld [vmem:[%s14758_s24 + $0x24] sm:$0xe] }
 0x24e   : > { %v8675_v44 = vor.u32 %v8674_v9, %v8671_v48  ;;  %v8680_v63 = vrot.slane %v8678_v28, 5  ;;  %v8684_v23 = vrot.slane %v8682_v17, 4  ;;  %v8690_v16 = vrot.slane %v8688_v1, 5  ;;  %19147 = vst [vmem:[#allocation13_spill] sm:$0xff] %v17244_v31  ;;  %v12704_v13 = vld [vmem:[%s14758_s24 + $0x2c] sm:$0x1] }
 0x24f   : > { %v8696_v43 = vshll.u32 %v12630_v61, 16  ;;  %v8702_v12 = vshll.u32 %v12631_v4, 16  ;;  %v5822_v18 = vadd.f32 %v5821_v24, %v17175_v8  ;;  %v8695_v36 = vrot.slane %v8693_v62, 4  ;;  %19148 = vst [vmem:[#allocation64_spill] sm:$0xff] %v17249_v15  ;;  %v17254_v62 = vpop.f32.mrf.mxu1 }
 0x250   : > { %v8676_v42 = vrot.slane %v8675_v44, 4  ;;  %v8706_v56 = vshrl.u32 %v12631_v4, 16  ;;  %v8685_v48 = vor.u32 %v8684_v23, %v8680_v63  ;;  %v8712_v0 = vshll.u32 %v12632_v7, 16 }
 0x251   : > { %v8698_v9 = vrot.slane %v8696_v43, 5  ;;  %v8704_v28 = vrot.slane %v8702_v12, 5  ;;  %v12746_v1 = vrot.slane %v12702_v20, 9  ;;  %v9362_v31 = vrot.slane %v12703_v52, 5  ;;  %v19149_v12 = vld [vmem:[#allocation17_spill] sm:$0xff] }
 0x252   : > { %v8681_v61 = vsel %vm14796_vm4, %v8676_v42, %v8680_v63  ;;  %v8708_v17 = vrot.slane %v8706_v56, 4  ;;  %v8686_v8 = vrot.slane %v8685_v48, 4  ;;  %v8714_v44 = vrot.slane %v8712_v0, 5  ;;  %v12707_v52 = vld [vmem:[%s14758_s24 + $0x38] sm:$0x1]  ;;  %v17263_v0 = vpop.f32.mrf.mxu0 }
 0x253   : > { %v8699_v24 = vor.u32 %v8698_v9, %v8695_v36  ;;  %v9365_v4 = vrot.slane %v12704_v13, 5  ;;  %v9363_v7 = vsel %vm15159_vm7, %v12746_v1, %v9362_v31  ;;  %v9364_v43 = vrot.slane %v9362_v31, 4  ;;  %v17271_v1 = vpop.f32.mrf.mxu1 }
 0x254   : > { %v8709_v23 = vor.u32 %v8708_v17, %v8704_v28  ;;  %v5500_v15 = vadd.f32 %v19149_v12, %v17147_v39  ;;  %v8691_v63 = vsel %vm14796_vm4, %v8686_v8, %v8690_v16  ;;  %v12747_v42 = vrot.slane %v12705_v11, 9 }
 0x255   : > { %v8700_v20 = vrot.slane %v8699_v24, 4  ;;  %v9369_v56 = vrot.slane %v12706_v47, 5  ;;  %v12668_v36 = vcombine.low %v8681_v61, %v8691_v63  ;;  %v9366_v48 = vsel %vm15159_vm7, %v9364_v43, %v9365_v4  ;;  %v19150_v61 = vld [vmem:[#allocation65_spill] sm:$0xff]  ;;  %v19151_v24 = vld [vmem:[#allocation67_spill] sm:$0xff]  ;;  %v12633_v4 = vld [vmem:[%s14758_s24 + $0x54] sm:$0xf]  ;;  %v17293_v63 = vpop.f32.mrf.mxu1 }
 0x256   : > { %v8710_v13 = vrot.slane %v8709_v23, 4  ;;  %v5795_v9 = vmul.f32 %v5500_v15, %v5500_v15  ;;  %v12763_v39 = vcombine.low %v9363_v7, %v9366_v48  ;;  %v9372_v11 = vrot.slane %v12707_v52, 5  ;;  %v19154_v52 = vld [vmem:[#allocation69_spill] sm:$0xff] }
 0x257   : > { %v8705_v31 = vsel %vm14796_vm4, %v8700_v20, %v8704_v28  ;;  %v9370_v16 = vsel %vm15159_vm7, %v12747_v42, %v9369_v56  ;;  %v9371_v17 = vrot.slane %v9369_v56, 4  ;;  %14244 = vmatprep.mubr.msk.bf16.mxu0 %vm352_vm1, %v12668_v36  ;;  %v17278_v8 = vadd.f32 %v19150_v61, %v16862_v14  ;;  %v17291_v14 = vpop.f32.mrf.mxu0  ;;  %v12634_v36 = vld [vmem:[%s14758_s24 + $0x58] sm:$0xf] }
 0x258   : > { %v8715_v47 = vsel %vm14796_vm4, %v8710_v13, %v8714_v44  ;;  %v5498_v28 = vadd.f32 %v19151_v24, %v17195_v21  ;;  %14274 = vmatprep.mubr.msk.bf16.mxu1 %vm352_vm1, %v12763_v39  ;;  %v5753_v7 = vadd.f32 %v17233_v51, %v17208_v37  ;;  %v5823_v43 = vadd.f32 %v5822_v18, %v17224_v2  ;;  %v19152_v44 = vld [vmem:[#allocation71_spill] sm:$0xff]  ;;  %v19155_v37 = vld [vmem:[#allocation18_spill] sm:$0xff]  ;;  %v17319_v24 = vpop.f32.mrf.mxu1 }
 0x259   : > { %v12669_v23 = vcombine.low %v8705_v31, %v8715_v47  ;;  %v17289_v12 = vadd.f32 %v19152_v44, %v16866_v54  ;;  %19153 = vst [vmem:[#allocation57_spill] sm:$0xff] %v17291_v14  ;;  %v9373_v21 = vsel %vm15159_vm7, %v9371_v17, %v9372_v11  ;;  %v17299_v42 = vadd.f32 %v19154_v52, %v17201_v40  ;;  %v19156_v18 = vld [vmem:[#allocation74_spill] sm:$0xff]  ;;  %v12635_v13 = vld [vmem:[%s14758_s24 + $0x5c] sm:$0x1]  ;;  %v17310_v31 = vpop.f32.mrf.mxu0  ;;  %v12636_v17 = vld [vmem:[%s14758_s24 + $0x60] sm:$0xf] }
 0x25a   : > { %v5793_v20 = vmul.f32 %v5498_v28, %v5498_v28  ;;  %v17303_v2 = vadd.f32 %v19155_v37, %v16878_v19  ;;  %v12764_v54 = vcombine.low %v9370_v16, %v9373_v21  ;;  %v5754_v51 = vadd.f32 %v5753_v7, %v5498_v28  ;;  %19157 = vst [vmem:[#allocation66_spill] sm:$0xff] %v17310_v31  ;;  %v12637_v21 = vld [vmem:[%s14758_s24 + $0x64] sm:$0xf]  ;;  %v12712_v14 = vld [vmem:[%s14758_s24 + $0x4c] sm:$0xf] }
 0x25b   : > { %14245 = vmatmul.mubr.msk.bf16.gmra.mxu0 %vm352_vm1, %v12669_v23  ;;  %v5499_v56 = vadd.f32 %v19156_v18, %v17212_v58  ;;  %v8717_v48 = vshrl.u32 %v12633_v4, 16  ;;  %v13269_v40 = vpack.c.bf16 %v17299_v42, %v5500_v15  ;;  %v17315_v19 = vmul.f32 %v17299_v42, %v17299_v42  ;;  %v12710_v31 = vld [vmem:[%s14758_s24 + $0x44] sm:$0x1] }
 0x25c   : > { %v5824_v39 = vadd.f32 %v5823_v43, %v5793_v20  ;;  %v8720_v16 = vshll.u32 %v12633_v4, 16  ;;  %14275 = vmatmul.mubr.msk.bf16.gmra.mxu1 %vm352_vm1, %v12764_v54  ;;  %v8726_v7 = vshll.u32 %v12634_v36, 16  ;;  %v8730_v43 = vshrl.u32 %v12634_v36, 16  ;;  %v12709_v54 = vld [vmem:[%s14758_s24 + $0x40] sm:$0xf] }
 0x25d   : > { %v13264_v58 = vpack.c.bf16 %v5499_v56, %v5498_v28  ;;  %v5755_v47 = vadd.f32 %v5754_v51, %v5499_v56  ;;  %v5794_v11 = vmul.f32 %v5499_v56, %v5499_v56  ;;  %v8719_v61 = vrot.slane %v8717_v48, 4  ;;  %13509 = vst [vmem:[%s16154_s13 + $0x98] sm:$0xff] %v13269_v40   ;;  %v12638_v28 = vld [vmem:[%s14758_s24 + $0x68] sm:$0x1]  ;;  %v17330_v51 = vpop.f32.mrf.mxu0  ;;  %v12708_v36 = vld [vmem:[%s14758_s24 + $0x3c] sm:$0xe] }
 0x25e   : > { %v8722_v23 = vrot.slane %v8720_v16, 5  ;;  %v8736_v44 = vshll.u32 %v12635_v13, 16  ;;  %v17326_v52 = vadd.f32 %v16852_v6, %v16891_v49  ;;  %v8741_v37 = vshrl.u32 %v12636_v17, 16  ;;  %19158 = vst [vmem:[#allocation12_spill] sm:$0xff] %v17330_v51 }
 0x25f   : > { %13508 = vst [vmem:[%s16154_s13 + $0x90] sm:$0xff] %v13264_v58   ;;  %v5756_v4 = vadd.f32 %v5755_v47, %v5500_v15  ;;  %v5825_v20 = vadd.f32 %v5824_v39, %v5794_v11  ;;  %v8728_v56 = vrot.slane %v8726_v7, 5  ;;  %v8732_v48 = vrot.slane %v8730_v43, 4  ;;  %v17333_v58 = vpop.f32.mrf.mxu1  ;;  %v12711_v43 = vld [vmem:[%s14758_s24 + $0x48] sm:$0xe] }
 0x260   : > { %v8723_v18 = vor.u32 %v8722_v23, %v8719_v61  ;;  %v8738_v40 = vrot.slane %v8736_v44, 5  ;;  %v8743_v16 = vrot.slane %v8741_v37, 4  ;;  %v8744_v15 = vshll.u32 %v12636_v17, 16  ;;  %v17337_v44 = vpop.f32.mrf.mxu0 }
 0x261   : > { %v5826_v13 = vadd.f32 %v5825_v20, %v5795_v9  ;;  %v8750_v39 = vshll.u32 %v12637_v21, 16  ;;  %v8733_v49 = vor.u32 %v8732_v48, %v8728_v56  ;;  %v8754_v47 = vshrl.u32 %v12637_v21, 16  ;;  %19159 = vst [vmem:[#allocation60_spill] sm:$0xff] %v17337_v44  ;;  %v19161_v44 = vld [vmem:[#allocation72_spill] sm:$0xff] }
 0x262   : > { %v8724_v6 = vrot.slane %v8723_v18, 4  ;;  %v8760_v11 = vshll.u32 %v12638_v28, 16  ;;  %v8746_v51 = vrot.slane %v8744_v15, 5  ;;  %v12748_v23 = vrot.slane %v12708_v36, 9  ;;  %v12713_v15 = vld [vmem:[%s14758_s24 + $0x50] sm:$0x1] }
 0x263   : > { %v8752_v61 = vrot.slane %v8750_v39, 5  ;;  %v9376_v7 = vrot.slane %v12709_v54, 5  ;;  %v8734_v17 = vrot.slane %v8733_v49, 4  ;;  %v8756_v20 = vrot.slane %v8754_v47, 4  ;;  %v17345_v39 = vpop.f32.mrf.mxu1 }
 0x264   : > { %v8729_v9 = vsel %vm14796_vm4, %v8724_v6, %v8728_v56  ;;  %v8762_v37 = vrot.slane %v8760_v11, 5  ;;  %v8747_v18 = vor.u32 %v8746_v51, %v8743_v16  ;;  %v9379_v48 = vrot.slane %v12710_v31, 5  ;;  %19160 = vst [vmem:[#allocation61_spill] sm:$0xff] %v17345_v39  ;;  %v17353_v11 = vpop.f32.mrf.mxu0 }
 0x265   : > { %v9377_v21 = vsel %vm15159_vm7, %v12748_v23, %v9376_v7  ;;  %v9378_v28 = vrot.slane %v9376_v7, 4  ;;  %v8739_v54 = vsel %vm14796_vm4, %v8734_v17, %v8738_v40  ;;  %v8757_v36 = vor.u32 %v8756_v20, %v8752_v61  ;;  %19162 = vst [vmem:[#allocation68_spill] sm:$0xff] %v17353_v11  ;;  %v17355_v31 = vpop.f32.mrf.mxu1  ;;  %v12717_v11 = vld [vmem:[%s14758_s24 + $0x60] sm:$0xe] }
 0x266   : > { %v5504_v56 = vadd.f32 %v19161_v44, %v17237_v27  ;;  %v12749_v6 = vrot.slane %v12711_v43, 9  ;;  %v12670_v49 = vcombine.low %v8729_v9, %v8739_v54  ;;  %v8748_v47 = vrot.slane %v8747_v18, 4  ;;  %v17366_v17 = vpop.f32.mrf.mxu0  ;;  %v19165_v18 = vld [vmem:[#allocation22_spill] sm:$0xff] }
 0x267   : > { %v9380_v51 = vsel %vm15159_vm7, %v9378_v28, %v9379_v48  ;;  %v9383_v16 = vrot.slane %v12712_v14, 5  ;;  %v8758_v23 = vrot.slane %v8757_v36, 4  ;;  %v9386_v40 = vrot.slane %v12713_v15, 5  ;;  %v19163_v14 = vld [vmem:[#allocation33_spill] sm:$0xff]  ;;  %19164 = vst [vmem:[#allocation19_spill] sm:$0xff] %v17366_v17  ;;  %v17376_v15 = vpop.f32.mrf.mxu1 }
 0x268   : > { %v12765_v7 = vcombine.low %v9377_v21, %v9380_v51  ;;  %v5799_v39 = vmul.f32 %v5504_v56, %v5504_v56  ;;  %14248 = vmatprep.mubr.msk.bf16.mxu0 %vm352_vm1, %v12670_v49  ;;  %v8753_v27 = vsel %vm14796_vm4, %v8748_v47, %v8752_v61  ;;  %v17364_v9 = vadd.f32 %v19163_v14, %v16904_v26  ;;  %v12639_v48 = vld [vmem:[%s14758_s24 + $0x6c] sm:$0xf]  ;;  %v17393_v51 = vpop.f32.mrf.mxu0  ;;  %v12642_v14 = vld [vmem:[%s14758_s24 + $0x78] sm:$0xf] }
 0x269   : > { %v9384_v43 = vsel %vm15159_vm7, %v12749_v6, %v9383_v16  ;;  %v9385_v44 = vrot.slane %v9383_v16, 4  ;;  %v8763_v20 = vsel %vm14796_vm4, %v8758_v23, %v8762_v37  ;;  %v5502_v21 = vadd.f32 %v19165_v18, %v17278_v8  ;;  %v19166_v36 = vld [vmem:[#allocation73_spill] sm:$0xff]  ;;  %v19167_v6 = vld [vmem:[#allocation35_spill] sm:$0xff]  ;;  %19169 = vst [vmem:[#allocation62_spill] sm:$0xff] %v17393_v51  ;;  %v19170_v16 = vld [vmem:[#allocation20_spill] sm:$0xff] }
 0x26a   : > { %14278 = vmatprep.mubr.msk.bf16.mxu1 %vm352_vm1, %v12765_v7  ;;  %v5757_v61 = vadd.f32 %v5756_v4, %v17299_v42  ;;  %v5827_v28 = vadd.f32 %v5826_v13, %v17315_v19  ;;  %v12671_v26 = vcombine.low %v8753_v27, %v8763_v20  ;;  %v17382_v37 = vadd.f32 %v19166_v36, %v16908_v60  ;;  %v12640_v8 = vld [vmem:[%s14758_s24 + $0x70] sm:$0xf]  ;;  %v19168_v13 = vld [vmem:[#allocation23_spill] sm:$0xff]  ;;  %v12641_v7 = vld [vmem:[%s14758_s24 + $0x74] sm:$0x1]  ;;  %v17406_v20 = vpop.f32.mrf.mxu1 }
 0x26b   : > { %v9387_v54 = vsel %vm15159_vm7, %v9385_v44, %v9386_v40  ;;  %v17386_v49 = vadd.f32 %v19167_v6, %v17289_v12  ;;  %v5797_v4 = vmul.f32 %v5502_v21, %v5502_v21  ;;  %v17391_v47 = vadd.f32 %v19168_v13, %v16917_v32  ;;  %v19172_v13 = vld [vmem:[#allocation24_spill] sm:$0xff]  ;;  %v12716_v51 = vld [vmem:[%s14758_s24 + $0x5c] sm:$0x1] }
 0x26c   : > { %v12766_v42 = vcombine.low %v9384_v43, %v9387_v54  ;;  %v5758_v19 = vadd.f32 %v5757_v61, %v5502_v21  ;;  %14249 = vmatmul.mubr.msk.bf16.gmra.mxu0 %vm352_vm1, %v12671_v26  ;;  %v5503_v23 = vadd.f32 %v19170_v16, %v17303_v2  ;;  %v8765_v40 = vshrl.u32 %v12639_v48, 16 }
 0x26d   : > { %v13279_v60 = vpack.c.bf16 %v17386_v49, %v5504_v56  ;;  %v17399_v12 = vmul.f32 %v17386_v49, %v17386_v49  ;;  %v5828_v32 = vadd.f32 %v5827_v28, %v5797_v4  ;;  %v8768_v27 = vshll.u32 %v12639_v48, 16  ;;  %v12643_v28 = vld [vmem:[%s14758_s24 + $0x7c] sm:$0xf]  ;;  %v17410_v48 = vpop.f32.mrf.mxu0 }
 0x26e   : > { %14279 = vmatmul.mubr.msk.bf16.gmra.mxu1 %vm352_vm1, %v12766_v42  ;;  %v8774_v43 = vshll.u32 %v12640_v8, 16  ;;  %v8778_v44 = vshrl.u32 %v12640_v8, 16  ;;  %v13274_v18 = vpack.c.bf16 %v5503_v23, %v5502_v21  ;;  %v5759_v61 = vadd.f32 %v5758_v19, %v5503_v23  ;;  %19171 = vst [vmem:[#allocation16_spill] sm:$0xff] %v17410_v48  ;;  %v12644_v21 = vld [vmem:[%s14758_s24 + $0x80] sm:$0x1] }
 0x26f   : > { %13511 = vst [vmem:[%s16154_s13 + $0xa8] sm:$0xff] %v13279_v60   ;;  %v5798_v26 = vmul.f32 %v5503_v23, %v5503_v23  ;;  %v8767_v54 = vrot.slane %v8765_v40, 4  ;;  %v8770_v2 = vrot.slane %v8768_v27, 5  ;;  %v8784_v42 = vshll.u32 %v12641_v7, 16  ;;  %v17420_v7 = vpop.f32.mrf.mxu1 }
 0x270   : > { %v8776_v36 = vrot.slane %v8774_v43, 5  ;;  %v8780_v6 = vrot.slane %v8778_v44, 4  ;;  %13510 = vst [vmem:[%s16154_s13 + $0xa0] sm:$0xff] %v13274_v18   ;;  %v5760_v8 = vadd.f32 %v5759_v61, %v5504_v56  ;;  %v17415_v16 = vadd.f32 %v19172_v13, %v16935_v57  ;;  %v12714_v43 = vld [vmem:[%s14758_s24 + $0x54] sm:$0xe] }
 0x271   : > { %v5829_v4 = vadd.f32 %v5828_v32, %v5798_v26  ;;  %v8789_v19 = vshrl.u32 %v12642_v14, 16  ;;  %v8771_v60 = vor.u32 %v8770_v2, %v8767_v54  ;;  %v8786_v40 = vrot.slane %v8784_v42, 5  ;;  %v12715_v44 = vld [vmem:[%s14758_s24 + $0x58] sm:$0xf]  ;;  %v17423_v54 = vpop.f32.mrf.mxu0  ;;  %v17425_v2 = vpop.f32.mrf.mxu1 }
 0x272   : > { %v8781_v23 = vor.u32 %v8780_v6, %v8776_v36  ;;  %v8792_v27 = vshll.u32 %v12642_v14, 16  ;;  %v8798_v56 = vshll.u32 %v12643_v28, 16  ;;  %v8802_v32 = vshrl.u32 %v12643_v28, 16  ;;  %19173 = vst [vmem:[#allocation17_spill] sm:$0xff] %v17423_v54  ;;  %19174 = vst [vmem:[#allocation65_spill] sm:$0xff] %v17425_v2 }
 0x273   : > { %v5830_v48 = vadd.f32 %v5829_v4, %v5799_v39  ;;  %v8791_v18 = vrot.slane %v8789_v19, 4  ;;  %v8772_v61 = vrot.slane %v8771_v60, 4  ;;  %v8808_v13 = vshll.u32 %v12644_v21, 16  ;;  %v12718_v60 = vld [vmem:[%s14758_s24 + $0x64] sm:$0xf] }
 0x274   : > { %v8782_v57 = vrot.slane %v8781_v23, 4  ;;  %v8794_v26 = vrot.slane %v8792_v27, 5  ;;  %v8800_v14 = vrot.slane %v8798_v56, 5  ;;  %v8804_v6 = vrot.slane %v8802_v32, 4  ;;  %v12719_v21 = vld [vmem:[%s14758_s24 + $0x68] sm:$0x1]  ;;  %v17434_v23 = vpop.f32.mrf.mxu0 }
 0x275   : > { %v12750_v42 = vrot.slane %v12714_v43, 9  ;;  %v9390_v17 = vrot.slane %v12715_v44, 5  ;;  %v8777_v39 = vsel %vm14796_vm4, %v8772_v61, %v8776_v36  ;;  %v8810_v19 = vrot.slane %v8808_v13, 5  ;;  %19175 = vst [vmem:[#allocation67_spill] sm:$0xff] %v17434_v23  ;;  %v17438_v44 = vpop.f32.mrf.mxu1  ;;  %v19177_v13 = vld [vmem:[#allocation21_spill] sm:$0xff] }
 0x276   : > { %v8787_v28 = vsel %vm14796_vm4, %v8782_v57, %v8786_v40  ;;  %v8795_v4 = vor.u32 %v8794_v26, %v8791_v18  ;;  %v8805_v54 = vor.u32 %v8804_v6, %v8800_v14  ;;  %v9393_v2 = vrot.slane %v12716_v51, 5  ;;  %v19176_v26 = vld [vmem:[#allocation36_spill] sm:$0xff] }
 0x277   : > { %v12672_v27 = vcombine.low %v8777_v39, %v8787_v28  ;;  %v9391_v56 = vsel %vm15159_vm7, %v12750_v42, %v9390_v17  ;;  %v9392_v43 = vrot.slane %v9390_v17, 4  ;;  %v5508_v36 = vadd.f32 %v16922_v33, %v17326_v52  ;;  %v17447_v42 = vpop.f32.mrf.mxu0  ;;  %v19179_v52 = vld [vmem:[#allocation31_spill] sm:$0xff] }
 0x278   : > { %v8796_v32 = vrot.slane %v8795_v4, 4  ;;  %v12751_v40 = vrot.slane %v12717_v11, 9  ;;  %v8806_v18 = vrot.slane %v8805_v54, 4  ;;  %v9397_v61 = vrot.slane %v12718_v60, 5  ;;  %19178 = vst [vmem:[#allocation71_spill] sm:$0xff] %v17447_v42  ;;  %v17459_v60 = vpop.f32.mrf.mxu1 }
 0x279   : > { %14252 = vmatprep.mubr.msk.bf16.mxu0 %vm352_vm1, %v12672_v27  ;;  %v9400_v57 = vrot.slane %v12719_v21, 5  ;;  %v17445_v6 = vadd.f32 %v19177_v13, %v19176_v26  ;;  %v9394_v51 = vsel %vm15159_vm7, %v9392_v43, %v9393_v2  ;;  %v5803_v33 = vmul.f32 %v5508_v36, %v5508_v36  ;;  %v12645_v43 = vld [vmem:[%s14758_s24 + $0x84] sm:$0xf] }
 0x27a   : > { %v8801_v17 = vsel %vm14796_vm4, %v8796_v32, %v8800_v14  ;;  %v5506_v11 = vadd.f32 %v19179_v52, %v17364_v9  ;;  %v8811_v54 = vsel %vm14796_vm4, %v8806_v18, %v8810_v19  ;;  %v12767_v39 = vcombine.low %v9391_v56, %v9394_v51  ;;  %v19180_v19 = vld [vmem:[#allocation37_spill] sm:$0xff]  ;;  %v19181_v56 = vld [vmem:[#allocation26_spill] sm:$0xff] }
 0x27b   : > { %v9398_v28 = vsel %vm15159_vm7, %v12751_v40, %v9397_v61  ;;  %v9399_v4 = vrot.slane %v9397_v61, 4  ;;  %v12673_v21 = vcombine.low %v8801_v17, %v8811_v54  ;;  %v5761_v14 = vadd.f32 %v5760_v8, %v17386_v49  ;;  %v19182_v40 = vld [vmem:[#allocation27_spill] sm:$0xff]  ;;  %v19183_v49 = vld [vmem:[#allocation25_spill] sm:$0xff]  ;;  %v12646_v61 = vld [vmem:[%s14758_s24 + $0x88] sm:$0xf]  ;;  %v17491_v54 = vpop.f32.mrf.mxu1 }
 0x27c   : > { %v5801_v2 = vmul.f32 %v5506_v11, %v5506_v11  ;;  %v5831_v27 = vadd.f32 %v5830_v48, %v17399_v12  ;;  %14282 = vmatprep.mubr.msk.bf16.mxu1 %vm352_vm1, %v12767_v39  ;;  %v17469_v32 = vadd.f32 %v19181_v56, %v19180_v19  ;;  %v17473_v18 = vadd.f32 %v19182_v40, %v17382_v37  ;;  %v17480_v12 = vpop.f32.mrf.mxu0  ;;  %v12647_v17 = vld [vmem:[%s14758_s24 + $0x8c] sm:$0x1] }
 0x27d   : > { %v9401_v9 = vsel %vm15159_vm7, %v9399_v4, %v9400_v57  ;;  %v17477_v8 = vadd.f32 %v19183_v49, %v16964_v55  ;;  %19184 = vst [vmem:[#allocation69_spill] sm:$0xff] %v17480_v12  ;;  %14253 = vmatmul.mubr.msk.bf16.gmra.mxu0 %vm352_vm1, %v12673_v21  ;;  %v5762_v57 = vadd.f32 %v5761_v14, %v5506_v11  ;;  %v8813_v51 = vshrl.u32 %v12645_v43, 16  ;;  %v19188_v49 = vld [vmem:[#allocation34_spill] sm:$0xff] }
 0x27e   : > { %v12768_v48 = vcombine.low %v9398_v28, %v9401_v9  ;;  %v5832_v26 = vadd.f32 %v5831_v27, %v5801_v2  ;;  %v5507_v13 = vadd.f32 %v16966_v53, %v17391_v47  ;;  %v13289_v37 = vpack.c.bf16 %v17473_v18, %v5508_v36  ;;  %19185 = vst [vmem:[#allocation18_spill] sm:$0xff] %v17491_v54  ;;  %v12648_v47 = vld [vmem:[%s14758_s24 + $0x90] sm:$0xf]  ;;  %v12649_v9 = vld [vmem:[%s14758_s24 + $0x94] sm:$0xf]  ;;  %v17497_v19 = vpop.f32.mrf.mxu0 }
 0x27f   : > { %v17489_v55 = vmul.f32 %v17473_v18, %v17473_v18  ;;  %v8816_v52 = vshll.u32 %v12645_v43, 16  ;;  %v8822_v53 = vshll.u32 %v12646_v61, 16  ;;  %v8815_v21 = vrot.slane %v8813_v51, 4  ;;  %19186 = vst [vmem:[#allocation74_spill] sm:$0xff] %v17497_v19  ;;  %v17499_v43 = vpop.f32.mrf.mxu1  ;;  %v12724_v54 = vld [vmem:[%s14758_s24 + $0x7c] sm:$0xf] }
 0x280   : > { %14283 = vmatmul.mubr.msk.bf16.gmra.mxu1 %vm352_vm1, %v12768_v48  ;;  %v13284_v39 = vpack.c.bf16 %v5507_v13, %v5506_v11  ;;  %v5763_v28 = vadd.f32 %v5762_v57, %v5507_v13  ;;  %v5802_v4 = vmul.f32 %v5507_v13, %v5507_v13  ;;  %13513 = vst [vmem:[%s16154_s13 + $0xb8] sm:$0xff] %v13289_v37   ;;  %v8826_v2 = vshrl.u32 %v12646_v61, 16  ;;  %v19189_v48 = vld [vmem:[#allocation30_spill] sm:$0xff]  ;;  %v17508_v12 = vpop.f32.mrf.mxu0  ;;  %v19323_v41 = vld [vmem:[#allocation71_spill] sm:$0xff] }
 0x281   : > { %v8818_v14 = vrot.slane %v8816_v52, 5  ;;  %v8832_v27 = vshll.u32 %v12647_v17, 16  ;;  %19187 = vst [vmem:[#allocation72_spill] sm:$0xff] %v17499_v43  ;;  %v8824_v40 = vrot.slane %v8822_v53, 5  ;;  %v17504_v57 = vadd.f32 %v19189_v48, %v19188_v49  ;;  %v12650_v13 = vld [vmem:[%s14758_s24 + $0x98] sm:$0x1] }
 0x282   : > { %13512 = vst [vmem:[%s16154_s13 + $0xb0] sm:$0xff] %v13284_v39   ;;  %v5764_v56 = vadd.f32 %v5763_v28, %v5508_v36  ;;  %v5833_v11 = vadd.f32 %v5832_v26, %v5802_v4  ;;  %v8828_v51 = vrot.slane %v8826_v2, 4  ;;  %v8837_v17 = vshrl.u32 %v12648_v47, 16  ;;  %v12720_v52 = vld [vmem:[%s14758_s24 + $0x6c] sm:$0xe]  ;;  %19190 = vst [vmem:[#allocation33_spill] sm:$0xff] %v17508_v12  ;;  %v17511_v28 = vpop.f32.mrf.mxu1  ;;  %v17515_v43 = vpop.f32.mrf.mxu0 }
 0x283   : > { %v8819_v37 = vor.u32 %v8818_v14, %v8815_v21  ;;  %v8834_v61 = vrot.slane %v8832_v27, 5  ;;  %v8840_v39 = vshll.u32 %v12648_v47, 16  ;;  %v8846_v42 = vshll.u32 %v12649_v9, 16  ;;  %v12721_v26 = vld [vmem:[%s14758_s24 + $0x70] sm:$0xf]  ;;  %19191 = vst [vmem:[#allocation22_spill] sm:$0xff] %v17511_v28 }
 0x284   : > { %v5834_v19 = vadd.f32 %v5833_v11, %v5803_v33  ;;  %v8850_v36 = vshrl.u32 %v12649_v9, 16  ;;  %v8829_v53 = vor.u32 %v8828_v51, %v8824_v40  ;;  %v8839_v49 = vrot.slane %v8837_v17, 4  ;;  %v12722_v21 = vld [vmem:[%s14758_s24 + $0x74] sm:$0x1]  ;;  %v12723_v12 = vld [vmem:[%s14758_s24 + $0x78] sm:$0xe] }
 0x285   : > { %v8820_v4 = vrot.slane %v8819_v37, 4  ;;  %v8856_v48 = vshll.u32 %v12650_v13, 16  ;;  %v8842_v14 = vrot.slane %v8840_v39, 5  ;;  %v8848_v2 = vrot.slane %v8846_v42, 5  ;;  %19192 = vst [vmem:[#allocation73_spill] sm:$0xff] %v17515_v43  ;;  %v19193_v13 = vld [vmem:[#allocation32_spill] sm:$0xff]  ;;  %v17523_v42 = vpop.f32.mrf.mxu1 }
 0x286   : > { %v8852_v27 = vrot.slane %v8850_v36, 4  ;;  %v12752_v23 = vrot.slane %v12720_v52, 9  ;;  %v8830_v47 = vrot.slane %v8829_v53, 4  ;;  %v9404_v11 = vrot.slane %v12721_v26, 5  ;;  %v12725_v39 = vld [vmem:[%s14758_s24 + $0x80] sm:$0x1] }
 0x287   : > { %v8825_v33 = vsel %vm14796_vm4, %v8820_v4, %v8824_v40  ;;  %v8858_v9 = vrot.slane %v8856_v48, 5  ;;  %v8843_v37 = vor.u32 %v8842_v14, %v8839_v49  ;;  %v9407_v17 = vrot.slane %v12722_v21, 5  ;;  %v17529_v21 = vpop.f32.mrf.mxu0  ;;  %v12729_v43 = vld [vmem:[%s14758_s24 + $0x90] sm:$0xe] }
 0x288   : > { %v8853_v51 = vor.u32 %v8852_v27, %v8848_v2  ;;  %v5512_v28 = vadd.f32 %v19193_v13, %v17415_v16  ;;  %v8835_v52 = vsel %vm14796_vm4, %v8830_v47, %v8834_v61  ;;  %v9405_v36 = vsel %vm15159_vm7, %v12752_v23, %v9404_v11  ;;  %19194 = vst [vmem:[#allocation35_spill] sm:$0xff] %v17529_v21  ;;  %v12727_v21 = vld [vmem:[%s14758_s24 + $0x88] sm:$0xf] }
 0x289   : > { %v9406_v40 = vrot.slane %v9404_v11, 4  ;;  %v12753_v4 = vrot.slane %v12723_v12, 9  ;;  %v12674_v53 = vcombine.low %v8825_v33, %v8835_v52  ;;  %v8844_v26 = vrot.slane %v8843_v37, 4  ;;  %v19195_v33 = vld [vmem:[#allocation29_spill] sm:$0xff]  ;;  %v17544_v11 = vpop.f32.mrf.mxu1 }
 0x28a   : > { %v8854_v49 = vrot.slane %v8853_v51, 4  ;;  %v5807_v48 = vmul.f32 %v5512_v28, %v5512_v28  ;;  %v9411_v14 = vrot.slane %v12724_v54, 5  ;;  %v9414_v27 = vrot.slane %v12725_v39, 5  ;;  %v19196_v51 = vld [vmem:[#allocation28_spill] sm:$0xff] }
 0x28b   : > { %v9408_v16 = vsel %vm15159_vm7, %v9406_v40, %v9407_v17  ;;  %v17535_v13 = vadd.f32 %v16984_v10, %v16990_v3  ;;  %14256 = vmatprep.mubr.msk.bf16.mxu0 %vm352_vm1, %v12674_v53  ;;  %v8849_v23 = vsel %vm14796_vm4, %v8844_v26, %v8848_v2  ;;  %v5510_v47 = vadd.f32 %v19195_v33, %v17445_v6  ;;  %v19197_v17 = vld [vmem:[#allocation38_spill] sm:$0xff]  ;;  %v19198_v6 = vld [vmem:[#allocation41_spill] sm:$0xff]  ;;  %v17560_v40 = vpop.f32.mrf.mxu0 }
 0x28c   : > { %v8859_v12 = vsel %vm14796_vm4, %v8854_v49, %v8858_v9  ;;  %v12769_v61 = vcombine.low %v9405_v36, %v9408_v16  ;;  %v9412_v10 = vsel %vm15159_vm7, %v12753_v4, %v9411_v14  ;;  %v9413_v3 = vrot.slane %v9411_v14, 4  ;;  %v12651_v36 = vld [vmem:[%s14758_s24 + $0x9c] sm:$0xf]  ;;  %19199 = vst [vmem:[#allocation23_spill] sm:$0xff] %v17560_v40  ;;  %v17562_v4 = vpop.f32.mrf.mxu1  ;;  %v19203_v26 = vld [vmem:[#allocation42_spill] sm:$0xff] }
 0x28d   : > { %v12675_v54 = vcombine.low %v8849_v23, %v8859_v12  ;;  %v5765_v37 = vadd.f32 %v5764_v56, %v17473_v18  ;;  %v5805_v2 = vmul.f32 %v5510_v47, %v5510_v47  ;;  %v5835_v9 = vadd.f32 %v5834_v19, %v17489_v55  ;;  %19200 = vst [vmem:[#allocation20_spill] sm:$0xff] %v17562_v4  ;;  %v19201_v19 = vld [vmem:[#allocation39_spill] sm:$0xff]  ;;  %v12653_v16 = vld [vmem:[%s14758_s24 + $0xa4] sm:$0x1] }
 0x28e   : > { %14286 = vmatprep.mubr.msk.bf16.mxu1 %vm352_vm1, %v12769_v61  ;;  %v17553_v39 = vadd.f32 %v19197_v17, %v19196_v51  ;;  %v17557_v52 = vadd.f32 %v19198_v6, %v17469_v32  ;;  %v9415_v18 = vsel %vm15159_vm7, %v9413_v3, %v9414_v27  ;;  %v19202_v56 = vld [vmem:[#allocation43_spill] sm:$0xff]  ;;  %v5511_v32 = vadd.f32 %v19203_v26, %v17477_v8  ;;  %v17580_v61 = vpop.f32.mrf.mxu0  ;;  %v12654_v8 = vld [vmem:[%s14758_s24 + $0xa8] sm:$0xf]  ;;  %v17583_v51 = vpop.f32.mrf.mxu1  ;;  %v12655_v6 = vld [vmem:[%s14758_s24 + $0xac] sm:$0xf] }
 0x28f   : > { %14257 = vmatmul.mubr.msk.bf16.gmra.mxu0 %vm352_vm1, %v12675_v54  ;;  %v5766_v55 = vadd.f32 %v5765_v37, %v5510_v47  ;;  %v17569_v53 = vadd.f32 %v19202_v56, %v19201_v19  ;;  %v12652_v49 = vld [vmem:[%s14758_s24 + $0xa0] sm:$0xf]  ;;  %v12770_v14 = vcombine.low %v9412_v10, %v9415_v18  ;;  %v5836_v23 = vadd.f32 %v5835_v9, %v5805_v2  ;;  %v19206_v19 = vld [vmem:[#allocation40_spill] sm:$0xff]  ;;  %v19207_v56 = vld [vmem:[#allocation50_spill] sm:$0xff] }
 0x290   : > { %v13299_v12 = vpack.c.bf16 %v17557_v52, %v5512_v28  ;;  %v17578_v27 = vmul.f32 %v17557_v52, %v17557_v52  ;;  %19204 = vst [vmem:[#allocation24_spill] sm:$0xff] %v17580_v61  ;;  %v13294_v33 = vpack.c.bf16 %v5511_v32, %v5510_v47  ;;  %v5806_v3 = vmul.f32 %v5511_v32, %v5511_v32  ;;  %v17596_v61 = vpop.f32.mrf.mxu0 }
 0x291   : > { %v5767_v54 = vadd.f32 %v5766_v55, %v5511_v32  ;;  %v8861_v37 = vshrl.u32 %v12651_v36, 16  ;;  %19205 = vst [vmem:[#allocation36_spill] sm:$0xff] %v17583_v51  ;;  %14287 = vmatmul.mubr.msk.bf16.gmra.mxu1 %vm352_vm1, %v12770_v14  ;;  %v8864_v10 = vshll.u32 %v12651_v36, 16  ;;  %v8870_v2 = vshll.u32 %v12652_v49, 16  ;;  %v12656_v32 = vld [vmem:[%s14758_s24 + $0xb0] sm:$0x1] }
 0x292   : > { %13515 = vst [vmem:[%s16154_s13 + $0xc8] sm:$0xff] %v13299_v12   ;;  %v8874_v9 = vshrl.u32 %v12652_v49, 16  ;;  %v8880_v17 = vshll.u32 %v12653_v16, 16  ;;  %13514 = vst [vmem:[%s16154_s13 + $0xc0] sm:$0xff] %v13294_v33   ;;  %v5837_v47 = vadd.f32 %v5836_v23, %v5806_v3  ;;  %v17593_v26 = vadd.f32 %v19207_v56, %v19206_v19  ;;  %v12726_v16 = vld [vmem:[%s14758_s24 + $0x84] sm:$0xe]  ;;  %v17599_v3 = vpop.f32.mrf.mxu1  ;;  %v17604_v51 = vpop.f32.mrf.mxu0 }
 0x293   : > { %v17589_v18 = vadd.f32 %v5767_v54, %v5512_v28  ;;  %v8863_v55 = vrot.slane %v8861_v37, 4  ;;  %19208 = vst [vmem:[#allocation21_spill] sm:$0xff] %v17596_v61  ;;  %v8866_v36 = vrot.slane %v8864_v10, 5  ;;  %v8872_v14 = vrot.slane %v8870_v2, 5  ;;  %19209 = vst [vmem:[#allocation31_spill] sm:$0xff] %v17599_v3 }
 0x294   : > { %v8876_v12 = vrot.slane %v8874_v9, 4  ;;  %v8882_v49 = vrot.slane %v8880_v17, 5  ;;  %v5838_v33 = vadd.f32 %v5837_v47, %v5807_v48  ;;  %v8885_v28 = vshrl.u32 %v12654_v8, 16  ;;  %v12728_v61 = vld [vmem:[%s14758_s24 + $0x8c] sm:$0x1]  ;;  %19210 = vst [vmem:[#allocation37_spill] sm:$0xff] %v17604_v51 }
 0x295   : > { %v8888_v54 = vshll.u32 %v12654_v8, 16  ;;  %v8894_v23 = vshll.u32 %v12655_v6, 16  ;;  %v8867_v37 = vor.u32 %v8866_v36, %v8863_v55  ;;  %v8898_v56 = vshrl.u32 %v12655_v6, 16 }
 0x296   : > { %v8877_v19 = vor.u32 %v8876_v12, %v8872_v14  ;;  %v8904_v40 = vshll.u32 %v12656_v32, 16  ;;  %v8887_v10 = vrot.slane %v8885_v28, 4  ;;  %v12754_v17 = vrot.slane %v12726_v16, 9  ;;  %v12730_v32 = vld [vmem:[%s14758_s24 + $0x94] sm:$0xf]  ;;  %v17612_v28 = vpop.f32.mrf.mxu1 }
 0x297   : > { %v8890_v2 = vrot.slane %v8888_v54, 5  ;;  %v8896_v9 = vrot.slane %v8894_v23, 5  ;;  %v8868_v48 = vrot.slane %v8867_v37, 4  ;;  %v8900_v47 = vrot.slane %v8898_v56, 4  ;;  %v12731_v12 = vld [vmem:[%s14758_s24 + $0x98] sm:$0x1] }
 0x298   : > { %v8878_v8 = vrot.slane %v8877_v19, 4  ;;  %v8906_v4 = vrot.slane %v8904_v40, 5  ;;  %v9418_v55 = vrot.slane %v12727_v21, 5  ;;  %v9421_v36 = vrot.slane %v12728_v61, 5 }
 0x299   : > { %v8891_v3 = vor.u32 %v8890_v2, %v8887_v10  ;;  %v17608_v6 = vadd.f32 %v17051_v59, %v17504_v57  ;;  %v8873_v16 = vsel %vm14796_vm4, %v8868_v48, %v8872_v14  ;;  %v8901_v23 = vor.u32 %v8900_v47, %v8896_v9  ;;  %v17620_v59 = vpop.f32.mrf.mxu0  ;;  %v17622_v57 = vpop.f32.mrf.mxu1 }
 0x29a   : > { %v8883_v54 = vsel %vm14796_vm4, %v8878_v8, %v8882_v49  ;;  %v12755_v37 = vrot.slane %v12729_v43, 9  ;;  %v9419_v21 = vsel %vm15159_vm7, %v12754_v17, %v9418_v55  ;;  %v9420_v61 = vrot.slane %v9418_v55, 4  ;;  %19211 = vst [vmem:[#allocation26_spill] sm:$0xff] %v17620_v59  ;;  %v19213_v17 = vld [vmem:[#allocation51_spill] sm:$0xff]  ;;  %v19214_v8 = vld [vmem:[#allocation52_spill] sm:$0xff] }
 0x29b   : > { %v12676_v40 = vcombine.low %v8873_v16, %v8883_v54  ;;  %v8892_v19 = vrot.slane %v8891_v3, 4  ;;  %v8902_v56 = vrot.slane %v8901_v23, 4  ;;  %v5811_v10 = vmul.f32 %v17608_v6, %v17608_v6  ;;  %v19212_v3 = vld [vmem:[#allocation44_spill] sm:$0xff]  ;;  %v17637_v55 = vpop.f32.mrf.mxu0  ;;  %v17643_v54 = vpop.f32.mrf.mxu1 }
 0x29c   : > { %v9425_v14 = vrot.slane %v12730_v32, 5  ;;  %v9428_v2 = vrot.slane %v12731_v12, 5  ;;  %v9422_v49 = vsel %vm15159_vm7, %v9420_v61, %v9421_v36  ;;  %v17633_v48 = vadd.f32 %v19213_v17, %v19212_v3  ;;  %19215 = vst [vmem:[#allocation27_spill] sm:$0xff] %v17637_v55  ;;  %v19217_v61 = vld [vmem:[#allocation47_spill] sm:$0xff] }
 0x29d   : > { %14260 = vmatprep.mubr.msk.bf16.mxu0 %vm352_vm1, %v12676_v40  ;;  %v8897_v43 = vsel %vm14796_vm4, %v8892_v19, %v8896_v9  ;;  %v5514_v47 = vadd.f32 %v19214_v8, %v17535_v13  ;;  %v8907_v32 = vsel %vm14796_vm4, %v8902_v56, %v8906_v4  ;;  %v12771_v12 = vcombine.low %v9419_v21, %v9422_v49  ;;  %v12657_v19 = vld [vmem:[%s14758_s24 + $0xb4] sm:$0xf]  ;;  %v19216_v21 = vld [vmem:[#allocation45_spill] sm:$0xff]  ;;  %v19218_v56 = vld [vmem:[#allocation48_spill] sm:$0xff] }
 0x29e   : > { %v9426_v9 = vsel %vm15159_vm7, %v12755_v37, %v9425_v14  ;;  %v9427_v16 = vrot.slane %v9425_v14, 4  ;;  %v12677_v36 = vcombine.low %v8897_v43, %v8907_v32  ;;  %v5769_v23 = vadd.f32 %v17589_v18, %v17557_v52  ;;  %v19219_v43 = vld [vmem:[#allocation46_spill] sm:$0xff]  ;;  %v12659_v17 = vld [vmem:[%s14758_s24 + $0xbc] sm:$0x1] }
 0x29f   : > { %v5809_v40 = vmul.f32 %v5514_v47, %v5514_v47  ;;  %v5839_v13 = vadd.f32 %v5838_v33, %v17578_v27  ;;  %14290 = vmatprep.mubr.msk.bf16.mxu1 %vm352_vm1, %v12771_v12  ;;  %v17654_v37 = vadd.f32 %v19217_v61, %v19216_v21  ;;  %v17658_v14 = vadd.f32 %v19218_v56, %v17553_v39  ;;  %v12658_v18 = vld [vmem:[%s14758_s24 + $0xb8] sm:$0xf]  ;;  %v17665_v27 = vpop.f32.mrf.mxu0  ;;  %v17677_v12 = vpop.f32.mrf.mxu1  ;;  %v12661_v21 = vld [vmem:[%s14758_s24 + $0xc4] sm:$0xf] }
 0x2a0   : > { %v9429_v4 = vsel %vm15159_vm7, %v9427_v16, %v9428_v2  ;;  %v17662_v52 = vadd.f32 %v17082_v35, %v19219_v43  ;;  %19220 = vst [vmem:[#allocation25_spill] sm:$0xff] %v17665_v27  ;;  %14261 = vmatmul.mubr.msk.bf16.gmra.mxu0 %vm352_vm1, %v12677_v36  ;;  %v5770_v2 = vadd.f32 %v5769_v23, %v5514_v47  ;;  %v8909_v8 = vshrl.u32 %v12657_v19, 16  ;;  %v12660_v36 = vld [vmem:[%s14758_s24 + $0xc0] sm:$0xf] }
 0x2a1   : > { %v12772_v33 = vcombine.low %v9426_v9, %v9429_v4  ;;  %v5840_v49 = vadd.f32 %v5839_v13, %v5809_v40  ;;  %v5515_v3 = vadd.f32 %v17092_v29, %v17569_v53  ;;  %v13309_v39 = vpack.c.bf16 %v17658_v14, %v17608_v6  ;;  %19221 = vst [vmem:[#allocation34_spill] sm:$0xff] %v17677_v12  ;;  %v17683_v61 = vpop.f32.mrf.mxu0 }
 0x2a2   : > { %v17675_v35 = vmul.f32 %v17658_v14, %v17658_v14  ;;  %v8912_v32 = vshll.u32 %v12657_v19, 16  ;;  %v8918_v53 = vshll.u32 %v12658_v18, 16  ;;  %v8911_v23 = vrot.slane %v8909_v8, 4  ;;  %19222 = vst [vmem:[#allocation30_spill] sm:$0xff] %v17683_v61  ;;  %v17695_v8 = vpop.f32.mrf.mxu1 }
 0x2a3   : > { %14291 = vmatmul.mubr.msk.bf16.gmra.mxu1 %vm352_vm1, %v12772_v33  ;;  %v13304_v9 = vpack.c.bf16 %v5515_v3, %v5514_v47  ;;  %v5771_v16 = vadd.f32 %v5770_v2, %v5515_v3  ;;  %v5810_v29 = vmul.f32 %v5515_v3, %v5515_v3  ;;  %13517 = vst [vmem:[%s16154_s13 + $0xd8] sm:$0xff] %v13309_v39   ;;  %v8922_v13 = vshrl.u32 %v12658_v18, 16  ;;  %v12662_v33 = vld [vmem:[%s14758_s24 + $0xc8] sm:$0x1]  ;;  %v12732_v39 = vld [vmem:[%s14758_s24 + $0x9c] sm:$0xe]  ;;  %v17699_v27 = vpop.f32.mrf.mxu0 }
 0x2a4   : > { %v8914_v40 = vrot.slane %v8912_v32, 5  ;;  %v8928_v4 = vshll.u32 %v12659_v17, 16  ;;  %v8920_v56 = vrot.slane %v8918_v53, 5  ;;  %v17691_v43 = vadd.f32 %v17096_v22, %v17086_v30  ;;  %19223 = vst [vmem:[#allocation32_spill] sm:$0xff] %v17695_v8  ;;  %v12734_v22 = vld [vmem:[%s14758_s24 + $0xa4] sm:$0x1] }
 0x2a5   : > { %13516 = vst [vmem:[%s16154_s13 + $0xd0] sm:$0xff] %v13304_v9   ;;  %v17687_v19 = vadd.f32 %v5771_v16, %v17608_v6  ;;  %v5841_v47 = vadd.f32 %v5840_v49, %v5810_v29  ;;  %v8924_v3 = vrot.slane %v8922_v13, 4  ;;  %v8933_v17 = vshrl.u32 %v12660_v36, 16  ;;  %v12733_v49 = vld [vmem:[%s14758_s24 + $0xa0] sm:$0xf]  ;;  %19224 = vst [vmem:[#allocation29_spill] sm:$0xff] %v17699_v27 }
 0x2a6   : > { %v8915_v2 = vor.u32 %v8914_v40, %v8911_v23  ;;  %v8930_v18 = vrot.slane %v8928_v4, 5  ;;  %v8936_v9 = vshll.u32 %v12660_v36, 16  ;;  %v8942_v6 = vshll.u32 %v12661_v21, 16  ;;  %v17701_v23 = vpop.f32.mrf.mxu1 }
 0x2a7   : > { %v5842_v32 = vadd.f32 %v5841_v47, %v5811_v10  ;;  %v8946_v16 = vshrl.u32 %v12661_v21, 16  ;;  %v8925_v53 = vor.u32 %v8924_v3, %v8920_v56  ;;  %v8935_v61 = vrot.slane %v8933_v17, 4  ;;  %19225 = vst [vmem:[#allocation28_spill] sm:$0xff] %v17701_v23  ;;  %v12735_v47 = vld [vmem:[%s14758_s24 + $0xa8] sm:$0xe]  ;;  %v17706_v17 = vpop.f32.mrf.mxu0 }
 0x2a8   : > { %v8916_v29 = vrot.slane %v8915_v2, 4  ;;  %v8952_v30 = vshll.u32 %v12662_v33, 16  ;;  %v8938_v40 = vrot.slane %v8936_v9, 5  ;;  %v8944_v13 = vrot.slane %v8942_v6, 5  ;;  %19226 = vst [vmem:[#allocation38_spill] sm:$0xff] %v17706_v17  ;;  %v17708_v33 = vpop.f32.mrf.mxu1 }
 0x2a9   : > { %v8948_v4 = vrot.slane %v8946_v16, 4  ;;  %v12756_v10 = vrot.slane %v12732_v39, 9  ;;  %v8926_v21 = vrot.slane %v8925_v53, 4  ;;  %v9432_v3 = vrot.slane %v12733_v49, 5  ;;  %19227 = vst [vmem:[#allocation41_spill] sm:$0xff] %v17708_v33  ;;  %v17720_v53 = vpop.f32.mrf.mxu0 }
 0x2aa   : > { %v8921_v36 = vsel %vm14796_vm4, %v8916_v29, %v8920_v56  ;;  %v8954_v2 = vrot.slane %v8952_v30, 5  ;;  %v8939_v27 = vor.u32 %v8938_v40, %v8935_v61  ;;  %v9435_v23 = vrot.slane %v12734_v22, 5  ;;  %v12736_v6 = vld [vmem:[%s14758_s24 + $0xac] sm:$0xf]  ;;  %v12737_v39 = vld [vmem:[%s14758_s24 + $0xb0] sm:$0x1]  ;;  %v17722_v30 = vpop.f32.mrf.mxu1 }
 0x2ab   : > { %v8949_v55 = vor.u32 %v8948_v4, %v8944_v13  ;;  %v17712_v9 = vadd.f32 %v17110_v34, %v17593_v26  ;;  %v8931_v16 = vsel %vm14796_vm4, %v8926_v21, %v8930_v18  ;;  %v9433_v56 = vsel %vm15159_vm7, %v12756_v10, %v9432_v3  ;;  %19228 = vst [vmem:[#allocation39_spill] sm:$0xff] %v17720_v53 }
 0x2ac   : > { %v9434_v49 = vrot.slane %v9432_v3, 4  ;;  %v12757_v29 = vrot.slane %v12735_v47, 9  ;;  %19229 = vst [vmem:[#allocation43_spill] sm:$0xff] %v17722_v30  ;;  %v12678_v61 = vcombine.low %v8921_v36, %v8931_v16  ;;  %v8940_v22 = vrot.slane %v8939_v27, 4  ;;  %v17734_v47 = vpop.f32.mrf.mxu0  ;;  %v17736_v21 = vpop.f32.mrf.mxu1 }
 0x2ad   : > { %v8950_v40 = vrot.slane %v8949_v55, 4  ;;  %v17726_v34 = vmul.f32 %v17712_v9, %v17712_v9  ;;  %v9439_v18 = vrot.slane %v12736_v6, 5  ;;  %v9442_v4 = vrot.slane %v12737_v39, 5  ;;  %19230 = vst [vmem:[#allocation42_spill] sm:$0xff] %v17736_v21 }
 0x2ae   : > { %v9436_v26 = vsel %vm15159_vm7, %v9434_v49, %v9435_v23  ;;  %v17732_v10 = vadd.f32 %v17132_v50, %v17107_v25  ;;  %14264 = vmatprep.mubr.msk.bf16.mxu0 %vm352_vm1, %v12678_v61  ;;  %v8945_v55 = vsel %vm14796_vm4, %v8940_v22, %v8944_v13  ;;  %v5518_v36 = vadd.f32 %v17137_v5, %v17633_v48  ;;  %v17749_v39 = vpop.f32.mrf.mxu0  ;;  %v17751_v13 = vpop.f32.mrf.mxu1  ;;  %v19232_v5 = vld [vmem:[#allocation59_spill] sm:$0xff]  ;;  %v19234_v61 = vld [vmem:[#allocation49_spill] sm:$0xff] }
 0x2af   : > { %v8955_v27 = vsel %vm14796_vm4, %v8950_v40, %v8954_v2  ;;  %v12773_v23 = vcombine.low %v9433_v56, %v9436_v26  ;;  %v9440_v25 = vsel %vm15159_vm7, %v12757_v29, %v9439_v18  ;;  %v9441_v50 = vrot.slane %v9439_v18, 4  ;;  %19231 = vst [vmem:[#allocation40_spill] sm:$0xff] %v17751_v13  ;;  %v19233_v56 = vld [vmem:[#allocation56_spill] sm:$0xff]  ;;  %v12793_v29 = vld [vmem:[%s14758_s24 + $0x18] sm:$0xf]  ;;  %v19235_v22 = vld [vmem:[#allocation53_spill] sm:$0xff] }
 0x2b0   : > { %v12679_v3 = vcombine.low %v8945_v55, %v8955_v27  ;;  %v5773_v6 = vadd.f32 %v17687_v19, %v17658_v14  ;;  %v5813_v2 = vmul.f32 %v5518_v36, %v5518_v36  ;;  %v5843_v16 = vadd.f32 %v5842_v32, %v17675_v35  ;;  %v12794_v32 = vld [vmem:[%s14758_s24 + $0x1c] sm:$0xf]  ;;  %v12795_v40 = vld [vmem:[%s14758_s24 + $0x20] sm:$0x1]  ;;  %v17777_v26 = vpop.f32.mrf.mxu1 }
 0x2b1   : > { %14294 = vmatprep.mubr.msk.bf16.mxu1 %vm352_vm1, %v12773_v23  ;;  %v17757_v48 = vadd.f32 %v19232_v5, %v17118_v45  ;;  %v17761_v49 = vadd.f32 %v19233_v56, %v17654_v37  ;;  %v9443_v14 = vsel %vm15159_vm7, %v9441_v50, %v9442_v4  ;;  %v17769_v35 = vadd.f32 %v19235_v22, %v19234_v61  ;;  %v17775_v37 = vpop.f32.mrf.mxu0  ;;  %v12738_v23 = vld [vmem:[%s14758_s24 + $0xb4] sm:$0xe]  ;;  %v12796_v5 = vld [vmem:[%s14758_s24 + $0x24] sm:$0xf]  ;;  %v12740_v22 = vld [vmem:[%s14758_s24 + $0xbc] sm:$0x1] }
 0x2b2   : > { %14265 = vmatmul.mubr.msk.bf16.gmra.mxu0 %vm352_vm1, %v12679_v3  ;;  %v5774_v19 = vadd.f32 %v5773_v6, %v5518_v36  ;;  %v5519_v45 = vadd.f32 %v17171_v46, %v17662_v52  ;;  %19236 = vst [vmem:[#allocation50_spill] sm:$0xff] %v17777_v26  ;;  %v12774_v18 = vcombine.low %v9440_v25, %v9443_v14  ;;  %v9865_v50 = vshrl.u32 %v12793_v29, 16  ;;  %v12739_v6 = vld [vmem:[%s14758_s24 + $0xb8] sm:$0xf]  ;;  %v17790_v25 = vpop.f32.mrf.mxu1  ;;  %v12797_v26 = vld [vmem:[%s14758_s24 + $0x28] sm:$0xf] }
 0x2b3   : > { %v5844_v55 = vadd.f32 %v5843_v16, %v5813_v2  ;;  %v13319_v4 = vpack.c.bf16 %v17761_v49, %v17712_v9  ;;  %v17783_v27 = vmul.f32 %v17761_v49, %v17761_v49  ;;  %v17788_v56 = vpop.f32.mrf.mxu0  ;;  %19237 = vst [vmem:[#allocation44_spill] sm:$0xff] %v17790_v25  ;;  %v9868_v2 = vshll.u32 %v12793_v29, 16 }
 0x2b4   : > { %v13314_v46 = vpack.c.bf16 %v5519_v45, %v5518_v36  ;;  %v5775_v52 = vadd.f32 %v5774_v19, %v5519_v45  ;;  %v5814_v3 = vmul.f32 %v5519_v45, %v5519_v45  ;;  %14295 = vmatmul.mubr.msk.bf16.gmra.mxu1 %vm352_vm1, %v12774_v18  ;;  %v9874_v16 = vshll.u32 %v12794_v32, 16  ;;  %v17800_v13 = vpop.f32.mrf.mxu1 }
 0x2b5   : > { %13519 = vst [vmem:[%s16154_s13 + $0xe8] sm:$0xff] %v13319_v4   ;;  %v9878_v14 = vshrl.u32 %v12794_v32, 16  ;;  %v9884_v61 = vshll.u32 %v12795_v40, 16  ;;  %v9867_v45 = vrot.slane %v9865_v50, 4  ;;  %v12758_v53 = vrot.slane %v12738_v23, 9  ;;  %v17798_v17 = vpop.f32.mrf.mxu0 }
 0x2b6   : > { %13518 = vst [vmem:[%s16154_s13 + $0xe0] sm:$0xff] %v13314_v46   ;;  %v5776_v36 = vadd.f32 %v5775_v52, %v17712_v9  ;;  %v5845_v19 = vadd.f32 %v5844_v55, %v5814_v3  ;;  %v9870_v25 = vrot.slane %v9868_v2, 5  ;;  %v9876_v18 = vrot.slane %v9874_v16, 5  ;;  %v17805_v9 = vpop.f32.mrf.mxu1  ;;  %v12798_v52 = vld [vmem:[%s14758_s24 + $0x2c] sm:$0x1] }
 0x2b7   : > { %v9880_v4 = vrot.slane %v9878_v14, 4  ;;  %v9886_v29 = vrot.slane %v9884_v61, 5  ;;  %v9446_v40 = vrot.slane %v12739_v6, 5  ;;  %v9449_v21 = vrot.slane %v12740_v22, 5  ;;  %v17803_v30 = vpop.f32.mrf.mxu0 }
 0x2b8   : > { %v5846_v32 = vadd.f32 %v5845_v19, %v17726_v34  ;;  %v9889_v46 = vshrl.u32 %v12796_v5, 16  ;;  %v9871_v55 = vor.u32 %v9870_v25, %v9867_v45  ;;  %v9892_v3 = vshll.u32 %v12796_v5, 16  ;;  %v17812_v61 = vpop.f32.mrf.mxu1  ;;  %v12742_v45 = vld [vmem:[%s14758_s24 + $0xc4] sm:$0xf] }
 0x2b9   : > { %v9881_v23 = vor.u32 %v9880_v4, %v9876_v18  ;;  %v9898_v50 = vshll.u32 %v12797_v26, 16  ;;  %v9447_v2 = vsel %vm15159_vm7, %v12758_v53, %v9446_v40  ;;  %v9448_v16 = vrot.slane %v9446_v40, 4  ;;  %v17810_v14 = vpop.f32.mrf.mxu0  ;;  %v19239_v53 = vld [vmem:[#allocation54_spill] sm:$0xff]  ;;  %v12741_v40 = vld [vmem:[%s14758_s24 + $0xc0] sm:$0xe] }
 0x2ba   : > { %v9891_v34 = vrot.slane %v9889_v46, 4  ;;  %v9902_v6 = vshrl.u32 %v12797_v26, 16  ;;  %19238 = vst [vmem:[#allocation51_spill] sm:$0xff] %v17810_v14  ;;  %v9872_v22 = vrot.slane %v9871_v55, 4  ;;  %v9894_v33 = vrot.slane %v9892_v3, 5  ;;  %v17823_v51 = vpop.f32.mrf.mxu1 }
 0x2bb   : > { %v9882_v19 = vrot.slane %v9881_v23, 4  ;;  %v9900_v25 = vrot.slane %v9898_v50, 5  ;;  %v9450_v5 = vsel %vm15159_vm7, %v9448_v16, %v9449_v21  ;;  %v9908_v59 = vshll.u32 %v12798_v52, 16  ;;  %v12743_v46 = vld [vmem:[%s14758_s24 + $0xc8] sm:$0x1]  ;;  %v17821_v26 = vpop.f32.mrf.mxu0 }
 0x2bc   : > { %v9904_v4 = vrot.slane %v9902_v6, 4  ;;  %v5524_v8 = vadd.f32 %v19239_v53, %v17691_v43  ;;  %19240 = vst [vmem:[#allocation52_spill] sm:$0xff] %v17821_v26  ;;  %v9877_v55 = vsel %vm14796_vm4, %v9872_v22, %v9876_v18  ;;  %v12775_v3 = vcombine.low %v9447_v2, %v9450_v5 }
 0x2bd   : > { %v9887_v23 = vsel %vm14796_vm4, %v9882_v19, %v9886_v29  ;;  %v9895_v50 = vor.u32 %v9894_v33, %v9891_v34  ;;  %v9910_v52 = vrot.slane %v9908_v59, 5  ;;  %v17831_v43 = vpop.f32.mrf.mxu0  ;;  %v12759_v26 = vrot.slane %v12741_v40, 9  ;;  %v19241_v29 = vld [vmem:[#allocation55_spill] sm:$0xff]  ;;  %v19243_v40 = vld [vmem:[#allocation13_spill] sm:$0xff] }
 0x2be   : > { %v12842_v21 = vcombine.low %v9877_v55, %v9887_v23  ;;  %v9905_v16 = vor.u32 %v9904_v4, %v9900_v25  ;;  %v17829_v6 = vmul.f32 %v5524_v8, %v5524_v8  ;;  %v17833_v53 = vpop.f32.mrf.mxu1  ;;  %14298 = vmatprep.mubr.msk.bf16.mxu1 %vm352_vm1, %v12775_v3  ;;  %v9453_v14 = vrot.slane %v12742_v45, 5  ;;  %v12800_v55 = vld [vmem:[%s14758_s24 + $0x34] sm:$0xf]  ;;  %v12801_v3 = vld [vmem:[%s14758_s24 + $0x38] sm:$0x1] }
 0x2bf   : > { %v9896_v12 = vrot.slane %v9895_v50, 4  ;;  %v9456_v18 = vrot.slane %v12743_v46, 5  ;;  %v5522_v59 = vadd.f32 %v19241_v29, %v17732_v10  ;;  %v5777_v2 = vadd.f32 %v5776_v36, %v17761_v49  ;;  %v17841_v22 = vpop.f32.mrf.mxu0  ;;  %v12799_v46 = vld [vmem:[%s14758_s24 + $0x30] sm:$0xf]  ;;  %v12802_v50 = vld [vmem:[%s14758_s24 + $0x3c] sm:$0xf] }
 0x2c0   : > { %14304 = vmatprep.mubr.msk.bf16.mxu0 %vm352_vm1, %v12842_v21  ;;  %v9906_v33 = vrot.slane %v9905_v16, 4  ;;  %v5847_v34 = vadd.f32 %v5846_v32, %v17783_v27  ;;  %19242 = vst [vmem:[#allocation45_spill] sm:$0xff] %v17841_v22  ;;  %v17843_v19 = vpop.f32.mrf.mxu1  ;;  %v9454_v5 = vsel %vm15159_vm7, %v12759_v26, %v9453_v14  ;;  %v9455_v4 = vrot.slane %v9453_v14, 4 }
 0x2c1   : > { %v9901_v45 = vsel %vm14796_vm4, %v9896_v12, %v9900_v25  ;;  %v5525_v10 = vadd.f32 %v19243_v40, %v17757_v48  ;;  %v5778_v27 = vadd.f32 %v5777_v2, %v5522_v59  ;;  %v5817_v36 = vmul.f32 %v5522_v59, %v5522_v59  ;;  %v17857_v12 = vpop.f32.mrf.mxu0 }
 0x2c2   : > { %v9911_v49 = vsel %vm14796_vm4, %v9906_v33, %v9910_v52  ;;  %v5523_v32 = vadd.f32 %v17254_v62, %v17769_v35  ;;  %19244 = vst [vmem:[#allocation47_spill] sm:$0xff] %v17857_v12  ;;  %v17859_v25 = vpop.f32.mrf.mxu1  ;;  %v9457_v14 = vsel %vm15159_vm7, %v9455_v4, %v9456_v18  ;;  %v9913_v18 = vshrl.u32 %v12799_v46, 16 }
 0x2c3   : > { %v12843_v26 = vcombine.low %v9901_v45, %v9911_v49  ;;  %v13329_v48 = vpack.c.bf16 %v5525_v10, %v5524_v8  ;;  %v5820_v23 = vmul.f32 %v5525_v10, %v5525_v10  ;;  %v12776_v21 = vcombine.low %v9454_v5, %v9457_v14  ;;  %v17865_v52 = vpop.f32.mrf.mxu0 }
 0x2c4   : > { %v5848_v16 = vadd.f32 %v5847_v34, %v5817_v36  ;;  %v13324_v62 = vpack.c.bf16 %v5523_v32, %v5522_v59  ;;  %v5779_v35 = vadd.f32 %v5778_v27, %v5523_v32  ;;  %19245 = vst [vmem:[#allocation48_spill] sm:$0xff] %v17865_v52  ;;  %v17867_v33 = vpop.f32.mrf.mxu1  ;;  %v5818_v29 = vmul.f32 %v5523_v32, %v5523_v32  ;;  %v12803_v59 = vld [vmem:[%s14758_s24 + $0x40] sm:$0xf]  ;;  %v12804_v32 = vld [vmem:[%s14758_s24 + $0x44] sm:$0x1] }
 0x2c5   : > { %14305 = vmatmul.mubr.msk.bf16.vlgmr.msra.gmra.mxu0 %vm352_vm1, %v12843_v26  ;;  %13521 = vst [vmem:[%s16154_s13 + $0xf8] sm:$0xff] %v13329_v48   ;;  %v9916_v2 = vshll.u32 %v12799_v46, 16  ;;  %v9922_v45 = vshll.u32 %v12800_v55, 16  ;;  %14299 = vmatmul.mubr.msk.bf16.gmra.mxu1 %vm352_vm1, %v12776_v21  ;;  %v9926_v34 = vshrl.u32 %v12800_v55, 16  ;;  %v9932_v4 = vshll.u32 %v12801_v3, 16  ;;  %v17874_v49 = vpop.f32.mrf.mxu0 }
 0x2c6   : > { %13520 = vst [vmem:[%s16154_s13 + $0xf0] sm:$0xff] %v13324_v62   ;;  %v5780_v5 = vadd.f32 %v5779_v35, %v5524_v8  ;;  %v9937_v40 = vshrl.u32 %v12802_v50, 16  ;;  %19246 = vst [vmem:[#allocation46_spill] sm:$0xff] %v17874_v49  ;;  %v5849_v27 = vadd.f32 %v5848_v16, %v5818_v29  ;;  %v9915_v36 = vrot.slane %v9913_v18, 4 }
 0x2c7   : > { %v9918_v14 = vrot.slane %v9916_v2, 5  ;;  %v9924_v26 = vrot.slane %v9922_v45, 5  ;;  %v9928_v52 = vrot.slane %v9926_v34, 4  ;;  %v9934_v46 = vrot.slane %v9932_v4, 5  ;;  %v17877_v12 = vpop.f32.mrf.mxu1  ;;  %v17879_v21 = vpop.f32.mrf.mxu0  ;;  %v12874_v2 = vld [vmem:[%s14758_s24 + $0x18] sm:$0xe] }
 0x2c8   : > { %v5781_v48 = vadd.f32 %v5780_v5, %v5525_v10  ;;  %v9939_v22 = vrot.slane %v9937_v40, 4  ;;  %19247 = vst [vmem:[#allocation59_spill] sm:$0xff] %v17879_v21  ;;  %v5850_v8 = vadd.f32 %v5849_v27, %v17829_v6  ;;  %v9940_v3 = vshll.u32 %v12802_v50, 16  ;;  %v12875_v21 = vld [vmem:[%s14758_s24 + $0x1c] sm:$0xf] }
 0x2c9   : > { %v9919_v55 = vor.u32 %v9918_v14, %v9915_v36  ;;  %v9946_v62 = vshll.u32 %v12803_v59, 16  ;;  %v9929_v35 = vor.u32 %v9928_v52, %v9924_v26  ;;  %v9950_v29 = vshrl.u32 %v12803_v59, 16  ;;  %v17883_v10 = vpop.f32.mrf.mxu1  ;;  %v17885_v45 = vpop.f32.mrf.mxu0  ;;  %v12876_v14 = vld [vmem:[%s14758_s24 + $0x20] sm:$0x1] }
 0x2ca   : > { %v5782_v16 = vrot.slane %v5781_v48, 4  ;;  %v9956_v18 = vshll.u32 %v12804_v32, 16  ;;  %19248 = vst [vmem:[#allocation56_spill] sm:$0xff] %v17883_v10  ;;  %19249 = vst [vmem:[#allocation49_spill] sm:$0xff] %v17885_v45  ;;  %v5851_v5 = vadd.f32 %v5850_v8, %v5820_v23  ;;  %v9942_v4 = vrot.slane %v9940_v3, 5 }
 0x2cb   : > { %v9920_v34 = vrot.slane %v9919_v55, 4  ;;  %v9948_v40 = vrot.slane %v9946_v62, 5  ;;  %v9930_v27 = vrot.slane %v9929_v35, 4  ;;  %v9952_v50 = vrot.slane %v9950_v29, 4  ;;  %v17889_v49 = vpop.f32.mrf.mxu1  ;;  %v17891_v52 = vpop.f32.mrf.mxu0 }
 0x2cc   : > { %v5783_v6 = vadd.f32 %v5782_v16, %v5781_v48  ;;  %v9958_v36 = vrot.slane %v9956_v18, 5  ;;  %19250 = vst [vmem:[#allocation53_spill] sm:$0xff] %v17889_v49  ;;  %19251 = vst [vmem:[#allocation54_spill] sm:$0xff] %v17891_v52  ;;  %v5852_v59 = vrot.slane %v5851_v5, 4  ;;  %v9943_v23 = vor.u32 %v9942_v4, %v9939_v22  ;;  %v12877_v16 = vld [vmem:[%s14758_s24 + $0x24] sm:$0xe] }
 0x2cd   : > { %v9925_v32 = vsel %vm14796_vm4, %v9920_v34, %v9924_v26  ;;  %v12922_v8 = vrot.slane %v12874_v2, 9  ;;  %v9935_v48 = vsel %vm14796_vm4, %v9930_v27, %v9934_v46  ;;  %v9953_v3 = vor.u32 %v9952_v50, %v9948_v40  ;;  %v17898_v35 = vpop.f32.mrf.mxu1  ;;  %v17900_v29 = vpop.f32.mrf.mxu0  ;;  %v12878_v49 = vld [vmem:[%s14758_s24 + $0x28] sm:$0xf]  ;;  %v12879_v46 = vld [vmem:[%s14758_s24 + $0x2c] sm:$0x1] }
 0x2ce   : > { %v5784_v55 = vrot.slane %v5783_v6, 2  ;;  %v10704_v62 = vrot.slane %v12875_v21, 5  ;;  %19252 = vst [vmem:[#allocation55_spill] sm:$0xff] %v17900_v29  ;;  %v5853_v18 = vadd.f32 %v5852_v59, %v5851_v5  ;;  %v12844_v52 = vcombine.low %v9925_v32, %v9935_v48  ;;  %v19254_v21 = vld [vmem:[#allocation70_spill] sm:$0xff] }
 0x2cf   : > { %v9944_v45 = vrot.slane %v9943_v23, 4  ;;  %v10707_v10 = vrot.slane %v12876_v14, 5  ;;  %v9954_v22 = vrot.slane %v9953_v3, 4  ;;  %v17906_v4 = vpop.f32.mrf.mxu0  ;;  %v2904_v27 = vrot.slane %v19254_v21, 1 }
 0x2d0   : > { %v5785_v26 = vadd.f32 %v5784_v55, %v5783_v6  ;;  %v10705_v2 = vsel %vm15159_vm7, %v12922_v8, %v10704_v62  ;;  %v10706_v34 = vrot.slane %v10704_v62, 4  ;;  %19253 = vst [vmem:[#allocation13_spill] sm:$0xff] %v17906_v4  ;;  %v5854_v50 = vrot.slane %v5853_v18, 2  ;;  %14308 = vmatprep.mubr.msk.bf16.mxu0 %vm352_vm1, %v12844_v52  ;;  %v12805_v55 = vld [vmem:[%s14758_s24 + $0x48] sm:$0xf]  ;;  %v19258_v4 = vld [vmem:[#allocation63_spill] sm:$0xff] }
 0x2d1   : > { %v9949_v5 = vsel %vm14796_vm4, %v9944_v45, %v9948_v40  ;;  %v12923_v14 = vrot.slane %v12877_v16, 9  ;;  %v17912_v6 = vpop.f32.mrf.mxu1  ;;  %v9959_v32 = vsel %vm14796_vm4, %v9954_v22, %v9958_v36  ;;  %v10711_v8 = vrot.slane %v12878_v49, 5  ;;  %v17919_v48 = vpop.f32.mrf.mxu0  ;;  %v12806_v40 = vld [vmem:[%s14758_s24 + $0x4c] sm:$0xf] }
 0x2d2   : > { %19255 = vst [vmem:[#allocation70_spill] sm:$0xff] %v17912_v6  ;;  %v5786_v59 = vrot.slane %v5785_v26, 1  ;;  %v10708_v23 = vsel %vm15159_vm7, %v10706_v34, %v10707_v10  ;;  %19256 = vst [vmem:[#allocation75_spill] sm:$0xff] %v17919_v48  ;;  %v5855_v3 = vadd.f32 %v5854_v50, %v5853_v18  ;;  %v12845_v52 = vcombine.low %v9949_v5, %v9959_v32  ;;  %v12808_v5 = vld [vmem:[%s14758_s24 + $0x54] sm:$0xf] }
 0x2d3   : > { %v12939_v62 = vcombine.low %v10705_v2, %v10708_v23  ;;  %v10714_v45 = vrot.slane %v12879_v46, 5  ;;  %v17922_v16 = vpop.f32.mrf.mxu1  ;;  %v19259_v29 = vrot.slane %v19258_v4, 1  ;;  %v10712_v49 = vsel %vm15159_vm7, %v12923_v14, %v10711_v8  ;;  %v17929_v34 = vpop.f32.mrf.mxu0  ;;  %v12807_v2 = vld [vmem:[%s14758_s24 + $0x50] sm:$0x1] }
 0x2d4   : > { %19257 = vst [vmem:[#allocation76_spill] sm:$0xff] %v17922_v16  ;;  %v5787_v22 = vadd.f32 %v5786_v59, %v5785_v26  ;;  %v10713_v10 = vrot.slane %v10711_v8, 4  ;;  %19260 = vst [vmem:[#allocation63_spill] sm:$0xff] %v17929_v34  ;;  %v2905_v18 = vadd.f32 %v2904_v27, %v19254_v21  ;;  %v5856_v50 = vrot.slane %v5855_v3, 1  ;;  %14309 = vmatmul.mubr.msk.bf16.gmra.mxu0 %vm352_vm1, %v12845_v52  ;;  %v12809_v21 = vld [vmem:[%s14758_s24 + $0x58] sm:$0xf] }
 0x2d5   : > { %v2835_v36 = vadd.f32 %v19259_v29, %v19258_v4  ;;  %14338 = vmatprep.mubr.msk.bf16.mxu1 %vm352_vm1, %v12939_v62  ;;  %v9961_v46 = vshrl.u32 %v12805_v55, 16  ;;  %v17936_v29 = vpop.f32.mrf.mxu1  ;;  %v9964_v14 = vshll.u32 %v12805_v55, 16  ;;  %v9970_v59 = vshll.u32 %v12806_v40, 16  ;;  %v17943_v27 = vpop.f32.mrf.mxu0  ;;  %v12810_v62 = vld [vmem:[%s14758_s24 + $0x5c] sm:$0x1] }
 0x2d6   : > { %19261 = vst [vmem:[#allocation77_spill] sm:$0xff] %v17936_v29  ;;  %v10715_v4 = vsel %vm15159_vm7, %v10713_v10, %v10714_v45  ;;  %19263 = vst [vmem:[#allocation79_spill] sm:$0xff] %v17943_v27  ;;  %v5857_v32 = vadd.f32 %v5856_v50, %v5855_v3  ;;  %v9974_v52 = vshrl.u32 %v12806_v40, 16  ;;  %v12881_v29 = vld [vmem:[%s14758_s24 + $0x34] sm:$0xf]  ;;  %v9988_v10 = vshll.u32 %v12808_v5, 16 }
 0x2d7   : > { %v17938_v26 = vadd.f32 %v5787_v22, %v2835_v36  ;;  %v12940_v23 = vcombine.low %v10712_v49, %v10715_v4  ;;  %v9963_v8 = vrot.slane %v9961_v46, 4  ;;  %v17946_v34 = vpop.f32.mrf.mxu1  ;;  %v9966_v48 = vrot.slane %v9964_v14, 5  ;;  %v12880_v50 = vld [vmem:[%s14758_s24 + $0x30] sm:$0xe]  ;;  %v17953_v49 = vpop.f32.mrf.mxu0  ;;  %v12883_v16 = vld [vmem:[%s14758_s24 + $0x3c] sm:$0xe] }
 0x2d8   : > { %19264 = vst [vmem:[#allocation80_spill] sm:$0xff] %v17946_v34  ;;  %v9972_v36 = vrot.slane %v9970_v59, 5  ;;  %v9980_v22 = vshll.u32 %v12807_v2, 16  ;;  %v17949_v45 = vadd.f32 %v5857_v32, %v2905_v18  ;;  %v9976_v55 = vrot.slane %v9974_v52, 4  ;;  %19266 = vst [vmem:[#allocation82_spill] sm:$0xff] %v17953_v49 }
 0x2d9   : > { %19262 = vst [vmem:[#allocation78_spill] sm:$0xff] %v17938_v26  ;;  %v9985_v26 = vshrl.u32 %v12808_v5, 16  ;;  %14339 = vmatmul.mubr.msk.bf16.vlgmr.msra.gmra.mxu1 %vm352_vm1, %v12940_v23  ;;  %v9994_v3 = vshll.u32 %v12809_v21, 16  ;;  %v9967_v40 = vor.u32 %v9966_v48, %v9963_v8  ;;  %v9998_v14 = vshrl.u32 %v12809_v21, 16  ;;  %v12882_v59 = vld [vmem:[%s14758_s24 + $0x38] sm:$0x1] }
 0x2da   : > { %19265 = vst [vmem:[#allocation81_spill] sm:$0xff] %v17949_v45  ;;  %v9982_v46 = vrot.slane %v9980_v22, 5  ;;  %v9977_v2 = vor.u32 %v9976_v55, %v9972_v36  ;;  %v9990_v27 = vrot.slane %v9988_v10, 5  ;;  %v10004_v18 = vshll.u32 %v12810_v62, 16  ;;  %v17956_v32 = vpop.f32.mrf.mxu1  ;;  %v17962_v22 = vpop.f32.mrf.mxu0 }
 0x2db   : > { %v9987_v4 = vrot.slane %v9985_v26, 4  ;;  %v9996_v34 = vrot.slane %v9994_v3, 5  ;;  %19267 = vst [vmem:[#allocation83_spill] sm:$0xff] %v17956_v32  ;;  %v9968_v23 = vrot.slane %v9967_v40, 4  ;;  %v10000_v5 = vrot.slane %v9998_v14, 4  ;;  %19269 = vst [vmem:[#allocation85_spill] sm:$0xff] %v17962_v22 }
 0x2dc   : > { %v12924_v52 = vrot.slane %v12880_v50, 9  ;;  %v10718_v45 = vrot.slane %v12881_v29, 5  ;;  %v9978_v6 = vrot.slane %v9977_v2, 4  ;;  %v10006_v48 = vrot.slane %v10004_v18, 5  ;;  %v12884_v26 = vld [vmem:[%s14758_s24 + $0x40] sm:$0xf]  ;;  %v17960_v21 = vpop.f32.mrf.mxu1 }
 0x2dd   : > { %v9991_v49 = vor.u32 %v9990_v27, %v9987_v4  ;;  %v10721_v8 = vrot.slane %v12882_v59, 5  ;;  %19268 = vst [vmem:[#allocation84_spill] sm:$0xff] %v17960_v21  ;;  %v9973_v62 = vsel %vm14796_vm4, %v9968_v23, %v9972_v36  ;;  %v10001_v55 = vor.u32 %v10000_v5, %v9996_v34  ;;  %v12885_v3 = vld [vmem:[%s14758_s24 + $0x44] sm:$0x1]  ;;  %v12811_v18 = vld [vmem:[%s14758_s24 + $0x60] sm:$0xf] }
 0x2de   : > { %v10719_v10 = vsel %vm15159_vm7, %v12924_v52, %v10718_v45  ;;  %v10720_v29 = vrot.slane %v10718_v45, 4  ;;  %v9983_v27 = vsel %vm14796_vm4, %v9978_v6, %v9982_v46  ;;  %v12925_v40 = vrot.slane %v12883_v16, 9  ;;  %v17971_v4 = vpop.f32.mrf.mxu1  ;;  %v12812_v52 = vld [vmem:[%s14758_s24 + $0x64] sm:$0xf]  ;;  %v12813_v6 = vld [vmem:[%s14758_s24 + $0x68] sm:$0x1] }
 0x2df   : > { %v9992_v50 = vrot.slane %v9991_v49, 4  ;;  %19270 = vst [vmem:[#allocation86_spill] sm:$0xff] %v17971_v4  ;;  %v12846_v14 = vcombine.low %v9973_v62, %v9983_v27  ;;  %v10002_v59 = vrot.slane %v10001_v55, 4  ;;  %v10725_v2 = vrot.slane %v12884_v26, 5  ;;  %v17980_v49 = vpop.f32.mrf.mxu0  ;;  %v12887_v22 = vld [vmem:[%s14758_s24 + $0x4c] sm:$0xf] }
 0x2e0   : > { %v10722_v36 = vsel %vm15159_vm7, %v10720_v29, %v10721_v8  ;;  %v10728_v5 = vrot.slane %v12885_v3, 5  ;;  %19271 = vst [vmem:[#allocation87_spill] sm:$0xff] %v17980_v49  ;;  %v17982_v16 = vpop.f32.mrf.mxu1  ;;  %v10009_v55 = vshrl.u32 %v12811_v18, 16  ;;  %v12815_v29 = vld [vmem:[%s14758_s24 + $0x70] sm:$0xf]  ;;  %v10018_v27 = vshll.u32 %v12812_v52, 16 }
 0x2e1   : > { %v9997_v23 = vsel %vm14796_vm4, %v9992_v50, %v9996_v34  ;;  %v12941_v45 = vcombine.low %v10719_v10, %v10722_v36  ;;  %19272 = vst [vmem:[#allocation88_spill] sm:$0xff] %v17982_v16  ;;  %14312 = vmatprep.mubr.msk.bf16.mxu0 %vm352_vm1, %v12846_v14  ;;  %v10007_v46 = vsel %vm14796_vm4, %v10002_v59, %v10006_v48  ;;  %v10727_v26 = vrot.slane %v10725_v2, 4  ;;  %v12814_v34 = vld [vmem:[%s14758_s24 + $0x6c] sm:$0xf]  ;;  %v12816_v48 = vld [vmem:[%s14758_s24 + $0x74] sm:$0x1] }
 0x2e2   : > { %v10726_v8 = vsel %vm15159_vm7, %v12925_v40, %v10725_v2  ;;  %v12847_v62 = vcombine.low %v9997_v23, %v10007_v46  ;;  %v10012_v10 = vshll.u32 %v12811_v18, 16  ;;  %v10022_v50 = vshrl.u32 %v12812_v52, 16  ;;  %v17999_v18 = vpop.f32.mrf.mxu0  ;;  %v12889_v21 = vld [vmem:[%s14758_s24 + $0x54] sm:$0xe] }
 0x2e3   : > { %14342 = vmatprep.mubr.msk.bf16.mxu1 %vm352_vm1, %v12941_v45  ;;  %v10729_v3 = vsel %vm15159_vm7, %v10727_v26, %v10728_v5  ;;  %v10028_v14 = vshll.u32 %v12813_v6, 16  ;;  %v10011_v36 = vrot.slane %v10009_v55, 4  ;;  %v10033_v23 = vshrl.u32 %v12814_v34, 16  ;;  %v12886_v45 = vld [vmem:[%s14758_s24 + $0x48] sm:$0xe]  ;;  %19274 = vst [vmem:[#allocation90_spill] sm:$0xff] %v17999_v18 }
 0x2e4   : > { %v17995_v59 = vpop.f32.mrf.mxu1  ;;  %14313 = vmatmul.mubr.msk.bf16.gmra.mxu0 %vm352_vm1, %v12847_v62  ;;  %v12942_v40 = vcombine.low %v10726_v8, %v10729_v3  ;;  %v10014_v2 = vrot.slane %v10012_v10, 5  ;;  %v10020_v46 = vrot.slane %v10018_v27, 5  ;;  %v10024_v49 = vrot.slane %v10022_v50, 4  ;;  %v12888_v10 = vld [vmem:[%s14758_s24 + $0x50] sm:$0x1]  ;;  %v18007_v4 = vpop.f32.mrf.mxu0 }
 0x2e5   : > { %19273 = vst [vmem:[#allocation89_spill] sm:$0xff] %v17995_v59  ;;  %v10030_v5 = vrot.slane %v10028_v14, 5  ;;  %v10036_v26 = vshll.u32 %v12814_v34, 16  ;;  %v10035_v62 = vrot.slane %v10033_v23, 4  ;;  %v10042_v8 = vshll.u32 %v12815_v29, 16  ;;  %19276 = vst [vmem:[#allocation92_spill] sm:$0xff] %v18007_v4 }
 0x2e6   : > { %v18002_v52 = vpop.f32.mrf.mxu1  ;;  %14343 = vmatmul.mubr.msk.bf16.gmra.mxu1 %vm352_vm1, %v12942_v40  ;;  %v10015_v6 = vor.u32 %v10014_v2, %v10011_v36  ;;  %v10046_v55 = vshrl.u32 %v12815_v29, 16  ;;  %v10025_v3 = vor.u32 %v10024_v49, %v10020_v46  ;;  %v10052_v16 = vshll.u32 %v12816_v48, 16  ;;  %v12890_v29 = vld [vmem:[%s14758_s24 + $0x58] sm:$0xf] }
 0x2e7   : > { %19275 = vst [vmem:[#allocation91_spill] sm:$0xff] %v18002_v52  ;;  %v10038_v59 = vrot.slane %v10036_v26, 5  ;;  %v12926_v18 = vrot.slane %v12886_v45, 9  ;;  %v10044_v50 = vrot.slane %v10042_v8, 5  ;;  %v10732_v14 = vrot.slane %v12887_v22, 5 }
 0x2e8   : > { %v10016_v27 = vrot.slane %v10015_v6, 4  ;;  %v10048_v34 = vrot.slane %v10046_v55, 4  ;;  %v10026_v52 = vrot.slane %v10025_v3, 4  ;;  %v10054_v36 = vrot.slane %v10052_v16, 5  ;;  %v18010_v23 = vpop.f32.mrf.mxu1  ;;  %v12891_v26 = vld [vmem:[%s14758_s24 + $0x5c] sm:$0x1]  ;;  %v18022_v3 = vpop.f32.mrf.mxu0 }
 0x2e9   : > { %v10039_v40 = vor.u32 %v10038_v59, %v10035_v62  ;;  %v10735_v2 = vrot.slane %v12888_v10, 5  ;;  %19277 = vst [vmem:[#allocation93_spill] sm:$0xff] %v18010_v23  ;;  %v10733_v45 = vsel %vm15159_vm7, %v12926_v18, %v10732_v14  ;;  %v10734_v22 = vrot.slane %v10732_v14, 4  ;;  %v12817_v10 = vld [vmem:[%s14758_s24 + $0x78] sm:$0xf]  ;;  %19278 = vst [vmem:[#allocation94_spill] sm:$0xff] %v18022_v3 }
 0x2ea   : > { %v10021_v49 = vsel %vm14796_vm4, %v10016_v27, %v10020_v46  ;;  %v10049_v48 = vor.u32 %v10048_v34, %v10044_v50  ;;  %v10031_v59 = vsel %vm14796_vm4, %v10026_v52, %v10030_v5  ;;  %v12927_v6 = vrot.slane %v12889_v21, 9  ;;  %v12818_v14 = vld [vmem:[%s14758_s24 + $0x7c] sm:$0xf]  ;;  %v12819_v5 = vld [vmem:[%s14758_s24 + $0x80] sm:$0x1]  ;;  %v18028_v21 = vpop.f32.mrf.mxu1 }
 0x2eb   : > { %v10040_v16 = vrot.slane %v10039_v40, 4  ;;  %v12848_v62 = vcombine.low %v10021_v49, %v10031_v59  ;;  %v10736_v55 = vsel %vm15159_vm7, %v10734_v22, %v10735_v2  ;;  %v10739_v46 = vrot.slane %v12890_v29, 5  ;;  %19279 = vst [vmem:[#allocation95_spill] sm:$0xff] %v18028_v21  ;;  %v12820_v29 = vld [vmem:[%s14758_s24 + $0x84] sm:$0xf] }
 0x2ec   : > { %v10050_v8 = vrot.slane %v10049_v48, 4  ;;  %v12943_v27 = vcombine.low %v10733_v45, %v10736_v55  ;;  %v10742_v34 = vrot.slane %v12891_v26, 5  ;;  %v10060_v48 = vshll.u32 %v12817_v10, 16  ;;  %v12821_v45 = vld [vmem:[%s14758_s24 + $0x88] sm:$0xf] }
 0x2ed   : > { %v10045_v18 = vsel %vm14796_vm4, %v10040_v16, %v10044_v50  ;;  %14316 = vmatprep.mubr.msk.bf16.mxu0 %vm352_vm1, %v12848_v62  ;;  %v10740_v40 = vsel %vm15159_vm7, %v12927_v6, %v10739_v46  ;;  %v10741_v2 = vrot.slane %v10739_v46, 4  ;;  %v10057_v50 = vshrl.u32 %v12817_v10, 16  ;;  %v18041_v62 = vpop.f32.mrf.mxu0  ;;  %v12893_v3 = vld [vmem:[%s14758_s24 + $0x64] sm:$0xf] }
 0x2ee   : > { %v10055_v52 = vsel %vm14796_vm4, %v10050_v8, %v10054_v36  ;;  %14346 = vmatprep.mubr.msk.bf16.mxu1 %vm352_vm1, %v12943_v27  ;;  %v10066_v26 = vshll.u32 %v12818_v14, 16  ;;  %v10070_v59 = vshrl.u32 %v12818_v14, 16  ;;  %v10076_v16 = vshll.u32 %v12819_v5, 16  ;;  %v12822_v36 = vld [vmem:[%s14758_s24 + $0x8c] sm:$0x1]  ;;  %19280 = vst [vmem:[#allocation96_spill] sm:$0xff] %v18041_v62  ;;  %v18045_v10 = vpop.f32.mrf.mxu1 }
 0x2ef   : > { %v12849_v49 = vcombine.low %v10045_v18, %v10055_v52  ;;  %v10743_v22 = vsel %vm15159_vm7, %v10741_v2, %v10742_v34  ;;  %v10059_v8 = vrot.slane %v10057_v50, 4  ;;  %v10062_v55 = vrot.slane %v10060_v48, 5  ;;  %v12892_v18 = vld [vmem:[%s14758_s24 + $0x60] sm:$0xe]  ;;  %19281 = vst [vmem:[#allocation97_spill] sm:$0xff] %v18045_v10  ;;  %v18050_v21 = vpop.f32.mrf.mxu0 }
 0x2f0   : > { %v12944_v6 = vcombine.low %v10740_v40, %v10743_v22  ;;  %v10081_v46 = vshrl.u32 %v12820_v29, 16  ;;  %v10068_v27 = vrot.slane %v10066_v26, 5  ;;  %v10072_v52 = vrot.slane %v10070_v59, 4  ;;  %v12894_v40 = vld [vmem:[%s14758_s24 + $0x68] sm:$0x1]  ;;  %19282 = vst [vmem:[#allocation98_spill] sm:$0xff] %v18050_v21  ;;  %v18053_v23 = vpop.f32.mrf.mxu1 }
 0x2f1   : > { %14317 = vmatmul.mubr.msk.bf16.gmra.mxu0 %vm352_vm1, %v12849_v49  ;;  %v10078_v34 = vrot.slane %v10076_v16, 5  ;;  %v10084_v2 = vshll.u32 %v12820_v29, 16  ;;  %v10063_v14 = vor.u32 %v10062_v55, %v10059_v8  ;;  %v10090_v62 = vshll.u32 %v12821_v45, 16  ;;  %v12895_v10 = vld [vmem:[%s14758_s24 + $0x6c] sm:$0xe]  ;;  %19283 = vst [vmem:[#allocation99_spill] sm:$0xff] %v18053_v23 }
 0x2f2   : > { %14347 = vmatmul.mubr.msk.bf16.gmra.mxu1 %vm352_vm1, %v12944_v6  ;;  %v10083_v5 = vrot.slane %v10081_v46, 4  ;;  %v10094_v49 = vshrl.u32 %v12821_v45, 16  ;;  %v10073_v50 = vor.u32 %v10072_v52, %v10068_v27  ;;  %v10100_v22 = vshll.u32 %v12822_v36, 16  ;;  %v12896_v46 = vld [vmem:[%s14758_s24 + $0x70] sm:$0xf] }
 0x2f3   : > { %v10086_v48 = vrot.slane %v10084_v2, 5  ;;  %v12928_v4 = vrot.slane %v12892_v18, 9  ;;  %v10064_v26 = vrot.slane %v10063_v14, 4  ;;  %v10092_v59 = vrot.slane %v10090_v62, 5  ;;  %v12902_v23 = vld [vmem:[%s14758_s24 + $0x88] sm:$0xf] }
 0x2f4   : > { %v10096_v29 = vrot.slane %v10094_v49, 4  ;;  %v10746_v16 = vrot.slane %v12893_v3, 5  ;;  %v10074_v6 = vrot.slane %v10073_v50, 4  ;;  %v10102_v55 = vrot.slane %v10100_v22, 5  ;;  %v12897_v3 = vld [vmem:[%s14758_s24 + $0x74] sm:$0x1]  ;;  %v18063_v49 = vpop.f32.mrf.mxu0 }
 0x2f5   : > { %v10087_v8 = vor.u32 %v10086_v48, %v10083_v5  ;;  %v10749_v45 = vrot.slane %v12894_v40, 5  ;;  %v10069_v36 = vsel %vm14796_vm4, %v10064_v26, %v10068_v27  ;;  %v12929_v5 = vrot.slane %v12895_v10, 9  ;;  %19284 = vst [vmem:[#allocation100_spill] sm:$0xff] %v18063_v49  ;;  %v12823_v22 = vld [vmem:[%s14758_s24 + $0x90] sm:$0xf] }
 0x2f6   : > { %v10097_v18 = vor.u32 %v10096_v29, %v10092_v59  ;;  %v10747_v52 = vsel %vm15159_vm7, %v12928_v4, %v10746_v16  ;;  %v10748_v62 = vrot.slane %v10746_v16, 4  ;;  %v10079_v2 = vsel %vm14796_vm4, %v10074_v6, %v10078_v34  ;;  %v18068_v4 = vpop.f32.mrf.mxu1  ;;  %v12824_v16 = vld [vmem:[%s14758_s24 + $0x94] sm:$0xf]  ;;  %v12825_v10 = vld [vmem:[%s14758_s24 + $0x98] sm:$0x1]  ;;  %v19286_v6 = vld [vmem:[#allocation15_spill] sm:$0xff] }
 0x2f7   : > { %v10088_v14 = vrot.slane %v10087_v8, 4  ;;  %v12850_v40 = vcombine.low %v10069_v36, %v10079_v2  ;;  %v10753_v48 = vrot.slane %v12896_v46, 5  ;;  %19285 = vst [vmem:[#allocation101_spill] sm:$0xff] %v18068_v4  ;;  %v10756_v34 = vrot.slane %v12897_v3, 5  ;;  %v12827_v2 = vld [vmem:[%s14758_s24 + $0xa0] sm:$0xf] }
 0x2f8   : > { %v10098_v50 = vrot.slane %v10097_v18, 4  ;;  %v10750_v27 = vsel %vm15159_vm7, %v10748_v62, %v10749_v45  ;;  %v18076_v8 = vadd.f32 %v17271_v1, %v19286_v6  ;;  %v19287_v18 = vld [vmem:[#allocation58_spill] sm:$0xff]  ;;  %v10105_v1 = vshrl.u32 %v12823_v22, 16  ;;  %v12901_v4 = vld [vmem:[%s14758_s24 + $0x84] sm:$0xe] }
 0x2f9   : > { %v10093_v26 = vsel %vm14796_vm4, %v10088_v14, %v10092_v59  ;;  %v12945_v29 = vcombine.low %v10747_v52, %v10750_v27  ;;  %14320 = vmatprep.mubr.msk.bf16.mxu0 %vm352_vm1, %v12850_v40  ;;  %v10754_v46 = vsel %vm15159_vm7, %v12929_v5, %v10753_v48  ;;  %v10755_v36 = vrot.slane %v10753_v48, 4  ;;  %v12826_v59 = vld [vmem:[%s14758_s24 + $0x9c] sm:$0xf]  ;;  %v18090_v14 = vpop.f32.mrf.mxu0  ;;  %v12828_v27 = vld [vmem:[%s14758_s24 + $0xa4] sm:$0x1]  ;;  %v18095_v48 = vpop.f32.mrf.mxu1 }
 0x2fa   : > { %v10103_v45 = vsel %vm14796_vm4, %v10098_v50, %v10102_v55  ;;  %v18086_v52 = vadd.f32 %v17293_v63, %v19287_v18  ;;  %v10108_v3 = vshll.u32 %v12823_v22, 16  ;;  %19288 = vst [vmem:[#allocation15_spill] sm:$0xff] %v18090_v14  ;;  %v10114_v5 = vshll.u32 %v12824_v16, 16  ;;  %19289 = vst [vmem:[#allocation58_spill] sm:$0xff] %v18095_v48  ;;  %v12898_v6 = vld [vmem:[%s14758_s24 + $0x78] sm:$0xe] }
 0x2fb   : > { %v12851_v62 = vcombine.low %v10093_v26, %v10103_v45  ;;  %14350 = vmatprep.mubr.msk.bf16.mxu1 %vm352_vm1, %v12945_v29  ;;  %v10757_v55 = vsel %vm15159_vm7, %v10755_v36, %v10756_v34  ;;  %v10118_v40 = vshrl.u32 %v12824_v16, 16  ;;  %v10124_v50 = vshll.u32 %v12825_v10, 16  ;;  %v12899_v34 = vld [vmem:[%s14758_s24 + $0x7c] sm:$0xf]  ;;  %v12900_v48 = vld [vmem:[%s14758_s24 + $0x80] sm:$0x1] }
 0x2fc   : > { %v12946_v63 = vcombine.low %v10754_v46, %v10757_v55  ;;  %v10107_v26 = vrot.slane %v10105_v1, 4  ;;  %v10110_v29 = vrot.slane %v10108_v3, 5  ;;  %v10129_v22 = vshrl.u32 %v12826_v59, 16 }
 0x2fd   : > { %14321 = vmatmul.mubr.msk.bf16.gmra.mxu0 %vm352_vm1, %v12851_v62  ;;  %v10116_v45 = vrot.slane %v10114_v5, 5  ;;  %v10120_v18 = vrot.slane %v10118_v40, 4  ;;  %v10126_v14 = vrot.slane %v10124_v50, 5  ;;  %v10132_v49 = vshll.u32 %v12826_v59, 16  ;;  %v18102_v62 = vpop.f32.mrf.mxu0 }
 0x2fe   : > { %14351 = vmatmul.mubr.msk.bf16.gmra.mxu1 %vm352_vm1, %v12946_v63  ;;  %v10111_v16 = vor.u32 %v10110_v29, %v10107_v26  ;;  %v10131_v10 = vrot.slane %v10129_v22, 4  ;;  %v10138_v36 = vshll.u32 %v12827_v2, 16  ;;  %v10142_v21 = vshrl.u32 %v12827_v2, 16  ;;  %19290 = vst [vmem:[#allocation102_spill] sm:$0xff] %v18102_v62 }
 0x2ff   : > { %v10121_v46 = vor.u32 %v10120_v18, %v10116_v45  ;;  %v10134_v1 = vrot.slane %v10132_v49, 5  ;;  %v10148_v3 = vshll.u32 %v12828_v27, 16  ;;  %v12930_v55 = vrot.slane %v12898_v6, 9 }
 0x300   : > { %v18104_v5 = vpop.f32.mrf.mxu1  ;;  %v10112_v59 = vrot.slane %v10111_v16, 4  ;;  %v10140_v40 = vrot.slane %v10138_v36, 5  ;;  %v10144_v50 = vrot.slane %v10142_v21, 4  ;;  %v10760_v63 = vrot.slane %v12899_v34, 5  ;;  %v18113_v16 = vpop.f32.mrf.mxu0  ;;  %v19293_v21 = vld [vmem:[#allocation14_spill] sm:$0xff] }
 0x301   : > { %19291 = vst [vmem:[#allocation103_spill] sm:$0xff] %v18104_v5  ;;  %v10122_v26 = vrot.slane %v10121_v46, 4  ;;  %v10135_v29 = vor.u32 %v10134_v1, %v10131_v10  ;;  %v10150_v22 = vrot.slane %v10148_v3, 5  ;;  %v10763_v2 = vrot.slane %v12900_v48, 5  ;;  %v12903_v5 = vld [vmem:[%s14758_s24 + $0x8c] sm:$0x1] }
 0x302   : > { %v10117_v18 = vsel %vm14796_vm4, %v10112_v59, %v10116_v45  ;;  %v10145_v49 = vor.u32 %v10144_v50, %v10140_v40  ;;  %v10761_v27 = vsel %vm15159_vm7, %v12930_v55, %v10760_v63  ;;  %v10762_v6 = vrot.slane %v10760_v63, 4  ;;  %19292 = vst [vmem:[#allocation104_spill] sm:$0xff] %v18113_v16  ;;  %v18121_v45 = vpop.f32.mrf.mxu1  ;;  %v12829_v59 = vld [vmem:[%s14758_s24 + $0xa8] sm:$0xf]  ;;  %v12905_v16 = vld [vmem:[%s14758_s24 + $0x94] sm:$0xf] }
 0x303   : > { %v18117_v34 = vadd.f32 %v17319_v24, %v19293_v21  ;;  %v10127_v48 = vsel %vm14796_vm4, %v10122_v26, %v10126_v14  ;;  %v10136_v10 = vrot.slane %v10135_v29, 4  ;;  %v12931_v36 = vrot.slane %v12901_v4, 9  ;;  %19294 = vst [vmem:[#allocation14_spill] sm:$0xff] %v18121_v45  ;;  %v19295_v50 = vld [vmem:[#allocation64_spill] sm:$0xff]  ;;  %v12830_v26 = vld [vmem:[%s14758_s24 + $0xac] sm:$0xf] }
 0x304   : > { %v12852_v46 = vcombine.low %v10117_v18, %v10127_v48  ;;  %v10146_v1 = vrot.slane %v10145_v49, 4  ;;  %v10764_v3 = vsel %vm15159_vm7, %v10762_v6, %v10763_v2  ;;  %v10767_v55 = vrot.slane %v12902_v23, 5  ;;  %v12831_v29 = vld [vmem:[%s14758_s24 + $0xb0] sm:$0x1]  ;;  %v12907_v45 = vld [vmem:[%s14758_s24 + $0x9c] sm:$0xe] }
 0x305   : > { %v18128_v63 = vadd.f32 %v17333_v58, %v19295_v50  ;;  %v10141_v24 = vsel %vm14796_vm4, %v10136_v10, %v10140_v40  ;;  %v12947_v14 = vcombine.low %v10761_v27, %v10764_v3  ;;  %v10770_v4 = vrot.slane %v12903_v5, 5  ;;  %v19296_v18 = vld [vmem:[#allocation61_spill] sm:$0xff]  ;;  %v12832_v40 = vld [vmem:[%s14758_s24 + $0xb4] sm:$0xf]  ;;  %v18144_v27 = vpop.f32.mrf.mxu0  ;;  %v12833_v10 = vld [vmem:[%s14758_s24 + $0xb8] sm:$0xf] }
 0x306   : > { %v18136_v49 = vadd.f32 %v19296_v18, %v17263_v0  ;;  %14324 = vmatprep.mubr.msk.bf16.mxu0 %vm352_vm1, %v12852_v46  ;;  %v10151_v23 = vsel %vm14796_vm4, %v10146_v1, %v10150_v22  ;;  %v10768_v58 = vsel %vm15159_vm7, %v12931_v36, %v10767_v55  ;;  %v10769_v2 = vrot.slane %v10767_v55, 4  ;;  %19297 = vst [vmem:[#allocation64_spill] sm:$0xff] %v18144_v27  ;;  %v19298_v5 = vld [vmem:[#allocation57_spill] sm:$0xff]  ;;  %v18152_v22 = vpop.f32.mrf.mxu1  ;;  %v12834_v55 = vld [vmem:[%s14758_s24 + $0xbc] sm:$0x1] }
 0x307   : > { %v18148_v6 = vadd.f32 %v17355_v31, %v19298_v5  ;;  %v12853_v21 = vcombine.low %v10141_v24, %v10151_v23  ;;  %14354 = vmatprep.mubr.msk.bf16.mxu1 %vm352_vm1, %v12947_v14  ;;  %v10153_v0 = vshrl.u32 %v12829_v59, 16  ;;  %v10156_v48 = vshll.u32 %v12829_v59, 16  ;;  %19299 = vst [vmem:[#allocation61_spill] sm:$0xff] %v18152_v22  ;;  %v12904_v18 = vld [vmem:[%s14758_s24 + $0x90] sm:$0xe]  ;;  %v18160_v22 = vpop.f32.mrf.mxu0 }
 0x308   : > { %v10771_v36 = vsel %vm15159_vm7, %v10769_v2, %v10770_v4  ;;  %v10162_v46 = vshll.u32 %v12830_v26, 16  ;;  %v10166_v1 = vshrl.u32 %v12830_v26, 16  ;;  %v10172_v3 = vshll.u32 %v12831_v29, 16  ;;  %19300 = vst [vmem:[#allocation57_spill] sm:$0xff] %v18160_v22 }
 0x309   : > { %14325 = vmatmul.mubr.msk.bf16.gmra.mxu0 %vm352_vm1, %v12853_v21  ;;  %v12948_v31 = vcombine.low %v10768_v58, %v10771_v36  ;;  %v10155_v50 = vrot.slane %v10153_v0, 4  ;;  %v10158_v24 = vrot.slane %v10156_v48, 5  ;;  %v10177_v14 = vshrl.u32 %v12832_v40, 16  ;;  %v12906_v58 = vld [vmem:[%s14758_s24 + $0x98] sm:$0x1]  ;;  %v18164_v21 = vpop.f32.mrf.mxu1 }
 0x30a   : > { %v10164_v59 = vrot.slane %v10162_v46, 5  ;;  %v10168_v23 = vrot.slane %v10166_v1, 4  ;;  %v10174_v5 = vrot.slane %v10172_v3, 5  ;;  %v10180_v27 = vshll.u32 %v12832_v40, 16  ;;  %19301 = vst [vmem:[#allocation105_spill] sm:$0xff] %v18164_v21 }
 0x30b   : > { %14355 = vmatmul.mubr.msk.bf16.gmra.mxu1 %vm352_vm1, %v12948_v31  ;;  %v10159_v4 = vor.u32 %v10158_v24, %v10155_v50  ;;  %v10179_v26 = vrot.slane %v10177_v14, 4  ;;  %v10186_v29 = vshll.u32 %v12833_v10, 16  ;;  %v10190_v2 = vshrl.u32 %v12833_v10, 16  ;;  %v12908_v14 = vld [vmem:[%s14758_s24 + $0xa0] sm:$0xf]  ;;  %v18168_v10 = vpop.f32.mrf.mxu0 }
 0x30c   : > { %v10169_v0 = vor.u32 %v10168_v23, %v10164_v59  ;;  %v10182_v48 = vrot.slane %v10180_v27, 5  ;;  %v10196_v36 = vshll.u32 %v12834_v55, 16  ;;  %v12932_v46 = vrot.slane %v12904_v18, 9  ;;  %19302 = vst [vmem:[#allocation106_spill] sm:$0xff] %v18168_v10  ;;  %v12913_v21 = vld [vmem:[%s14758_s24 + $0xb4] sm:$0xe] }
 0x30d   : > { %v10160_v40 = vrot.slane %v10159_v4, 4  ;;  %v10188_v1 = vrot.slane %v10186_v29, 5  ;;  %v10192_v3 = vrot.slane %v10190_v2, 4  ;;  %v10774_v22 = vrot.slane %v12905_v16, 5  ;;  %v12909_v4 = vld [vmem:[%s14758_s24 + $0xa4] sm:$0x1]  ;;  %v18175_v16 = vpop.f32.mrf.mxu1 }
 0x30e   : > { %v10170_v62 = vrot.slane %v10169_v0, 4  ;;  %v10183_v31 = vor.u32 %v10182_v48, %v10179_v26  ;;  %v10198_v50 = vrot.slane %v10196_v36, 5  ;;  %v10777_v24 = vrot.slane %v12906_v58, 5  ;;  %19303 = vst [vmem:[#allocation107_spill] sm:$0xff] %v18175_v16  ;;  %v19304_v26 = vld [vmem:[#allocation66_spill] sm:$0xff] }
 0x30f   : > { %v10165_v23 = vsel %vm14796_vm4, %v10160_v40, %v10164_v59  ;;  %v10193_v27 = vor.u32 %v10192_v3, %v10188_v1  ;;  %v10775_v55 = vsel %vm15159_vm7, %v12932_v46, %v10774_v22  ;;  %v10776_v18 = vrot.slane %v10774_v22, 4  ;;  %v12835_v46 = vld [vmem:[%s14758_s24 + $0xc0] sm:$0xf]  ;;  %v19305_v40 = vld [vmem:[#allocation12_spill] sm:$0xff] }
 0x310   : > { %v18179_v29 = vadd.f32 %v17376_v15, %v19304_v26  ;;  %v10175_v2 = vsel %vm14796_vm4, %v10170_v62, %v10174_v5  ;;  %v10184_v58 = vrot.slane %v10183_v31, 4  ;;  %v12933_v0 = vrot.slane %v12907_v45, 9  ;;  %v12836_v62 = vld [vmem:[%s14758_s24 + $0xc4] sm:$0xf]  ;;  %v12837_v45 = vld [vmem:[%s14758_s24 + $0xc8] sm:$0x1]  ;;  %v18194_v5 = vpop.f32.mrf.mxu0 }
 0x311   : > { %v12854_v59 = vcombine.low %v10165_v23, %v10175_v2  ;;  %v10194_v48 = vrot.slane %v10193_v27, 4  ;;  %v10778_v22 = vsel %vm15159_vm7, %v10776_v18, %v10777_v24  ;;  %v10781_v36 = vrot.slane %v12908_v14, 5  ;;  %19306 = vst [vmem:[#allocation66_spill] sm:$0xff] %v18194_v5  ;;  %v19307_v31 = vld [vmem:[#allocation60_spill] sm:$0xff]  ;;  %v12838_v14 = vld [vmem:[%s14758_s24 + $0xcc] sm:$0xf]  ;;  %v18206_v27 = vpop.f32.mrf.mxu1 }
 0x312   : > { %v18188_v3 = vadd.f32 %v17406_v20, %v19305_v40  ;;  %v10189_v15 = vsel %vm14796_vm4, %v10184_v58, %v10188_v1  ;;  %v12949_v26 = vcombine.low %v10775_v55, %v10778_v22  ;;  %v10784_v10 = vrot.slane %v12909_v4, 5  ;;  %19308 = vst [vmem:[#allocation12_spill] sm:$0xff] %v18206_v27  ;;  %v19309_v55 = vld [vmem:[#allocation68_spill] sm:$0xff]  ;;  %v19310_v18 = vld [vmem:[#allocation65_spill] sm:$0xff] }
 0x313   : > { %v18198_v23 = vadd.f32 %v17420_v7, %v19307_v31  ;;  %14328 = vmatprep.mubr.msk.bf16.mxu0 %vm352_vm1, %v12854_v59  ;;  %v10199_v20 = vsel %vm14796_vm4, %v10194_v48, %v10198_v50  ;;  %v10782_v1 = vsel %vm15159_vm7, %v12933_v0, %v10781_v36  ;;  %v10783_v24 = vrot.slane %v10781_v36, 4  ;;  %v12839_v59 = vld [vmem:[%s14758_s24 + $0xd0] sm:$0xf]  ;;  %v12840_v36 = vld [vmem:[%s14758_s24 + $0xd4] sm:$0x1] }
 0x314   : > { %v18210_v4 = vadd.f32 %v19310_v18, %v19309_v55  ;;  %v12855_v7 = vcombine.low %v10189_v15, %v10199_v20  ;;  %14358 = vmatprep.mubr.msk.bf16.mxu1 %vm352_vm1, %v12949_v26  ;;  %v10201_v2 = vshrl.u32 %v12835_v46, 16  ;;  %v10204_v58 = vshll.u32 %v12835_v46, 16  ;;  %v12910_v20 = vld [vmem:[%s14758_s24 + $0xa8] sm:$0xe]  ;;  %v18219_v26 = vpop.f32.mrf.mxu0 }
 0x315   : > { %v10785_v50 = vsel %vm15159_vm7, %v10783_v24, %v10784_v10  ;;  %v10210_v0 = vshll.u32 %v12836_v62, 16  ;;  %v10214_v48 = vshrl.u32 %v12836_v62, 16  ;;  %v10220_v22 = vshll.u32 %v12837_v45, 16  ;;  %19311 = vst [vmem:[#allocation60_spill] sm:$0xff] %v18219_v26  ;;  %v12911_v10 = vld [vmem:[%s14758_s24 + $0xac] sm:$0xf]  ;;  %v18222_v24 = vpop.f32.mrf.mxu1 }
 0x316   : > { %14329 = vmatmul.mubr.msk.bf16.gmra.mxu0 %vm352_vm1, %v12855_v7  ;;  %v12950_v40 = vcombine.low %v10782_v1, %v10785_v50  ;;  %v10203_v31 = vrot.slane %v10201_v2, 4  ;;  %v10206_v55 = vrot.slane %v10204_v58, 5  ;;  %v10225_v15 = vshrl.u32 %v12838_v14, 16  ;;  %19312 = vst [vmem:[#allocation68_spill] sm:$0xff] %v18222_v24  ;;  %v12912_v2 = vld [vmem:[%s14758_s24 + $0xb0] sm:$0x1]  ;;  %v18227_v32 = vpop.f32.mrf.mxu0 }
 0x317   : > { %v10212_v46 = vrot.slane %v10210_v0, 5  ;;  %v10216_v18 = vrot.slane %v10214_v48, 4  ;;  %v10222_v5 = vrot.slane %v10220_v22, 5  ;;  %v10228_v27 = vshll.u32 %v12838_v14, 16 }
 0x318   : > { %14359 = vmatmul.mubr.msk.bf16.gmra.mxu1 %vm352_vm1, %v12950_v40  ;;  %v10207_v62 = vor.u32 %v10206_v55, %v10203_v31  ;;  %v10227_v45 = vrot.slane %v10225_v15, 4  ;;  %v10234_v1 = vshll.u32 %v12839_v59, 16  ;;  %v10238_v7 = vshrl.u32 %v12839_v59, 16  ;;  %v12914_v59 = vld [vmem:[%s14758_s24 + $0xb8] sm:$0xf]  ;;  %v18230_v15 = vpop.f32.mrf.mxu1 }
 0x319   : > { %v10217_v58 = vor.u32 %v10216_v18, %v10212_v46  ;;  %v10230_v50 = vrot.slane %v10228_v27, 5  ;;  %v10244_v16 = vshll.u32 %v12840_v36, 16  ;;  %v12934_v26 = vrot.slane %v12910_v20, 9  ;;  %19313 = vst [vmem:[#allocation65_spill] sm:$0xff] %v18230_v15 }
 0x31a   : > { %v10208_v0 = vrot.slane %v10207_v62, 4  ;;  %v10236_v48 = vrot.slane %v10234_v1, 5  ;;  %v10240_v14 = vrot.slane %v10238_v7, 4  ;;  %v10788_v22 = vrot.slane %v12911_v10, 5  ;;  %v12915_v10 = vld [vmem:[%s14758_s24 + $0xbc] sm:$0x1] }
 0x31b   : > { %v10218_v24 = vrot.slane %v10217_v58, 4  ;;  %v10231_v40 = vor.u32 %v10230_v50, %v10227_v45  ;;  %v10246_v31 = vrot.slane %v10244_v16, 5  ;;  %v10791_v55 = vrot.slane %v12912_v2, 5  ;;  %v19314_v62 = vld [vmem:[#allocation19_spill] sm:$0xff] }
 0x31c   : > { %v10213_v27 = vsel %vm14796_vm4, %v10208_v0, %v10212_v46  ;;  %v10241_v36 = vor.u32 %v10240_v14, %v10236_v48  ;;  %v10789_v20 = vsel %vm15159_vm7, %v12934_v26, %v10788_v22  ;;  %v10790_v18 = vrot.slane %v10788_v22, 4  ;;  %v12916_v26 = vld [vmem:[%s14758_s24 + $0xc0] sm:$0xe]  ;;  %v12917_v0 = vld [vmem:[%s14758_s24 + $0xc4] sm:$0xf]  ;;  %v18247_v14 = vpop.f32.mrf.mxu0 }
 0x31d   : > { %v18239_v45 = vadd.f32 %v17438_v44, %v19314_v62  ;;  %v10223_v16 = vsel %vm14796_vm4, %v10218_v24, %v10222_v5  ;;  %v10232_v1 = vrot.slane %v10231_v40, 4  ;;  %v12935_v7 = vrot.slane %v12913_v21, 9  ;;  %v19315_v44 = vld [vmem:[#allocation62_spill] sm:$0xff]  ;;  %v12918_v40 = vld [vmem:[%s14758_s24 + $0xc8] sm:$0x1] }
 0x31e   : > { %v12856_v2 = vcombine.low %v10213_v27, %v10223_v16  ;;  %v10242_v58 = vrot.slane %v10241_v36, 4  ;;  %v10792_v46 = vsel %vm15159_vm7, %v10790_v18, %v10791_v55  ;;  %v10795_v50 = vrot.slane %v12914_v59, 5  ;;  %v12919_v27 = vld [vmem:[%s14758_s24 + $0xcc] sm:$0xe]  ;;  %v18257_v36 = vpop.f32.mrf.mxu1  ;;  %v19317_v55 = vld [vmem:[#allocation16_spill] sm:$0xff]  ;;  %v19318_v59 = vld [vmem:[#allocation18_spill] sm:$0xff] }
 0x31f   : > { %v18251_v22 = vadd.f32 %v17459_v60, %v19315_v44  ;;  %v10237_v5 = vsel %vm14796_vm4, %v10232_v1, %v10236_v48  ;;  %v12951_v21 = vcombine.low %v10789_v20, %v10792_v46  ;;  %v10798_v24 = vrot.slane %v12915_v10, 5  ;;  %19316 = vst [vmem:[#allocation19_spill] sm:$0xff] %v18257_v36  ;;  %v12920_v48 = vld [vmem:[%s14758_s24 + $0xd0] sm:$0xf]  ;;  %v12921_v20 = vld [vmem:[%s14758_s24 + $0xd4] sm:$0x1] }
 0x320   : > { %v18261_v18 = vadd.f32 %v19318_v59, %v19317_v55  ;;  %14332 = vmatprep.mubr.msk.bf16.mxu0 %vm352_vm1, %v12856_v2  ;;  %v10247_v62 = vsel %vm14796_vm4, %v10242_v58, %v10246_v31  ;;  %v10796_v60 = vsel %vm15159_vm7, %v12935_v7, %v10795_v50  ;;  %v10797_v16 = vrot.slane %v10795_v50, 4  ;;  %v19319_v10 = vld [vmem:[#allocation17_spill] sm:$0xff]  ;;  %v19320_v1 = vld [vmem:[#allocation72_spill] sm:$0xff]  ;;  %v19321_v44 = vld [vmem:[#allocation67_spill] sm:$0xff]  ;;  %v18285_v59 = vpop.f32.mrf.mxu0  ;;  %s18687_s24 = sand.u32 1, %s11685_s21   ;;  %s218_s21 = scalar_lea.vmem [#allocation5], %s16083_s9 }
 0x321   : > { %v18272_v46 = vadd.f32 %v19320_v1, %v19319_v10  ;;  %v19322_v36 = vld [vmem:[#allocation22_spill] sm:$0xff]  ;;  %v12857_v55 = vcombine.low %v10237_v5, %v10247_v62  ;;  %14362 = vmatprep.mubr.msk.bf16.mxu1 %vm352_vm1, %v12951_v21  ;;  %v12936_v2 = vrot.slane %v12916_v26, 9  ;;  %v18281_v31 = vadd.f32 %v17523_v42, %v19323_v41  ;;  %v18288_v62 = vpop.f32.mrf.mxu1  ;;  %v19324_v26 = vld [vmem:[#allocation69_spill] sm:$0xff] }
 0x322   : > { %v18276_v15 = vadd.f32 %v19322_v36, %v19321_v44  ;;  %v10799_v7 = vsel %vm15159_vm7, %v10797_v16, %v10798_v24  ;;  %v10802_v58 = vrot.slane %v12917_v0, 5  ;;  %v10805_v50 = vrot.slane %v12918_v40, 5  ;;  %v19325_v42 = vld [vmem:[#allocation74_spill] sm:$0xff]  ;;  %v19326_v44 = vld [vmem:[#allocation20_spill] sm:$0xff]  ;;  %v19327_v40 = vld [vmem:[#allocation33_spill] sm:$0xff] }
 0x323   : > { %14333 = vmatmul.mubr.msk.bf16.gmra.mxu0 %vm352_vm1, %v12857_v55  ;;  %v12952_v10 = vcombine.low %v10796_v60, %v10799_v7  ;;  %v12937_v36 = vrot.slane %v12919_v27, 9  ;;  %v10809_v1 = vrot.slane %v12920_v48, 5  ;;  %v10812_v5 = vrot.slane %v12921_v20, 5  ;;  %v19328_v16 = vld [vmem:[#allocation36_spill] sm:$0xff]  ;;  %v19329_v27 = vld [vmem:[#allocation73_spill] sm:$0xff]  ;;  %v19330_v48 = vld [vmem:[#allocation31_spill] sm:$0xff] }
 0x324   : > { %v18292_v21 = vadd.f32 %v17544_v11, %v19324_v26  ;;  %v18296_v41 = vadd.f32 %v19326_v44, %v19325_v42  ;;  %v10803_v0 = vsel %vm15159_vm7, %v12936_v2, %v10802_v58  ;;  %v10804_v24 = vrot.slane %v10802_v58, 4  ;;  %v18319_v42 = vpop.f32.mrf.mxu0  ;;  %v19331_v44 = vld [vmem:[#allocation35_spill] sm:$0xff] }
 0x325   : > { %v18302_v60 = vadd.f32 %v19328_v16, %v19327_v40  ;;  %v18306_v20 = vadd.f32 %v19330_v48, %v19329_v27  ;;  %14363 = vmatmul.mubr.msk.bf16.gmra.mxu1 %vm352_vm1, %v12952_v10  ;;  %v7371_v11 = vadd.f32 %v17734_v47, %v18076_v8  ;;  %v10811_v55 = vrot.slane %v10809_v1, 4 }
 0x326   : > { %v10806_v7 = vsel %vm15159_vm7, %v10804_v24, %v10805_v50  ;;  %v10810_v2 = vsel %vm15159_vm7, %v12937_v36, %v10809_v1  ;;  %v7369_v58 = vadd.f32 %v17749_v39, %v18086_v52  ;;  %v7372_v26 = vadd.f32 %v17775_v37, %v18117_v34  ;;  %v18329_v36 = vpop.f32.mrf.mxu1  ;;  %v19332_v1 = vld [vmem:[#allocation23_spill] sm:$0xff]  ;;  %v19333_v34 = vld [vmem:[#allocation24_spill] sm:$0xff]  ;;  %v18352_v24 = vpop.f32.mrf.mxu0 }
 0x327   : > { %v18323_v10 = vadd.f32 %v17612_v28, %v19331_v44  ;;  %v12953_v47 = vcombine.low %v10803_v0, %v10806_v7  ;;  %v10813_v8 = vsel %vm15159_vm7, %v10811_v55, %v10812_v5  ;;  %v7370_v50 = vadd.f32 %v17788_v56, %v18128_v63 }
 0x328   : > { %v18333_v39 = vadd.f32 %v17622_v57, %v19332_v1  ;;  %v8161_v37 = vadd.f32 %v17800_v13, %v7371_v11  ;;  %v8159_v52 = vadd.f32 %v17805_v9, %v7369_v58  ;;  %v8162_v28 = vadd.f32 %v17812_v61, %v7372_v26  ;;  %v19334_v9 = vld [vmem:[#allocation51_spill] sm:$0xff]  ;;  %v19338_v58 = vld [vmem:[#allocation37_spill] sm:$0xff]  ;;  %v19339_v26 = vld [vmem:[#allocation32_spill] sm:$0xff] }
 0x329   : > { %v18340_v0 = vadd.f32 %v17643_v54, %v19333_v34  ;;  %14366 = vmatprep.mubr.msk.bf16.mxu1 %vm352_vm1, %v12953_v47  ;;  %v12954_v38 = vcombine.low %v10810_v2, %v10813_v8  ;;  %v7375_v56 = vadd.f32 %v17798_v17, %v18136_v49  ;;  %v8160_v57 = vadd.f32 %v17823_v51, %v7370_v50  ;;  %v19335_v54 = vld [vmem:[#allocation52_spill] sm:$0xff]  ;;  %v18354_v17 = vpop.f32.mrf.mxu1  ;;  %v19336_v51 = vld [vmem:[#allocation21_spill] sm:$0xff]  ;;  %v19337_v49 = vld [vmem:[#allocation34_spill] sm:$0xff] }
 0x32a   : > { %v7373_v13 = vadd.f32 %v17803_v30, %v18148_v6  ;;  %v7376_v63 = vadd.f32 %v19334_v9, %v18179_v29  ;;  %v13339_v61 = vpack.c.bf16 %v8162_v28, %v8161_v37  ;;  %v7374_v5 = vadd.f32 %v19335_v54, %v18188_v3  ;;  %v19340_v1 = vld [vmem:[#allocation47_spill] sm:$0xff]  ;;  %v19345_v54 = vld [vmem:[#allocation28_spill] sm:$0xff] }
 0x32b   : > { %v8454_v40 = vmul.f32 %v8159_v52, %v8159_v52  ;;  %v13334_v16 = vpack.c.bf16 %v8160_v57, %v8159_v52  ;;  %v8416_v27 = vadd.f32 %v8160_v57, %v8159_v52  ;;  %v8455_v48 = vmul.f32 %v8160_v57, %v8160_v57  ;;  %v19342_v57 = vld [vmem:[#allocation48_spill] sm:$0xff] }
 0x32c   : > { %v18358_v11 = vadd.f32 %v19337_v49, %v19336_v51  ;;  %13523 = vst [vmem:[%s16154_s13 + $0x108] sm:$0xff] %v13339_v61   ;;  %v8165_v30 = vadd.f32 %v17833_v53, %v7375_v56  ;;  %v8163_v6 = vadd.f32 %v17843_v19, %v7373_v13  ;;  %v8166_v29 = vadd.f32 %v17859_v25, %v7376_v63  ;;  %v18373_v25 = vpop.f32.mrf.mxu0  ;;  %v19343_v63 = vld [vmem:[#allocation53_spill] sm:$0xff] }
 0x32d   : > { %14367 = vmatmul.mubr.msk.bf16.gmra.mxu1 %vm352_vm1, %v12954_v38  ;;  %v8456_v3 = vmul.f32 %v8161_v37, %v8161_v37  ;;  %13522 = vst [vmem:[%s16154_s13 + $0x100] sm:$0xff] %v13334_v16   ;;  %v8417_v55 = vadd.f32 %v8416_v27, %v8161_v37  ;;  %v8486_v7 = vadd.f32 %v8455_v48, %v8454_v40  ;;  %v19346_v40 = vld [vmem:[#allocation27_spill] sm:$0xff]  ;;  %v19348_v27 = vld [vmem:[#allocation56_spill] sm:$0xff] }
 0x32e   : > { %v8164_v2 = vadd.f32 %v17867_v33, %v7374_v5  ;;  %v18369_v44 = vadd.f32 %v19339_v26, %v19338_v58  ;;  %v8457_v47 = vmul.f32 %v8162_v28, %v8162_v28  ;;  %v7379_v53 = vadd.f32 %v17831_v43, %v18198_v23  ;;  %v18377_v34 = vpop.f32.mrf.mxu1  ;;  %v19341_v33 = vld [vmem:[#allocation45_spill] sm:$0xff]  ;;  %v18399_v51 = vpop.f32.mrf.mxu0  ;;  %v19350_v58 = vld [vmem:[#allocation59_spill] sm:$0xff] }
 0x32f   : > { %v13349_v19 = vpack.c.bf16 %v8166_v29, %v8165_v30  ;;  %v8487_v8 = vadd.f32 %v8486_v7, %v8456_v3  ;;  %v8418_v50 = vadd.f32 %v8417_v55, %v8162_v28  ;;  %v7380_v37 = vadd.f32 %v19340_v1, %v18239_v45  ;;  %v19344_v45 = vld [vmem:[#allocation26_spill] sm:$0xff] }
 0x330   : > { %v13344_v52 = vpack.c.bf16 %v8164_v2, %v8163_v6  ;;  %v7377_v38 = vadd.f32 %v19341_v33, %v18210_v4  ;;  %v8458_v56 = vmul.f32 %v8163_v6, %v8163_v6  ;;  %v7378_v13 = vadd.f32 %v19342_v57, %v18251_v22  ;;  %v19347_v4 = vld [vmem:[#allocation41_spill] sm:$0xff]  ;;  %v18404_v7 = vpop.f32.mrf.mxu1  ;;  %v19354_v33 = vld [vmem:[#allocation76_spill] sm:$0xff] }
 0x331   : > { %13525 = vst [vmem:[%s16154_s13 + $0x118] sm:$0xff] %v13349_v19   ;;  %v8459_v43 = vmul.f32 %v8164_v2, %v8164_v2  ;;  %v8419_v23 = vadd.f32 %v8418_v50, %v8163_v6  ;;  %v8488_v9 = vadd.f32 %v8487_v8, %v8457_v47  ;;  %v8169_v28 = vadd.f32 %v17877_v12, %v7379_v53  ;;  %v19349_v6 = vld [vmem:[#allocation46_spill] sm:$0xff]  ;;  %v19351_v47 = vld [vmem:[#allocation49_spill] sm:$0xff]  ;;  %v19356_v57 = vld [vmem:[#allocation80_spill] sm:$0xff] }
 0x332   : > { %13524 = vst [vmem:[%s16154_s13 + $0x110] sm:$0xff] %v13344_v52   ;;  %v18387_v61 = vadd.f32 %v19343_v63, %v7380_v37  ;;  %v18391_v5 = vadd.f32 %v19345_v54, %v19344_v45  ;;  %v18395_v16 = vadd.f32 %v19347_v4, %v19346_v40  ;;  %v8167_v48 = vadd.f32 %v19348_v27, %v7377_v38  ;;  %v18428_v63 = vpop.f32.mrf.mxu1  ;;  %v19358_v54 = vld [vmem:[#allocation75_spill] sm:$0xff] }
 0x333   : > { %v8168_v22 = vadd.f32 %v17898_v35, %v7378_v13  ;;  %v8489_v12 = vadd.f32 %v8488_v9, %v8458_v56  ;;  %v8420_v49 = vadd.f32 %v8419_v23, %v8164_v2  ;;  %v7383_v3 = vadd.f32 %v19349_v6, %v18261_v18  ;;  %v19352_v35 = vld [vmem:[#allocation54_spill] sm:$0xff]  ;;  %v19355_v56 = vld [vmem:[#allocation77_spill] sm:$0xff]  ;;  %v18424_v13 = vpop.f32.mrf.mxu0  ;;  %v19357_v23 = vld [vmem:[#allocation55_spill] sm:$0xff] }
 0x334   : > { %v13359_v55 = vpack.c.bf16 %v18387_v61, %v8169_v28  ;;  %v7381_v26 = vadd.f32 %v19350_v58, %v18272_v46  ;;  %v7384_v53 = vadd.f32 %v19351_v47, %v18276_v15  ;;  %v7382_v19 = vadd.f32 %v19352_v35, %v18281_v31  ;;  %v19353_v18 = vld [vmem:[#allocation70_spill] sm:$0xff]  ;;  %v19359_v6 = vld [vmem:[#allocation13_spill] sm:$0xff]  ;;  %v19362_v58 = vld [vmem:[#allocation43_spill] sm:$0xff] }
 0x335   : > { %v13354_v8 = vpack.c.bf16 %v8168_v22, %v8167_v48  ;;  %v8460_v50 = vmul.f32 %v8165_v30, %v8165_v30  ;;  %v8461_v1 = vmul.f32 %v8166_v29, %v8166_v29  ;;  %v8421_v2 = vadd.f32 %v8420_v49, %v8165_v30  ;;  %v19363_v47 = vld [vmem:[#allocation30_spill] sm:$0xff] }
 0x336   : > { %v8490_v37 = vadd.f32 %v8489_v12, %v8459_v43  ;;  %13527 = vst [vmem:[%s16154_s13 + $0x128] sm:$0xff] %v13359_v55   ;;  %v18415_v52 = vadd.f32 %v19353_v18, %v7383_v3  ;;  %v8171_v38 = vadd.f32 %v19354_v33, %v7381_v26  ;;  %v18419_v46 = vadd.f32 %v19355_v56, %v7384_v53  ;;  %v19360_v3 = vld [vmem:[#allocation63_spill] sm:$0xff]  ;;  %v19364_v53 = vld [vmem:[#allocation42_spill] sm:$0xff]  ;;  %v18459_v33 = vpop.f32.mrf.mxu1  ;;  %v19369_v56 = vld [vmem:[#allocation29_spill] sm:$0xff] }
 0x337   : > { %13526 = vst [vmem:[%s16154_s13 + $0x120] sm:$0xff] %v13354_v8   ;;  %v18422_v15 = vadd.f32 %v19356_v57, %v7382_v19  ;;  %v8422_v30 = vadd.f32 %v8421_v2, %v8166_v29  ;;  %v8462_v43 = vmul.f32 %v8167_v48, %v8167_v48  ;;  %v7387_v9 = vadd.f32 %v19357_v23, %v18292_v21  ;;  %v19361_v21 = vld [vmem:[#allocation25_spill] sm:$0xff]  ;;  %v19366_v8 = vld [vmem:[#allocation86_spill] sm:$0xff]  ;;  %v19370_v57 = vld [vmem:[#allocation40_spill] sm:$0xff] }
 0x338   : > { %v8491_v31 = vadd.f32 %v8490_v37, %v8460_v50  ;;  %v8463_v45 = vmul.f32 %v8168_v22, %v8168_v22  ;;  %v7388_v40 = vadd.f32 %v19358_v54, %v18302_v60  ;;  %v13369_v4 = vpack.c.bf16 %v18419_v46, %v18415_v52  ;;  %v19365_v60 = vld [vmem:[#allocation83_spill] sm:$0xff]  ;;  %v18451_v50 = vpop.f32.mrf.mxu0  ;;  %v19368_v37 = vld [vmem:[#allocation88_spill] sm:$0xff] }
 0x339   : > { %v13364_v27 = vpack.c.bf16 %v18422_v15, %v8171_v38  ;;  %v8423_v12 = vadd.f32 %v8422_v30, %v8167_v48  ;;  %v7385_v29 = vadd.f32 %v19359_v6, %v18296_v41  ;;  %v7386_v55 = vadd.f32 %v19360_v3, %v18306_v20  ;;  %v19367_v20 = vld [vmem:[#allocation84_spill] sm:$0xff]  ;;  %v19371_v23 = vld [vmem:[#allocation79_spill] sm:$0xff]  ;;  %v19375_v3 = vld [vmem:[#allocation82_spill] sm:$0xff] }
 0x33a   : > { %v8492_v49 = vadd.f32 %v8491_v31, %v8461_v1  ;;  %v6968_v26 = vadd.f32 %v19362_v58, %v19361_v21  ;;  %v6973_v35 = vadd.f32 %v19364_v53, %v19363_v47  ;;  %13529 = vst [vmem:[%s16154_s13 + $0x138] sm:$0xff] %v13369_v4   ;;  %v18446_v19 = vadd.f32 %v19365_v60, %v7387_v9  ;;  %v19377_v58 = vld [vmem:[#allocation89_spill] sm:$0xff] }
 0x33b   : > { %13528 = vst [vmem:[%s16154_s13 + $0x130] sm:$0xff] %v13364_v27   ;;  %v18449_v48 = vadd.f32 %v19366_v8, %v7388_v40  ;;  %v8424_v1 = vadd.f32 %v8423_v12, %v8168_v22  ;;  %v18454_v2 = vadd.f32 %v19367_v20, %v7385_v29  ;;  %v18457_v18 = vadd.f32 %v19368_v37, %v7386_v55  ;;  %v19372_v40 = vld [vmem:[#allocation85_spill] sm:$0xff]  ;;  %v19373_v12 = vld [vmem:[#allocation38_spill] sm:$0xff]  ;;  %v19376_v55 = vld [vmem:[#allocation87_spill] sm:$0xff] }
 0x33c   : > { %v8493_v41 = vadd.f32 %v8492_v49, %v8462_v43  ;;  %v6971_v31 = vadd.f32 %v19370_v57, %v19369_v56  ;;  %v8464_v30 = vmul.f32 %v8169_v28, %v8169_v28  ;;  %v7391_v9 = vadd.f32 %v19371_v23, %v18323_v10  ;;  %v19374_v49 = vld [vmem:[#allocation50_spill] sm:$0xff]  ;;  %v19378_v53 = vld [vmem:[#allocation93_spill] sm:$0xff]  ;;  %v19380_v20 = vld [vmem:[#allocation95_spill] sm:$0xff] }
 0x33d   : > { %v13379_v43 = vpack.c.bf16 %v18449_v48, %v18446_v19  ;;  %v8425_v22 = vadd.f32 %v8424_v1, %v8169_v28  ;;  %v7392_v4 = vadd.f32 %v19372_v40, %v18340_v0  ;;  %v13374_v27 = vpack.c.bf16 %v18457_v18, %v18454_v2  ;;  %v19379_v1 = vld [vmem:[#allocation91_spill] sm:$0xff]  ;;  %v19381_v57 = vld [vmem:[#allocation90_spill] sm:$0xff]  ;;  %v19384_v40 = vld [vmem:[#allocation96_spill] sm:$0xff] }
 0x33e   : > { %v8494_v54 = vadd.f32 %v8493_v41, %v8463_v45  ;;  %v6974_v6 = vadd.f32 %v19374_v49, %v19373_v12  ;;  %v8465_v29 = vmul.f32 %v18387_v61, %v18387_v61  ;;  %v7389_v10 = vadd.f32 %v19375_v3, %v18333_v39  ;;  %v18480_v45 = vpop.f32.mrf.mxu0  ;;  %v19386_v49 = vld [vmem:[#allocation44_spill] sm:$0xff] }
 0x33f   : > { %13531 = vst [vmem:[%s16154_s13 + $0x148] sm:$0xff] %v13379_v43   ;;  %v7390_v28 = vadd.f32 %v19376_v55, %v18358_v11  ;;  %v8426_v0 = vadd.f32 %v8425_v22, %v18387_v61  ;;  %13530 = vst [vmem:[%s16154_s13 + $0x140] sm:$0xff] %v13374_v27   ;;  %v18485_v47 = vadd.f32 %v19377_v58, %v7391_v9  ;;  %v19382_v9 = vld [vmem:[#allocation92_spill] sm:$0xff]  ;;  %v19383_v22 = vld [vmem:[#allocation94_spill] sm:$0xff] }
 0x340   : > { %v8495_v21 = vadd.f32 %v8494_v54, %v8464_v30  ;;  %v18488_v60 = vadd.f32 %v19378_v53, %v7392_v4  ;;  %v18490_v8 = vpop.f32.mrf.mxu1  ;;  %v8466_v41 = vmul.f32 %v8171_v38, %v8171_v38  ;;  %v8467_v39 = vmul.f32 %v18422_v15, %v18422_v15  ;;  %v14254_v12 = vpop.f32.mrf.mxu0  ;;  %v19387_v55 = vld [vmem:[#allocation97_spill] sm:$0xff]  ;;  %v19390_v58 = vld [vmem:[#allocation58_spill] sm:$0xff] }
 0x341   : > { %v18495_v11 = vadd.f32 %v19379_v1, %v7389_v10  ;;  %v18498_v37 = vadd.f32 %v19380_v20, %v7390_v28  ;;  %v8427_v61 = vadd.f32 %v8426_v0, %v8171_v38  ;;  %v7395_v30 = vadd.f32 %v19381_v57, %v18369_v44  ;;  %v19385_v38 = vld [vmem:[#allocation39_spill] sm:$0xff]  ;;  %v19391_v1 = vld [vmem:[#allocation98_spill] sm:$0xff] }
 0x342   : > { %v8496_v56 = vadd.f32 %v8495_v21, %v8465_v29  ;;  %v13389_v23 = vpack.c.bf16 %v18488_v60, %v18485_v47  ;;  %v7393_v43 = vadd.f32 %v19382_v9, %v18391_v5  ;;  %v7396_v54 = vadd.f32 %v19383_v22, %v18395_v16  ;;  %v9641_v5 = vpop.f32.mrf.mxu1  ;;  %v19389_v21 = vld [vmem:[#allocation101_spill] sm:$0xff]  ;;  %v19393_v57 = vld [vmem:[#allocation15_spill] sm:$0xff]  ;;  %v19394_v9 = vld [vmem:[#allocation102_spill] sm:$0xff] }
 0x343   : > { %v7394_v4 = vadd.f32 %v19384_v40, %v6968_v26  ;;  %v13384_v27 = vpack.c.bf16 %v18498_v37, %v18495_v11  ;;  %v6972_v29 = vadd.f32 %v19386_v49, %v19385_v38  ;;  %v8468_v44 = vmul.f32 %v18415_v52, %v18415_v52  ;;  %v19388_v26 = vld [vmem:[#allocation99_spill] sm:$0xff]  ;;  %v19397_v38 = vld [vmem:[#allocation61_spill] sm:$0xff] }
 0x344   : > { %v8497_v3 = vadd.f32 %v8496_v56, %v8466_v41  ;;  %v8428_v10 = vadd.f32 %v8427_v61, %v18422_v15  ;;  %13533 = vst [vmem:[%s16154_s13 + $0x158] sm:$0xff] %v13389_v23   ;;  %v18519_v16 = vadd.f32 %v19387_v55, %v7395_v30  ;;  %v18522_v28 = vadd.f32 %v19388_v26, %v7393_v43  ;;  %v19392_v61 = vld [vmem:[#allocation100_spill] sm:$0xff] }
 0x345   : > { %13532 = vst [vmem:[%s16154_s13 + $0x150] sm:$0xff] %v13384_v27   ;;  %v18525_v0 = vadd.f32 %v19389_v21, %v7396_v54  ;;  %v18528_v53 = vadd.f32 %v19390_v58, %v7394_v4  ;;  %v7399_v20 = vadd.f32 %v19391_v1, %v6973_v35  ;;  %v7397_v56 = vadd.f32 %v19392_v61, %v6971_v31  ;;  %v9155_v54 = vpop.f32.mrf.mxu0  ;;  %v14285_v35 = vpop.f32.mrf.mxu1  ;;  %v19395_v31 = vld [vmem:[#allocation103_spill] sm:$0xff]  ;;  %v19396_v4 = vld [vmem:[#allocation14_spill] sm:$0xff] }
 0x346   : > { %v8429_v41 = vadd.f32 %v8428_v10, %v18415_v52  ;;  %v8498_v15 = vadd.f32 %v8497_v3, %v8467_v39  ;;  %v7400_v30 = vadd.f32 %v19393_v57, %v6974_v6  ;;  %v7398_v43 = vadd.f32 %v19394_v9, %v6972_v29  ;;  %v19398_v29 = vld [vmem:[#allocation105_spill] sm:$0xff] }
 0x347   : > { %v13399_v23 = vpack.c.bf16 %v18525_v0, %v18519_v16  ;;  %v13394_v22 = vpack.c.bf16 %v18528_v53, %v18522_v28  ;;  %v8469_v40 = vmul.f32 %v18419_v46, %v18419_v46  ;;  %v18545_v6 = vadd.f32 %v19395_v31, %v7399_v20  ;;  %v14255_v58 = vpop.f32.mrf.mxu0  ;;  %v9644_v1 = vpop.f32.mrf.mxu1 }
 0x348   : > { %v8499_v52 = vadd.f32 %v8498_v15, %v8468_v44  ;;  %v8430_v39 = vadd.f32 %v8429_v41, %v18419_v46  ;;  %v18548_v27 = vadd.f32 %v19396_v4, %v7397_v56  ;;  %v18551_v49 = vadd.f32 %v19397_v38, %v7400_v30 }
 0x349   : > { %13535 = vst [vmem:[%s16154_s13 + $0x168] sm:$0xff] %v13399_v23   ;;  %13534 = vst [vmem:[%s16154_s13 + $0x160] sm:$0xff] %v13394_v22   ;;  %v18554_v3 = vadd.f32 %v19398_v29, %v7398_v43  ;;  %v8470_v46 = vmul.f32 %v18454_v2, %v18454_v2  ;;  %v8471_v55 = vmul.f32 %v18457_v18, %v18457_v18 }
 0x34a   : > { %v8431_v44 = vadd.f32 %v8430_v39, %v18454_v2  ;;  %v8500_v10 = vadd.f32 %v8499_v52, %v8469_v40  ;;  %v13409_v26 = vpack.c.bf16 %v18551_v49, %v18545_v6  ;;  %v8472_v20 = vmul.f32 %v18446_v19, %v18446_v19 }
 0x34b   : > { %v13404_v21 = vpack.c.bf16 %v18554_v3, %v18548_v27  ;;  %v18572_v2 = vadd.f32 %v18329_v36, %v18227_v32  ;;  %v18576_v61 = vadd.f32 %v18354_v17, %v18247_v14  ;;  %v18580_v56 = vadd.f32 %v18377_v34, %v18285_v59 }
 0x34c   : > { %v8501_v41 = vadd.f32 %v8500_v10, %v8470_v46  ;;  %v8432_v15 = vadd.f32 %v8431_v44, %v18457_v18  ;;  %13537 = vst [vmem:[%s16154_s13 + $0x178] sm:$0xff] %v13409_v26   ;;  %v18585_v30 = vadd.f32 %v18404_v7, %v18319_v42  ;;  %v18589_v23 = vadd.f32 %v18428_v63, %v18352_v24  ;;  %v9158_v42 = vpop.f32.mrf.mxu0 }
 0x34d   : > { %13536 = vst [vmem:[%s16154_s13 + $0x170] sm:$0xff] %v13404_v21   ;;  %v18593_v32 = vadd.f32 %v18459_v33, %v18373_v25  ;;  %v18597_v14 = vadd.f32 %v18490_v8, %v18399_v51  ;;  %v18600_v59 = vadd.f32 %v9641_v5, %v18424_v13  ;;  %v18603_v36 = vadd.f32 %v14285_v35, %v18451_v50 }
 0x34e   : > { %v8433_v18 = vadd.f32 %v8432_v15, %v18446_v19  ;;  %v8502_v57 = vadd.f32 %v8501_v41, %v8471_v55  ;;  %v8473_v17 = vmul.f32 %v18449_v48, %v18449_v48  ;;  %v18609_v25 = vadd.f32 %v9644_v1, %v18480_v45 }
 0x34f   : > { %v8474_v13 = vmul.f32 %v18495_v11, %v18495_v11  ;;  %v8475_v50 = vmul.f32 %v18498_v37, %v18498_v37  ;;  %v14258_v8 = vpop.f32.mrf.mxu0  ;;  %v8478_v4 = vmul.f32 %v18522_v28, %v18522_v28  ;;  %v8480_v10 = vmul.f32 %v18519_v16, %v18519_v16 }
 0x350   : > { %v8503_v24 = vadd.f32 %v8502_v57, %v8472_v20  ;;  %v8434_v34 = vadd.f32 %v8433_v18, %v18449_v48  ;;  %v8481_v21 = vmul.f32 %v18525_v0, %v18525_v0  ;;  %v8482_v41 = vmul.f32 %v18548_v27, %v18548_v27 }
 0x351   : > { %v14288_v7 = vpop.f32.mrf.mxu1  ;;  %v9171_v52 = vpop.f32.mrf.mxu0  ;;  %v8483_v20 = vmul.f32 %v18554_v3, %v18554_v3 }
 0x352   : > { %v18611_v63 = vadd.f32 %v14288_v7, %v14254_v12  ;;  %v8435_v51 = vadd.f32 %v8434_v34, %v18495_v11  ;;  %v8504_v19 = vadd.f32 %v8503_v24, %v8473_v17  ;;  %v8476_v12 = vmul.f32 %v18485_v47, %v18485_v47 }
 0x353   : > { %v9657_v33 = vpop.f32.mrf.mxu1  ;;  %v14259_v29 = vpop.f32.mrf.mxu0  ;;  %v8484_v34 = vmul.f32 %v18545_v6, %v18545_v6 }
 0x354   : > { %v18618_v5 = vadd.f32 %v9657_v33, %v9155_v54  ;;  %v8505_v48 = vadd.f32 %v8504_v19, %v8474_v13  ;;  %v8436_v45 = vadd.f32 %v8435_v51, %v18498_v37  ;;  %v8477_v54 = vmul.f32 %v18488_v60, %v18488_v60 }
 0x355   : > { %v14289_v9 = vpop.f32.mrf.mxu1 }
 0x356   : > { %v18621_v43 = vadd.f32 %v14289_v9, %v14255_v58  ;;  %v8437_v22 = vadd.f32 %v8436_v45, %v18485_v47  ;;  %v8506_v11 = vadd.f32 %v8505_v48, %v8475_v50  ;;  %v8479_v47 = vmul.f32 %v18528_v53, %v18528_v53 }
 0x357   : > { %v9660_v40 = vpop.f32.mrf.mxu1  ;;  %v8485_v50 = vmul.f32 %v18551_v49, %v18551_v49 }
 0x358   : > { %v18626_v39 = vadd.f32 %v9660_v40, %v9158_v42  ;;  %v8507_v35 = vadd.f32 %v8506_v11, %v8476_v12  ;;  %v8438_v31 = vadd.f32 %v8437_v22, %v18488_v60  ;;  %v9174_v60 = vpop.f32.mrf.mxu0 }
 0x35a   : > { %v8439_v37 = vadd.f32 %v8438_v31, %v18522_v28  ;;  %v8508_v38 = vadd.f32 %v8507_v35, %v8477_v54 }
 0x35c   : > { %v8509_v44 = vadd.f32 %v8508_v38, %v8478_v4  ;;  %v8440_v46 = vadd.f32 %v8439_v37, %v18528_v53 }
 0x35e   : > { %v8441_v55 = vadd.f32 %v8440_v46, %v18519_v16  ;;  %v8510_v26 = vadd.f32 %v8509_v44, %v8479_v47  ;;  %v19399_v44 = vld [vmem:[#allocation78_spill] sm:$0xff] }
 0x360   : > { %v8511_v58 = vadd.f32 %v8510_v26, %v8480_v10  ;;  %v8442_v28 = vadd.f32 %v8441_v55, %v18525_v0  ;;  %v14262_v16 = vpop.f32.mrf.mxu0 }
 0x362   : > { %v8443_v1 = vadd.f32 %v8442_v28, %v18548_v27  ;;  %v8512_v53 = vadd.f32 %v8511_v58, %v8481_v21  ;;  %v9187_v13 = vpop.f32.mrf.mxu0  ;;  %v19400_v21 = vld [vmem:[#allocation81_spill] sm:$0xff] }
 0x363   : > { %v14292_v15 = vpop.f32.mrf.mxu1 }
 0x364   : > { %v18648_v18 = vadd.f32 %v14292_v15, %v14258_v8  ;;  %v8513_v42 = vadd.f32 %v8512_v53, %v8482_v41  ;;  %v8444_v17 = vadd.f32 %v8443_v1, %v18554_v3  ;;  %v14263_v9 = vpop.f32.mrf.mxu0 }
 0x365   : > { %v9673_v57 = vpop.f32.mrf.mxu1 }
 0x366   : > { %v18651_v24 = vadd.f32 %v9673_v57, %v9171_v52  ;;  %v8445_v7 = vadd.f32 %v8444_v17, %v18545_v6  ;;  %v8514_v27 = vadd.f32 %v8513_v42, %v8483_v20  ;;  %v9190_v40 = vpop.f32.mrf.mxu0 }
 0x367   : > { %v14293_v0 = vpop.f32.mrf.mxu1 }
 0x368   : > { %v18656_v51 = vadd.f32 %v14293_v0, %v14259_v29  ;;  %v8446_v33 = vadd.f32 %v8445_v7, %v18551_v49  ;;  %v8515_v8 = vadd.f32 %v8514_v27, %v8484_v34 }
 0x369   : > { %v9676_v19 = vpop.f32.mrf.mxu1 }
 0x36a   : > { %v18661_v3 = vadd.f32 %v9676_v19, %v9174_v60  ;;  %v8447_v48 = vrot.slane %v8446_v33, 4  ;;  %v8516_v45 = vadd.f32 %v8515_v8, %v8485_v50 }
 0x36c   : > { %v8448_v12 = vadd.f32 %v8447_v48, %v8446_v33  ;;  %v8517_v22 = vrot.slane %v8516_v45, 4 }
 0x36e   : > { %v8449_v11 = vrot.slane %v8448_v12, 2  ;;  %v8518_v6 = vadd.f32 %v8517_v22, %v8516_v45  ;;  %v19401_v45 = vld [vmem:[#allocation104_spill] sm:$0xff] }
 0x36f   : > { %v19403_v22 = vld [vmem:[#allocation64_spill] sm:$0xff] }
 0x370   : > { %v8450_v52 = vadd.f32 %v8449_v11, %v8448_v12  ;;  %v8519_v54 = vrot.slane %v8518_v6, 2  ;;  %v19404_v11 = vld [vmem:[#allocation12_spill] sm:$0xff] }
 0x372   : > { %v8451_v35 = vrot.slane %v8450_v52, 1  ;;  %v8520_v31 = vadd.f32 %v8519_v54, %v8518_v6  ;;  %v14266_v37 = vpop.f32.mrf.mxu0  ;;  %v9752_v6 = vadd.f32 %v19404_v11, %v19403_v22 }
 0x374   : > { %v14296_v4 = vpop.f32.mrf.mxu1  ;;  %v8452_v38 = vadd.f32 %v8451_v35, %v8450_v52  ;;  %v8521_v47 = vrot.slane %v8520_v31, 1  ;;  %v9203_v26 = vpop.f32.mrf.mxu0  ;;  %v19406_v52 = vld [vmem:[#allocation68_spill] sm:$0xff] }
 0x375   : > { %v18663_v49 = vadd.f32 %v14296_v4, %v14262_v16 }
 0x376   : > { %v9689_v29 = vpop.f32.mrf.mxu1  ;;  %v18666_v46 = vadd.f32 %v8452_v38, %v19399_v44  ;;  %v8522_v10 = vadd.f32 %v8521_v47, %v8520_v31  ;;  %v14267_v1 = vpop.f32.mrf.mxu0  ;;  %v19407_v31 = vld [vmem:[#allocation106_spill] sm:$0xff] }
 0x377   : > { %v18668_v55 = vadd.f32 %v9689_v29, %v9187_v13 }
 0x378   : > { %v14297_v60 = vpop.f32.mrf.mxu1  ;;  %v18671_v58 = vadd.f32 %v8522_v10, %v19400_v21  ;;  %v9206_v53 = vpop.f32.mrf.mxu0 }
 0x379   : > { %v18673_v28 = vadd.f32 %v14297_v60, %v14263_v9  ;;  %v19402_v9 = vld [vmem:[#allocation107_spill] sm:$0xff] }
 0x37a   : > { %v9692_v41 = vpop.f32.mrf.mxu1  ;;  %v9754_v12 = vadd.f32 %v19402_v9, %v19401_v45 }
 0x37b   : > { %v18675_v15 = vadd.f32 %v9692_v41, %v9190_v40  ;;  %v19405_v40 = vld [vmem:[#allocation57_spill] sm:$0xff] }
 0x37c   : > { %v9755_v54 = vadd.f32 %v19406_v52, %v19405_v40  ;;  %v19410_v40 = vld [vmem:[#allocation66_spill] sm:$0xff]  ;;  %v19411_v52 = vld [vmem:[#allocation19_spill] sm:$0xff] }
 0x385   : > { %v14306_v20 = vpop.f32.mrf.mxu0  ;;  %v14300_v16 = vpop.f32.mrf.mxu1 }
 0x386   : > { %v18677_v57 = vadd.f32 %v14300_v16, %v14266_v37  ;;  %v19408_v37 = vld [vmem:[#allocation65_spill] sm:$0xff]  ;;  %v10544_v38 = vadd.f32 %v14306_v20, %v9754_v12  ;;  %v19409_v12 = vld [vmem:[#allocation60_spill] sm:$0xff] }
 0x387   : > { %v9705_v42 = vpop.f32.mrf.mxu1  ;;  %v10383_v17 = vpop.f32.mrf.mxu0  ;;  %v9753_v4 = vadd.f32 %v19408_v37, %v19407_v31 }
 0x388   : > { %v18679_v0 = vadd.f32 %v9705_v42, %v9203_v26  ;;  %v10542_v47 = vadd.f32 %v10383_v17, %v9752_v6 }
 0x389   : > { %v14301_v34 = vpop.f32.mrf.mxu1  ;;  %v14307_v13 = vpop.f32.mrf.mxu0 }
 0x38a   : > { %v18681_v7 = vadd.f32 %v14301_v34, %v14267_v1  ;;  %v10545_v29 = vadd.f32 %v14307_v13, %v9755_v54  ;;  %v9758_v54 = vadd.f32 %v19411_v52, %v19410_v40 }
 0x38b   : > { %v9708_v27 = vpop.f32.mrf.mxu1  ;;  %v10386_v50 = vpop.f32.mrf.mxu0 }
 0x38c   : > { %v18683_v19 = vadd.f32 %v9708_v27, %v9206_v53  ;;  %v10543_v26 = vadd.f32 %v10386_v50, %v9753_v4  ;;  %v9756_v50 = vadd.f32 %v18288_v62, %v19409_v12 }
 0x394   : > { %v14310_v33 = vpop.f32.mrf.mxu0 }
 0x396   : > { %v10399_v48 = vpop.f32.mrf.mxu0 }
 0x398   : > { %v14311_v44 = vpop.f32.mrf.mxu0 }
 0x399   : > { %v14340_v8 = vpop.f32.mrf.mxu1 }
 0x39a   : > { %v11110_v60 = vadd.f32 %v14340_v8, %v10544_v38  ;;  %v10402_v42 = vpop.f32.mrf.mxu0  ;;  %v10548_v38 = vadd.f32 %v14310_v33, %v9758_v54 }
 0x39b   : > { %v10949_v35 = vpop.f32.mrf.mxu1 }
 0x39c   : > { %v11108_v21 = vadd.f32 %v10949_v35, %v10542_v47  ;;  %v11405_v22 = vmul.f32 %v11110_v60, %v11110_v60  ;;  %v10546_v35 = vadd.f32 %v10399_v48, %v9756_v50  ;;  %v10549_v47 = vadd.f32 %v14311_v44, %v18572_v2 }
 0x39d   : > { %v14341_v10 = vpop.f32.mrf.mxu1 }
 0x39e   : > { %v11111_v41 = vadd.f32 %v14341_v10, %v10545_v29  ;;  %v11403_v34 = vmul.f32 %v11108_v21, %v11108_v21 }
 0x39f   : > { %v10952_v1 = vpop.f32.mrf.mxu1 }
 0x3a0   : > { %v13419_v53 = vpack.c.bf16 %v11111_v41, %v11110_v60  ;;  %v11109_v16 = vadd.f32 %v10952_v1, %v10543_v26  ;;  %v11406_v31 = vmul.f32 %v11111_v41, %v11111_v41 }
 0x3a2   : > { %13539 = vst [vmem:[%s16154_s13 + $0x188] sm:$0xff] %v13419_v53   ;;  %v13414_v27 = vpack.c.bf16 %v11109_v16, %v11108_v21  ;;  %v11365_v45 = vadd.f32 %v11109_v16, %v11108_v21  ;;  %v11404_v9 = vmul.f32 %v11109_v16, %v11109_v16 }
 0x3a4   : > { %13538 = vst [vmem:[%s16154_s13 + $0x180] sm:$0xff] %v13414_v27   ;;  %v11366_v20 = vadd.f32 %v11365_v45, %v11110_v60  ;;  %v11435_v17 = vadd.f32 %v11404_v9, %v11403_v34  ;;  %v14314_v13 = vpop.f32.mrf.mxu0  ;;  %v10547_v60 = vadd.f32 %v10402_v42, %v18576_v61 }
 0x3a5   : > { %v10552_v54 = vadd.f32 %v14314_v13, %v18580_v56 }
 0x3a6   : > { %v11436_v8 = vadd.f32 %v11435_v17, %v11405_v22  ;;  %v14344_v11 = vpop.f32.mrf.mxu1  ;;  %v10415_v6 = vpop.f32.mrf.mxu0  ;;  %v11367_v37 = vadd.f32 %v11366_v20, %v11111_v41 }
 0x3a7   : > { %v11114_v21 = vadd.f32 %v14344_v11, %v10548_v38  ;;  %v10550_v11 = vadd.f32 %v10415_v6, %v18585_v30 }
 0x3a8   : > { %v10965_v4 = vpop.f32.mrf.mxu1  ;;  %v11437_v10 = vadd.f32 %v11436_v8, %v11406_v31  ;;  %v14315_v26 = vpop.f32.mrf.mxu0 }
 0x3a9   : > { %v11112_v29 = vadd.f32 %v10965_v4, %v10546_v35  ;;  %v11409_v44 = vmul.f32 %v11114_v21, %v11114_v21  ;;  %v10553_v35 = vadd.f32 %v14315_v26, %v18589_v23 }
 0x3aa   : > { %v14345_v62 = vpop.f32.mrf.mxu1  ;;  %v10418_v41 = vpop.f32.mrf.mxu0 }
 0x3ab   : > { %v11368_v1 = vadd.f32 %v11367_v37, %v11112_v29  ;;  %v11407_v53 = vmul.f32 %v11112_v29, %v11112_v29  ;;  %v11115_v16 = vadd.f32 %v14345_v62, %v10549_v47  ;;  %v10551_v4 = vadd.f32 %v10418_v41, %v18593_v32 }
 0x3ac   : > { %v10968_v34 = vpop.f32.mrf.mxu1 }
 0x3ad   : > { %v11438_v48 = vadd.f32 %v11437_v10, %v11407_v53  ;;  %v13429_v27 = vpack.c.bf16 %v11115_v16, %v11114_v21  ;;  %v11113_v45 = vadd.f32 %v10968_v34, %v10547_v60  ;;  %v11410_v42 = vmul.f32 %v11115_v16, %v11115_v16 }
 0x3af   : > { %13541 = vst [vmem:[%s16154_s13 + $0x198] sm:$0xff] %v13429_v27   ;;  %v13424_v33 = vpack.c.bf16 %v11113_v45, %v11112_v29  ;;  %v11369_v9 = vadd.f32 %v11368_v1, %v11113_v45  ;;  %v11408_v2 = vmul.f32 %v11113_v45, %v11113_v45 }
 0x3b1   : > { %13540 = vst [vmem:[%s16154_s13 + $0x190] sm:$0xff] %v13424_v33   ;;  %v11370_v22 = vadd.f32 %v11369_v9, %v11114_v21  ;;  %v11439_v20 = vadd.f32 %v11438_v48, %v11408_v2  ;;  %v14318_v61 = vpop.f32.mrf.mxu0 }
 0x3b2   : > { %v14348_v12 = vpop.f32.mrf.mxu1 }
 0x3b3   : > { %v11440_v17 = vadd.f32 %v11439_v20, %v11409_v44  ;;  %v10431_v50 = vpop.f32.mrf.mxu0  ;;  %v11371_v8 = vadd.f32 %v11370_v22, %v11115_v16  ;;  %v11118_v47 = vadd.f32 %v14348_v12, %v10552_v54  ;;  %v10556_v44 = vadd.f32 %v14318_v61, %v18597_v14 }
 0x3b4   : > { %v10981_v40 = vpop.f32.mrf.mxu1  ;;  %v10554_v33 = vadd.f32 %v10431_v50, %v18600_v59 }
 0x3b5   : > { %v11441_v52 = vadd.f32 %v11440_v17, %v11410_v42  ;;  %v11116_v31 = vadd.f32 %v10981_v40, %v10550_v11  ;;  %v14319_v37 = vpop.f32.mrf.mxu0  ;;  %v11413_v23 = vmul.f32 %v11118_v47, %v11118_v47 }
 0x3b6   : > { %v14349_v38 = vpop.f32.mrf.mxu1  ;;  %v10557_v22 = vadd.f32 %v14319_v37, %v18603_v36 }
 0x3b7   : > { %v11372_v29 = vadd.f32 %v11371_v8, %v11116_v31  ;;  %v11411_v10 = vmul.f32 %v11116_v31, %v11116_v31  ;;  %v11119_v60 = vadd.f32 %v14349_v38, %v10553_v35  ;;  %v10434_v6 = vpop.f32.mrf.mxu0 }
 0x3b8   : > { %v10984_v62 = vpop.f32.mrf.mxu1  ;;  %v10555_v17 = vadd.f32 %v10434_v6, %v18609_v25 }
 0x3b9   : > { %v11442_v21 = vadd.f32 %v11441_v52, %v11411_v10  ;;  %v13439_v30 = vpack.c.bf16 %v11119_v60, %v11118_v47  ;;  %v11117_v1 = vadd.f32 %v10984_v62, %v10551_v4  ;;  %v11414_v34 = vmul.f32 %v11119_v60, %v11119_v60 }
 0x3bb   : > { %13543 = vst [vmem:[%s16154_s13 + $0x1a8] sm:$0xff] %v13439_v30   ;;  %v13434_v53 = vpack.c.bf16 %v11117_v1, %v11116_v31  ;;  %v11373_v56 = vadd.f32 %v11372_v29, %v11117_v1  ;;  %v11412_v13 = vmul.f32 %v11117_v1, %v11117_v1 }
 0x3bd   : > { %13542 = vst [vmem:[%s16154_s13 + $0x1a0] sm:$0xff] %v13434_v53   ;;  %v11374_v26 = vadd.f32 %v11373_v56, %v11118_v47  ;;  %v11443_v16 = vadd.f32 %v11442_v21, %v11412_v13  ;;  %v14322_v32 = vpop.f32.mrf.mxu0 }
 0x3be   : > { %v14352_v27 = vpop.f32.mrf.mxu1  ;;  %v10560_v1 = vadd.f32 %v14322_v32, %v18611_v63 }
 0x3bf   : > { %v11444_v48 = vadd.f32 %v11443_v16, %v11413_v23  ;;  %v10447_v41 = vpop.f32.mrf.mxu0  ;;  %v11375_v45 = vadd.f32 %v11374_v26, %v11119_v60  ;;  %v11122_v8 = vadd.f32 %v14352_v27, %v10556_v44 }
 0x3c0   : > { %v10997_v9 = vpop.f32.mrf.mxu1  ;;  %v10558_v21 = vadd.f32 %v10447_v41, %v18618_v5 }
 0x3c1   : > { %v11445_v2 = vadd.f32 %v11444_v48, %v11414_v34  ;;  %v11120_v20 = vadd.f32 %v10997_v9, %v10554_v33  ;;  %v14323_v42 = vpop.f32.mrf.mxu0  ;;  %v11417_v36 = vmul.f32 %v11122_v8, %v11122_v8 }
 0x3c2   : > { %v14353_v12 = vpop.f32.mrf.mxu1  ;;  %v10561_v53 = vadd.f32 %v14323_v42, %v18621_v43 }
 0x3c3   : > { %v11376_v11 = vadd.f32 %v11375_v45, %v11120_v20  ;;  %v11415_v40 = vmul.f32 %v11120_v20, %v11120_v20  ;;  %v11123_v52 = vadd.f32 %v14353_v12, %v10557_v22  ;;  %v10450_v50 = vpop.f32.mrf.mxu0 }
 0x3c4   : > { %v11000_v54 = vpop.f32.mrf.mxu1  ;;  %v10559_v23 = vadd.f32 %v10450_v50, %v18626_v39 }
 0x3c5   : > { %v11446_v35 = vadd.f32 %v11445_v2, %v11415_v40  ;;  %v13449_v59 = vpack.c.bf16 %v11123_v52, %v11122_v8  ;;  %v11121_v31 = vadd.f32 %v11000_v54, %v10555_v17  ;;  %v11418_v47 = vmul.f32 %v11123_v52, %v11123_v52 }
 0x3c7   : > { %13545 = vst [vmem:[%s16154_s13 + $0x1b8] sm:$0xff] %v13449_v59   ;;  %v13444_v4 = vpack.c.bf16 %v11121_v31, %v11120_v20  ;;  %v11377_v14 = vadd.f32 %v11376_v11, %v11121_v31  ;;  %v11416_v61 = vmul.f32 %v11121_v31, %v11121_v31 }
 0x3c9   : > { %13544 = vst [vmem:[%s16154_s13 + $0x1b0] sm:$0xff] %v13444_v4   ;;  %v11378_v37 = vadd.f32 %v11377_v14, %v11122_v8  ;;  %v11447_v38 = vadd.f32 %v11446_v35, %v11416_v61  ;;  %v14326_v25 = vpop.f32.mrf.mxu0 }
 0x3ca   : > { %v10564_v54 = vadd.f32 %v14326_v25, %v18648_v18 }
 0x3cb   : > { %v11448_v29 = vadd.f32 %v11447_v38, %v11417_v36  ;;  %v14356_v10 = vpop.f32.mrf.mxu1  ;;  %v10463_v60 = vpop.f32.mrf.mxu0  ;;  %v11379_v62 = vadd.f32 %v11378_v37, %v11123_v52 }
 0x3cc   : > { %v11126_v16 = vadd.f32 %v14356_v10, %v10560_v1  ;;  %v10562_v11 = vadd.f32 %v10463_v60, %v18651_v24 }
 0x3cd   : > { %v11013_v30 = vpop.f32.mrf.mxu1  ;;  %v11449_v6 = vadd.f32 %v11448_v29, %v11418_v47  ;;  %v14327_v13 = vpop.f32.mrf.mxu0 }
 0x3ce   : > { %v11124_v56 = vadd.f32 %v11013_v30, %v10558_v21  ;;  %v11421_v43 = vmul.f32 %v11126_v16, %v11126_v16  ;;  %v10565_v35 = vadd.f32 %v14327_v13, %v18656_v51 }
 0x3cf   : > { %v14357_v26 = vpop.f32.mrf.mxu1  ;;  %v10466_v41 = vpop.f32.mrf.mxu0 }
 0x3d0   : > { %v11380_v34 = vadd.f32 %v11379_v62, %v11124_v56  ;;  %v11419_v48 = vmul.f32 %v11124_v56, %v11124_v56  ;;  %v11127_v27 = vadd.f32 %v14357_v26, %v10561_v53  ;;  %v10563_v50 = vadd.f32 %v10466_v41, %v18661_v3 }
 0x3d1   : > { %v11016_v45 = vpop.f32.mrf.mxu1 }
 0x3d2   : > { %v11450_v33 = vadd.f32 %v11449_v6, %v11419_v48  ;;  %v13459_v5 = vpack.c.bf16 %v11127_v27, %v11126_v16  ;;  %v11125_v9 = vadd.f32 %v11016_v45, %v10559_v23  ;;  %v11422_v20 = vmul.f32 %v11127_v27, %v11127_v27 }
 0x3d4   : > { %13547 = vst [vmem:[%s16154_s13 + $0x1c8] sm:$0xff] %v13459_v5   ;;  %v13454_v2 = vpack.c.bf16 %v11125_v9, %v11124_v56  ;;  %v11381_v63 = vadd.f32 %v11380_v34, %v11125_v9  ;;  %v11420_v32 = vmul.f32 %v11125_v9, %v11125_v9 }
 0x3d6   : > { %13546 = vst [vmem:[%s16154_s13 + $0x1c0] sm:$0xff] %v13454_v2   ;;  %v11382_v44 = vadd.f32 %v11381_v63, %v11126_v16  ;;  %v11451_v22 = vadd.f32 %v11450_v33, %v11420_v32  ;;  %v14330_v39 = vpop.f32.mrf.mxu0 }
 0x3d7   : > { %v10568_v26 = vadd.f32 %v14330_v39, %v18663_v49 }
 0x3d8   : > { %v11452_v42 = vadd.f32 %v11451_v22, %v11421_v43  ;;  %v14360_v17 = vpop.f32.mrf.mxu1  ;;  %v10479_v12 = vpop.f32.mrf.mxu0  ;;  %v11383_v8 = vadd.f32 %v11382_v44, %v11127_v27 }
 0x3d9   : > { %v11130_v14 = vadd.f32 %v14360_v17, %v10564_v54  ;;  %v10566_v56 = vadd.f32 %v10479_v12, %v18668_v55 }
 0x3da   : > { %v11029_v40 = vpop.f32.mrf.mxu1  ;;  %v11453_v52 = vadd.f32 %v11452_v42, %v11422_v20  ;;  %v14331_v31 = vpop.f32.mrf.mxu0 }
 0x3db   : > { %v11128_v59 = vadd.f32 %v11029_v40, %v10562_v11  ;;  %v11425_v51 = vmul.f32 %v11130_v14, %v11130_v14  ;;  %v10569_v16 = vadd.f32 %v14331_v31, %v18673_v28 }
 0x3dc   : > { %v14361_v4 = vpop.f32.mrf.mxu1  ;;  %v10482_v10 = vpop.f32.mrf.mxu0 }
 0x3dd   : > { %v11384_v61 = vadd.f32 %v11383_v8, %v11128_v59  ;;  %v11423_v36 = vmul.f32 %v11128_v59, %v11128_v59  ;;  %v11131_v37 = vadd.f32 %v14361_v4, %v10565_v35  ;;  %v10567_v27 = vadd.f32 %v10482_v10, %v18675_v15 }
 0x3de   : > { %v11032_v38 = vpop.f32.mrf.mxu1 }
 0x3df   : > { %v11454_v47 = vadd.f32 %v11453_v52, %v11423_v36  ;;  %v13469_v24 = vpack.c.bf16 %v11131_v37, %v11130_v14  ;;  %v11129_v29 = vadd.f32 %v11032_v38, %v10563_v50  ;;  %v11426_v30 = vmul.f32 %v11131_v37, %v11131_v37 }
 0x3e1   : > { %13549 = vst [vmem:[%s16154_s13 + $0x1d8] sm:$0xff] %v13469_v24   ;;  %v13464_v60 = vpack.c.bf16 %v11129_v29, %v11128_v59  ;;  %v11385_v18 = vadd.f32 %v11384_v61, %v11129_v29  ;;  %v11424_v25 = vmul.f32 %v11129_v29, %v11129_v29 }
 0x3e3   : > { %13548 = vst [vmem:[%s16154_s13 + $0x1d0] sm:$0xff] %v13464_v60   ;;  %v11386_v62 = vadd.f32 %v11385_v18, %v11130_v14  ;;  %v11455_v3 = vadd.f32 %v11454_v47, %v11424_v25  ;;  %v14334_v21 = vpop.f32.mrf.mxu0 }
 0x3e4   : > { %v10572_v15 = vadd.f32 %v14334_v21, %v18677_v57 }
 0x3e5   : > { %v11456_v6 = vadd.f32 %v11455_v3, %v11425_v51  ;;  %v14364_v1 = vpop.f32.mrf.mxu1  ;;  %v11387_v53 = vadd.f32 %v11386_v62, %v11131_v37  ;;  %v10495_v34 = vpop.f32.mrf.mxu0 }
 0x3e6   : > { %v11134_v33 = vadd.f32 %v14364_v1, %v10568_v26  ;;  %v10570_v49 = vadd.f32 %v10495_v34, %v18679_v0 }
 0x3e7   : > { %v11045_v13 = vpop.f32.mrf.mxu1  ;;  %v11457_v23 = vadd.f32 %v11456_v6, %v11426_v30  ;;  %v14335_v55 = vpop.f32.mrf.mxu0 }
 0x3e8   : > { %v11132_v48 = vadd.f32 %v11045_v13, %v10566_v56  ;;  %v11429_v20 = vmul.f32 %v11134_v33, %v11134_v33  ;;  %v10573_v17 = vadd.f32 %v14335_v55, %v18681_v7 }
 0x3e9   : > { %v14365_v45 = vpop.f32.mrf.mxu1  ;;  %v10498_v12 = vpop.f32.mrf.mxu0 }
 0x3ea   : > { %v11388_v5 = vadd.f32 %v11387_v53, %v11132_v48  ;;  %v11427_v41 = vmul.f32 %v11132_v48, %v11132_v48  ;;  %v11135_v9 = vadd.f32 %v14365_v45, %v10569_v16  ;;  %v10571_v31 = vadd.f32 %v10498_v12, %v18683_v19 }
 0x3eb   : > { %v11048_v2 = vpop.f32.mrf.mxu1 }
 0x3ec   : > { %v11458_v63 = vadd.f32 %v11457_v23, %v11427_v41  ;;  %v13479_v32 = vpack.c.bf16 %v11135_v9, %v11134_v33  ;;  %v11133_v43 = vadd.f32 %v11048_v2, %v10567_v27  ;;  %v11430_v52 = vmul.f32 %v11135_v9, %v11135_v9 }
 0x3ed   : > { %v14368_v44 = vpop.f32.mrf.mxu1 }
 0x3ee   : > { %13551 = vst [vmem:[%s16154_s13 + $0x1e8] sm:$0xff] %v13479_v32   ;;  %v13474_v28 = vpack.c.bf16 %v11133_v43, %v11132_v48  ;;  %v11389_v22 = vadd.f32 %v11388_v5, %v11133_v43  ;;  %v11428_v39 = vmul.f32 %v11133_v43, %v11133_v43  ;;  %v11138_v0 = vadd.f32 %v14368_v44, %v10572_v15 }
 0x3ef   : > { %v11061_v42 = vpop.f32.mrf.mxu1 }
 0x3f0   : > { %13550 = vst [vmem:[%s16154_s13 + $0x1e0] sm:$0xff] %v13474_v28   ;;  %v11390_v8 = vadd.f32 %v11389_v22, %v11134_v33  ;;  %v11459_v11 = vadd.f32 %v11458_v63, %v11428_v39  ;;  %v11136_v40 = vadd.f32 %v11061_v42, %v10570_v49  ;;  %v11433_v29 = vmul.f32 %v11138_v0, %v11138_v0 }
 0x3f1   : > { %v14369_v54 = vpop.f32.mrf.mxu1 }
 0x3f2   : > { %v11460_v35 = vadd.f32 %v11459_v11, %v11429_v20  ;;  %v11391_v59 = vadd.f32 %v11390_v8, %v11135_v9  ;;  %v11139_v50 = vadd.f32 %v14369_v54, %v10573_v17  ;;  %v11431_v14 = vmul.f32 %v11136_v40, %v11136_v40 }
 0x3f3   : > { %v11064_v57 = vpop.f32.mrf.mxu1 }
 0x3f4   : > { %v11392_v4 = vadd.f32 %v11391_v59, %v11136_v40  ;;  %v11461_v61 = vadd.f32 %v11460_v35, %v11430_v52  ;;  %v13489_v7 = vpack.c.bf16 %v11139_v50, %v11138_v0  ;;  %v11137_v36 = vadd.f32 %v11064_v57, %v10571_v31 }
 0x3f5   : > { %v11434_v18 = vmul.f32 %v11139_v50, %v11139_v50 }
 0x3f6   : > { %v11462_v37 = vadd.f32 %v11461_v61, %v11431_v14  ;;  %13553 = vst [vmem:[%s16154_s13 + $0x1f8] sm:$0xff] %v13489_v7   ;;  %v13484_v38 = vpack.c.bf16 %v11137_v36, %v11136_v40  ;;  %v11393_v47 = vadd.f32 %v11392_v4, %v11137_v36  ;;  %v11432_v24 = vmul.f32 %v11137_v36, %v11137_v36 }
 0x3f8   : > { %13552 = vst [vmem:[%s16154_s13 + $0x1f0] sm:$0xff] %v13484_v38   ;;  %v11394_v10 = vadd.f32 %v11393_v47, %v11138_v0  ;;  %v11463_v60 = vadd.f32 %v11462_v37, %v11432_v24 }
 0x3fa   : > { %v11395_v25 = vadd.f32 %v11394_v10, %v11139_v50  ;;  %v11464_v51 = vadd.f32 %v11463_v60, %v11433_v29 }
 0x3fc   : > { %v11396_v19 = vrot.slane %v11395_v25, 4  ;;  %v11465_v62 = vadd.f32 %v11464_v51, %v11434_v18 }
 0x3fe   : > { %v11397_v3 = vadd.f32 %v11396_v19, %v11395_v25  ;;  %v11466_v21 = vrot.slane %v11465_v62, 4 }
 0x400   : > { %v11398_v30 = vrot.slane %v11397_v3, 2  ;;  %v11467_v6 = vadd.f32 %v11466_v21, %v11465_v62 }
 0x402   : > { %v11399_v1 = vadd.f32 %v11398_v30, %v11397_v3  ;;  %v11468_v53 = vrot.slane %v11467_v6, 2 }
 0x404   : > { %v11400_v56 = vrot.slane %v11399_v1, 1  ;;  %v11469_v13 = vadd.f32 %v11468_v53, %v11467_v6 }
 0x406   : > { %v11401_v23 = vadd.f32 %v11400_v56, %v11399_v1  ;;  %v11470_v26 = vrot.slane %v11469_v13, 1 }
 0x408   : > { %v11402_v16 = vadd.f32 %v11401_v23, %v18666_v46  ;;  %v11471_v34 = vadd.f32 %v11470_v26, %v11469_v13 }
 0x40a   : > { %v11472_v48 = vadd.f32 %v11471_v34, %v18671_v58  ;;  %11473 = vst [vmem:[%s218_s21] sm:$0x1] %v11402_v16 }
 0x40c   : > { %11474 = vst [vmem:[%s18846_s26] sm:$0x1] %v11472_v48 }
 0x40d   : > { %s13170_s5 = sshll.u32 %s14632_s18, 11  ;;  %s11508_s6 = sshll.u32 %s16154_s13, 4  ;;  %s11509_s6 = int_to_ptr.vmem [resolvable:$true] %s11508_s6 }
 0x40e   : > { %s11497_s10 = scalar_lea.hbm %s18837_s2, %s13170_s5  ;;  %s14642_s11 = smov 2048  }
 0x40f   : > { %14387 = sst [smem:[#allocation9]] (%p14718_p4), %s14642_s11  ;;  %s14643_s12 = smov 4096  }
 0x410   : > { %14388 = sst [smem:[#allocation9 + $0x1]] (%p14718_p4), %s14643_s12  ;;  %s14644_s14 = smov 32  }
 0x411   : > { %14389 = sst [smem:[#allocation9 + $0x2]] (%p14718_p4), %s14644_s14  ;;  %s14645_s22 = smov 64  }
 0x412   : > { %14390 = sst [smem:[#allocation9 + $0x3]] (%p14718_p4), %s14645_s22  ;;  %s14646_s13 = smov 4  }
 0x413   : > { %14391 = sst [smem:[#allocation9 + $0x4]] (%p14718_p4), %s14645_s22  ;;  %s14647_s7 = smov 131072  }
 0x414   : > { %14392 = sst [smem:[#allocation9 + $0x5]] (%p14718_p4), %s14646_s13  ;;  %s14648_s5 = smov 0  }
 0x415   : > { %14393 = dma.general (%p14718_p4), %s11509_s6, 8192, %s11497_s10, %s11476_s29, %s14647_s7, [#allocation9], %s14648_s5, 0  }
 0x416   : > { %s13038_s8 = sshll.u32 %s14632_s18, 4  ;;  %s11538_s11 = sshll.u32 %s218_s21, 4  ;;  %s11539_s11 = int_to_ptr.vmem [resolvable:$true] %s11538_s11 }
 0x417   : > { %s11536_s26 = scalar_lea.hbm %s18838_s3, %s13038_s8  ;;  %s14534_s30 = scalar_lea.vmem %s11539_s11, 16 }
 0x418   : > { %p14535_p12 = scmp.ne.s32.totalorder %s11539_s11, %s14534_s30  ;;  %s14649_s22 = smov [#allocation5]  }
 0x419   : > { %s14538_s13 = sshll.u32 %s14649_s22, 4  ;;  %s14539_s13 = int_to_ptr.vmem [resolvable:$false] %s14538_s13 }
 0x41a   : > { %p14536_p13 = pnand %p14535_p12, %p14718_p4  ;;  %s14540_s29 = scalar_lea.vmem %s14539_s13, 32 }
 0x41b   : > { %p14541_p1 = scmp.lt.s32.totalorder %s11539_s11, %s14539_s13  ;;  %p14542_p2 = scmp.lt.s32.totalorder %s14540_s29, %s14534_s30 }
 0x41c   : > { %p14537_p0 = pneg %p14536_p13 }
 0x41d   : > { %p14543_p3 = por %p14542_p2, %p14541_p1 }
 0x41f   : > { %p14544_p5 = pnand %p14543_p3, %p14537_p0 }
 0x421   : > { %14547 = shalt.err (!%p14544_p5)
}
 0x422   : > { %s14548_s21 = scalar_lea.hbm %s11536_s26, 16  ;;  %s14552_s7 = scalar_lea.hbm %s18838_s3, 32 }
 0x423   : > { %p14549_p6 = scmp.ne.s32.totalorder %s11536_s26, %s14548_s21  ;;  %p14553_p10 = scmp.lt.s32.totalorder %s11536_s26, %s18838_s3 }
 0x424   : > { %p14554_p11 = scmp.lt.s32.totalorder %s14552_s7, %s14548_s21 }
 0x425   : > { %p14550_p7 = pnand %p14549_p6, %p14718_p4 }
 0x426   : > { %p14555_p12 = por %p14554_p11, %p14553_p10 }
 0x427   : > { %p14551_p9 = pneg %p14550_p7 }
 0x429   : > { %p14556_p13 = pnand %p14555_p12, %p14551_p9 }
 0x42b   : > { %14559 = shalt.err (!%p14556_p13)
}
 0x42c   : > { %s19412_s30 = scalar_lea.sflag [#allocation6], %s18687_s24  ;;  %s11550_s13 = scalar_lea.hbm %s18839_s4, %s13038_s8 }
 0x42d   : > { %14394 = dma.vmem_to_hbm [thread:$0]  (%p14718_p4), %s11539_s11, 16, %s11536_s26, %s19412_s30  }
 0x42e   : > { %s19413_s29 = scalar_lea.vmem [#allocation7], %s16083_s9  ;;  %s14650_s10 = smov [#allocation7]  }
 0x42f   : > { %s11552_s6 = sshll.u32 %s19413_s29, 4  ;;  %s14564_s7 = sshll.u32 %s14650_s10, 4  ;;  %s11553_s6 = int_to_ptr.vmem [resolvable:$true] %s11552_s6  ;;  %s14565_s7 = int_to_ptr.vmem [resolvable:$false] %s14564_s7 }
 0x430   : > { %s14560_s21 = scalar_lea.vmem %s11553_s6, 16  ;;  %s14566_s5 = scalar_lea.vmem %s14565_s7, 32 }
 0x431   : > { %p14561_p0 = scmp.ne.s32.totalorder %s11553_s6, %s14560_s21  ;;  %p14567_p3 = scmp.lt.s32.totalorder %s11553_s6, %s14565_s7 }
 0x432   : > { %p14568_p5 = scmp.lt.s32.totalorder %s14566_s5, %s14560_s21 }
 0x433   : > { %p14562_p1 = pnand %p14561_p0, %p14718_p4 }
 0x434   : > { %p14569_p6 = por %p14568_p5, %p14567_p3 }
 0x435   : > { %p14563_p2 = pneg %p14562_p1 }
 0x437   : > { %p14570_p7 = pnand %p14569_p6, %p14563_p2 }
 0x439   : > { %14573 = shalt.err (!%p14570_p7)
}
 0x43a   : > { %s14574_s18 = scalar_lea.hbm %s11550_s13, 16  ;;  %s14578_s8 = scalar_lea.hbm %s18839_s4, 32 }
 0x43b   : > { %p14575_p9 = scmp.ne.s32.totalorder %s11550_s13, %s14574_s18  ;;  %p14579_p12 = scmp.lt.s32.totalorder %s11550_s13, %s18839_s4 }
 0x43c   : > { %p14580_p13 = scmp.lt.s32.totalorder %s14578_s8, %s14574_s18 }
 0x43d   : > { %p14576_p10 = pnand %p14575_p9, %p14718_p4 }
 0x43e   : > { %p14581_p0 = por %p14580_p13, %p14579_p12 }
 0x43f   : > { %p14577_p11 = pneg %p14576_p10 }
 0x441   : > { %p14582_p1 = pnand %p14581_p0, %p14577_p11 }
 0x443   : > { %14585 = shalt.err (!%p14582_p1)
}
 0x444   : > { %14395 = dma.vmem_to_hbm [thread:$0]  (%p14718_p4), %s11553_s6, 16, %s11550_s13, %s19412_s30  }
 0x445 PF: > { %p14409_p2 = scmp.ge.s32.totalorder %s14640_s20, 2  ;;  %s11564_s14 = sand.u32 1, %s14620_s15  }
 0x446   : > { %s11565_s22 = scalar_lea.sflag [#allocation4], %s11564_s14 }
 0x447   : > { %p14400_p3 = pnand %p14409_p2, %p14727_p8 }
 0x449   : > { %p14401_p5 = pneg %p14400_p3 }
 0x44b   : > { %14611 = dma.done.wait (%p14401_p5), %s11565_s22, 8192  }
 0x44c   : > { %14613 = vsyncadd (%p14401_p5), %s11565_s22, 4294959104  ;;  %s19414_s29 = sadd.s32 4294967294, %s14640_s20  }
 0x44d   : > { %s11573_s21 = sand.u32 1, %s19414_s29  }
 0x44e   : > { %s11574_s10 = scalar_lea.sflag [#allocation6], %s11573_s21 }
 0x44f   : > { %14615 = dma.done.wait (%p14401_p5), %s11574_s10, 32  }
 0x450   : > { %14617 = vsyncadd (%p14401_p5), %s11574_s10, 4294967264  ;;  %s21_s20 = sadd.s32 1, %s14640_s20   ;;  %s19415_s15 = smov %s14624_s16 }
 0x451   : > { %p18_p4 = scmp.ge.s32.totalorder %s21_s20, 4   ;;  %s19416_s16 = smov %s14628_s17 }
 0x452   : > { %s19417_s17 = smov %s14733_s28  ;;  %s19418_s18 = smov %s14636_s19 }
 0x453   : > { %s19419_s19 = smov %s19421_s23  ;;  %20 = sbr.rel (!%p18_p4) target bundleno = 6 (0x6), region = 121 }
 0x458   :  { %11586 = vsyncpa [#allocation4], 1 }
 0x459   :  { %11588 = vsyncpa [#allocation4 + $0x1], 1 }
 0x45a   :  { %11589 = vsyncpa [#allocation6], 1 }
 0x45b   :  { %11591 = vsyncpa [#allocation6 + $0x1], 1 }

</bundles_post_ra>
